<compile_context>
chip_gen: v7x
topology: tpu7x:2x2x1
jax: 0.10.0
libtpu: 0.0.40
codegen_flags: <defaults>
</compile_context>

<pallas_src>
import functools

import jax
import jax.numpy as jnp
from jax.experimental import pallas as pl
from jax.experimental.pallas import tpu as pltpu


# ---------------------------------------------------------------------------
# Helpers
# ---------------------------------------------------------------------------
def _small_linear_fma(f, w_t, b_row):
    """(n, K) @ (K, D) + (1, D) with tiny K: unrolled VPU broadcast-FMAs (no MXU)."""
    n = f.shape[0]
    d = w_t.shape[1]
    acc = jnp.broadcast_to(b_row, (n, d))
    for kk in range(f.shape[1]):
        acc = acc + f[:, kk:kk + 1] * w_t[kk:kk + 1, :]
    return acc


# ---------------------------------------------------------------------------
# Fused kernel
# ---------------------------------------------------------------------------
def _fused_lightgcn_kernel(
    # scalar-prefetch refs (SMEM, int32)
    fetch_col_ref,          # (n_i * n_k,) column block actually fetched for (i, k) — used by index_map only
    blk_mask_ref,           # (n_i * n_k,) 1 iff adjacency block (i, k) has any nonzero
    # inputs
    lw_ref,                 # SMEM (n_layers + 1,) f32 layer weights
    uemb_ref,               # (n_users, D) f32
    iemb_ref,               # (m_items, D) f32
    fcat_ref, wcat_ref, bcat_ref,        # (n_users, 1), (1, D), (1, D)
    fprof_ref, wprof_ref, bprof_ref,     # (n_users, Kp), (Kp, D), (1, D)
    fgen_ref, wgen_ref, bgen_ref,        # (m_items, Kg), (Kg, D), (1, D)
    adj_ref,                # (TM, TK) bf16 adjacency block
    # outputs
    out_ref,                # (N, D) f32 — resident accumulator, flushed once at grid end
    # scratch
    e_buf,                  # VMEM (2*N, D) bf16 — E^(l)/E^(l+1) ping-pong
    acc_ref,                # VMEM (TM, D) f32  — per-row-tile matmul accumulator
    *,
    n_users, N, NK, TM, TK, cat_scale, prof_scale, genre_scale,
):
    del fetch_col_ref       # consumed only by the adjacency index_map
    l = pl.program_id(0)
    i = pl.program_id(1)
    k = pl.program_id(2)

    # ---- Phase 0 (first grid step only): metadata integration + accumulator init ----
    @pl.when((l == 0) & (i == 0) & (k == 0))
    def _():
        w0 = lw_ref[0]
        # users: emb + cat_scale*(f_cat@Wc^T + bc) + prof_scale*(f_prof@Wp^T + bp)
        u = uemb_ref[...]
        u = u + cat_scale * _small_linear_fma(fcat_ref[...], wcat_ref[...], bcat_ref[...])
        u = u + prof_scale * _small_linear_fma(fprof_ref[...], wprof_ref[...], bprof_ref[...])
        out_ref[0:n_users, :] = w0 * u
        e_buf[0:n_users, :] = u.astype(e_buf.dtype)
        # items: emb + genre_scale*(f_genre@Wg^T + bg)
        it = iemb_ref[...] + genre_scale * _small_linear_fma(
            fgen_ref[...], wgen_ref[...], bgen_ref[...])
        out_ref[n_users:, :] = w0 * it
        e_buf[n_users:N, :] = it.astype(e_buf.dtype)

    # ---- Propagation: E^(l+1)[i-tile] = sum_k A[i, k] @ E^(l)[k-tile] ----
    src = l % 2             # e_buf half holding E^(l)
    dst = 1 - src           # e_buf half receiving E^(l+1)

    @pl.when(k == 0)
    def _():
        acc_ref[...] = jnp.zeros_like(acc_ref)

    @pl.when(blk_mask_ref[i * NK + k] != 0)          # skip all-zero adjacency blocks
    def _():
        e_start = pl.multiple_of(src * N + k * TK, TK)
        e_blk = e_buf[pl.ds(e_start, TK), :]                         # (TK, D) bf16
        acc_ref[...] += jnp.dot(adj_ref[...], e_blk,
                                preferred_element_type=jnp.float32)  # MXU, f32 acc

    @pl.when(k == NK - 1)
    def _():
        e_new = acc_ref[...]                                         # (TM, D) f32
        d_start = pl.multiple_of(dst * N + i * TM, TM)
        e_buf[pl.ds(d_start, TM), :] = e_new.astype(e_buf.dtype)
        r_start = pl.multiple_of(i * TM, TM)
        out_ref[pl.ds(r_start, TM), :] = (out_ref[pl.ds(r_start, TM), :]
                                          + lw_ref[l + 1] * e_new)


# ---------------------------------------------------------------------------
# Wrapper
# ---------------------------------------------------------------------------
def lightgcn_forward(user_emb, item_emb,
                     f_cat, w_cat, b_cat,
                     f_prof, w_prof, b_prof,
                     f_genre, w_genre, b_genre,
                     adjacency, layer_weights,
                     *, n_layers, cat_scale, prof_scale, genre_scale,
                     block_m=256, block_k=256):
    n_users, D = user_emb.shape
    m_items = item_emb.shape[0]
    N = n_users + m_items

    # 256-aligned tiles fill the v6e/v7x 256-wide MXU and are also 128-aligned for v5e.
    TM = min(block_m, N)
    TK = min(block_k, N)
    assert n_layers >= 1
    assert N % TM == 0 and N % TK == 0, "row/col tiles must divide N"
    assert TM % 8 == 0 and (TK % 128 == 0 or TK == N), "TPU (8,128) tiling constraint"
    assert n_users % 8 == 0, "user/item boundary must be sublane-aligned"
    n_i, n_kb = N // TM, N // TK

    # MXU operands in bf16 (f32 accumulation in-kernel): halves A's HBM/VMEM footprint.
    adj_bf16 = adjacency.astype(jnp.bfloat16)

    # Block-sparsity metadata (bipartite graph => ~half the blocks are exactly zero).
    blocks = adjacency.reshape(n_i, TM, n_kb, TK)
    blk_mask = (jnp.max(jnp.abs(blocks), axis=(1, 3)) > 0).astype(jnp.int32)   # (n_i, n_kb)
    # For an all-zero block fetch the same column block as the previous step, so the
    # pipeline skips the DMA entirely (block index unchanged => no re-fetch).
    cur = jnp.argmax(blk_mask, axis=1).astype(jnp.int32)
    cols = []
    for kk in range(n_kb):
        cur = jnp.where(blk_mask[:, kk] == 1, jnp.int32(kk), cur)
        cols.append(cur)
    fetch_col = jnp.stack(cols, axis=1).astype(jnp.int32)                      # (n_i, n_kb)

    kp = f_prof.shape[1]
    kg = f_genre.shape[1]

    def _const2d(shape):
        # full-array VMEM operand, fetched once (constant block index across the grid)
        return pl.BlockSpec(shape, lambda l, i, k, fc, mk: (0, 0))

    in_specs = [
        pl.BlockSpec(memory_space=pltpu.MemorySpace.SMEM),       # layer_weights (scalars)
        _const2d((n_users, D)),                                  # user embeddings
        _const2d((m_items, D)),                                  # item embeddings
        _const2d((n_users, 1)),  _const2d((1, D)), _const2d((1, D)),   # category feature
        _const2d((n_users, kp)), _const2d((kp, D)), _const2d((1, D)),  # profile feature
        _const2d((m_items, kg)), _const2d((kg, D)), _const2d((1, D)),  # genre feature
        # adjacency: streamed (TM, TK) bf16 blocks; zero blocks redirected (no DMA).
        pl.BlockSpec((TM, TK), lambda l, i, k, fc, mk: (i, fc[i * n_kb + k])),
    ]
    out_specs = pl.BlockSpec((N, D), lambda l, i, k, fc, mk: (0, 0))   # resident accumulator

    grid_spec = pltpu.PrefetchScalarGridSpec(
        num_scalar_prefetch=2,
        grid=(n_layers, n_i, n_kb),
        in_specs=in_specs,
        out_specs=out_specs,
        scratch_shapes=[
            pltpu.VMEM((2 * N, D), jnp.bfloat16),    # E^(l)/E^(l+1) ping-pong
            pltpu.VMEM((TM, D), jnp.float32),        # per-row-tile matmul accumulator
        ],
    )

    # Explicit VMEM budget (re-derived so the same tiling also fits v7x's 64 MiB/TC).
    vmem_bytes = (2 * TM * TK * 2            # double-buffered bf16 A blocks
                  + 2 * N * D * 2            # resident E ping-pong (bf16)
                  + N * D * 4                # resident output accumulator (f32)
                  + TM * D * 4               # matmul accumulator
                  + N * D * 4                # embedding tables
                  + 4 * 1024 * 1024)         # features / weights / headroom
    vmem_limit = int(min(max(vmem_bytes, 16 * 1024 * 1024), 48 * 1024 * 1024))

    kernel = functools.partial(
        _fused_lightgcn_kernel,
        n_users=n_users, N=N, NK=n_kb, TM=TM, TK=TK,
        cat_scale=cat_scale, prof_scale=prof_scale, genre_scale=genre_scale)

    out = pl.pallas_call(
        kernel,
        out_shape=jax.ShapeDtypeStruct((N, D), jnp.float32),
        grid_spec=grid_spec,
        compiler_params=pltpu.CompilerParams(
            dimension_semantics=("arbitrary", "arbitrary", "arbitrary"),
            vmem_limit_bytes=vmem_limit),
    )(fetch_col.reshape(-1), blk_mask.reshape(-1),
      layer_weights,
      user_emb, item_emb,
      f_cat.reshape(n_users, 1), w_cat.T, b_cat.reshape(1, D),
      f_prof, w_prof.T, b_prof.reshape(1, D),
      f_genre, w_genre.T, b_genre.reshape(1, D),
      adj_bf16)

    return out[:n_users], out[n_users:]


# ---------------------------------------------------------------------------
# Pure-JAX references
# ---------------------------------------------------------------------------
def lightgcn_reference_f32(user_emb, item_emb,
                           f_cat, w_cat, b_cat,
                           f_prof, w_prof, b_prof,
                           f_genre, w_genre, b_genre,
                           adjacency, layer_weights,
                           *, n_layers, cat_scale, prof_scale, genre_scale):
    """Faithful f32 mirror of the PyTorch forward."""
    n_users = user_emb.shape[0]
    u = (user_emb
         + cat_scale * (f_cat[:, None] @ w_cat.T + b_cat)
         + prof_scale * (f_prof @ w_prof.T + b_prof))
    it = item_emb + genre_scale * (f_genre @ w_genre.T + b_genre)
    emb = jnp.concatenate([u, it], axis=0)
    out = layer_weights[0] * emb
    for l in range(n_layers):
        emb = adjacency @ emb
        out = out + layer_weights[l + 1] * emb
    return out[:n_users], out[n_users:]


def lightgcn_reference_bf16(user_emb, item_emb,
                            f_cat, w_cat, b_cat,
                            f_prof, w_prof, b_prof,
                            f_genre, w_genre, b_genre,
                            adjacency, layer_weights,
                            *, n_layers, cat_scale, prof_scale, genre_scale):
    """Mirrors the kernel's mixed precision (bf16 MXU operands, f32 accumulation)."""
    n_users = user_emb.shape[0]
    u = user_emb
    u = u + cat_scale * _small_linear_fma(f_cat[:, None], w_cat.T, b_cat[None, :])
    u = u + prof_scale * _small_linear_fma(f_prof, w_prof.T, b_prof[None, :])
    it = item_emb + genre_scale * _small_linear_fma(f_genre, w_genre.T, b_genre[None, :])
    emb = jnp.concatenate([u, it], axis=0)               # E^(0), f32
    a16 = adjacency.astype(jnp.bfloat16)
    out = layer_weights[0] * emb
    e16 = emb.astype(jnp.bfloat16)
    for l in range(n_layers):
        emb = jnp.dot(a16, e16, preferred_element_type=jnp.float32)
        out = out + layer_weights[l + 1] * emb
        e16 = emb.astype(jnp.bfloat16)
    return out[:n_users], out[n_users:]


# ---------------------------------------------------------------------------
# Main
# ---------------------------------------------------------------------------
if __name__ == "__main__":
    key = jax.random.PRNGKey(0)
    ks = jax.random.split(key, 12)

    n_users, m_items, latent_dim, n_layers = 256, 256, 128, 3
    N = n_users + m_items

    cat_scale, prof_scale, genre_scale = 0.5, 1.0, 1.0

    def xavier(k, shape):
        bound = (6.0 / (shape[0] + shape[1])) ** 0.5
        return jax.random.uniform(k, shape, jnp.float32, -bound, bound)

    user_emb = xavier(ks[0], (n_users, latent_dim))
    item_emb = xavier(ks[1], (m_items, latent_dim))

    # Features: one 1-D creator feature, one 8-dim creator feature, one 16-dim item feature
    f_cat = jax.random.uniform(ks[2], (n_users,), jnp.float32)
    f_prof = jax.random.uniform(ks[3], (n_users, 8), jnp.float32)
    f_genre = jax.random.uniform(ks[4], (m_items, 16), jnp.float32)

    # nn.Linear-style init  U(-1/sqrt(in), 1/sqrt(in))
    def linear_init(kw, kb, out_dim, in_dim):
        b = 1.0 / (in_dim ** 0.5)
        W = jax.random.uniform(kw, (out_dim, in_dim), jnp.float32, -b, b)
        bias = jax.random.uniform(kb, (out_dim,), jnp.float32, -b, b)
        return W, bias

    w_cat, b_cat = linear_init(ks[5], ks[6], latent_dim, 1)
    w_prof, b_prof = linear_init(ks[7], ks[8], latent_dim, 8)
    w_genre, b_genre = linear_init(ks[9], ks[10], latent_dim, 16)

    # Dense, symmetrically normalized bipartite adjacency (LightGCN getSparseGraph).
    R = (jax.random.uniform(ks[11], (n_users, m_items)) < 0.1).astype(jnp.float32)
    A = jnp.zeros((N, N), jnp.float32)
    A = A.at[:n_users, n_users:].set(R)
    A = A.at[n_users:, :n_users].set(R.T)
    deg = A.sum(axis=1)
    d_inv_sqrt = jnp.where(deg > 0, deg ** -0.5, 0.0)
    adjacency = d_inv_sqrt[:, None] * A * d_inv_sqrt[None, :]

    # layer_weights is nn.Parameter(torch.ones(n_layers + 1)) created in forward
    layer_weights = jnp.ones((n_layers + 1,), jnp.float32)

    args = (user_emb, item_emb,
            f_cat, w_cat, b_cat,
            f_prof, w_prof, b_prof,
            f_genre, w_genre, b_genre,
            adjacency, layer_weights)
    kwargs = dict(n_layers=n_layers, cat_scale=cat_scale,
                  prof_scale=prof_scale, genre_scale=genre_scale)

    u_out, i_out = lightgcn_forward(*args, **kwargs)
    jax.block_until_ready((u_out, i_out))

    # Tight check vs. a reference with identical mixed precision (bf16 MXU operands,
    # f32 accumulation): validates tiling / block-skip / accumulation logic.
    u_m, i_m = lightgcn_reference_bf16(*args, **kwargs)
    assert jnp.allclose(u_out, u_m, rtol=2e-3, atol=2e-3), "user mismatch vs bf16-matched ref"
    assert jnp.allclose(i_out, i_m, rtol=2e-3, atol=2e-3), "item mismatch vs bf16-matched ref"

    # Loose check vs. the full-f32 PyTorch-faithful reference (the bf16 adjacency MXU
    # operands introduce ~1e-3-level deviations; accumulation stays f32).
    u_f, i_f = lightgcn_reference_f32(*args, **kwargs)
    assert jnp.allclose(u_out, u_f, rtol=3e-2, atol=3e-2), "user mismatch vs f32 ref"
    assert jnp.allclose(i_out, i_f, rtol=3e-2, atol=3e-2), "item mismatch vs f32 ref"

    print("KERNEL_OK")
</pallas_src>

<mosaic_0001>
module attributes {stable_mosaic.version = 11 : i64} {
  func.func @_fused_lightgcn_kernel(%arg0: i32, %arg1: i32, %arg2: i32, %arg3: memref<4xi32, #tpu.memory_space<smem>>, %arg4: memref<4xi32, #tpu.memory_space<smem>>, %arg5: memref<4xf32, #tpu.memory_space<smem>>, %arg6: memref<256x128xf32, #tpu.memory_space<vmem>>, %arg7: memref<256x128xf32, #tpu.memory_space<vmem>>, %arg8: memref<256x1xf32, #tpu.memory_space<vmem>>, %arg9: memref<1x128xf32, #tpu.memory_space<vmem>>, %arg10: memref<1x128xf32, #tpu.memory_space<vmem>>, %arg11: memref<256x8xf32, #tpu.memory_space<vmem>>, %arg12: memref<8x128xf32, #tpu.memory_space<vmem>>, %arg13: memref<1x128xf32, #tpu.memory_space<vmem>>, %arg14: memref<256x16xf32, #tpu.memory_space<vmem>>, %arg15: memref<16x128xf32, #tpu.memory_space<vmem>>, %arg16: memref<1x128xf32, #tpu.memory_space<vmem>>, %arg17: memref<256x256xbf16, #tpu.memory_space<vmem>>, %arg18: memref<512x128xf32, #tpu.memory_space<vmem>>, %arg19: memref<1024x128xbf16, #tpu.memory_space<vmem>>, %arg20: memref<256x128xf32, #tpu.memory_space<vmem>>) attributes {dimension_semantics = [#tpu.dimension_semantics<arbitrary>, #tpu.dimension_semantics<arbitrary>, #tpu.dimension_semantics<arbitrary>], iteration_bounds = array<i64: 3, 2, 2>, scalar_prefetch = 2 : i64, scratch_operands = 2 : i64, tpu.core_type = #tpu.core_type<tc>, window_params = [{transform_indices = @transform_0, window_bounds = array<i64: 4>}, {pipeline_mode = #tpu.pipeline_mode<synchronous>, transform_indices = @transform_1, window_bounds = array<i64: 256, 128>}, {pipeline_mode = #tpu.pipeline_mode<synchronous>, transform_indices = @transform_2, window_bounds = array<i64: 256, 128>}, {pipeline_mode = #tpu.pipeline_mode<synchronous>, transform_indices = @transform_3, window_bounds = array<i64: 256, 1>}, {pipeline_mode = #tpu.pipeline_mode<synchronous>, transform_indices = @transform_4, window_bounds = array<i64: 1, 128>}, {pipeline_mode = #tpu.pipeline_mode<synchronous>, transform_indices = @transform_5, window_bounds = array<i64: 1, 128>}, {pipeline_mode = #tpu.pipeline_mode<synchronous>, transform_indices = @transform_6, window_bounds = array<i64: 256, 8>}, {pipeline_mode = #tpu.pipeline_mode<synchronous>, transform_indices = @transform_7, window_bounds = array<i64: 8, 128>}, {pipeline_mode = #tpu.pipeline_mode<synchronous>, transform_indices = @transform_8, window_bounds = array<i64: 1, 128>}, {pipeline_mode = #tpu.pipeline_mode<synchronous>, transform_indices = @transform_9, window_bounds = array<i64: 256, 16>}, {pipeline_mode = #tpu.pipeline_mode<synchronous>, transform_indices = @transform_10, window_bounds = array<i64: 16, 128>}, {pipeline_mode = #tpu.pipeline_mode<synchronous>, transform_indices = @transform_11, window_bounds = array<i64: 1, 128>}, {transform_indices = @transform_12, window_bounds = array<i64: 256, 256>}, {pipeline_mode = #tpu.pipeline_mode<synchronous>, transform_indices = @transform_13, window_bounds = array<i64: 512, 128>}]} {
    %c0_i32 = arith.constant 0 : i32
    %0 = arith.cmpi eq, %arg0, %c0_i32 : i32
    %c0_i32_0 = arith.constant 0 : i32
    %1 = arith.cmpi eq, %arg1, %c0_i32_0 : i32
    %2 = arith.andi %0, %1 : i1
    %c0_i32_1 = arith.constant 0 : i32
    %3 = arith.cmpi eq, %arg2, %c0_i32_1 : i32
    %4 = arith.andi %2, %3 : i1
    %5 = arith.extui %4 : i1 to i32
    %c0_i32_2 = arith.constant 0 : i32
    %6 = arith.cmpi ne, %5, %c0_i32_2 : i32
    scf.if %6 {
      %c0 = arith.constant 0 : index
      %31 = memref.load %arg5[%c0] : memref<4xf32, #tpu.memory_space<smem>>
      %c0_15 = arith.constant 0 : index
      %c0_16 = arith.constant 0 : index
      %32 = vector.load %arg6[%c0_15, %c0_16] : memref<256x128xf32, #tpu.memory_space<vmem>>, vector<256x128xf32>
      %c0_17 = arith.constant 0 : index
      %c0_18 = arith.constant 0 : index
      %33 = vector.load %arg8[%c0_17, %c0_18] : memref<256x1xf32, #tpu.memory_space<vmem>>, vector<256x1xf32>
      %c0_19 = arith.constant 0 : index
      %c0_20 = arith.constant 0 : index
      %34 = vector.load %arg9[%c0_19, %c0_20] : memref<1x128xf32, #tpu.memory_space<vmem>>, vector<1x128xf32>
      %c0_21 = arith.constant 0 : index
      %c0_22 = arith.constant 0 : index
      %35 = vector.load %arg10[%c0_21, %c0_22] : memref<1x128xf32, #tpu.memory_space<vmem>>, vector<1x128xf32>
      %36 = vector.shape_cast %35 : vector<1x128xf32> to vector<1x128xf32>
      %37 = vector.broadcast %36 : vector<1x128xf32> to vector<256x128xf32>
      %38 = vector.broadcast %33 : vector<256x1xf32> to vector<256x128xf32>
      %39 = vector.broadcast %34 : vector<1x128xf32> to vector<256x128xf32>
      %40 = arith.mulf %38, %39 : vector<256x128xf32>
      %41 = arith.addf %37, %40 : vector<256x128xf32>
      %cst = arith.constant 5.000000e-01 : f32
      %42 = vector.broadcast %cst : f32 to vector<256x128xf32>
      %43 = arith.mulf %42, %41 : vector<256x128xf32>
      %44 = arith.addf %32, %43 : vector<256x128xf32>
      %c0_23 = arith.constant 0 : index
      %c0_24 = arith.constant 0 : index
      %45 = vector.load %arg11[%c0_23, %c0_24] : memref<256x8xf32, #tpu.memory_space<vmem>>, vector<256x8xf32>
      %c0_25 = arith.constant 0 : index
      %c0_26 = arith.constant 0 : index
      %46 = vector.load %arg12[%c0_25, %c0_26] : memref<8x128xf32, #tpu.memory_space<vmem>>, vector<8x128xf32>
      %c0_27 = arith.constant 0 : index
      %c0_28 = arith.constant 0 : index
      %47 = vector.load %arg13[%c0_27, %c0_28] : memref<1x128xf32, #tpu.memory_space<vmem>>, vector<1x128xf32>
      %48 = vector.shape_cast %47 : vector<1x128xf32> to vector<1x128xf32>
      %49 = vector.broadcast %48 : vector<1x128xf32> to vector<256x128xf32>
      %50 = vector.extract_strided_slice %45 {offsets = [0, 0], sizes = [256, 1], strides = [1, 1]} : vector<256x8xf32> to vector<256x1xf32>
      %51 = vector.extract_strided_slice %46 {offsets = [0, 0], sizes = [1, 128], strides = [1, 1]} : vector<8x128xf32> to vector<1x128xf32>
      %52 = vector.broadcast %50 : vector<256x1xf32> to vector<256x128xf32>
      %53 = vector.broadcast %51 : vector<1x128xf32> to vector<256x128xf32>
      %54 = arith.mulf %52, %53 : vector<256x128xf32>
      %55 = arith.addf %49, %54 : vector<256x128xf32>
      %56 = vector.extract_strided_slice %45 {offsets = [0, 1], sizes = [256, 1], strides = [1, 1]} : vector<256x8xf32> to vector<256x1xf32>
      %57 = vector.extract_strided_slice %46 {offsets = [1, 0], sizes = [1, 128], strides = [1, 1]} : vector<8x128xf32> to vector<1x128xf32>
      %58 = vector.broadcast %56 : vector<256x1xf32> to vector<256x128xf32>
      %59 = vector.broadcast %57 : vector<1x128xf32> to vector<256x128xf32>
      %60 = arith.mulf %58, %59 : vector<256x128xf32>
      %61 = arith.addf %55, %60 : vector<256x128xf32>
      %62 = vector.extract_strided_slice %45 {offsets = [0, 2], sizes = [256, 1], strides = [1, 1]} : vector<256x8xf32> to vector<256x1xf32>
      %63 = vector.extract_strided_slice %46 {offsets = [2, 0], sizes = [1, 128], strides = [1, 1]} : vector<8x128xf32> to vector<1x128xf32>
      %64 = vector.broadcast %62 : vector<256x1xf32> to vector<256x128xf32>
      %65 = vector.broadcast %63 : vector<1x128xf32> to vector<256x128xf32>
      %66 = arith.mulf %64, %65 : vector<256x128xf32>
      %67 = arith.addf %61, %66 : vector<256x128xf32>
      %68 = vector.extract_strided_slice %45 {offsets = [0, 3], sizes = [256, 1], strides = [1, 1]} : vector<256x8xf32> to vector<256x1xf32>
      %69 = vector.extract_strided_slice %46 {offsets = [3, 0], sizes = [1, 128], strides = [1, 1]} : vector<8x128xf32> to vector<1x128xf32>
      %70 = vector.broadcast %68 : vector<256x1xf32> to vector<256x128xf32>
      %71 = vector.broadcast %69 : vector<1x128xf32> to vector<256x128xf32>
      %72 = arith.mulf %70, %71 : vector<256x128xf32>
      %73 = arith.addf %67, %72 : vector<256x128xf32>
      %74 = vector.extract_strided_slice %45 {offsets = [0, 4], sizes = [256, 1], strides = [1, 1]} : vector<256x8xf32> to vector<256x1xf32>
      %75 = vector.extract_strided_slice %46 {offsets = [4, 0], sizes = [1, 128], strides = [1, 1]} : vector<8x128xf32> to vector<1x128xf32>
      %76 = vector.broadcast %74 : vector<256x1xf32> to vector<256x128xf32>
      %77 = vector.broadcast %75 : vector<1x128xf32> to vector<256x128xf32>
      %78 = arith.mulf %76, %77 : vector<256x128xf32>
      %79 = arith.addf %73, %78 : vector<256x128xf32>
      %80 = vector.extract_strided_slice %45 {offsets = [0, 5], sizes = [256, 1], strides = [1, 1]} : vector<256x8xf32> to vector<256x1xf32>
      %81 = vector.extract_strided_slice %46 {offsets = [5, 0], sizes = [1, 128], strides = [1, 1]} : vector<8x128xf32> to vector<1x128xf32>
      %82 = vector.broadcast %80 : vector<256x1xf32> to vector<256x128xf32>
      %83 = vector.broadcast %81 : vector<1x128xf32> to vector<256x128xf32>
      %84 = arith.mulf %82, %83 : vector<256x128xf32>
      %85 = arith.addf %79, %84 : vector<256x128xf32>
      %86 = vector.extract_strided_slice %45 {offsets = [0, 6], sizes = [256, 1], strides = [1, 1]} : vector<256x8xf32> to vector<256x1xf32>
      %87 = vector.extract_strided_slice %46 {offsets = [6, 0], sizes = [1, 128], strides = [1, 1]} : vector<8x128xf32> to vector<1x128xf32>
      %88 = vector.broadcast %86 : vector<256x1xf32> to vector<256x128xf32>
      %89 = vector.broadcast %87 : vector<1x128xf32> to vector<256x128xf32>
      %90 = arith.mulf %88, %89 : vector<256x128xf32>
      %91 = arith.addf %85, %90 : vector<256x128xf32>
      %92 = vector.extract_strided_slice %45 {offsets = [0, 7], sizes = [256, 1], strides = [1, 1]} : vector<256x8xf32> to vector<256x1xf32>
      %93 = vector.extract_strided_slice %46 {offsets = [7, 0], sizes = [1, 128], strides = [1, 1]} : vector<8x128xf32> to vector<1x128xf32>
      %94 = vector.broadcast %92 : vector<256x1xf32> to vector<256x128xf32>
      %95 = vector.broadcast %93 : vector<1x128xf32> to vector<256x128xf32>
      %96 = arith.mulf %94, %95 : vector<256x128xf32>
      %97 = arith.addf %91, %96 : vector<256x128xf32>
      %cst_29 = arith.constant 1.000000e+00 : f32
      %98 = vector.broadcast %cst_29 : f32 to vector<256x128xf32>
      %99 = arith.mulf %98, %97 : vector<256x128xf32>
      %100 = arith.addf %44, %99 : vector<256x128xf32>
      %101 = vector.broadcast %31 : f32 to vector<256x128xf32>
      %102 = arith.mulf %101, %100 : vector<256x128xf32>
      %c0_30 = arith.constant 0 : index
      %c0_31 = arith.constant 0 : index
      %103 = vector.load %arg18[%c0_30, %c0_31] : memref<512x128xf32, #tpu.memory_space<vmem>>, vector<256x128xf32>
      tpu.vector_store %arg18[%c0_30, %c0_31], %102 {strides = array<i32>} : memref<512x128xf32, #tpu.memory_space<vmem>>, vector<256x128xf32>,
      %104 = arith.truncf %100 : vector<256x128xf32> to vector<256x128xbf16>
      %c0_32 = arith.constant 0 : index
      %c0_33 = arith.constant 0 : index
      %105 = vector.load %arg19[%c0_32, %c0_33] : memref<1024x128xbf16, #tpu.memory_space<vmem>>, vector<256x128xbf16>
      tpu.vector_store %arg19[%c0_32, %c0_33], %104 {strides = array<i32>} : memref<1024x128xbf16, #tpu.memory_space<vmem>>, vector<256x128xbf16>,
      %c0_34 = arith.constant 0 : index
      %c0_35 = arith.constant 0 : index
      %106 = vector.load %arg7[%c0_34, %c0_35] : memref<256x128xf32, #tpu.memory_space<vmem>>, vector<256x128xf32>
      %c0_36 = arith.constant 0 : index
      %c0_37 = arith.constant 0 : index
      %107 = vector.load %arg14[%c0_36, %c0_37] : memref<256x16xf32, #tpu.memory_space<vmem>>, vector<256x16xf32>
      %c0_38 = arith.constant 0 : index
      %c0_39 = arith.constant 0 : index
      %108 = vector.load %arg15[%c0_38, %c0_39] : memref<16x128xf32, #tpu.memory_space<vmem>>, vector<16x128xf32>
      %c0_40 = arith.constant 0 : index
      %c0_41 = arith.constant 0 : index
      %109 = vector.load %arg16[%c0_40, %c0_41] : memref<1x128xf32, #tpu.memory_space<vmem>>, vector<1x128xf32>
      %110 = vector.shape_cast %109 : vector<1x128xf32> to vector<1x128xf32>
      %111 = vector.broadcast %110 : vector<1x128xf32> to vector<256x128xf32>
      %112 = vector.extract_strided_slice %107 {offsets = [0, 0], sizes = [256, 1], strides = [1, 1]} : vector<256x16xf32> to vector<256x1xf32>
      %113 = vector.extract_strided_slice %108 {offsets = [0, 0], sizes = [1, 128], strides = [1, 1]} : vector<16x128xf32> to vector<1x128xf32>
      %114 = vector.broadcast %112 : vector<256x1xf32> to vector<256x128xf32>
      %115 = vector.broadcast %113 : vector<1x128xf32> to vector<256x128xf32>
      %116 = arith.mulf %114, %115 : vector<256x128xf32>
      %117 = arith.addf %111, %116 : vector<256x128xf32>
      %118 = vector.extract_strided_slice %107 {offsets = [0, 1], sizes = [256, 1], strides = [1, 1]} : vector<256x16xf32> to vector<256x1xf32>
      %119 = vector.extract_strided_slice %108 {offsets = [1, 0], sizes = [1, 128], strides = [1, 1]} : vector<16x128xf32> to vector<1x128xf32>
      %120 = vector.broadcast %118 : vector<256x1xf32> to vector<256x128xf32>
      %121 = vector.broadcast %119 : vector<1x128xf32> to vector<256x128xf32>
      %122 = arith.mulf %120, %121 : vector<256x128xf32>
      %123 = arith.addf %117, %122 : vector<256x128xf32>
      %124 = vector.extract_strided_slice %107 {offsets = [0, 2], sizes = [256, 1], strides = [1, 1]} : vector<256x16xf32> to vector<256x1xf32>
      %125 = vector.extract_strided_slice %108 {offsets = [2, 0], sizes = [1, 128], strides = [1, 1]} : vector<16x128xf32> to vector<1x128xf32>
      %126 = vector.broadcast %124 : vector<256x1xf32> to vector<256x128xf32>
      %127 = vector.broadcast %125 : vector<1x128xf32> to vector<256x128xf32>
      %128 = arith.mulf %126, %127 : vector<256x128xf32>
      %129 = arith.addf %123, %128 : vector<256x128xf32>
      %130 = vector.extract_strided_slice %107 {offsets = [0, 3], sizes = [256, 1], strides = [1, 1]} : vector<256x16xf32> to vector<256x1xf32>
      %131 = vector.extract_strided_slice %108 {offsets = [3, 0], sizes = [1, 128], strides = [1, 1]} : vector<16x128xf32> to vector<1x128xf32>
      %132 = vector.broadcast %130 : vector<256x1xf32> to vector<256x128xf32>
      %133 = vector.broadcast %131 : vector<1x128xf32> to vector<256x128xf32>
      %134 = arith.mulf %132, %133 : vector<256x128xf32>
      %135 = arith.addf %129, %134 : vector<256x128xf32>
      %136 = vector.extract_strided_slice %107 {offsets = [0, 4], sizes = [256, 1], strides = [1, 1]} : vector<256x16xf32> to vector<256x1xf32>
      %137 = vector.extract_strided_slice %108 {offsets = [4, 0], sizes = [1, 128], strides = [1, 1]} : vector<16x128xf32> to vector<1x128xf32>
      %138 = vector.broadcast %136 : vector<256x1xf32> to vector<256x128xf32>
      %139 = vector.broadcast %137 : vector<1x128xf32> to vector<256x128xf32>
      %140 = arith.mulf %138, %139 : vector<256x128xf32>
      %141 = arith.addf %135, %140 : vector<256x128xf32>
      %142 = vector.extract_strided_slice %107 {offsets = [0, 5], sizes = [256, 1], strides = [1, 1]} : vector<256x16xf32> to vector<256x1xf32>
      %143 = vector.extract_strided_slice %108 {offsets = [5, 0], sizes = [1, 128], strides = [1, 1]} : vector<16x128xf32> to vector<1x128xf32>
      %144 = vector.broadcast %142 : vector<256x1xf32> to vector<256x128xf32>
      %145 = vector.broadcast %143 : vector<1x128xf32> to vector<256x128xf32>
      %146 = arith.mulf %144, %145 : vector<256x128xf32>
      %147 = arith.addf %141, %146 : vector<256x128xf32>
      %148 = vector.extract_strided_slice %107 {offsets = [0, 6], sizes = [256, 1], strides = [1, 1]} : vector<256x16xf32> to vector<256x1xf32>
      %149 = vector.extract_strided_slice %108 {offsets = [6, 0], sizes = [1, 128], strides = [1, 1]} : vector<16x128xf32> to vector<1x128xf32>
      %150 = vector.broadcast %148 : vector<256x1xf32> to vector<256x128xf32>
      %151 = vector.broadcast %149 : vector<1x128xf32> to vector<256x128xf32>
      %152 = arith.mulf %150, %151 : vector<256x128xf32>
      %153 = arith.addf %147, %152 : vector<256x128xf32>
      %154 = vector.extract_strided_slice %107 {offsets = [0, 7], sizes = [256, 1], strides = [1, 1]} : vector<256x16xf32> to vector<256x1xf32>
      %155 = vector.extract_strided_slice %108 {offsets = [7, 0], sizes = [1, 128], strides = [1, 1]} : vector<16x128xf32> to vector<1x128xf32>
      %156 = vector.broadcast %154 : vector<256x1xf32> to vector<256x128xf32>
      %157 = vector.broadcast %155 : vector<1x128xf32> to vector<256x128xf32>
      %158 = arith.mulf %156, %157 : vector<256x128xf32>
      %159 = arith.addf %153, %158 : vector<256x128xf32>
      %160 = vector.extract_strided_slice %107 {offsets = [0, 8], sizes = [256, 1], strides = [1, 1]} : vector<256x16xf32> to vector<256x1xf32>
      %161 = vector.extract_strided_slice %108 {offsets = [8, 0], sizes = [1, 128], strides = [1, 1]} : vector<16x128xf32> to vector<1x128xf32>
      %162 = vector.broadcast %160 : vector<256x1xf32> to vector<256x128xf32>
      %163 = vector.broadcast %161 : vector<1x128xf32> to vector<256x128xf32>
      %164 = arith.mulf %162, %163 : vector<256x128xf32>
      %165 = arith.addf %159, %164 : vector<256x128xf32>
      %166 = vector.extract_strided_slice %107 {offsets = [0, 9], sizes = [256, 1], strides = [1, 1]} : vector<256x16xf32> to vector<256x1xf32>
      %167 = vector.extract_strided_slice %108 {offsets = [9, 0], sizes = [1, 128], strides = [1, 1]} : vector<16x128xf32> to vector<1x128xf32>
      %168 = vector.broadcast %166 : vector<256x1xf32> to vector<256x128xf32>
      %169 = vector.broadcast %167 : vector<1x128xf32> to vector<256x128xf32>
      %170 = arith.mulf %168, %169 : vector<256x128xf32>
      %171 = arith.addf %165, %170 : vector<256x128xf32>
      %172 = vector.extract_strided_slice %107 {offsets = [0, 10], sizes = [256, 1], strides = [1, 1]} : vector<256x16xf32> to vector<256x1xf32>
      %173 = vector.extract_strided_slice %108 {offsets = [10, 0], sizes = [1, 128], strides = [1, 1]} : vector<16x128xf32> to vector<1x128xf32>
      %174 = vector.broadcast %172 : vector<256x1xf32> to vector<256x128xf32>
      %175 = vector.broadcast %173 : vector<1x128xf32> to vector<256x128xf32>
      %176 = arith.mulf %174, %175 : vector<256x128xf32>
      %177 = arith.addf %171, %176 : vector<256x128xf32>
      %178 = vector.extract_strided_slice %107 {offsets = [0, 11], sizes = [256, 1], strides = [1, 1]} : vector<256x16xf32> to vector<256x1xf32>
      %179 = vector.extract_strided_slice %108 {offsets = [11, 0], sizes = [1, 128], strides = [1, 1]} : vector<16x128xf32> to vector<1x128xf32>
      %180 = vector.broadcast %178 : vector<256x1xf32> to vector<256x128xf32>
      %181 = vector.broadcast %179 : vector<1x128xf32> to vector<256x128xf32>
      %182 = arith.mulf %180, %181 : vector<256x128xf32>
      %183 = arith.addf %177, %182 : vector<256x128xf32>
      %184 = vector.extract_strided_slice %107 {offsets = [0, 12], sizes = [256, 1], strides = [1, 1]} : vector<256x16xf32> to vector<256x1xf32>
      %185 = vector.extract_strided_slice %108 {offsets = [12, 0], sizes = [1, 128], strides = [1, 1]} : vector<16x128xf32> to vector<1x128xf32>
      %186 = vector.broadcast %184 : vector<256x1xf32> to vector<256x128xf32>
      %187 = vector.broadcast %185 : vector<1x128xf32> to vector<256x128xf32>
      %188 = arith.mulf %186, %187 : vector<256x128xf32>
      %189 = arith.addf %183, %188 : vector<256x128xf32>
      %190 = vector.extract_strided_slice %107 {offsets = [0, 13], sizes = [256, 1], strides = [1, 1]} : vector<256x16xf32> to vector<256x1xf32>
      %191 = vector.extract_strided_slice %108 {offsets = [13, 0], sizes = [1, 128], strides = [1, 1]} : vector<16x128xf32> to vector<1x128xf32>
      %192 = vector.broadcast %190 : vector<256x1xf32> to vector<256x128xf32>
      %193 = vector.broadcast %191 : vector<1x128xf32> to vector<256x128xf32>
      %194 = arith.mulf %192, %193 : vector<256x128xf32>
      %195 = arith.addf %189, %194 : vector<256x128xf32>
      %196 = vector.extract_strided_slice %107 {offsets = [0, 14], sizes = [256, 1], strides = [1, 1]} : vector<256x16xf32> to vector<256x1xf32>
      %197 = vector.extract_strided_slice %108 {offsets = [14, 0], sizes = [1, 128], strides = [1, 1]} : vector<16x128xf32> to vector<1x128xf32>
      %198 = vector.broadcast %196 : vector<256x1xf32> to vector<256x128xf32>
      %199 = vector.broadcast %197 : vector<1x128xf32> to vector<256x128xf32>
      %200 = arith.mulf %198, %199 : vector<256x128xf32>
      %201 = arith.addf %195, %200 : vector<256x128xf32>
      %202 = vector.extract_strided_slice %107 {offsets = [0, 15], sizes = [256, 1], strides = [1, 1]} : vector<256x16xf32> to vector<256x1xf32>
      %203 = vector.extract_strided_slice %108 {offsets = [15, 0], sizes = [1, 128], strides = [1, 1]} : vector<16x128xf32> to vector<1x128xf32>
      %204 = vector.broadcast %202 : vector<256x1xf32> to vector<256x128xf32>
      %205 = vector.broadcast %203 : vector<1x128xf32> to vector<256x128xf32>
      %206 = arith.mulf %204, %205 : vector<256x128xf32>
      %207 = arith.addf %201, %206 : vector<256x128xf32>
      %cst_42 = arith.constant 1.000000e+00 : f32
      %208 = vector.broadcast %cst_42 : f32 to vector<256x128xf32>
      %209 = arith.mulf %208, %207 : vector<256x128xf32>
      %210 = arith.addf %106, %209 : vector<256x128xf32>
      %211 = vector.broadcast %31 : f32 to vector<256x128xf32>
      %212 = arith.mulf %211, %210 : vector<256x128xf32>
      %c256 = arith.constant 256 : index
      %c0_43 = arith.constant 0 : index
      %213 = vector.load %arg18[%c256, %c0_43] : memref<512x128xf32, #tpu.memory_space<vmem>>, vector<256x128xf32>
      tpu.vector_store %arg18[%c256, %c0_43], %212 {strides = array<i32>} : memref<512x128xf32, #tpu.memory_space<vmem>>, vector<256x128xf32>,
      %214 = arith.truncf %210 : vector<256x128xf32> to vector<256x128xbf16>
      %c256_44 = arith.constant 256 : index
      %c0_45 = arith.constant 0 : index
      %215 = vector.load %arg19[%c256_44, %c0_45] : memref<1024x128xbf16, #tpu.memory_space<vmem>>, vector<256x128xbf16>
      tpu.vector_store %arg19[%c256_44, %c0_45], %214 {strides = array<i32>} : memref<1024x128xbf16, #tpu.memory_space<vmem>>, vector<256x128xbf16>,
    } else {
    }
    %c2_i32 = arith.constant 2 : i32
    %c0_i32_3 = arith.constant 0 : i32
    %7 = arith.cmpi eq, %c2_i32, %c0_i32_3 : i32
    %c1_i32 = arith.constant 1 : i32
    %8 = arith.select %7, %c1_i32, %c2_i32 : i32
    %9 = arith.remsi %arg0, %8 : i32
    %c0_i32_4 = arith.constant 0 : i32
    %10 = arith.cmpi ne, %9, %c0_i32_4 : i32
    %c0_i32_5 = arith.constant 0 : i32
    %11 = arith.cmpi slt, %9, %c0_i32_5 : i32
    %c0_i32_6 = arith.constant 0 : i32
    %12 = arith.cmpi slt, %8, %c0_i32_6 : i32
    %13 = arith.xori %11, %12 : i1
    %14 = arith.andi %13, %10 : i1
    %15 = arith.addi %9, %8 : i32
    %16 = arith.select %14, %15, %9 : i32
    %c1_i32_7 = arith.constant 1 : i32
    %17 = arith.subi %c1_i32_7, %16 : i32
    %c0_i32_8 = arith.constant 0 : i32
    %18 = arith.cmpi eq, %arg2, %c0_i32_8 : i32
    %19 = arith.extui %18 : i1 to i32
    %c0_i32_9 = arith.constant 0 : i32
    %20 = arith.cmpi ne, %19, %c0_i32_9 : i32
    scf.if %20 {
      %cst = arith.constant 0.000000e+00 : f32
      %31 = vector.broadcast %cst : f32 to vector<256x128xf32>
      %c0 = arith.constant 0 : index
      %c0_15 = arith.constant 0 : index
      %32 = vector.load %arg20[%c0, %c0_15] : memref<256x128xf32, #tpu.memory_space<vmem>>, vector<256x128xf32>
      tpu.vector_store %arg20[%c0, %c0_15], %31 {strides = array<i32>} : memref<256x128xf32, #tpu.memory_space<vmem>>, vector<256x128xf32>,
    } else {
    }
    %c2_i32_10 = arith.constant 2 : i32
    %21 = arith.muli %arg1, %c2_i32_10 : i32
    %22 = arith.addi %21, %arg2 : i32
    %23 = arith.index_cast %22 : i32 to index
    %24 = memref.load %arg4[%23] : memref<4xi32, #tpu.memory_space<smem>>
    %c0_i32_11 = arith.constant 0 : i32
    %25 = arith.cmpi ne, %24, %c0_i32_11 : i32
    %26 = arith.extui %25 : i1 to i32
    %c0_i32_12 = arith.constant 0 : i32
    %27 = arith.cmpi ne, %26, %c0_i32_12 : i32
    scf.if %27 {
      %c512_i32 = arith.constant 512 : i32
      %31 = arith.muli %16, %c512_i32 : i32
      %c256_i32 = arith.constant 256 : i32
      %32 = arith.muli %arg2, %c256_i32 : i32
      %33 = arith.addi %31, %32 : i32
      %34 = tpu.assume_multiple %33, 256 : i32
      %35 = arith.index_cast %34 : i32 to index
      %c0 = arith.constant 0 : index
      %36 = vector.load %arg19[%35, %c0] : memref<1024x128xbf16, #tpu.memory_space<vmem>>, vector<256x128xbf16>
      %c0_15 = arith.constant 0 : index
      %c0_16 = arith.constant 0 : index
      %37 = vector.load %arg20[%c0_15, %c0_16] : memref<256x128xf32, #tpu.memory_space<vmem>>, vector<256x128xf32>
      %c0_17 = arith.constant 0 : index
      %c0_18 = arith.constant 0 : index
      %38 = vector.load %arg17[%c0_17, %c0_18] : memref<256x256xbf16, #tpu.memory_space<vmem>>, vector<256x256xbf16>
      %cst = arith.constant dense<0.000000e+00> : vector<256x128xf32>
      %39 = tpu.matmul %38, %36, %cst {dimension_numbers = #tpu.dot_dimension_numbers<[1], [0], [0], [1], [0, 0, 1, 1], [], []>} : vector<256x256xbf16>, vector<256x128xbf16>, vector<256x128xf32> -> vector<256x128xf32>
      %40 = arith.addf %37, %39 : vector<256x128xf32>
      %c0_19 = arith.constant 0 : index
      %c0_20 = arith.constant 0 : index
      %41 = vector.load %arg20[%c0_19, %c0_20] : memref<256x128xf32, #tpu.memory_space<vmem>>, vector<256x128xf32>
      tpu.vector_store %arg20[%c0_19, %c0_20], %40 {strides = array<i32>} : memref<256x128xf32, #tpu.memory_space<vmem>>, vector<256x128xf32>,
    } else {
    }
    %c1_i32_13 = arith.constant 1 : i32
    %28 = arith.cmpi eq, %arg2, %c1_i32_13 : i32
    %29 = arith.extui %28 : i1 to i32
    %c0_i32_14 = arith.constant 0 : i32
    %30 = arith.cmpi ne, %29, %c0_i32_14 : i32
    scf.if %30 {
      %c0 = arith.constant 0 : index
      %c0_15 = arith.constant 0 : index
      %31 = vector.load %arg20[%c0, %c0_15] : memref<256x128xf32, #tpu.memory_space<vmem>>, vector<256x128xf32>
      %c512_i32 = arith.constant 512 : i32
      %32 = arith.muli %17, %c512_i32 : i32
      %c256_i32 = arith.constant 256 : i32
      %33 = arith.muli %arg1, %c256_i32 : i32
      %34 = arith.addi %32, %33 : i32
      %35 = tpu.assume_multiple %34, 256 : i32
      %36 = arith.truncf %31 : vector<256x128xf32> to vector<256x128xbf16>
      %37 = arith.index_cast %35 : i32 to index
      %c0_16 = arith.constant 0 : index
      %38 = vector.load %arg19[%37, %c0_16] : memref<1024x128xbf16, #tpu.memory_space<vmem>>, vector<256x128xbf16>
      tpu.vector_store %arg19[%37, %c0_16], %36 {strides = array<i32>} : memref<1024x128xbf16, #tpu.memory_space<vmem>>, vector<256x128xbf16>,
      %c256_i32_17 = arith.constant 256 : i32
      %39 = arith.muli %arg1, %c256_i32_17 : i32
      %40 = tpu.assume_multiple %39, 256 : i32
      %41 = arith.index_cast %40 : i32 to index
      %c0_18 = arith.constant 0 : index
      %42 = vector.load %arg18[%41, %c0_18] : memref<512x128xf32, #tpu.memory_space<vmem>>, vector<256x128xf32>
      %c1_i32_19 = arith.constant 1 : i32
      %43 = arith.addi %arg0, %c1_i32_19 : i32
      %44 = arith.index_cast %43 : i32 to index
      %45 = memref.load %arg5[%44] : memref<4xf32, #tpu.memory_space<smem>>
      %46 = vector.broadcast %45 : f32 to vector<256x128xf32>
      %47 = arith.mulf %46, %31 : vector<256x128xf32>
      %48 = arith.addf %42, %47 : vector<256x128xf32>
      %49 = arith.index_cast %40 : i32 to index
      %c0_20 = arith.constant 0 : index
      %50 = vector.load %arg18[%49, %c0_20] : memref<512x128xf32, #tpu.memory_space<vmem>>, vector<256x128xf32>
      tpu.vector_store %arg18[%49, %c0_20], %48 {strides = array<i32>} : memref<512x128xf32, #tpu.memory_space<vmem>>, vector<256x128xf32>,
    } else {
    }
    return
  }
  func.func @transform_0(%arg0: i32, %arg1: i32, %arg2: i32, %arg3: memref<4xi32, #tpu.memory_space<smem>>, %arg4: memref<4xi32, #tpu.memory_space<smem>>) -> i32 {
    %c0_i32 = arith.constant 0 : i32
    %c0_i32_0 = arith.constant 0 : i32
    return %c0_i32 : i32
  }
  func.func @transform_1(%arg0: i32, %arg1: i32, %arg2: i32, %arg3: memref<4xi32, #tpu.memory_space<smem>>, %arg4: memref<4xi32, #tpu.memory_space<smem>>) -> (i32, i32) {
    %c0_i32 = arith.constant 0 : i32
    %c0_i32_0 = arith.constant 0 : i32
    %c0_i32_1 = arith.constant 0 : i32
    return %c0_i32, %c0_i32_0 : i32, i32
  }
  func.func @transform_2(%arg0: i32, %arg1: i32, %arg2: i32, %arg3: memref<4xi32, #tpu.memory_space<smem>>, %arg4: memref<4xi32, #tpu.memory_space<smem>>) -> (i32, i32) {
    %c0_i32 = arith.constant 0 : i32
    %c0_i32_0 = arith.constant 0 : i32
    %c0_i32_1 = arith.constant 0 : i32
    return %c0_i32, %c0_i32_0 : i32, i32
  }
  func.func @transform_3(%arg0: i32, %arg1: i32, %arg2: i32, %arg3: memref<4xi32, #tpu.memory_space<smem>>, %arg4: memref<4xi32, #tpu.memory_space<smem>>) -> (i32, i32) {
    %c0_i32 = arith.constant 0 : i32
    %c0_i32_0 = arith.constant 0 : i32
    %c0_i32_1 = arith.constant 0 : i32
    return %c0_i32, %c0_i32_0 : i32, i32
  }
  func.func @transform_4(%arg0: i32, %arg1: i32, %arg2: i32, %arg3: memref<4xi32, #tpu.memory_space<smem>>, %arg4: memref<4xi32, #tpu.memory_space<smem>>) -> (i32, i32) {
    %c0_i32 = arith.constant 0 : i32
    %c0_i32_0 = arith.constant 0 : i32
    %c0_i32_1 = arith.constant 0 : i32
    return %c0_i32, %c0_i32_0 : i32, i32
  }
  func.func @transform_5(%arg0: i32, %arg1: i32, %arg2: i32, %arg3: memref<4xi32, #tpu.memory_space<smem>>, %arg4: memref<4xi32, #tpu.memory_space<smem>>) -> (i32, i32) {
    %c0_i32 = arith.constant 0 : i32
    %c0_i32_0 = arith.constant 0 : i32
    %c0_i32_1 = arith.constant 0 : i32
    return %c0_i32, %c0_i32_0 : i32, i32
  }
  func.func @transform_6(%arg0: i32, %arg1: i32, %arg2: i32, %arg3: memref<4xi32, #tpu.memory_space<smem>>, %arg4: memref<4xi32, #tpu.memory_space<smem>>) -> (i32, i32) {
    %c0_i32 = arith.constant 0 : i32
    %c0_i32_0 = arith.constant 0 : i32
    %c0_i32_1 = arith.constant 0 : i32
    return %c0_i32, %c0_i32_0 : i32, i32
  }
  func.func @transform_7(%arg0: i32, %arg1: i32, %arg2: i32, %arg3: memref<4xi32, #tpu.memory_space<smem>>, %arg4: memref<4xi32, #tpu.memory_space<smem>>) -> (i32, i32) {
    %c0_i32 = arith.constant 0 : i32
    %c0_i32_0 = arith.constant 0 : i32
    %c0_i32_1 = arith.constant 0 : i32
    return %c0_i32, %c0_i32_0 : i32, i32
  }
  func.func @transform_8(%arg0: i32, %arg1: i32, %arg2: i32, %arg3: memref<4xi32, #tpu.memory_space<smem>>, %arg4: memref<4xi32, #tpu.memory_space<smem>>) -> (i32, i32) {
    %c0_i32 = arith.constant 0 : i32
    %c0_i32_0 = arith.constant 0 : i32
    %c0_i32_1 = arith.constant 0 : i32
    return %c0_i32, %c0_i32_0 : i32, i32
  }
  func.func @transform_9(%arg0: i32, %arg1: i32, %arg2: i32, %arg3: memref<4xi32, #tpu.memory_space<smem>>, %arg4: memref<4xi32, #tpu.memory_space<smem>>) -> (i32, i32) {
    %c0_i32 = arith.constant 0 : i32
    %c0_i32_0 = arith.constant 0 : i32
    %c0_i32_1 = arith.constant 0 : i32
    return %c0_i32, %c0_i32_0 : i32, i32
  }
  func.func @transform_10(%arg0: i32, %arg1: i32, %arg2: i32, %arg3: memref<4xi32, #tpu.memory_space<smem>>, %arg4: memref<4xi32, #tpu.memory_space<smem>>) -> (i32, i32) {
    %c0_i32 = arith.constant 0 : i32
    %c0_i32_0 = arith.constant 0 : i32
    %c0_i32_1 = arith.constant 0 : i32
    return %c0_i32, %c0_i32_0 : i32, i32
  }
  func.func @transform_11(%arg0: i32, %arg1: i32, %arg2: i32, %arg3: memref<4xi32, #tpu.memory_space<smem>>, %arg4: memref<4xi32, #tpu.memory_space<smem>>) -> (i32, i32) {
    %c0_i32 = arith.constant 0 : i32
    %c0_i32_0 = arith.constant 0 : i32
    %c0_i32_1 = arith.constant 0 : i32
    return %c0_i32, %c0_i32_0 : i32, i32
  }
  func.func @transform_12(%arg0: i32, %arg1: i32, %arg2: i32, %arg3: memref<4xi32, #tpu.memory_space<smem>>, %arg4: memref<4xi32, #tpu.memory_space<smem>>) -> (i32, i32) {
    %c2_i32 = arith.constant 2 : i32
    %0 = arith.muli %arg1, %c2_i32 : i32
    %1 = arith.addi %0, %arg2 : i32
    %2 = arith.index_cast %1 : i32 to index
    %3 = memref.load %arg3[%2] : memref<4xi32, #tpu.memory_space<smem>>
    %c0_i32 = arith.constant 0 : i32
    return %arg1, %3 : i32, i32
  }
  func.func @transform_13(%arg0: i32, %arg1: i32, %arg2: i32, %arg3: memref<4xi32, #tpu.memory_space<smem>>, %arg4: memref<4xi32, #tpu.memory_space<smem>>) -> (i32, i32) {
    %c0_i32 = arith.constant 0 : i32
    %c0_i32_0 = arith.constant 0 : i32
    %c0_i32_1 = arith.constant 0 : i32
    return %c0_i32, %c0_i32_0 : i32, i32
  }
}

</mosaic_0001>

<bundles_post_ra>
// kernel: tpu_custom_call.1
= control target key start
LH: loop header
LB: loop body
LE: loop exit
PB: predicated region body
PF: predicated region fallthrough
CT: control target
= control target key end

     0   :  { %s14727_s0 = inlined_call_operand.vmem [shape: s32[4], index: 0, kind: input, shape index: {}]   ;;  %s14728_s2 = inlined_call_operand.vmem [shape: f32[4], index: 2, kind: input, shape index: {}]   ;;  %s14729_s3 = inlined_call_operand.vmem [shape: f32[256,128], index: 3, kind: input, shape index: {}]   ;;  %s14730_s4 = inlined_call_operand.vmem [shape: f32[256,128], index: 4, kind: input, shape index: {}]   ;;  %s14731_s5 = inlined_call_operand.vmem [shape: f32[256,1], index: 5, kind: input, shape index: {}]   ;;  %s14732_s6 = inlined_call_operand.vmem [shape: f32[1,128], index: 6, kind: input, shape index: {}]   ;;  %s14733_s7 = inlined_call_operand.vmem [shape: f32[1,128], index: 7, kind: input, shape index: {}]   ;;  %s14734_s8 = inlined_call_operand.vmem [shape: f32[256,8], index: 8, kind: input, shape index: {}]   ;;  %s14735_s9 = inlined_call_operand.vmem [shape: f32[8,128], index: 9, kind: input, shape index: {}]   ;;  %s14736_s10 = inlined_call_operand.vmem [shape: f32[1,128], index: 10, kind: input, shape index: {}]   ;;  %s14737_s11 = inlined_call_operand.vmem [shape: f32[256,16], index: 11, kind: input, shape index: {}]   ;;  %s14738_s12 = inlined_call_operand.vmem [shape: f32[16,128], index: 12, kind: input, shape index: {}]   ;;  %s14739_s13 = inlined_call_operand.vmem [shape: f32[1,128], index: 13, kind: input, shape index: {}]   ;;  %s14740_s14 = inlined_call_operand.hbm [shape: bf16[512,512], index: 14, kind: input, shape index: {}]   ;;  %s14741_s15 = inlined_call_operand.hbm [shape: f32[512,128], index: 15, kind: output, shape index: {}]   ;;  %s14742_s1 = inlined_call_operand.vmem [shape: s32[4], index: 1, kind: input, shape index: {}]  }
   0x1   :  { %14877 = sst [smem:[#allocation414_spill]] %s14728_s2  ;;  %s20_s20 = sshll.u32 %s14727_s0, 4  ;;  %s21_s20 = int_to_ptr.vmem [resolvable:$true] %s20_s20 }
   0x2   :  { %14878 = sst [smem:[#allocation415_spill]] %s14729_s3  ;;  %s24_s23 = sshll.u32 %s14742_s1, 4  ;;  %s25_s23 = int_to_ptr.vmem [resolvable:$true] %s24_s23 }
   0x3   :  { %14879 = sst [smem:[#allocation416_spill]] %s14730_s4  ;;  %s7459_s24 = scalar_lea.vmem %s21_s20, 16 }
   0x4   :  { %14880 = sst [smem:[#allocation417_spill]] %s14735_s9  ;;  %p7460_p0 = scmp.ne.s32.totalorder %s21_s20, %s7459_s24 }
   0x5   :  { %14881 = sst [smem:[#allocation418_spill]] %s14736_s10  ;;  %p7464_p1 = scmp.lt.s32.totalorder %s21_s20, %s21_s20 }
   0x6   :  { %14882 = sst [smem:[#allocation419_spill]] %s14738_s12  ;;  %p7465_p2 = scmp.lt.s32.totalorder %s7459_s24, %s7459_s24 }
   0x7   :  { %14883 = sst [smem:[#allocation420_spill]] %s14739_s13 }
   0x8   :  { %14884 = sst [smem:[#allocation421_spill]] %s14741_s15  ;;  %p7466_p3 = por %p7465_p2, %p7464_p1 }
   0xa   :  { %p7467_p4 = pnand %p7466_p3, %p7460_p0 }
   0xc   :  { %7470 = shalt.err (!%p7467_p4)  }
   0xd   :  { %s7648_s25 = smov [#allocation5]   ;;  %s7471_s26 = scalar_lea.vmem %s25_s23, 16 }
   0xe   :  { %23 = dma.vmem_to_smem %s21_s20, 16, %s7648_s25, [#allocation4] }
   0xf   :  { %p7472_p5 = scmp.ne.s32.totalorder %s25_s23, %s7471_s26  ;;  %p7476_p6 = scmp.lt.s32.totalorder %s25_s23, %s25_s23 }
  0x10   :  { %p7477_p7 = scmp.lt.s32.totalorder %s7471_s26, %s7471_s26 }
  0x12   :  { %p7478_p8 = por %p7477_p7, %p7476_p6 }
  0x14   :  { %p7479_p9 = pnand %p7478_p8, %p7472_p5 }
  0x16   :  { %7482 = shalt.err (!%p7479_p9)  }
  0x17   :  { %s7649_s0 = smov [#allocation6]  }
  0x18   :  { %27 = dma.vmem_to_smem %s25_s23, 16, %s7649_s0, [#allocation4] }
  0x19   :  { %7594 = dma.done.wait [#allocation4], 32 }
  0x1a   :  { %7595 = vsyncadd [#allocation4], 4294967264 }
  0x1b   :  { %29 = sfence }
  0x1c   :  { %30 = vsyncpa [#allocation10], 0 }
  0x1d   :  { %31 = vsyncpa [#allocation8], 0 }
  0x1e   :  { %33 = vsyncpa [#allocation8 + $0x1], 0 }
  0x1f   :  { %34 = vsyncpa [#allocation9], 0  ;;  %s7761_s1 = smov 0   ;;  %s7763_s27 = smov 0  }
  0x20   :  { %s7765_s28 = smov 0   ;;  %s7767_s29 = smov 0  }
  0x21   :  { %s7769_s30 = smov 0   ;;  %s7771_s16 = smov 0  }
  0x22   :  { %s7773_s17 = smov 0   ;;  %s7775_s18 = smov 0  }
  0x23   :  { %s7777_s19 = smov 0   ;;  %s7779_s20 = smov 0  }
  0x24 LB: > { %14885 = sst [smem:[#allocation19_spill]] %s7618_s28  ;;  %s52_s22 = sadd.s32 1, %s7634_s17  ;;  %s7646_s20 = sphi %s7779_s20, %s40_s20   ;;  %s7642_s19 = sphi %s7777_s19, %s16557_s19   ;;  %s7638_s18 = sphi %s7775_s18, %s16561_s18   ;;  %s7634_s17 = sphi %s7773_s17, %s16555_s17   ;;  %s7630_s16 = sphi %s7771_s16, %s16554_s16   ;;  %s7626_s30 = sphi %s7769_s30, %s16560_s30   ;;  %s7622_s29 = sphi %s7767_s29, %s16553_s29   ;;  %s7618_s28 = sphi %s7765_s28, %s16552_s28   ;;  %s7614_s27 = sphi %s7763_s27, %s16559_s27   ;;  %s7610_s1 = sphi %s7761_s1, %s16558_s1  }
  0x25   : > { %14886 = sst [smem:[#allocation20_spill]] %s7634_s17  ;;  %p53_p10 = scmp.ge.s32.totalorder %s52_s22, 2 }
  0x26   : > { %14887 = sst [smem:[#allocation21_spill]] %s7642_s19  ;;  %s55_s23 = sadd.s32 1, %s7638_s18 }
  0x27   : > { %s59_s24 = sadd.s32 1, %s7642_s19  ;;  %s6859_s25 = sshll.u32 %s7638_s18, 1 }
  0x28   : > { %s16563_s22 = smov (%p53_p10, %s52_s22), 0  ;;  %s16565_s23 = smov (!%p53_p10, %s55_s23), %s7638_s18 }
  0x29   : > { %14888 = sst [smem:[#allocation22_spill]] %s16563_s22  ;;  %s7820_s26 = sadd.s32 %s7634_s17, %s6859_s25 }
  0x2a   : > { %s326_s0 = sadd.s32 1, %s7618_s28  ;;  %p57_p11 = scmp.ge.s32.totalorder %s16565_s23, 2 }
  0x2b   : > { %s317_s21 = sld [smem:[#allocation5 + %s7820_s26]]  ;;  %p333_p12 = scmp.ne.s32.totalorder %s7618_s28, %s7614_s27 }
  0x2c   : > { %p334_p13 = scmp.eq.s32.totalorder %s7646_s20, 0  ;;  %s16567_s23 = smov (%p57_p11, %s16565_s23), 0 }
  0x2d   : > { %14889 = sst [smem:[#allocation23_spill]] %s16567_s23  ;;  %s16569_s24 = smov (!%p57_p11, %s59_s24), %s7642_s19 }
  0x2e   : > { %s6860_s15 = sshll.u32 %s16567_s23, 1  ;;  %s321_s4 = ssub.s32 %s7638_s18, %s16567_s23 }
  0x2f   : > { %p61_p0 = scmp.ge.s32.totalorder %s16569_s24, 3  ;;  %s319_s13 = sadd.s32 %s6860_s15, %s16563_s22 }
  0x30   : > { %s320_s25 = sld [smem:[#allocation5 + %s319_s13]]  ;;  %p7834_p1 = por %p334_p13, %p333_p12 }
  0x31   : > { %s16571_s24 = smov (%p61_p0, %s16569_s24), 0  ;;  %p339_p2 = scmp.ne.s32.totalorder %s7614_s27, %s7610_s1 }
  0x32   : > { %14891 = sst [smem:[#allocation24_spill]] %s16571_s24  ;;  %s14892_s12 = sadd.s32 4294967295, %s7646_s20  }
  0x33   : > { %p7844_p3 = scmp.eq.s32.totalorder %s14892_s12, 0  ;;  %p6861_p4 = scmp.ge.s32.totalorder %s7646_s20, 1 }
  0x34   : > { %p371_p5 = scmp.lt.s32.totalorder %s7646_s20, 13  ;;  %s14896_s2 = sld [smem:[#allocation414_spill]] }
  0x35   : > { %p7852_p6 = por %p7844_p3, %p339_p2  ;;  %p7078_p11 = scmp.lt.s32.totalorder %s7646_s20, 12 }
  0x36   : > { %p7856_p7 = pnand %p6861_p4, %p371_p5  ;;  %s322_s23 = ssub.s32 %s317_s21, %s320_s25 }
  0x37   : > { %s14894_s13 = scalar_select %p7852_p6, 1, 0 }
  0x38   : > { %s14895_s15 = scalar_select %p7856_p7, 1, 0 }
  0x39   : > { %s323_s22 = sor.u32 %s322_s23, %s321_s4  ;;  %p7067_p8 = pneg %p7856_p7 }
  0x3a   : > { %s384_s12 = sshll.u32 %s14896_s2, 4  ;;  %p324_p9 = scmp.eq.s32.totalorder %s323_s22, 0  ;;  %s385_s12 = int_to_ptr.vmem [resolvable:$true] %s384_s12 }
  0x3b   : > { %p7867_p10 = pnand %p7067_p8, %p7844_p3  ;;  %s7483_s9 = scalar_lea.vmem %s385_s12, 16 }
  0x3c   : > { %s7872_s10 = scalar_select %p324_p9, %s7618_s28, %s326_s0  }
  0x3d   : > { %p7484_p12 = scmp.ne.s32.totalorder %s385_s12, %s7483_s9  ;;  %p7485_p13 = pneg %p7867_p10 }
  0x3e   : > { %14898 = sst [smem:[#allocation25_spill]] %s7872_s10  ;;  %p7491_p4 = scmp.lt.s32.totalorder %s385_s12, %s385_s12 }
  0x3f   : > { %p7486_p0 = pnand %p7485_p13, %p7484_p12  ;;  %p7492_p5 = scmp.lt.s32.totalorder %s7483_s9, %s7483_s9 }
  0x41   : > { %p7487_p2 = pneg %p7486_p0  ;;  %p7493_p6 = por %p7492_p5, %p7491_p4 }
  0x43   : > { %p7494_p7 = pnand %p7493_p6, %p7487_p2 }
  0x45   : > { %7497 = shalt.err (!%p7494_p7)
}
  0x46   : > { %s7650_s4 = smov [#allocation7]   ;;  %s16573_s26 = smov (!%p7834_p1, %s7820_s26), 0 }
  0x47   : > { %7070 = dma.vmem_to_smem (!%p7867_p10), %s385_s12, 16, %s7650_s4, [#allocation10]  }
  0x48   : > { %s7057_s21 = scalar_select %p7834_p1, [#allocation5], [#allocation13] }
  0x49   : > { %p7888_p6 = pnand %p7078_p11, %p7834_p1  ;;  %s428_s19 = sand.u32 1, %s7618_s28  }
  0x4a   : > { %s6864_s22 = sshll.u32 %s428_s19, 8  ;;  %s16575_s21 = smov (!%p7078_p11, %s7057_s21), [#allocation14] }
  0x4b   : > { %s16577_s26 = smov (!%p7078_p11, %s16573_s26), 0  ;;  %s432_s24 = scalar_lea.vmem [#allocation11], %s6864_s22 }
  0x4c   : > { %s435_s23 = sld [smem:[%s16575_s21 + %s16577_s26]]  ;;  %s445_s0 = sshll.u32 %s432_s24, 4  ;;  %s7898_s0 = int_to_ptr.vmem [resolvable:$true] %s445_s0 }
  0x4d   : > { %s6926_s25 = sshll.u32 %s7638_s18, 7  ;;  %s7905_s28 = scalar_lea.sflag [#allocation8], %s428_s19 }
  0x4e   : > { %p7500_p7 = pneg %p7888_p6  ;;  %s7503_s2 = scalar_lea.hbm %s14740_s14, 16384 }
  0x52   : > { %s6867_s17 = sshll.u32 %s435_s23, 1 }
  0x53   : > { %s442_s1 = sadd.s32 %s6926_s25, %s6867_s17 }
  0x54   : > { %s6869_s12 = sshll.u32 %s442_s1, 6 }
  0x55   : > { %s7903_s10 = scalar_lea.hbm %s14740_s14, %s6869_s12 }
  0x56   : > { %s7498_s26 = scalar_lea.hbm %s7903_s10, 4096  ;;  %p7504_p10 = scmp.lt.u32.totalorder %s7903_s10, %s14740_s14 }
  0x57   : > { %p7499_p1 = scmp.ne.s32.totalorder %s7903_s10, %s7498_s26  ;;  %p7505_p11 = scmp.lt.u32.totalorder %s7503_s2, %s7498_s26 }
  0x58   : > { %p7507_p13 = scmp.lt.u32.totalorder %s7498_s26, %s7903_s10 }
  0x59   : > { %p7501_p8 = pnand %p7500_p7, %p7499_p1  ;;  %p7506_p12 = por %p7505_p11, %p7504_p10 }
  0x5b   : > { %p7502_p9 = pneg %p7501_p8  ;;  %p7508_p0 = por %p7507_p13, %p7506_p12 }
  0x5d   : > { %p7509_p2 = pnand %p7508_p0, %p7502_p9 }
  0x5f   : > { %7512 = shalt.err (!%p7509_p2)
}
  0x60   : > { %s7513_s19 = scalar_lea.vmem %s7898_s0, 4096  ;;  %s7651_s25 = smov [#allocation11]  }
  0x61   : > { %p7514_p4 = scmp.ne.s32.totalorder %s7898_s0, %s7513_s19  ;;  %s7518_s17 = sshll.u32 %s7651_s25, 4  ;;  %s7519_s17 = int_to_ptr.vmem [resolvable:$false] %s7518_s17 }
  0x62   : > { %s7520_s1 = scalar_lea.vmem %s7519_s17, 8192  ;;  %p7521_p8 = scmp.lt.s32.totalorder %s7898_s0, %s7519_s17 }
  0x63   : > { %p7516_p5 = pnand %p7514_p4, %p7500_p7  ;;  %p7522_p10 = scmp.lt.s32.totalorder %s7520_s1, %s7513_s19 }
  0x65   : > { %p7517_p1 = pneg %p7516_p5  ;;  %p7523_p11 = por %p7522_p10, %p7521_p8 }
  0x67   : > { %p7524_p12 = pnand %p7523_p11, %p7517_p1 }
  0x69   : > { %7527 = shalt.err (!%p7524_p12)
}
  0x6a   : > { %s7652_s12 = smov 256   ;;  %s7653_s4 = smov 128  }
  0x6b   : > { %s7654_s26 = smov 8   ;;  %p14900_p7 = scmp.ne.s32.totalorder %s14895_s15, 0 }
  0x6c   : > { %7076 = dma.hbm_to_vmem [thread:$0]  (!%p7888_p6), %s7903_s10, 4096, %s7898_s0, %s7905_s28, %s7652_s12, %s7653_s4, %s7654_s26  }
  0x6d   : > { %457 = sbr.rel (%p14900_p7) target bundleno = 2375 (0x947), region = 72 }
  0x74   : > { %7597 = dma.done.wait (%p7844_p3), [#allocation10], 16  }
  0x75   : > { %7599 = vsyncadd (%p7844_p3), [#allocation10], 4294967280  ;;  %s463_s21 = sand.u32 1, %s7614_s27   ;;  %p14901_p9 = scmp.ne.s32.totalorder %s14894_s13, 0 }
  0x76   : > { %s6872_s22 = sshll.u32 %s463_s21, 8  ;;  %s464_s2 = scalar_lea.sflag [#allocation8], %s463_s21 }
  0x77   : > { %s7940_s23 = scalar_lea.vmem [#allocation11], %s6872_s22 }
  0x78   : > { %7601 = dma.done.wait (%p14901_p9), %s464_s2, 4096  }
  0x79   : > { %7603 = vsyncadd (%p14901_p9), %s464_s2, 4294963200 }
  0x7a   : > { %472 = sfence }
  0x7b   : > { %p512_p6 = scmp.eq.s32.totalorder %s7630_s16, 0  ;;  %p513_p13 = scmp.eq.s32.totalorder %s7626_s30, 0 }
  0x7c   : > { %p516_p3 = scmp.eq.s32.totalorder %s7622_s29, 0 }
  0x7d   : > { %p514_p0 = pnand %p513_p13, %p512_p6 }
  0x7f   : > { %p515_p2 = pneg %p514_p0 }
  0x81   : > { %p517_p4 = pnand %p516_p3, %p515_p2 }
  0x83   : > { %520 = sbr.rel (%p517_p4) target bundleno = 1963 (0x7ab), region = 84 }
  0x8a   : > { %v556_v0 = vld [vmem:[%s14731_s5 + $0x10] sm:$0xff]  ;;  %v554_v1 = vld [vmem:[%s14731_s5] sm:$0xff]  ;;  %v14756_v2 = vmov 0   ;;  %v557_v3 = vld [vmem:[%s14731_s5 + $0x18] sm:$0xff]  ;;  %s14932_s28 = sld [smem:[#allocation417_spill]]  ;;  %s14940_s0 = sld [smem:[#allocation418_spill]] }
  0x8b   : > { %7189 = vset.pattern.permute.xlu1 %v14756_v2  ;;  %7188 = vset.pattern.permute.xlu0 %v14756_v2  ;;  %v555_v4 = vld [vmem:[%s14731_s5 + $0x8] sm:$0xff]  ;;  %v558_v6 = vld [vmem:[%s14731_s5 + $0x20] sm:$0xff]  ;;  %v561_v7 = vld [vmem:[%s14731_s5 + $0x38] sm:$0xff]  ;;  %s521_s2 = sld [smem:[#allocation7]]  ;;  %s15199_s9 = sld [smem:[#allocation415_spill]] }
  0x8c   : > { %606 = vperm.xlu1 %7189, %v556_v0   ;;  %596 = vperm.xlu0 %7188, %v554_v1   ;;  %v559_v5 = vld [vmem:[%s14731_s5 + $0x28] sm:$0xff]  ;;  %v560_v8 = vld [vmem:[%s14731_s5 + $0x30] sm:$0xff]  ;;  %v562_v10 = vld [vmem:[%s14731_s5 + $0x40] sm:$0xff]  ;;  %s15863_s10 = sld [smem:[#allocation419_spill]]  ;;  %s15870_s1 = sld [smem:[#allocation420_spill]] }
  0x8d   : > { %v563_v9 = vld [vmem:[%s14731_s5 + $0x48] sm:$0xff]  ;;  %v565_v11 = vld [vmem:[%s14731_s5 + $0x58] sm:$0xff]  ;;  %v564_v12 = vld [vmem:[%s14731_s5 + $0x50] sm:$0xff]  ;;  %s16473_s22 = sld [smem:[#allocation416_spill]] }
  0x8e   : > { %v567_v13 = vld [vmem:[%s14731_s5 + $0x68] sm:$0xff]  ;;  %v566_v14 = vld [vmem:[%s14731_s5 + $0x60] sm:$0xff]  ;;  %v569_v15 = vld [vmem:[%s14731_s5 + $0x78] sm:$0xff] }
  0x8f   : > { %v568_v16 = vld [vmem:[%s14731_s5 + $0x70] sm:$0xff]  ;;  %v571_v17 = vld [vmem:[%s14731_s5 + $0x88] sm:$0xff]  ;;  %v570_v18 = vld [vmem:[%s14731_s5 + $0x80] sm:$0xff] }
  0x90   : > { %611 = vperm.xlu1 %7189, %v557_v3   ;;  %601 = vperm.xlu0 %7188, %v555_v4   ;;  %v573_v19 = vld [vmem:[%s14731_s5 + $0x98] sm:$0xff]  ;;  %v572_v20 = vld [vmem:[%s14731_s5 + $0x90] sm:$0xff]  ;;  %v575_v21 = vld [vmem:[%s14731_s5 + $0xa8] sm:$0xff]  ;;  %s14933_s15 = smov %s14932_s28 }
  0x91   : > { %v574_v22 = vld [vmem:[%s14731_s5 + $0xa0] sm:$0xff]  ;;  %v577_v23 = vld [vmem:[%s14731_s5 + $0xb8] sm:$0xff]  ;;  %v576_v24 = vld [vmem:[%s14731_s5 + $0xb0] sm:$0xff] }
  0x92   : > { %v579_v25 = vld [vmem:[%s14731_s5 + $0xc8] sm:$0xff]  ;;  %v578_v26 = vld [vmem:[%s14731_s5 + $0xc0] sm:$0xff]  ;;  %v581_v27 = vld [vmem:[%s14731_s5 + $0xd8] sm:$0xff] }
  0x93   : > { %v580_v28 = vld [vmem:[%s14731_s5 + $0xd0] sm:$0xff]  ;;  %v583_v29 = vld [vmem:[%s14731_s5 + $0xe8] sm:$0xff]  ;;  %v582_v30 = vld [vmem:[%s14731_s5 + $0xe0] sm:$0xff] }
  0x94   : > { %621 = vperm.xlu1 %7189, %v559_v5   ;;  %616 = vperm.xlu0 %7188, %v558_v6   ;;  %v585_v31 = vld [vmem:[%s14731_s5 + $0xf8] sm:$0xff]  ;;  %v584_v32 = vld [vmem:[%s14731_s5 + $0xf0] sm:$0xff]  ;;  %v8050_v33 = vld [vmem:[%s14734_s8 + $0x8] sm:$0xff] }
  0x95   : > { %v8055_v34 = vld [vmem:[%s14734_s8] sm:$0xff]  ;;  %v8062_v35 = vld [vmem:[%s14734_s8 + $0x18] sm:$0xff]  ;;  %v8067_v36 = vld [vmem:[%s14734_s8 + $0x10] sm:$0xff] }
  0x96   : > { %v8074_v37 = vld [vmem:[%s14734_s8 + $0x28] sm:$0xff]  ;;  %v8079_v38 = vld [vmem:[%s14734_s8 + $0x20] sm:$0xff]  ;;  %v8086_v39 = vld [vmem:[%s14734_s8 + $0x38] sm:$0xff] }
  0x97   : > { %v8091_v40 = vld [vmem:[%s14734_s8 + $0x30] sm:$0xff]  ;;  %v8098_v41 = vld [vmem:[%s14734_s8 + $0x48] sm:$0xff]  ;;  %v8103_v42 = vld [vmem:[%s14734_s8 + $0x40] sm:$0xff] }
  0x98   : > { %631 = vperm.xlu1 %7189, %v561_v7   ;;  %626 = vperm.xlu0 %7188, %v560_v8   ;;  %v8110_v43 = vld [vmem:[%s14734_s8 + $0x58] sm:$0xff]  ;;  %v8115_v44 = vld [vmem:[%s14734_s8 + $0x50] sm:$0xff]  ;;  %v8122_v45 = vld [vmem:[%s14734_s8 + $0x68] sm:$0xff]  ;;  %v14757_v7 = vmov 1  }
  0x99   : > { %v8127_v46 = vld [vmem:[%s14734_s8 + $0x60] sm:$0xff]  ;;  %v8134_v47 = vld [vmem:[%s14734_s8 + $0x78] sm:$0xff]  ;;  %v8139_v48 = vld [vmem:[%s14734_s8 + $0x70] sm:$0xff] }
  0x9a   : > { %v8146_v49 = vld [vmem:[%s14734_s8 + $0x88] sm:$0xff]  ;;  %v8151_v50 = vld [vmem:[%s14734_s8 + $0x80] sm:$0xff]  ;;  %v8158_v51 = vld [vmem:[%s14734_s8 + $0x98] sm:$0xff] }
  0x9b   : > { %v8163_v52 = vld [vmem:[%s14734_s8 + $0x90] sm:$0xff]  ;;  %v8170_v53 = vld [vmem:[%s14734_s8 + $0xa8] sm:$0xff]  ;;  %v8175_v54 = vld [vmem:[%s14734_s8 + $0xa0] sm:$0xff] }
  0x9c   : > { %641 = vperm.xlu1 %7189, %v563_v9   ;;  %636 = vperm.xlu0 %7188, %v562_v10   ;;  %v8182_v55 = vld [vmem:[%s14734_s8 + $0xb8] sm:$0xff]  ;;  %v8187_v56 = vld [vmem:[%s14734_s8 + $0xb0] sm:$0xff]  ;;  %v8194_v57 = vld [vmem:[%s14734_s8 + $0xc8] sm:$0xff] }
  0x9d   : > { %v8199_v58 = vld [vmem:[%s14734_s8 + $0xc0] sm:$0xff]  ;;  %v8206_v59 = vld [vmem:[%s14734_s8 + $0xd8] sm:$0xff]  ;;  %v8211_v60 = vld [vmem:[%s14734_s8 + $0xd0] sm:$0xff] }
  0x9e   : > { %v8218_v61 = vld [vmem:[%s14734_s8 + $0xe8] sm:$0xff]  ;;  %v8223_v62 = vld [vmem:[%s14734_s8 + $0xe0] sm:$0xff]  ;;  %v8230_v63 = vld [vmem:[%s14734_s8 + $0xf8] sm:$0xff] }
  0x9f   : > { %v8235_v0 = vld [vmem:[%s14734_s8 + $0xf0] sm:$0xff]  ;;  %v8242_v1 = vld [vmem:[%s14737_s11 + $0x8] sm:$0xff]  ;;  %v8247_v3 = vld [vmem:[%s14732_s6] ss:$0 sm:$0xff] }
  0xa0   : > { %651 = vperm.xlu1 %7189, %v565_v11   ;;  %646 = vperm.xlu0 %7188, %v564_v12   ;;  %v8257_v8 = vld [vmem:[%s14733_s7] ss:$0 sm:$0xff]  ;;  %v8365_v2 = vld [vmem:[%s14737_s11 + $0x90] sm:$0xff] }
  0xa1   : > { %v8263_v9 = vld [vmem:[%s14737_s11 + $0x20] sm:$0xff] }
  0xa4   : > { %661 = vperm.xlu1 %7189, %v567_v13   ;;  %656 = vperm.xlu0 %7188, %v566_v14  }
  0xa8   : > { %671 = vperm.xlu1 %7189, %v569_v15   ;;  %666 = vperm.xlu0 %7188, %v568_v16   ;;  %v8275_v15 = vld [vmem:[%s14737_s11 + $0x30] sm:$0xff] }
  0xac   : > { %681 = vperm.xlu1 %7189, %v571_v17   ;;  %676 = vperm.xlu0 %7188, %v570_v18  }
  0xb0   : > { %691 = vperm.xlu1 %7189, %v573_v19   ;;  %686 = vperm.xlu0 %7188, %v572_v20  }
  0xb4   : > { %701 = vperm.xlu1 %7189, %v575_v21   ;;  %696 = vperm.xlu0 %7188, %v574_v22   ;;  %v8290_v22 = vld [vmem:[%s14737_s11 + $0x40] sm:$0xff] }
  0xb8   : > { %711 = vperm.xlu1 %7189, %v577_v23   ;;  %706 = vperm.xlu0 %7188, %v576_v24  }
  0xbc   : > { %721 = vperm.xlu1 %7189, %v579_v25   ;;  %716 = vperm.xlu0 %7188, %v578_v26  }
  0xc0   : > { %731 = vperm.xlu1 %7189, %v581_v27   ;;  %726 = vperm.xlu0 %7188, %v580_v28  }
  0xc4   : > { %741 = vperm.xlu1 %7189, %v583_v29   ;;  %736 = vperm.xlu0 %7188, %v582_v30   ;;  %v8305_v29 = vld [vmem:[%s14737_s11 + $0x50] sm:$0xff] }
  0xc8   : > { %751 = vperm.xlu1 %7189, %v585_v31   ;;  %746 = vperm.xlu0 %7188, %v584_v32  }
  0xcc   : > { %935 = vperm.xlu1 %7189, %v8050_v33   ;;  %930 = vperm.xlu0 %7188, %v8055_v34  }
  0xd0   : > { %945 = vperm.xlu1 %7189, %v8062_v35   ;;  %940 = vperm.xlu0 %7188, %v8067_v36  }
  0xd4   : > { %955 = vperm.xlu1 %7189, %v8074_v37   ;;  %950 = vperm.xlu0 %7188, %v8079_v38  }
  0xd8   : > { %965 = vperm.xlu1 %7189, %v8086_v39   ;;  %960 = vperm.xlu0 %7188, %v8091_v40  }
  0xdc   : > { %975 = vperm.xlu1 %7189, %v8098_v41   ;;  %970 = vperm.xlu0 %7188, %v8103_v42  }
  0xe0   : > { %985 = vperm.xlu1 %7189, %v8110_v43   ;;  %980 = vperm.xlu0 %7188, %v8115_v44  }
  0xe4   : > { %995 = vperm.xlu1 %7189, %v8122_v45   ;;  %990 = vperm.xlu0 %7188, %v8127_v46  }
  0xe8   : > { %1005 = vperm.xlu1 %7189, %v8134_v47   ;;  %1000 = vperm.xlu0 %7188, %v8139_v48  }
  0xec   : > { %1015 = vperm.xlu1 %7189, %v8146_v49   ;;  %1010 = vperm.xlu0 %7188, %v8151_v50  }
  0xf0   : > { %1025 = vperm.xlu1 %7189, %v8158_v51   ;;  %1020 = vperm.xlu0 %7188, %v8163_v52  }
  0xf4   : > { %1035 = vperm.xlu1 %7189, %v8170_v53   ;;  %1030 = vperm.xlu0 %7188, %v8175_v54  }
  0xf8   : > { %1045 = vperm.xlu1 %7189, %v8182_v55   ;;  %1040 = vperm.xlu0 %7188, %v8187_v56  }
  0xfc   : > { %1055 = vperm.xlu1 %7189, %v8194_v57   ;;  %1050 = vperm.xlu0 %7188, %v8199_v58  }
 0x100   : > { %1065 = vperm.xlu1 %7189, %v8206_v59   ;;  %1060 = vperm.xlu0 %7188, %v8211_v60  }
 0x104   : > { %1075 = vperm.xlu1 %7189, %v8218_v61   ;;  %1070 = vperm.xlu0 %7188, %v8223_v62  }
 0x108   : > { %1085 = vperm.xlu1 %7189, %v8230_v63   ;;  %1080 = vperm.xlu0 %7188, %v8235_v0  }
 0x10b   : > { %v8249_v4 = vpop.permute.xlu1 %606  ;;  %v597_v5 = vpop.permute.xlu0 %596 }
 0x10c   : > { %14902 = vst [vmem:[#allocation26_spill] sm:$0xff] %v8249_v4  ;;  %v760_v6 = vmul.f32 %v8247_v3, %v597_v5  ;;  %7190 = vset.pattern.permute.xlu1 %v14757_v7  ;;  %2737 = vperm.xlu0 %7188, %v8242_v1  }
 0x10d   : > { %1161 = vperm.xlu1 %7190, %v8050_v33  }
 0x10e   : > { %v8266_v10 = vadd.f32 %v8257_v8, %v760_v6 }
 0x10f   : > { %v612_v11 = vpop.permute.xlu1 %611  ;;  %v602_v12 = vpop.permute.xlu0 %601 }
 0x110   : > { %14903 = vst [vmem:[#allocation27_spill] sm:$0xff] %v8266_v10  ;;  %v763_v13 = vmul.f32 %v8247_v3, %v612_v11  ;;  %v761_v14 = vmul.f32 %v8247_v3, %v602_v12  ;;  %2752 = vperm.xlu0 %7188, %v8263_v9   ;;  %v8320_v12 = vld [vmem:[%s14737_s11 + $0x60] sm:$0xff] }
 0x111   : > { %1165 = vperm.xlu1 %7190, %v8067_v36  }
 0x112   : > { %v8278_v16 = vadd.f32 %v8257_v8, %v763_v13  ;;  %v8281_v17 = vadd.f32 %v8257_v8, %v761_v14 }
 0x113   : > { %v622_v18 = vpop.permute.xlu1 %621  ;;  %v617_v19 = vpop.permute.xlu0 %616 }
 0x114   : > { %14904 = vst [vmem:[#allocation28_spill] sm:$0xff] %v8278_v16  ;;  %14905 = vst [vmem:[#allocation29_spill] sm:$0xff] %v8281_v17  ;;  %v765_v20 = vmul.f32 %v8247_v3, %v622_v18  ;;  %v764_v21 = vmul.f32 %v8247_v3, %v617_v19  ;;  %2762 = vperm.xlu0 %7188, %v8275_v15   ;;  %v8410_v16 = vld [vmem:[%s14737_s11 + $0xc0] sm:$0xff] }
 0x115   : > { %1173 = vperm.xlu1 %7190, %v8079_v38  }
 0x116   : > { %v8293_v23 = vadd.f32 %v8257_v8, %v765_v20  ;;  %v8296_v24 = vadd.f32 %v8257_v8, %v764_v21 }
 0x117   : > { %v632_v25 = vpop.permute.xlu1 %631  ;;  %v627_v26 = vpop.permute.xlu0 %626 }
 0x118   : > { %14906 = vst [vmem:[#allocation30_spill] sm:$0xff] %v8293_v23  ;;  %14907 = vst [vmem:[#allocation31_spill] sm:$0xff] %v8296_v24  ;;  %v767_v27 = vmul.f32 %v8247_v3, %v632_v25  ;;  %v766_v28 = vmul.f32 %v8247_v3, %v627_v26  ;;  %2772 = vperm.xlu0 %7188, %v8290_v22   ;;  %v8335_v25 = vld [vmem:[%s14737_s11 + $0x70] sm:$0xff] }
 0x119   : > { %1181 = vperm.xlu1 %7190, %v8091_v40  }
 0x11a   : > { %v8308_v30 = vadd.f32 %v8257_v8, %v767_v27  ;;  %v8311_v31 = vadd.f32 %v8257_v8, %v766_v28 }
 0x11b   : > { %v642_v32 = vpop.permute.xlu1 %641  ;;  %v637_v5 = vpop.permute.xlu0 %636 }
 0x11c   : > { %14908 = vst [vmem:[#allocation32_spill] sm:$0xff] %v8308_v30  ;;  %14909 = vst [vmem:[#allocation33_spill] sm:$0xff] %v8311_v31  ;;  %v769_v6 = vmul.f32 %v8247_v3, %v642_v32  ;;  %v768_v11 = vmul.f32 %v8247_v3, %v637_v5  ;;  %2782 = vperm.xlu0 %7188, %v8305_v29   ;;  %v8395_v30 = vld [vmem:[%s14737_s11 + $0xb0] sm:$0xff]  ;;  %v14936_v31 = vmov 1  }
 0x11d   : > { %1189 = vperm.xlu1 %7190, %v8103_v42  }
 0x11e   : > { %v8323_v13 = vadd.f32 %v8257_v8, %v769_v6  ;;  %v8326_v14 = vadd.f32 %v8257_v8, %v768_v11  ;;  %v8350_v11 = vld [vmem:[%s14737_s11 + $0x80] sm:$0xff] }
 0x11f   : > { %v652_v18 = vpop.permute.xlu1 %651  ;;  %v647_v19 = vpop.permute.xlu0 %646 }
 0x120   : > { %14910 = vst [vmem:[#allocation34_spill] sm:$0xff] %v8323_v13  ;;  %14911 = vst [vmem:[#allocation35_spill] sm:$0xff] %v8326_v14  ;;  %v771_v20 = vmul.f32 %v8247_v3, %v652_v18  ;;  %v770_v21 = vmul.f32 %v8247_v3, %v647_v19  ;;  %2792 = vperm.xlu0 %7188, %v8320_v12  }
 0x121   : > { %1197 = vperm.xlu1 %7190, %v8115_v44  }
 0x122   : > { %v8338_v26 = vadd.f32 %v8257_v8, %v771_v20  ;;  %v8341_v27 = vadd.f32 %v8257_v8, %v770_v21 }
 0x123   : > { %v662_v28 = vpop.permute.xlu1 %661  ;;  %v657_v32 = vpop.permute.xlu0 %656 }
 0x124   : > { %14912 = vst [vmem:[#allocation36_spill] sm:$0xff] %v8338_v26  ;;  %14913 = vst [vmem:[#allocation37_spill] sm:$0xff] %v8341_v27  ;;  %v773_v5 = vmul.f32 %v8247_v3, %v662_v28  ;;  %v772_v6 = vmul.f32 %v8247_v3, %v657_v32  ;;  %2802 = vperm.xlu0 %7188, %v8335_v25   ;;  %v8380_v26 = vld [vmem:[%s14737_s11 + $0xa0] sm:$0xff] }
 0x125   : > { %1205 = vperm.xlu1 %7190, %v8127_v46  }
 0x126   : > { %v8353_v18 = vadd.f32 %v8257_v8, %v773_v5  ;;  %v8356_v19 = vadd.f32 %v8257_v8, %v772_v6 }
 0x127   : > { %v672_v20 = vpop.permute.xlu1 %671  ;;  %v667_v21 = vpop.permute.xlu0 %666 }
 0x128   : > { %14914 = vst [vmem:[#allocation38_spill] sm:$0xff] %v8353_v18  ;;  %14915 = vst [vmem:[#allocation39_spill] sm:$0xff] %v8356_v19  ;;  %v775_v28 = vmul.f32 %v8247_v3, %v672_v20  ;;  %v774_v32 = vmul.f32 %v8247_v3, %v667_v21  ;;  %2812 = vperm.xlu0 %7188, %v8350_v11  }
 0x129   : > { %1213 = vperm.xlu1 %7190, %v8139_v48  }
 0x12a   : > { %v8368_v5 = vadd.f32 %v8257_v8, %v775_v28  ;;  %v8371_v6 = vadd.f32 %v8257_v8, %v774_v32 }
 0x12b   : > { %v682_v7 = vpop.permute.xlu1 %681  ;;  %v677_v18 = vpop.permute.xlu0 %676 }
 0x12c   : > { %14916 = vst [vmem:[#allocation40_spill] sm:$0xff] %v8368_v5  ;;  %14917 = vst [vmem:[#allocation41_spill] sm:$0xff] %v8371_v6  ;;  %v777_v20 = vmul.f32 %v8247_v3, %v682_v7  ;;  %v776_v21 = vmul.f32 %v8247_v3, %v677_v18  ;;  %2822 = vperm.xlu0 %7188, %v8365_v2   ;;  %v8440_v6 = vld [vmem:[%s14737_s11 + $0xe0] sm:$0xff] }
 0x12d   : > { %1221 = vperm.xlu1 %7190, %v8151_v50  }
 0x12e   : > { %v8383_v28 = vadd.f32 %v8257_v8, %v777_v20  ;;  %v8386_v32 = vadd.f32 %v8257_v8, %v776_v21 }
 0x12f   : > { %v692_v5 = vpop.permute.xlu1 %691  ;;  %v687_v13 = vpop.permute.xlu0 %686 }
 0x130   : > { %14918 = vst [vmem:[#allocation42_spill] sm:$0xff] %v8383_v28  ;;  %14919 = vst [vmem:[#allocation43_spill] sm:$0xff] %v8386_v32  ;;  %v779_v7 = vmul.f32 %v8247_v3, %v692_v5  ;;  %v778_v18 = vmul.f32 %v8247_v3, %v687_v13  ;;  %2832 = vperm.xlu0 %7188, %v8380_v26   ;;  %v1088_v32 = vlaneseq }
 0x131   : > { %1229 = vperm.xlu1 %7190, %v8163_v52  }
 0x132   : > { %v8398_v20 = vadd.f32 %v8257_v8, %v779_v7  ;;  %v8401_v21 = vadd.f32 %v8257_v8, %v778_v18  ;;  %v8451_v19 = vshrl.u32 %v1088_v32, 7 }
 0x133   : > { %v702_v28 = vpop.permute.xlu1 %701  ;;  %v697_v23 = vpop.permute.xlu0 %696 }
 0x134   : > { %14920 = vst [vmem:[#allocation44_spill] sm:$0xff] %v8398_v20  ;;  %14921 = vst [vmem:[#allocation45_spill] sm:$0xff] %v8401_v21  ;;  %v781_v5 = vmul.f32 %v8247_v3, %v702_v28  ;;  %v780_v13 = vmul.f32 %v8247_v3, %v697_v23  ;;  %2842 = vperm.xlu0 %7188, %v8395_v30   ;;  %v8425_v21 = vld [vmem:[%s14737_s11 + $0xd0] sm:$0xff]  ;;  %v8469_v27 = vsub.s32 0, %v8451_v19 }
 0x135   : > { %1237 = vperm.xlu1 %7190, %v8175_v54   ;;  %14928 = vst [vmem:[#allocation52_spill] sm:$0xff] %v8451_v19 }
 0x136   : > { %v8413_v7 = vadd.f32 %v8257_v8, %v781_v5  ;;  %v8416_v18 = vadd.f32 %v8257_v8, %v780_v13  ;;  %14931 = vst [vmem:[#allocation55_spill] sm:$0xff] %v8469_v27 }
 0x137   : > { %v712_v20 = vpop.permute.xlu1 %711  ;;  %v707_v10 = vpop.permute.xlu0 %706 }
 0x138   : > { %14922 = vst [vmem:[#allocation46_spill] sm:$0xff] %v8413_v7  ;;  %14923 = vst [vmem:[#allocation47_spill] sm:$0xff] %v8416_v18  ;;  %v783_v28 = vmul.f32 %v8247_v3, %v712_v20  ;;  %v782_v23 = vmul.f32 %v8247_v3, %v707_v10  ;;  %2852 = vperm.xlu0 %7188, %v8410_v16  }
 0x139   : > { %1245 = vperm.xlu1 %7190, %v8187_v56  }
 0x13a   : > { %v8428_v5 = vadd.f32 %v8257_v8, %v783_v28  ;;  %v8431_v13 = vadd.f32 %v8257_v8, %v782_v23 }
 0x13b   : > { %v722_v7 = vpop.permute.xlu1 %721  ;;  %v717_v18 = vpop.permute.xlu0 %716 }
 0x13c   : > { %14924 = vst [vmem:[#allocation48_spill] sm:$0xff] %v8428_v5  ;;  %14925 = vst [vmem:[#allocation49_spill] sm:$0xff] %v8431_v13  ;;  %v785_v20 = vmul.f32 %v8247_v3, %v722_v7  ;;  %v784_v10 = vmul.f32 %v8247_v3, %v717_v18  ;;  %2862 = vperm.xlu0 %7188, %v8425_v21  }
 0x13d   : > { %1253 = vperm.xlu1 %7190, %v8199_v58  }
 0x13e   : > { %v8443_v28 = vadd.f32 %v8257_v8, %v785_v20  ;;  %v8446_v23 = vadd.f32 %v8257_v8, %v784_v10  ;;  %v8457_v20 = vld [vmem:[%s14737_s11 + $0xf0] sm:$0xff] }
 0x13f   : > { %v732_v5 = vpop.permute.xlu1 %731  ;;  %v727_v7 = vpop.permute.xlu0 %726 }
 0x140   : > { %14926 = vst [vmem:[#allocation50_spill] sm:$0xff] %v8443_v28  ;;  %14927 = vst [vmem:[#allocation51_spill] sm:$0xff] %v8446_v23  ;;  %v787_v18 = vmul.f32 %v8247_v3, %v732_v5  ;;  %v786_v13 = vmul.f32 %v8247_v3, %v727_v7  ;;  %2872 = vperm.xlu0 %7188, %v8440_v6  }
 0x141   : > { %1261 = vperm.xlu1 %7190, %v8211_v60  }
 0x142   : > { %v8460_v10 = vadd.f32 %v8257_v8, %v787_v18  ;;  %v8463_v28 = vadd.f32 %v8257_v8, %v786_v13  ;;  %v920_v18 = vld [vmem:[%s14932_s28] sm:$0xff] }
 0x143   : > { %v742_v5 = vpop.permute.xlu1 %741  ;;  %v737_v23 = vpop.permute.xlu0 %736  ;;  %v8485_v24 = vrot.slane %v920_v18, %v8469_v27 }
 0x144   : > { %14929 = vst [vmem:[#allocation53_spill] sm:$0xff] %v8460_v10  ;;  %14930 = vst [vmem:[#allocation54_spill] sm:$0xff] %v8463_v28  ;;  %v789_v7 = vmul.f32 %v8247_v3, %v742_v5  ;;  %v788_v32 = vmul.f32 %v8247_v3, %v737_v23  ;;  %2882 = vperm.xlu0 %7188, %v8457_v20  }
 0x145   : > { %1269 = vperm.xlu1 %7190, %v8223_v62   ;;  %14937 = vst [vmem:[#allocation58_spill] sm:$0xff] %v8485_v24 }
 0x146   : > { %v8476_v13 = vadd.f32 %v8257_v8, %v789_v7  ;;  %v8479_v10 = vadd.f32 %v8257_v8, %v788_v32 }
 0x147   : > { %v752_v5 = vpop.permute.xlu1 %751  ;;  %v747_v28 = vpop.permute.xlu0 %746 }
 0x148   : > { %14934 = vst [vmem:[#allocation56_spill] sm:$0xff] %v8476_v13  ;;  %14935 = vst [vmem:[#allocation57_spill] sm:$0xff] %v8479_v10  ;;  %v791_v23 = vmul.f32 %v8247_v3, %v752_v5  ;;  %v790_v14 = vmul.f32 %v8247_v3, %v747_v28  ;;  %7198 = vset.pattern.permute.xlu0 %v14936_v31  ;;  %v8498_v5 = vld [vmem:[%s14940_s0] ss:$0 sm:$0xff]  ;;  %v14761_v13 = vmov 2  }
 0x149   : > { %1277 = vperm.xlu1 %7190, %v8235_v0   ;;  %1157 = vperm.xlu0 %7198, %v8055_v34  }
 0x14a   : > { %v8490_v7 = vadd.f32 %v8257_v8, %v791_v23  ;;  %v8493_v32 = vadd.f32 %v8257_v8, %v790_v14 }
 0x14b   : > { %v936_v3 = vpop.permute.xlu1 %935  ;;  %v931_v28 = vpop.permute.xlu0 %930 }
 0x14c   : > { %14938 = vst [vmem:[#allocation59_spill] sm:$0xff] %v8490_v7  ;;  %14939 = vst [vmem:[#allocation60_spill] sm:$0xff] %v8493_v32  ;;  %v1093_v18 = vmul.f32 %v8485_v24, %v936_v3  ;;  %v1092_v27 = vmul.f32 %v8485_v24, %v931_v28 }
 0x14d   : > { %7191 = vset.pattern.permute.xlu1 %v14761_v13  ;;  %1169 = vperm.xlu0 %7198, %v8062_v35  }
 0x14e   : > { %v8505_v23 = vadd.f32 %v8498_v5, %v1093_v18  ;;  %v8508_v8 = vadd.f32 %v8498_v5, %v1092_v27  ;;  %1353 = vperm.xlu1 %7191, %v8055_v34  }
 0x14f   : > { %v946_v14 = vpop.permute.xlu1 %945  ;;  %v8511_v7 = vpop.permute.xlu0 %940 }
 0x150   : > { %14941 = vst [vmem:[#allocation61_spill] sm:$0xff] %v8505_v23  ;;  %14942 = vst [vmem:[#allocation62_spill] sm:$0xff] %v8508_v8  ;;  %v1095_v3 = vmul.f32 %v8485_v24, %v946_v14 }
 0x151   : > { %14943 = vst [vmem:[#allocation63_spill] sm:$0xff] %v8511_v7  ;;  %1177 = vperm.xlu0 %7198, %v8074_v37  }
 0x152   : > { %v8516_v28 = vadd.f32 %v8498_v5, %v1095_v3  ;;  %1361 = vperm.xlu1 %7191, %v8067_v36  }
 0x153   : > { %v956_v13 = vpop.permute.xlu1 %955  ;;  %v951_v18 = vpop.permute.xlu0 %950 }
 0x154   : > { %14944 = vst [vmem:[#allocation64_spill] sm:$0xff] %v8516_v28  ;;  %v1097_v32 = vmul.f32 %v8485_v24, %v956_v13  ;;  %v1096_v27 = vmul.f32 %v8485_v24, %v951_v18 }
 0x155   : > { %1185 = vperm.xlu0 %7198, %v8086_v39  }
 0x156   : > { %v8523_v8 = vadd.f32 %v8498_v5, %v1097_v32  ;;  %v8526_v14 = vadd.f32 %v8498_v5, %v1096_v27  ;;  %1365 = vperm.xlu1 %7191, %v8062_v35  }
 0x157   : > { %v966_v3 = vpop.permute.xlu1 %965  ;;  %v961_v28 = vpop.permute.xlu0 %960 }
 0x158   : > { %14945 = vst [vmem:[#allocation65_spill] sm:$0xff] %v8523_v8  ;;  %14946 = vst [vmem:[#allocation66_spill] sm:$0xff] %v8526_v14  ;;  %v1099_v10 = vmul.f32 %v8485_v24, %v966_v3  ;;  %v1098_v23 = vmul.f32 %v8485_v24, %v961_v28 }
 0x159   : > { %1193 = vperm.xlu0 %7198, %v8098_v41  }
 0x15a   : > { %v8533_v13 = vadd.f32 %v8498_v5, %v1099_v10  ;;  %v8536_v18 = vadd.f32 %v8498_v5, %v1098_v23  ;;  %1373 = vperm.xlu1 %7191, %v8074_v37  }
 0x15b   : > { %v976_v32 = vpop.permute.xlu1 %975  ;;  %v971_v27 = vpop.permute.xlu0 %970 }
 0x15c   : > { %14947 = vst [vmem:[#allocation67_spill] sm:$0xff] %v8533_v13  ;;  %14948 = vst [vmem:[#allocation68_spill] sm:$0xff] %v8536_v18  ;;  %v1101_v8 = vmul.f32 %v8485_v24, %v976_v32  ;;  %v1100_v14 = vmul.f32 %v8485_v24, %v971_v27 }
 0x15d   : > { %1201 = vperm.xlu0 %7198, %v8110_v43  }
 0x15e   : > { %v8543_v28 = vadd.f32 %v8498_v5, %v1101_v8  ;;  %v8546_v3 = vadd.f32 %v8498_v5, %v1100_v14  ;;  %1381 = vperm.xlu1 %7191, %v8086_v39  }
 0x15f   : > { %v986_v10 = vpop.permute.xlu1 %985  ;;  %v981_v23 = vpop.permute.xlu0 %980 }
 0x160   : > { %14949 = vst [vmem:[#allocation69_spill] sm:$0xff] %v8543_v28  ;;  %14950 = vst [vmem:[#allocation70_spill] sm:$0xff] %v8546_v3  ;;  %v1103_v13 = vmul.f32 %v8485_v24, %v986_v10  ;;  %v1102_v18 = vmul.f32 %v8485_v24, %v981_v23 }
 0x161   : > { %1209 = vperm.xlu0 %7198, %v8122_v45  }
 0x162   : > { %v8553_v32 = vadd.f32 %v8498_v5, %v1103_v13  ;;  %v8556_v27 = vadd.f32 %v8498_v5, %v1102_v18  ;;  %1389 = vperm.xlu1 %7191, %v8098_v41  }
 0x163   : > { %v996_v8 = vpop.permute.xlu1 %995  ;;  %v991_v14 = vpop.permute.xlu0 %990 }
 0x164   : > { %14951 = vst [vmem:[#allocation71_spill] sm:$0xff] %v8553_v32  ;;  %14952 = vst [vmem:[#allocation72_spill] sm:$0xff] %v8556_v27  ;;  %v1105_v28 = vmul.f32 %v8485_v24, %v996_v8  ;;  %v1104_v3 = vmul.f32 %v8485_v24, %v991_v14 }
 0x165   : > { %1217 = vperm.xlu0 %7198, %v8134_v47  }
 0x166   : > { %v8563_v10 = vadd.f32 %v8498_v5, %v1105_v28  ;;  %v8566_v23 = vadd.f32 %v8498_v5, %v1104_v3  ;;  %1397 = vperm.xlu1 %7191, %v8110_v43  }
 0x167   : > { %v1006_v13 = vpop.permute.xlu1 %1005  ;;  %v1001_v18 = vpop.permute.xlu0 %1000 }
 0x168   : > { %14953 = vst [vmem:[#allocation73_spill] sm:$0xff] %v8563_v10  ;;  %14954 = vst [vmem:[#allocation74_spill] sm:$0xff] %v8566_v23  ;;  %v1107_v32 = vmul.f32 %v8485_v24, %v1006_v13  ;;  %v1106_v27 = vmul.f32 %v8485_v24, %v1001_v18 }
 0x169   : > { %1225 = vperm.xlu0 %7198, %v8146_v49  }
 0x16a   : > { %v8573_v8 = vadd.f32 %v8498_v5, %v1107_v32  ;;  %v8576_v14 = vadd.f32 %v8498_v5, %v1106_v27  ;;  %1405 = vperm.xlu1 %7191, %v8122_v45  }
 0x16b   : > { %v1016_v28 = vpop.permute.xlu1 %1015  ;;  %v1011_v3 = vpop.permute.xlu0 %1010 }
 0x16c   : > { %14955 = vst [vmem:[#allocation75_spill] sm:$0xff] %v8573_v8  ;;  %14956 = vst [vmem:[#allocation76_spill] sm:$0xff] %v8576_v14  ;;  %v1109_v10 = vmul.f32 %v8485_v24, %v1016_v28  ;;  %v1108_v23 = vmul.f32 %v8485_v24, %v1011_v3 }
 0x16d   : > { %1233 = vperm.xlu0 %7198, %v8158_v51  }
 0x16e   : > { %v8583_v13 = vadd.f32 %v8498_v5, %v1109_v10  ;;  %v8586_v18 = vadd.f32 %v8498_v5, %v1108_v23  ;;  %1413 = vperm.xlu1 %7191, %v8134_v47  }
 0x16f   : > { %v1026_v32 = vpop.permute.xlu1 %1025  ;;  %v1021_v27 = vpop.permute.xlu0 %1020 }
 0x170   : > { %14957 = vst [vmem:[#allocation77_spill] sm:$0xff] %v8583_v13  ;;  %14958 = vst [vmem:[#allocation78_spill] sm:$0xff] %v8586_v18  ;;  %v1111_v8 = vmul.f32 %v8485_v24, %v1026_v32  ;;  %v1110_v14 = vmul.f32 %v8485_v24, %v1021_v27 }
 0x171   : > { %1241 = vperm.xlu0 %7198, %v8170_v53  }
 0x172   : > { %v8593_v28 = vadd.f32 %v8498_v5, %v1111_v8  ;;  %v8596_v3 = vadd.f32 %v8498_v5, %v1110_v14  ;;  %1421 = vperm.xlu1 %7191, %v8146_v49  }
 0x173   : > { %v1036_v10 = vpop.permute.xlu1 %1035  ;;  %v1031_v23 = vpop.permute.xlu0 %1030 }
 0x174   : > { %14959 = vst [vmem:[#allocation79_spill] sm:$0xff] %v8593_v28  ;;  %14960 = vst [vmem:[#allocation80_spill] sm:$0xff] %v8596_v3  ;;  %v1113_v13 = vmul.f32 %v8485_v24, %v1036_v10  ;;  %v1112_v18 = vmul.f32 %v8485_v24, %v1031_v23 }
 0x175   : > { %1249 = vperm.xlu0 %7198, %v8182_v55  }
 0x176   : > { %v8603_v32 = vadd.f32 %v8498_v5, %v1113_v13  ;;  %v8606_v27 = vadd.f32 %v8498_v5, %v1112_v18  ;;  %1429 = vperm.xlu1 %7191, %v8158_v51  }
 0x177   : > { %v1046_v8 = vpop.permute.xlu1 %1045  ;;  %v1041_v14 = vpop.permute.xlu0 %1040 }
 0x178   : > { %14961 = vst [vmem:[#allocation81_spill] sm:$0xff] %v8603_v32  ;;  %14962 = vst [vmem:[#allocation82_spill] sm:$0xff] %v8606_v27  ;;  %v1115_v28 = vmul.f32 %v8485_v24, %v1046_v8  ;;  %v1114_v3 = vmul.f32 %v8485_v24, %v1041_v14 }
 0x179   : > { %1257 = vperm.xlu0 %7198, %v8194_v57  }
 0x17a   : > { %v8613_v10 = vadd.f32 %v8498_v5, %v1115_v28  ;;  %v8616_v23 = vadd.f32 %v8498_v5, %v1114_v3  ;;  %1437 = vperm.xlu1 %7191, %v8170_v53  }
 0x17b   : > { %v1056_v13 = vpop.permute.xlu1 %1055  ;;  %v1051_v18 = vpop.permute.xlu0 %1050 }
 0x17c   : > { %14963 = vst [vmem:[#allocation83_spill] sm:$0xff] %v8613_v10  ;;  %14964 = vst [vmem:[#allocation84_spill] sm:$0xff] %v8616_v23  ;;  %v1117_v32 = vmul.f32 %v8485_v24, %v1056_v13  ;;  %v1116_v27 = vmul.f32 %v8485_v24, %v1051_v18 }
 0x17d   : > { %1265 = vperm.xlu0 %7198, %v8206_v59  }
 0x17e   : > { %v8623_v8 = vadd.f32 %v8498_v5, %v1117_v32  ;;  %v8626_v14 = vadd.f32 %v8498_v5, %v1116_v27  ;;  %1445 = vperm.xlu1 %7191, %v8182_v55  }
 0x17f   : > { %v1066_v28 = vpop.permute.xlu1 %1065  ;;  %v1061_v3 = vpop.permute.xlu0 %1060 }
 0x180   : > { %14965 = vst [vmem:[#allocation85_spill] sm:$0xff] %v8623_v8  ;;  %14966 = vst [vmem:[#allocation86_spill] sm:$0xff] %v8626_v14  ;;  %v1119_v10 = vmul.f32 %v8485_v24, %v1066_v28  ;;  %v1118_v23 = vmul.f32 %v8485_v24, %v1061_v3 }
 0x181   : > { %1273 = vperm.xlu0 %7198, %v8218_v61  }
 0x182   : > { %v8633_v13 = vadd.f32 %v8498_v5, %v1119_v10  ;;  %v8636_v18 = vadd.f32 %v8498_v5, %v1118_v23  ;;  %1453 = vperm.xlu1 %7191, %v8194_v57   ;;  %v8652_v10 = vld [vmem:[%s14737_s11] sm:$0xff] }
 0x183   : > { %v1076_v32 = vpop.permute.xlu1 %1075  ;;  %v1071_v27 = vpop.permute.xlu0 %1070 }
 0x184   : > { %14967 = vst [vmem:[#allocation87_spill] sm:$0xff] %v8633_v13  ;;  %14968 = vst [vmem:[#allocation88_spill] sm:$0xff] %v8636_v18  ;;  %v1121_v8 = vmul.f32 %v8485_v24, %v1076_v32  ;;  %v1120_v14 = vmul.f32 %v8485_v24, %v1071_v27 }
 0x185   : > { %1281 = vperm.xlu0 %7198, %v8230_v63  }
 0x186   : > { %v8643_v28 = vadd.f32 %v8498_v5, %v1121_v8  ;;  %v8646_v3 = vadd.f32 %v8498_v5, %v1120_v14  ;;  %1461 = vperm.xlu1 %7191, %v8206_v59  }
 0x187   : > { %v1086_v23 = vpop.permute.xlu1 %1085  ;;  %v1081_v13 = vpop.permute.xlu0 %1080 }
 0x188   : > { %14969 = vst [vmem:[#allocation89_spill] sm:$0xff] %v8643_v28  ;;  %14970 = vst [vmem:[#allocation90_spill] sm:$0xff] %v8646_v3  ;;  %v1123_v32 = vmul.f32 %v8485_v24, %v1086_v23  ;;  %v1122_v27 = vmul.f32 %v8485_v24, %v1081_v13  ;;  %v8667_v28 = vld [vmem:[%s14737_s11 + $0x18] sm:$0xff] }
 0x189   : > { %2959 = vperm.xlu0 %7198, %v8652_v10  }
 0x18a   : > { %v8658_v8 = vadd.f32 %v8498_v5, %v1123_v32  ;;  %v8661_v14 = vadd.f32 %v8498_v5, %v1122_v27  ;;  %1469 = vperm.xlu1 %7191, %v8218_v61   ;;  %v8678_v5 = vld [vmem:[%s14737_s11 + $0x28] sm:$0xff]  ;;  %v14763_v27 = vmov 3  }
 0x18b   : > { %v8669_v3 = vpop.permute.xlu0 %2737 }
 0x18c   : > { %14971 = vst [vmem:[#allocation91_spill] sm:$0xff] %v8658_v8  ;;  %14972 = vst [vmem:[#allocation92_spill] sm:$0xff] %v8661_v14  ;;  %v8671_v23 = vpop.permute.xlu1 %1161 }
 0x18d   : > { %14973 = vst [vmem:[#allocation93_spill] sm:$0xff] %v8669_v3  ;;  %14974 = vst [vmem:[#allocation94_spill] sm:$0xff] %v8671_v23  ;;  %2971 = vperm.xlu0 %7198, %v8667_v28   ;;  %v8689_v3 = vld [vmem:[%s14737_s11 + $0x38] sm:$0xff] }
 0x18e   : > { %1477 = vperm.xlu1 %7191, %v8230_v63  }
 0x18f   : > { %v8680_v13 = vpop.permute.xlu0 %2752 }
 0x190   : > { %14975 = vst [vmem:[#allocation95_spill] sm:$0xff] %v8680_v13  ;;  %v8682_v32 = vpop.permute.xlu1 %1165  ;;  %v8700_v13 = vld [vmem:[%s14737_s11 + $0x48] sm:$0xff] }
 0x191   : > { %14976 = vst [vmem:[#allocation96_spill] sm:$0xff] %v8682_v32  ;;  %2979 = vperm.xlu0 %7198, %v8678_v5  }
 0x192   : > { %7192 = vset.pattern.permute.xlu1 %v14763_v27 }
 0x193   : > { %1553 = vperm.xlu1 %7192, %v8050_v33   ;;  %v8692_v8 = vpop.permute.xlu0 %2762 }
 0x194   : > { %14977 = vst [vmem:[#allocation97_spill] sm:$0xff] %v8692_v8  ;;  %v8694_v14 = vpop.permute.xlu1 %1173  ;;  %v8711_v8 = vld [vmem:[%s14737_s11 + $0x58] sm:$0xff] }
 0x195   : > { %14978 = vst [vmem:[#allocation98_spill] sm:$0xff] %v8694_v14  ;;  %2987 = vperm.xlu0 %7198, %v8689_v3  }
 0x197   : > { %1557 = vperm.xlu1 %7192, %v8067_v36   ;;  %v8703_v27 = vpop.permute.xlu0 %2772 }
 0x198   : > { %14979 = vst [vmem:[#allocation99_spill] sm:$0xff] %v8703_v27  ;;  %v8705_v18 = vpop.permute.xlu1 %1181  ;;  %v8722_v27 = vld [vmem:[%s14737_s11 + $0x68] sm:$0xff] }
 0x199   : > { %14980 = vst [vmem:[#allocation100_spill] sm:$0xff] %v8705_v18  ;;  %2995 = vperm.xlu0 %7198, %v8700_v13  }
 0x19b   : > { %1565 = vperm.xlu1 %7192, %v8079_v38   ;;  %v8714_v14 = vpop.permute.xlu0 %2782 }
 0x19c   : > { %14981 = vst [vmem:[#allocation101_spill] sm:$0xff] %v8714_v14  ;;  %v8716_v17 = vpop.permute.xlu1 %1189  ;;  %v8733_v14 = vld [vmem:[%s14737_s11 + $0x78] sm:$0xff] }
 0x19d   : > { %14982 = vst [vmem:[#allocation102_spill] sm:$0xff] %v8716_v17  ;;  %3003 = vperm.xlu0 %7198, %v8711_v8  }
 0x19f   : > { %1573 = vperm.xlu1 %7192, %v8091_v40   ;;  %v8725_v18 = vpop.permute.xlu0 %2792 }
 0x1a0   : > { %14983 = vst [vmem:[#allocation103_spill] sm:$0xff] %v8725_v18  ;;  %v8727_v23 = vpop.permute.xlu1 %1197  ;;  %v8744_v18 = vld [vmem:[%s14737_s11 + $0x88] sm:$0xff] }
 0x1a1   : > { %14984 = vst [vmem:[#allocation104_spill] sm:$0xff] %v8727_v23  ;;  %3011 = vperm.xlu0 %7198, %v8722_v27  }
 0x1a3   : > { %1581 = vperm.xlu1 %7192, %v8103_v42   ;;  %v8736_v17 = vpop.permute.xlu0 %2802 }
 0x1a4   : > { %14985 = vst [vmem:[#allocation105_spill] sm:$0xff] %v8736_v17  ;;  %v8738_v31 = vpop.permute.xlu1 %1205  ;;  %v8755_v17 = vld [vmem:[%s14737_s11 + $0x98] sm:$0xff] }
 0x1a5   : > { %14986 = vst [vmem:[#allocation106_spill] sm:$0xff] %v8738_v31  ;;  %3019 = vperm.xlu0 %7198, %v8733_v14   ;;  %14989 = vst [vmem:[#allocation109_spill] sm:$0xff] %v8755_v17 }
 0x1a7   : > { %1589 = vperm.xlu1 %7192, %v8115_v44   ;;  %v8747_v23 = vpop.permute.xlu0 %2812 }
 0x1a8   : > { %14987 = vst [vmem:[#allocation107_spill] sm:$0xff] %v8747_v23  ;;  %v8749_v4 = vpop.permute.xlu1 %1213  ;;  %v8766_v23 = vld [vmem:[%s14737_s11 + $0xa8] sm:$0xff] }
 0x1a9   : > { %14988 = vst [vmem:[#allocation108_spill] sm:$0xff] %v8749_v4  ;;  %3027 = vperm.xlu0 %7198, %v8744_v18   ;;  %14992 = vst [vmem:[#allocation112_spill] sm:$0xff] %v8766_v23 }
 0x1ab   : > { %1597 = vperm.xlu1 %7192, %v8127_v46   ;;  %v8758_v31 = vpop.permute.xlu0 %2822 }
 0x1ac   : > { %14990 = vst [vmem:[#allocation110_spill] sm:$0xff] %v8758_v31  ;;  %v8760_v32 = vpop.permute.xlu1 %1221  ;;  %v8777_v31 = vld [vmem:[%s14737_s11 + $0xb8] sm:$0xff] }
 0x1ad   : > { %14991 = vst [vmem:[#allocation111_spill] sm:$0xff] %v8760_v32  ;;  %3035 = vperm.xlu0 %7198, %v8755_v17   ;;  %14995 = vst [vmem:[#allocation115_spill] sm:$0xff] %v8777_v31 }
 0x1af   : > { %1605 = vperm.xlu1 %7192, %v8139_v48   ;;  %v8769_v4 = vpop.permute.xlu0 %2832 }
 0x1b0   : > { %14993 = vst [vmem:[#allocation113_spill] sm:$0xff] %v8769_v4  ;;  %v8771_v24 = vpop.permute.xlu1 %1229  ;;  %v8788_v4 = vld [vmem:[%s14737_s11 + $0xc8] sm:$0xff] }
 0x1b1   : > { %14994 = vst [vmem:[#allocation114_spill] sm:$0xff] %v8771_v24  ;;  %3043 = vperm.xlu0 %7198, %v8766_v23   ;;  %14998 = vst [vmem:[#allocation118_spill] sm:$0xff] %v8788_v4 }
 0x1b3   : > { %1613 = vperm.xlu1 %7192, %v8151_v50   ;;  %v8780_v32 = vpop.permute.xlu0 %2842 }
 0x1b4   : > { %14996 = vst [vmem:[#allocation116_spill] sm:$0xff] %v8780_v32  ;;  %v8782_v7 = vpop.permute.xlu1 %1237  ;;  %v8799_v32 = vld [vmem:[%s14737_s11 + $0xd8] sm:$0xff] }
 0x1b5   : > { %14997 = vst [vmem:[#allocation117_spill] sm:$0xff] %v8782_v7  ;;  %3051 = vperm.xlu0 %7198, %v8777_v31   ;;  %15001 = vst [vmem:[#allocation121_spill] sm:$0xff] %v8799_v32 }
 0x1b7   : > { %1621 = vperm.xlu1 %7192, %v8163_v52   ;;  %v8791_v24 = vpop.permute.xlu0 %2852 }
 0x1b8   : > { %14999 = vst [vmem:[#allocation119_spill] sm:$0xff] %v8791_v24  ;;  %v8793_v19 = vpop.permute.xlu1 %1245  ;;  %v8810_v24 = vld [vmem:[%s14737_s11 + $0xe8] sm:$0xff] }
 0x1b9   : > { %15000 = vst [vmem:[#allocation120_spill] sm:$0xff] %v8793_v19  ;;  %3059 = vperm.xlu0 %7198, %v8788_v4   ;;  %15004 = vst [vmem:[#allocation124_spill] sm:$0xff] %v8810_v24 }
 0x1bb   : > { %1629 = vperm.xlu1 %7192, %v8175_v54   ;;  %v8802_v7 = vpop.permute.xlu0 %2862 }
 0x1bc   : > { %15002 = vst [vmem:[#allocation122_spill] sm:$0xff] %v8802_v7  ;;  %v8804_v31 = vpop.permute.xlu1 %1253  ;;  %v8821_v7 = vld [vmem:[%s14737_s11 + $0xf8] sm:$0xff] }
 0x1bd   : > { %15003 = vst [vmem:[#allocation123_spill] sm:$0xff] %v8804_v31  ;;  %3067 = vperm.xlu0 %7198, %v8799_v32  }
 0x1bf   : > { %1637 = vperm.xlu1 %7192, %v8187_v56   ;;  %v8813_v19 = vpop.permute.xlu0 %2872 }
 0x1c0   : > { %15005 = vst [vmem:[#allocation125_spill] sm:$0xff] %v8813_v19  ;;  %v8815_v4 = vpop.permute.xlu1 %1261 }
 0x1c1   : > { %15006 = vst [vmem:[#allocation126_spill] sm:$0xff] %v8815_v4  ;;  %3075 = vperm.xlu0 %7198, %v8810_v24   ;;  %v15011_v24 = vmov 2  }
 0x1c3   : > { %1645 = vperm.xlu1 %7192, %v8199_v58   ;;  %v8824_v31 = vpop.permute.xlu0 %2882 }
 0x1c4   : > { %15007 = vst [vmem:[#allocation127_spill] sm:$0xff] %v8824_v31  ;;  %v8826_v32 = vpop.permute.xlu1 %1269 }
 0x1c5   : > { %15008 = vst [vmem:[#allocation128_spill] sm:$0xff] %v8826_v32  ;;  %3083 = vperm.xlu0 %7198, %v8821_v7  }
 0x1c7   : > { %1653 = vperm.xlu1 %7192, %v8211_v60  }
 0x1c8   : > { %v8830_v19 = vpop.permute.xlu1 %1277  ;;  %v8832_v4 = vpop.permute.xlu0 %1157 }
 0x1c9   : > { %15009 = vst [vmem:[#allocation129_spill] sm:$0xff] %v8830_v19  ;;  %15010 = vst [vmem:[#allocation130_spill] sm:$0xff] %v8832_v4  ;;  %7200 = vset.pattern.permute.xlu0 %v15011_v24  ;;  %v14780_v4 = vmov 4  }
 0x1ca   : > { %1357 = vperm.xlu0 %7200, %v8050_v33  }
 0x1cb   : > { %1661 = vperm.xlu1 %7192, %v8223_v62  }
 0x1cc   : > { %v8837_v23 = vpop.permute.xlu0 %1169 }
 0x1cd   : > { %15012 = vst [vmem:[#allocation131_spill] sm:$0xff] %v8837_v23  ;;  %v8839_v17 = vpop.permute.xlu1 %1353 }
 0x1ce   : > { %15013 = vst [vmem:[#allocation132_spill] sm:$0xff] %v8839_v17  ;;  %1369 = vperm.xlu0 %7200, %v8079_v38  }
 0x1cf   : > { %1669 = vperm.xlu1 %7192, %v8235_v0  }
 0x1d0   : > { %v8843_v31 = vpop.permute.xlu0 %1177 }
 0x1d1   : > { %15014 = vst [vmem:[#allocation133_spill] sm:$0xff] %v8843_v31  ;;  %v8845_v32 = vpop.permute.xlu1 %1361 }
 0x1d2   : > { %1377 = vperm.xlu0 %7200, %v8091_v40  }
 0x1d3   : > { %7193 = vset.pattern.permute.xlu1 %v14780_v4 }
 0x1d4   : > { %1745 = vperm.xlu1 %7193, %v8055_v34   ;;  %v8850_v19 = vpop.permute.xlu0 %1185 }
 0x1d5   : > { %15015 = vst [vmem:[#allocation134_spill] sm:$0xff] %v8850_v19  ;;  %v8852_v23 = vpop.permute.xlu1 %1365 }
 0x1d6   : > { %15016 = vst [vmem:[#allocation135_spill] sm:$0xff] %v8852_v23  ;;  %1385 = vperm.xlu0 %7200, %v8103_v42  }
 0x1d8   : > { %1753 = vperm.xlu1 %7193, %v8067_v36   ;;  %v8856_v17 = vpop.permute.xlu0 %1193 }
 0x1d9   : > { %15017 = vst [vmem:[#allocation136_spill] sm:$0xff] %v8856_v17  ;;  %v8858_v31 = vpop.permute.xlu1 %1373 }
 0x1da   : > { %15018 = vst [vmem:[#allocation137_spill] sm:$0xff] %v8858_v31  ;;  %1393 = vperm.xlu0 %7200, %v8115_v44  }
 0x1dc   : > { %1757 = vperm.xlu1 %7193, %v8062_v35   ;;  %v8862_v24 = vpop.permute.xlu0 %1201 }
 0x1dd   : > { %15019 = vst [vmem:[#allocation138_spill] sm:$0xff] %v8862_v24  ;;  %v8864_v4 = vpop.permute.xlu1 %1381 }
 0x1de   : > { %15020 = vst [vmem:[#allocation139_spill] sm:$0xff] %v8864_v4  ;;  %1401 = vperm.xlu0 %7200, %v8127_v46  }
 0x1e0   : > { %1765 = vperm.xlu1 %7193, %v8074_v37   ;;  %v8868_v34 = vpop.permute.xlu0 %1209 }
 0x1e1   : > { %15021 = vst [vmem:[#allocation140_spill] sm:$0xff] %v8868_v34  ;;  %v8870_v19 = vpop.permute.xlu1 %1389 }
 0x1e2   : > { %15022 = vst [vmem:[#allocation141_spill] sm:$0xff] %v8870_v19  ;;  %1409 = vperm.xlu0 %7200, %v8139_v48  }
 0x1e4   : > { %1773 = vperm.xlu1 %7193, %v8086_v39   ;;  %v8874_v31 = vpop.permute.xlu0 %1217 }
 0x1e5   : > { %15023 = vst [vmem:[#allocation142_spill] sm:$0xff] %v8874_v31  ;;  %v8876_v17 = vpop.permute.xlu1 %1397 }
 0x1e6   : > { %15024 = vst [vmem:[#allocation143_spill] sm:$0xff] %v8876_v17  ;;  %1417 = vperm.xlu0 %7200, %v8151_v50  }
 0x1e8   : > { %1781 = vperm.xlu1 %7193, %v8098_v41   ;;  %v8880_v35 = vpop.permute.xlu0 %1225 }
 0x1e9   : > { %15025 = vst [vmem:[#allocation144_spill] sm:$0xff] %v8880_v35  ;;  %v8882_v4 = vpop.permute.xlu1 %1405  ;;  %v9170_v35 = vld [vmem:[%s14734_s8 + $0xd8] sm:$0xff] }
 0x1ea   : > { %15026 = vst [vmem:[#allocation145_spill] sm:$0xff] %v8882_v4  ;;  %1425 = vperm.xlu0 %7200, %v8163_v52  }
 0x1ec   : > { %1789 = vperm.xlu1 %7193, %v8110_v43   ;;  %v8886_v37 = vpop.permute.xlu0 %1233 }
 0x1ed   : > { %15027 = vst [vmem:[#allocation146_spill] sm:$0xff] %v8886_v37  ;;  %v8888_v19 = vpop.permute.xlu1 %1413  ;;  %v9159_v37 = vld [vmem:[%s14734_s8 + $0xc8] sm:$0xff] }
 0x1ee   : > { %15028 = vst [vmem:[#allocation147_spill] sm:$0xff] %v8888_v19  ;;  %1433 = vperm.xlu0 %7200, %v8175_v54  }
 0x1f0   : > { %1797 = vperm.xlu1 %7193, %v8122_v45   ;;  %v8892_v39 = vpop.permute.xlu0 %1241 }
 0x1f1   : > { %15029 = vst [vmem:[#allocation148_spill] sm:$0xff] %v8892_v39  ;;  %v8894_v17 = vpop.permute.xlu1 %1421 }
 0x1f2   : > { %15030 = vst [vmem:[#allocation149_spill] sm:$0xff] %v8894_v17  ;;  %1441 = vperm.xlu0 %7200, %v8187_v56  }
 0x1f4   : > { %1805 = vperm.xlu1 %7193, %v8134_v47   ;;  %v8898_v41 = vpop.permute.xlu0 %1249 }
 0x1f5   : > { %15031 = vst [vmem:[#allocation150_spill] sm:$0xff] %v8898_v41  ;;  %v8900_v4 = vpop.permute.xlu1 %1429 }
 0x1f6   : > { %15032 = vst [vmem:[#allocation151_spill] sm:$0xff] %v8900_v4  ;;  %1449 = vperm.xlu0 %7200, %v8199_v58  }
 0x1f8   : > { %1813 = vperm.xlu1 %7193, %v8146_v49   ;;  %v8904_v43 = vpop.permute.xlu0 %1257 }
 0x1f9   : > { %15033 = vst [vmem:[#allocation152_spill] sm:$0xff] %v8904_v43  ;;  %v8906_v19 = vpop.permute.xlu1 %1437  ;;  %v9137_v43 = vld [vmem:[%s14734_s8 + $0xa8] sm:$0xff] }
 0x1fa   : > { %15034 = vst [vmem:[#allocation153_spill] sm:$0xff] %v8906_v19  ;;  %1457 = vperm.xlu0 %7200, %v8211_v60  }
 0x1fc   : > { %1821 = vperm.xlu1 %7193, %v8158_v51   ;;  %v8910_v45 = vpop.permute.xlu0 %1265 }
 0x1fd   : > { %15035 = vst [vmem:[#allocation154_spill] sm:$0xff] %v8910_v45  ;;  %v8912_v17 = vpop.permute.xlu1 %1445 }
 0x1fe   : > { %15036 = vst [vmem:[#allocation155_spill] sm:$0xff] %v8912_v17  ;;  %1465 = vperm.xlu0 %7200, %v8223_v62  }
 0x200   : > { %1829 = vperm.xlu1 %7193, %v8170_v53   ;;  %v8916_v47 = vpop.permute.xlu0 %1273 }
 0x201   : > { %15037 = vst [vmem:[#allocation156_spill] sm:$0xff] %v8916_v47  ;;  %v8918_v4 = vpop.permute.xlu1 %1453 }
 0x202   : > { %15038 = vst [vmem:[#allocation157_spill] sm:$0xff] %v8918_v4  ;;  %1473 = vperm.xlu0 %7200, %v8235_v0  }
 0x204   : > { %1837 = vperm.xlu1 %7193, %v8182_v55   ;;  %v8922_v49 = vpop.permute.xlu0 %1281 }
 0x205   : > { %15039 = vst [vmem:[#allocation158_spill] sm:$0xff] %v8922_v49  ;;  %v8924_v19 = vpop.permute.xlu1 %1461 }
 0x206   : > { %15040 = vst [vmem:[#allocation159_spill] sm:$0xff] %v8924_v19  ;;  %3159 = vperm.xlu0 %7200, %v8242_v1   ;;  %v9126_v19 = vld [vmem:[%s14734_s8 + $0x98] sm:$0xff] }
 0x208   : > { %1845 = vperm.xlu1 %7193, %v8194_v57   ;;  %v8928_v51 = vpop.permute.xlu0 %2959 }
 0x209   : > { %15041 = vst [vmem:[#allocation160_spill] sm:$0xff] %v8928_v51  ;;  %v8930_v17 = vpop.permute.xlu1 %1469 }
 0x20a   : > { %15042 = vst [vmem:[#allocation161_spill] sm:$0xff] %v8930_v17  ;;  %3171 = vperm.xlu0 %7200, %v8263_v9  }
 0x20c   : > { %1853 = vperm.xlu1 %7193, %v8206_v59   ;;  %v8934_v53 = vpop.permute.xlu0 %2971  ;;  %v14782_v59 = vmov 5  }
 0x20d   : > { %15043 = vst [vmem:[#allocation162_spill] sm:$0xff] %v8934_v53  ;;  %v8936_v47 = vpop.permute.xlu1 %1477 }
 0x20e   : > { %15044 = vst [vmem:[#allocation163_spill] sm:$0xff] %v8936_v47  ;;  %3179 = vperm.xlu0 %7200, %v8275_v15   ;;  %v9115_v47 = vld [vmem:[%s14734_s8 + $0x88] sm:$0xff] }
 0x210   : > { %1861 = vperm.xlu1 %7193, %v8218_v61   ;;  %v8940_v55 = vpop.permute.xlu0 %2979 }
 0x211   : > { %15045 = vst [vmem:[#allocation164_spill] sm:$0xff] %v8940_v55  ;;  %v9104_v55 = vld [vmem:[%s14734_s8 + $0x78] sm:$0xff] }
 0x212   : > { %v8942_v1 = vpop.permute.xlu1 %1553  ;;  %3187 = vperm.xlu0 %7200, %v8290_v22  }
 0x213   : > { %15046 = vst [vmem:[#allocation165_spill] sm:$0xff] %v8942_v1 }
 0x214   : > { %1869 = vperm.xlu1 %7193, %v8230_v63   ;;  %v8946_v57 = vpop.permute.xlu0 %2987 }
 0x215   : > { %15047 = vst [vmem:[#allocation166_spill] sm:$0xff] %v8946_v57  ;;  %v9096_v57 = vld [vmem:[%s14734_s8 + $0x10] sm:$0xff] }
 0x216   : > { %v8948_v9 = vpop.permute.xlu1 %1557  ;;  %3195 = vperm.xlu0 %7200, %v8305_v29  }
 0x218   : > { %7194 = vset.pattern.permute.xlu1 %v14782_v59  ;;  %v8952_v15 = vpop.permute.xlu0 %2995 }
 0x219   : > { %15048 = vst [vmem:[#allocation167_spill] sm:$0xff] %v8952_v15  ;;  %1945 = vperm.xlu1 %7194, %v8050_v33  }
 0x21a   : > { %v8955_v61 = vpop.permute.xlu1 %1565  ;;  %3203 = vperm.xlu0 %7200, %v8320_v12  }
 0x21b   : > { %15049 = vst [vmem:[#allocation168_spill] sm:$0xff] %v8955_v61 }
 0x21c   : > { %v8958_v22 = vpop.permute.xlu0 %3003 }
 0x21d   : > { %15050 = vst [vmem:[#allocation169_spill] sm:$0xff] %v8958_v22  ;;  %1949 = vperm.xlu1 %7194, %v8067_v36  }
 0x21e   : > { %v8961_v63 = vpop.permute.xlu1 %1573  ;;  %3211 = vperm.xlu0 %7200, %v8335_v25  }
 0x21f   : > { %15051 = vst [vmem:[#allocation170_spill] sm:$0xff] %v8961_v63 }
 0x220   : > { %v8964_v29 = vpop.permute.xlu0 %3011 }
 0x221   : > { %15052 = vst [vmem:[#allocation171_spill] sm:$0xff] %v8964_v29  ;;  %1957 = vperm.xlu1 %7194, %v8079_v38  }
 0x222   : > { %v8967_v59 = vpop.permute.xlu1 %1581  ;;  %3219 = vperm.xlu0 %7200, %v8350_v11  }
 0x223   : > { %15053 = vst [vmem:[#allocation172_spill] sm:$0xff] %v8967_v59 }
 0x224   : > { %v8970_v33 = vpop.permute.xlu0 %3019 }
 0x225   : > { %15054 = vst [vmem:[#allocation173_spill] sm:$0xff] %v8970_v33  ;;  %1965 = vperm.xlu1 %7194, %v8091_v40   ;;  %v14784_v33 = vmov 6  }
 0x226   : > { %v8973_v12 = vpop.permute.xlu1 %1589  ;;  %3227 = vperm.xlu0 %7200, %v8365_v2  }
 0x227   : > { %15055 = vst [vmem:[#allocation174_spill] sm:$0xff] %v8973_v12 }
 0x228   : > { %v8976_v36 = vpop.permute.xlu0 %3027 }
 0x229   : > { %15056 = vst [vmem:[#allocation175_spill] sm:$0xff] %v8976_v36  ;;  %1973 = vperm.xlu1 %7194, %v8103_v42  }
 0x22a   : > { %v8979_v25 = vpop.permute.xlu1 %1597  ;;  %3235 = vperm.xlu0 %7200, %v8380_v26  }
 0x22b   : > { %15057 = vst [vmem:[#allocation176_spill] sm:$0xff] %v8979_v25 }
 0x22c   : > { %v8982_v38 = vpop.permute.xlu0 %3035 }
 0x22d   : > { %15058 = vst [vmem:[#allocation177_spill] sm:$0xff] %v8982_v38  ;;  %1981 = vperm.xlu1 %7194, %v8115_v44  }
 0x22e   : > { %v8985_v11 = vpop.permute.xlu1 %1605  ;;  %3243 = vperm.xlu0 %7200, %v8395_v30  }
 0x22f   : > { %15059 = vst [vmem:[#allocation178_spill] sm:$0xff] %v8985_v11  ;;  %v9304_v11 = vld [vmem:[%s14734_s8 + $0x60] sm:$0xff] }
 0x230   : > { %v8988_v40 = vpop.permute.xlu0 %3043 }
 0x231   : > { %15060 = vst [vmem:[#allocation179_spill] sm:$0xff] %v8988_v40  ;;  %1989 = vperm.xlu1 %7194, %v8127_v46  }
 0x232   : > { %v8991_v2 = vpop.permute.xlu1 %1613  ;;  %3251 = vperm.xlu0 %7200, %v8410_v16  }
 0x233   : > { %15061 = vst [vmem:[#allocation180_spill] sm:$0xff] %v8991_v2 }
 0x234   : > { %v8994_v42 = vpop.permute.xlu0 %3051 }
 0x235   : > { %15062 = vst [vmem:[#allocation181_spill] sm:$0xff] %v8994_v42  ;;  %1997 = vperm.xlu1 %7194, %v8139_v48  }
 0x236   : > { %v8997_v26 = vpop.permute.xlu1 %1621  ;;  %3259 = vperm.xlu0 %7200, %v8425_v21  }
 0x237   : > { %15063 = vst [vmem:[#allocation182_spill] sm:$0xff] %v8997_v26 }
 0x238   : > { %v9000_v44 = vpop.permute.xlu0 %3059 }
 0x239   : > { %15064 = vst [vmem:[#allocation183_spill] sm:$0xff] %v9000_v44  ;;  %2005 = vperm.xlu1 %7194, %v8151_v50   ;;  %v15070_v44 = vmov 3   ;;  %v9021_v50 = vld [vmem:[%s14734_s8] sm:$0xff] }
 0x23a   : > { %v9003_v30 = vpop.permute.xlu1 %1629  ;;  %3267 = vperm.xlu0 %7200, %v8440_v6  }
 0x23b   : > { %15065 = vst [vmem:[#allocation184_spill] sm:$0xff] %v9003_v30  ;;  %v9282_v30 = vld [vmem:[%s14734_s8 + $0x40] sm:$0xff] }
 0x23c   : > { %v9006_v46 = vpop.permute.xlu0 %3067 }
 0x23d   : > { %15066 = vst [vmem:[#allocation185_spill] sm:$0xff] %v9006_v46  ;;  %2013 = vperm.xlu1 %7194, %v8163_v52  }
 0x23e   : > { %v9009_v16 = vpop.permute.xlu1 %1637  ;;  %3275 = vperm.xlu0 %7200, %v8457_v20  }
 0x23f   : > { %15067 = vst [vmem:[#allocation186_spill] sm:$0xff] %v9009_v16 }
 0x240   : > { %v9012_v48 = vpop.permute.xlu0 %3075 }
 0x241   : > { %15068 = vst [vmem:[#allocation187_spill] sm:$0xff] %v9012_v48  ;;  %2021 = vperm.xlu1 %7194, %v8175_v54   ;;  %v9032_v54 = vld [vmem:[%s14734_s8 + $0x18] sm:$0xff] }
 0x242   : > { %v9015_v21 = vpop.permute.xlu1 %1645  ;;  %7202 = vset.pattern.permute.xlu0 %v15070_v44 }
 0x243   : > { %15069 = vst [vmem:[#allocation188_spill] sm:$0xff] %v9015_v21  ;;  %1549 = vperm.xlu0 %7202, %v9021_v50   ;;  %v15118_v21 = vld [vmem:[#allocation109_spill] sm:$0xff] }
 0x244   : > { %v9024_v52 = vpop.permute.xlu0 %3083 }
 0x245   : > { %15071 = vst [vmem:[#allocation189_spill] sm:$0xff] %v9024_v52  ;;  %2029 = vperm.xlu1 %7194, %v8187_v56   ;;  %v9043_v52 = vld [vmem:[%s14734_s8 + $0x28] sm:$0xff] }
 0x246   : > { %v9027_v6 = vpop.permute.xlu1 %1653 }
 0x247   : > { %15072 = vst [vmem:[#allocation190_spill] sm:$0xff] %v9027_v6  ;;  %1561 = vperm.xlu0 %7202, %v9032_v54  }
 0x249   : > { %2037 = vperm.xlu1 %7194, %v8199_v58   ;;  %v9036_v20 = vpop.permute.xlu0 %1357  ;;  %v9054_v58 = vld [vmem:[%s14734_s8 + $0x38] sm:$0xff] }
 0x24a   : > { %15073 = vst [vmem:[#allocation191_spill] sm:$0xff] %v9036_v20  ;;  %v9038_v48 = vpop.permute.xlu1 %1661  ;;  %v15193_v20 = vld [vmem:[#allocation26_spill] sm:$0xff] }
 0x24b   : > { %15074 = vst [vmem:[#allocation192_spill] sm:$0xff] %v9038_v48  ;;  %1569 = vperm.xlu0 %7202, %v9043_v52  }
 0x24d   : > { %2045 = vperm.xlu1 %7194, %v8211_v60   ;;  %v9047_v56 = vpop.permute.xlu0 %1369  ;;  %v9065_v60 = vld [vmem:[%s14734_s8 + $0x48] sm:$0xff] }
 0x24e   : > { %15075 = vst [vmem:[#allocation193_spill] sm:$0xff] %v9047_v56  ;;  %v9049_v46 = vpop.permute.xlu1 %1669 }
 0x24f   : > { %15076 = vst [vmem:[#allocation194_spill] sm:$0xff] %v9049_v46  ;;  %1577 = vperm.xlu0 %7202, %v9054_v58  }
 0x251   : > { %2053 = vperm.xlu1 %7194, %v8223_v62   ;;  %v9058_v42 = vpop.permute.xlu0 %1377  ;;  %v9076_v62 = vld [vmem:[%s14734_s8 + $0x58] sm:$0xff] }
 0x252   : > { %15077 = vst [vmem:[#allocation195_spill] sm:$0xff] %v9058_v42 }
 0x253   : > { %v9060_v40 = vpop.permute.xlu1 %1745  ;;  %1585 = vperm.xlu0 %7202, %v9065_v60  }
 0x254   : > { %15078 = vst [vmem:[#allocation196_spill] sm:$0xff] %v9060_v40  ;;  %v9192_v40 = vld [vmem:[%s14734_s8 + $0xf8] sm:$0xff] }
 0x255   : > { %2061 = vperm.xlu1 %7194, %v8235_v0   ;;  %v9069_v38 = vpop.permute.xlu0 %1385  ;;  %v9088_v0 = vld [vmem:[%s14734_s8 + $0x68] sm:$0xff] }
 0x256   : > { %15079 = vst [vmem:[#allocation197_spill] sm:$0xff] %v9069_v38 }
 0x257   : > { %v9071_v36 = vpop.permute.xlu1 %1753  ;;  %1593 = vperm.xlu0 %7202, %v9076_v62  }
 0x259   : > { %7195 = vset.pattern.permute.xlu1 %v14784_v33  ;;  %v9080_v29 = vpop.permute.xlu0 %1393 }
 0x25a   : > { %15080 = vst [vmem:[#allocation198_spill] sm:$0xff] %v9080_v29  ;;  %2137 = vperm.xlu1 %7195, %v9021_v50  }
 0x25b   : > { %v9083_v22 = vpop.permute.xlu1 %1757  ;;  %1601 = vperm.xlu0 %7202, %v9088_v0  }
 0x25c   : > { %15081 = vst [vmem:[#allocation199_spill] sm:$0xff] %v9083_v22  ;;  %v9181_v22 = vld [vmem:[%s14734_s8 + $0xe8] sm:$0xff] }
 0x25d   : > { %v9091_v15 = vpop.permute.xlu0 %1401 }
 0x25e   : > { %15082 = vst [vmem:[#allocation200_spill] sm:$0xff] %v9091_v15  ;;  %2145 = vperm.xlu1 %7195, %v9096_v57  }
 0x25f   : > { %v9099_v33 = vpop.permute.xlu1 %1765  ;;  %1609 = vperm.xlu0 %7202, %v9104_v55  }
 0x260   : > { %15083 = vst [vmem:[#allocation201_spill] sm:$0xff] %v9099_v33 }
 0x261   : > { %v9107_v53 = vpop.permute.xlu0 %1409 }
 0x262   : > { %15084 = vst [vmem:[#allocation202_spill] sm:$0xff] %v9107_v53  ;;  %2149 = vperm.xlu1 %7195, %v9032_v54   ;;  %v9337_v53 = vld [vmem:[%s14734_s8 + $0x90] sm:$0xff] }
 0x263   : > { %v9110_v51 = vpop.permute.xlu1 %1773  ;;  %1617 = vperm.xlu0 %7202, %v9115_v47  }
 0x264   : > { %15085 = vst [vmem:[#allocation203_spill] sm:$0xff] %v9110_v51 }
 0x265   : > { %v9118_v49 = vpop.permute.xlu0 %1417 }
 0x266   : > { %15086 = vst [vmem:[#allocation204_spill] sm:$0xff] %v9118_v49  ;;  %2157 = vperm.xlu1 %7195, %v9043_v52   ;;  %v9315_v49 = vld [vmem:[%s14734_s8 + $0x70] sm:$0xff] }
 0x267   : > { %v9121_v17 = vpop.permute.xlu1 %1781  ;;  %1625 = vperm.xlu0 %7202, %v9126_v19  }
 0x268   : > { %15087 = vst [vmem:[#allocation205_spill] sm:$0xff] %v9121_v17  ;;  %v9148_v17 = vld [vmem:[%s14734_s8 + $0xb8] sm:$0xff] }
 0x269   : > { %v9129_v4 = vpop.permute.xlu0 %1425 }
 0x26a   : > { %15088 = vst [vmem:[#allocation206_spill] sm:$0xff] %v9129_v4  ;;  %2165 = vperm.xlu1 %7195, %v9054_v58  }
 0x26b   : > { %v9132_v45 = vpop.permute.xlu1 %1789  ;;  %1633 = vperm.xlu0 %7202, %v9137_v43  }
 0x26c   : > { %15089 = vst [vmem:[#allocation207_spill] sm:$0xff] %v9132_v45 }
 0x26d   : > { %v9140_v41 = vpop.permute.xlu0 %1433 }
 0x26e   : > { %15090 = vst [vmem:[#allocation208_spill] sm:$0xff] %v9140_v41  ;;  %2173 = vperm.xlu1 %7195, %v9065_v60   ;;  %v9293_v41 = vld [vmem:[%s14734_s8 + $0x50] sm:$0xff] }
 0x26f   : > { %v9143_v39 = vpop.permute.xlu1 %1797  ;;  %1641 = vperm.xlu0 %7202, %v9148_v17  }
 0x270   : > { %15091 = vst [vmem:[#allocation209_spill] sm:$0xff] %v9143_v39 }
 0x271   : > { %v9151_v45 = vpop.permute.xlu0 %1441 }
 0x272   : > { %15092 = vst [vmem:[#allocation210_spill] sm:$0xff] %v9151_v45  ;;  %2181 = vperm.xlu1 %7195, %v9076_v62  }
 0x273   : > { %v9154_v51 = vpop.permute.xlu1 %1805  ;;  %1649 = vperm.xlu0 %7202, %v9159_v37  }
 0x274   : > { %15093 = vst [vmem:[#allocation211_spill] sm:$0xff] %v9154_v51 }
 0x275   : > { %v9162_v39 = vpop.permute.xlu0 %1449 }
 0x276   : > { %15094 = vst [vmem:[#allocation212_spill] sm:$0xff] %v9162_v39  ;;  %2189 = vperm.xlu1 %7195, %v9088_v0  }
 0x277   : > { %v9165_v33 = vpop.permute.xlu1 %1813  ;;  %1657 = vperm.xlu0 %7202, %v9170_v35  }
 0x278   : > { %15095 = vst [vmem:[#allocation213_spill] sm:$0xff] %v9165_v33 }
 0x279   : > { %v9173_v51 = vpop.permute.xlu0 %1457 }
 0x27a   : > { %15096 = vst [vmem:[#allocation214_spill] sm:$0xff] %v9173_v51  ;;  %2197 = vperm.xlu1 %7195, %v9104_v55  }
 0x27b   : > { %v9176_v31 = vpop.permute.xlu1 %1821  ;;  %1665 = vperm.xlu0 %7202, %v9181_v22  }
 0x27c   : > { %15097 = vst [vmem:[#allocation215_spill] sm:$0xff] %v9176_v31 }
 0x27d   : > { %v9184_v33 = vpop.permute.xlu0 %1465 }
 0x27e   : > { %15098 = vst [vmem:[#allocation216_spill] sm:$0xff] %v9184_v33  ;;  %2205 = vperm.xlu1 %7195, %v9115_v47   ;;  %v9260_v33 = vld [vmem:[%s14734_s8 + $0x20] sm:$0xff] }
 0x27f   : > { %v9187_v34 = vpop.permute.xlu1 %1829  ;;  %1673 = vperm.xlu0 %7202, %v9192_v40  }
 0x280   : > { %15099 = vst [vmem:[#allocation217_spill] sm:$0xff] %v9187_v34 }
 0x281   : > { %v9195_v31 = vpop.permute.xlu0 %1473 }
 0x282   : > { %15100 = vst [vmem:[#allocation218_spill] sm:$0xff] %v9195_v31  ;;  %2213 = vperm.xlu1 %7195, %v9126_v19  }
 0x283   : > { %v9198_v24 = vpop.permute.xlu1 %1837  ;;  %3351 = vperm.xlu0 %7202, %v8652_v10  }
 0x284   : > { %15101 = vst [vmem:[#allocation219_spill] sm:$0xff] %v9198_v24 }
 0x285   : > { %v9201_v23 = vpop.permute.xlu0 %3159 }
 0x286   : > { %15102 = vst [vmem:[#allocation220_spill] sm:$0xff] %v9201_v23  ;;  %2221 = vperm.xlu1 %7195, %v9137_v43  }
 0x287   : > { %v9204_v34 = vpop.permute.xlu1 %1845  ;;  %3363 = vperm.xlu0 %7202, %v8667_v28  }
 0x288   : > { %15103 = vst [vmem:[#allocation221_spill] sm:$0xff] %v9204_v34 }
 0x289   : > { %v9207_v46 = vpop.permute.xlu0 %3171 }
 0x28a   : > { %15104 = vst [vmem:[#allocation222_spill] sm:$0xff] %v9207_v46  ;;  %2229 = vperm.xlu1 %7195, %v9148_v17  }
 0x28b   : > { %v9210_v48 = vpop.permute.xlu1 %1853  ;;  %3371 = vperm.xlu0 %7202, %v8678_v5  }
 0x28c   : > { %15105 = vst [vmem:[#allocation223_spill] sm:$0xff] %v9210_v48 }
 0x28d   : > { %v9213_v31 = vpop.permute.xlu0 %3179 }
 0x28e   : > { %15106 = vst [vmem:[#allocation224_spill] sm:$0xff] %v9213_v31  ;;  %2237 = vperm.xlu1 %7195, %v9159_v37  }
 0x28f   : > { %v9216_v24 = vpop.permute.xlu1 %1861  ;;  %3379 = vperm.xlu0 %7202, %v8689_v3  }
 0x290   : > { %15107 = vst [vmem:[#allocation225_spill] sm:$0xff] %v9216_v24 }
 0x291   : > { %v9219_v23 = vpop.permute.xlu0 %3187 }
 0x292   : > { %15108 = vst [vmem:[#allocation226_spill] sm:$0xff] %v9219_v23  ;;  %2245 = vperm.xlu1 %7195, %v9170_v35  }
 0x293   : > { %v9222_v34 = vpop.permute.xlu1 %1869  ;;  %3387 = vperm.xlu0 %7202, %v8700_v13  }
 0x294   : > { %15109 = vst [vmem:[#allocation227_spill] sm:$0xff] %v9222_v34  ;;  %v14786_v34 = vmov 7  }
 0x295   : > { %v9225_v46 = vpop.permute.xlu0 %3195 }
 0x296   : > { %15110 = vst [vmem:[#allocation228_spill] sm:$0xff] %v9225_v46  ;;  %2253 = vperm.xlu1 %7195, %v9181_v22   ;;  %v9243_v46 = vld [vmem:[%s14734_s8 + $0x8] sm:$0xff] }
 0x297   : > { %3395 = vperm.xlu0 %7202, %v8711_v8  }
 0x298   : > { %v9229_v31 = vpop.permute.xlu1 %1945 }
 0x299   : > { %15111 = vst [vmem:[#allocation229_spill] sm:$0xff] %v9229_v31  ;;  %v9231_v48 = vpop.permute.xlu0 %3203  ;;  %v15153_v31 = vmov 0  }
 0x29a   : > { %15112 = vst [vmem:[#allocation230_spill] sm:$0xff] %v9231_v48  ;;  %2261 = vperm.xlu1 %7195, %v9192_v40  }
 0x29b   : > { %3403 = vperm.xlu0 %7202, %v8722_v27  }
 0x29c   : > { %v9235_v23 = vpop.permute.xlu1 %1949 }
 0x29d   : > { %v9237_v24 = vpop.permute.xlu0 %3211 }
 0x29e   : > { %15113 = vst [vmem:[#allocation231_spill] sm:$0xff] %v9237_v24  ;;  %7196 = vset.pattern.permute.xlu1 %v14786_v34 }
 0x29f   : > { %2337 = vperm.xlu1 %7196, %v9243_v46   ;;  %3411 = vperm.xlu0 %7202, %v8733_v14  }
 0x2a0   : > { %v9247_v48 = vpop.permute.xlu1 %1957 }
 0x2a1   : > { %15114 = vst [vmem:[#allocation232_spill] sm:$0xff] %v9247_v48  ;;  %v9249_v6 = vpop.permute.xlu0 %3219 }
 0x2a2   : > { %15115 = vst [vmem:[#allocation233_spill] sm:$0xff] %v9249_v6 }
 0x2a3   : > { %2341 = vperm.xlu1 %7196, %v9096_v57   ;;  %3419 = vperm.xlu0 %7202, %v8744_v18   ;;  %v9271_v57 = vld [vmem:[%s14734_s8 + $0x30] sm:$0xff] }
 0x2a4   : > { %v9253_v24 = vpop.permute.xlu1 %1965 }
 0x2a5   : > { %15116 = vst [vmem:[#allocation234_spill] sm:$0xff] %v9253_v24  ;;  %v9255_v34 = vpop.permute.xlu0 %3227 }
 0x2a6   : > { %15117 = vst [vmem:[#allocation235_spill] sm:$0xff] %v9255_v34  ;;  %v15121_v34 = vld [vmem:[#allocation112_spill] sm:$0xff] }
 0x2a7   : > { %2349 = vperm.xlu1 %7196, %v9260_v33   ;;  %3427 = vperm.xlu0 %7202, %v15118_v21  }
 0x2a8   : > { %v9264_v51 = vpop.permute.xlu1 %1973 }
 0x2a9   : > { %15119 = vst [vmem:[#allocation109_spill] sm:$0xff] %v9264_v51  ;;  %v9266_v6 = vpop.permute.xlu0 %3235  ;;  %v9326_v51 = vld [vmem:[%s14734_s8 + $0x80] sm:$0xff] }
 0x2aa   : > { %15120 = vst [vmem:[#allocation236_spill] sm:$0xff] %v9266_v6  ;;  %v15124_v6 = vld [vmem:[#allocation115_spill] sm:$0xff] }
 0x2ab   : > { %2357 = vperm.xlu1 %7196, %v9271_v57   ;;  %3435 = vperm.xlu0 %7202, %v15121_v34  }
 0x2ac   : > { %v9275_v16 = vpop.permute.xlu1 %1981 }
 0x2ad   : > { %15122 = vst [vmem:[#allocation112_spill] sm:$0xff] %v9275_v16  ;;  %v9277_v39 = vpop.permute.xlu0 %3243 }
 0x2ae   : > { %15123 = vst [vmem:[#allocation237_spill] sm:$0xff] %v9277_v39  ;;  %v15127_v39 = vld [vmem:[#allocation118_spill] sm:$0xff] }
 0x2af   : > { %2365 = vperm.xlu1 %7196, %v9282_v30   ;;  %3443 = vperm.xlu0 %7202, %v15124_v6  }
 0x2b0   : > { %v9286_v45 = vpop.permute.xlu1 %1989 }
 0x2b1   : > { %15125 = vst [vmem:[#allocation115_spill] sm:$0xff] %v9286_v45  ;;  %v9288_v26 = vpop.permute.xlu0 %3251 }
 0x2b2   : > { %15126 = vst [vmem:[#allocation238_spill] sm:$0xff] %v9288_v26  ;;  %v15130_v26 = vld [vmem:[#allocation121_spill] sm:$0xff] }
 0x2b3   : > { %2373 = vperm.xlu1 %7196, %v9293_v41   ;;  %3451 = vperm.xlu0 %7202, %v15127_v39  }
 0x2b4   : > { %v9297_v2 = vpop.permute.xlu1 %1997 }
 0x2b5   : > { %15128 = vst [vmem:[#allocation118_spill] sm:$0xff] %v9297_v2  ;;  %v9299_v4 = vpop.permute.xlu0 %3259 }
 0x2b6   : > { %15129 = vst [vmem:[#allocation239_spill] sm:$0xff] %v9299_v4  ;;  %v15133_v4 = vld [vmem:[#allocation124_spill] sm:$0xff] }
 0x2b7   : > { %2381 = vperm.xlu1 %7196, %v9304_v11   ;;  %3459 = vperm.xlu0 %7202, %v15130_v26  }
 0x2b8   : > { %v9308_v45 = vpop.permute.xlu1 %2005 }
 0x2b9   : > { %15131 = vst [vmem:[#allocation121_spill] sm:$0xff] %v9308_v45  ;;  %v9310_v16 = vpop.permute.xlu0 %3267 }
 0x2ba   : > { %15132 = vst [vmem:[#allocation240_spill] sm:$0xff] %v9310_v16 }
 0x2bb   : > { %2389 = vperm.xlu1 %7196, %v9315_v49   ;;  %3467 = vperm.xlu0 %7202, %v15133_v4  }
 0x2bc   : > { %v9319_v2 = vpop.permute.xlu1 %2013 }
 0x2bd   : > { %15134 = vst [vmem:[#allocation124_spill] sm:$0xff] %v9319_v2  ;;  %v9321_v25 = vpop.permute.xlu0 %3275 }
 0x2be   : > { %15135 = vst [vmem:[#allocation241_spill] sm:$0xff] %v9321_v25  ;;  %v15138_v25 = vmov 4  }
 0x2bf   : > { %2397 = vperm.xlu1 %7196, %v9326_v51   ;;  %3475 = vperm.xlu0 %7202, %v8821_v7  }
 0x2c0   : > { %v9330_v16 = vpop.permute.xlu1 %2021 }
 0x2c1   : > { %15136 = vst [vmem:[#allocation242_spill] sm:$0xff] %v9330_v16  ;;  %v9349_v16 = vld [vmem:[%s14734_s8 + $0xa0] sm:$0xff] }
 0x2c2   : > { %v9332_v45 = vpop.permute.xlu0 %1549 }
 0x2c3   : > { %15137 = vst [vmem:[#allocation243_spill] sm:$0xff] %v9332_v45  ;;  %2405 = vperm.xlu1 %7196, %v9337_v53   ;;  %7204 = vset.pattern.permute.xlu0 %v15138_v25 }
 0x2c4   : > { %v9341_v2 = vpop.permute.xlu1 %2029  ;;  %1749 = vperm.xlu0 %7204, %v9243_v46  }
 0x2c5   : > { %15139 = vst [vmem:[#allocation244_spill] sm:$0xff] %v9341_v2  ;;  %v9360_v2 = vld [vmem:[%s14734_s8 + $0xb0] sm:$0xff] }
 0x2c6   : > { %v9344_v12 = vpop.permute.xlu0 %1561 }
 0x2c7   : > { %15140 = vst [vmem:[#allocation245_spill] sm:$0xff] %v9344_v12  ;;  %2413 = vperm.xlu1 %7196, %v9349_v16  }
 0x2c8   : > { %v9352_v45 = vpop.permute.xlu1 %2037  ;;  %1761 = vperm.xlu0 %7204, %v9260_v33  }
 0x2c9   : > { %15141 = vst [vmem:[#allocation246_spill] sm:$0xff] %v9352_v45  ;;  %v9371_v45 = vld [vmem:[%s14734_s8 + $0xc0] sm:$0xff] }
 0x2ca   : > { %v9355_v24 = vpop.permute.xlu0 %1569 }
 0x2cb   : > { %15142 = vst [vmem:[#allocation247_spill] sm:$0xff] %v9355_v24  ;;  %2421 = vperm.xlu1 %7196, %v9360_v2  }
 0x2cc   : > { %v9363_v12 = vpop.permute.xlu1 %2045  ;;  %1769 = vperm.xlu0 %7204, %v9271_v57  }
 0x2cd   : > { %15143 = vst [vmem:[#allocation248_spill] sm:$0xff] %v9363_v12  ;;  %v9382_v12 = vld [vmem:[%s14734_s8 + $0xd0] sm:$0xff] }
 0x2ce   : > { %v9366_v15 = vpop.permute.xlu0 %1577 }
 0x2cf   : > { %15144 = vst [vmem:[#allocation249_spill] sm:$0xff] %v9366_v15  ;;  %2429 = vperm.xlu1 %7196, %v9371_v45  }
 0x2d0   : > { %v9374_v24 = vpop.permute.xlu1 %2053  ;;  %1777 = vperm.xlu0 %7204, %v9282_v30  }
 0x2d1   : > { %15145 = vst [vmem:[#allocation250_spill] sm:$0xff] %v9374_v24  ;;  %v9393_v24 = vld [vmem:[%s14734_s8 + $0xe0] sm:$0xff] }
 0x2d2   : > { %v9377_v59 = vpop.permute.xlu0 %1585 }
 0x2d3   : > { %15146 = vst [vmem:[#allocation251_spill] sm:$0xff] %v9377_v59  ;;  %2437 = vperm.xlu1 %7196, %v9382_v12  }
 0x2d4   : > { %v9385_v15 = vpop.permute.xlu1 %2061  ;;  %1785 = vperm.xlu0 %7204, %v9293_v41  }
 0x2d5   : > { %15147 = vst [vmem:[#allocation252_spill] sm:$0xff] %v9385_v15  ;;  %v9404_v15 = vld [vmem:[%s14734_s8 + $0xf0] sm:$0xff] }
 0x2d6   : > { %v9388_v48 = vpop.permute.xlu0 %1593  ;;  %15151 = vst [vmem:[#allocation256_spill] sm:$0xff] %v9404_v15 }
 0x2d7   : > { %15148 = vst [vmem:[#allocation253_spill] sm:$0xff] %v9388_v48  ;;  %2445 = vperm.xlu1 %7196, %v9393_v24  }
 0x2d8   : > { %1793 = vperm.xlu0 %7204, %v9304_v11  }
 0x2d9   : > { %v9397_v59 = vpop.permute.xlu1 %2137 }
 0x2da   : > { %15149 = vst [vmem:[#allocation254_spill] sm:$0xff] %v9397_v59  ;;  %v9399_v29 = vpop.permute.xlu0 %1601  ;;  %v9420_v59 = vld [vmem:[%s14737_s11 + $0x10] sm:$0xff] }
 0x2db   : > { %15150 = vst [vmem:[#allocation255_spill] sm:$0xff] %v9399_v29  ;;  %2453 = vperm.xlu1 %7196, %v9404_v15  }
 0x2dc   : > { %1801 = vperm.xlu0 %7204, %v9315_v49  }
 0x2dd   : > { %v9408_v48 = vpop.permute.xlu1 %2145 }
 0x2de   : > { %v9410_v63 = vpop.permute.xlu0 %1609 }
 0x2df   : > { %15152 = vst [vmem:[#allocation257_spill] sm:$0xff] %v9410_v63  ;;  %7197 = vset.pattern.permute.xlu1 %v15153_v31 }
 0x2e0   : > { %2732 = vperm.xlu1 %7197, %v8652_v10   ;;  %1809 = vperm.xlu0 %7204, %v9326_v51  }
 0x2e1   : > { %v9415_v29 = vpop.permute.xlu1 %2149 }
 0x2e2   : > { %15154 = vst [vmem:[#allocation258_spill] sm:$0xff] %v9415_v29  ;;  %v9422_v38 = vpop.permute.xlu0 %1617 }
 0x2e3   : > { %15155 = vst [vmem:[#allocation259_spill] sm:$0xff] %v9422_v38 }
 0x2e4   : > { %2742 = vperm.xlu1 %7197, %v9420_v59   ;;  %1817 = vperm.xlu0 %7204, %v9337_v53  }
 0x2e5   : > { %v9426_v63 = vpop.permute.xlu1 %2157 }
 0x2e6   : > { %15156 = vst [vmem:[#allocation260_spill] sm:$0xff] %v9426_v63  ;;  %v9428_v31 = vpop.permute.xlu0 %1625 }
 0x2e7   : > { %15157 = vst [vmem:[#allocation261_spill] sm:$0xff] %v9428_v31 }
 0x2e8   : > { %2747 = vperm.xlu1 %7197, %v8667_v28   ;;  %1825 = vperm.xlu0 %7204, %v9349_v16  }
 0x2e9   : > { %v9432_v10 = vpop.permute.xlu1 %2165 }
 0x2ea   : > { %15158 = vst [vmem:[#allocation262_spill] sm:$0xff] %v9432_v10  ;;  %v9434_v29 = vpop.permute.xlu0 %1633 }
 0x2eb   : > { %15159 = vst [vmem:[#allocation263_spill] sm:$0xff] %v9434_v29 }
 0x2ec   : > { %2757 = vperm.xlu1 %7197, %v8678_v5   ;;  %1833 = vperm.xlu0 %7204, %v9360_v2  }
 0x2ed   : > { %v9438_v38 = vpop.permute.xlu1 %2173 }
 0x2ee   : > { %15160 = vst [vmem:[#allocation264_spill] sm:$0xff] %v9438_v38  ;;  %v9440_v61 = vpop.permute.xlu0 %1641 }
 0x2ef   : > { %15161 = vst [vmem:[#allocation265_spill] sm:$0xff] %v9440_v61 }
 0x2f0   : > { %2767 = vperm.xlu1 %7197, %v8689_v3   ;;  %1841 = vperm.xlu0 %7204, %v9371_v45  }
 0x2f1   : > { %v9444_v31 = vpop.permute.xlu1 %2181 }
 0x2f2   : > { %15162 = vst [vmem:[#allocation266_spill] sm:$0xff] %v9444_v31  ;;  %v9446_v28 = vpop.permute.xlu0 %1649 }
 0x2f3   : > { %15163 = vst [vmem:[#allocation267_spill] sm:$0xff] %v9446_v28 }
 0x2f4   : > { %2777 = vperm.xlu1 %7197, %v8700_v13   ;;  %1849 = vperm.xlu0 %7204, %v9382_v12  }
 0x2f5   : > { %v9450_v29 = vpop.permute.xlu1 %2189 }
 0x2f6   : > { %15164 = vst [vmem:[#allocation268_spill] sm:$0xff] %v9450_v29  ;;  %v9452_v5 = vpop.permute.xlu0 %1657  ;;  %v15184_v29 = vld [vmem:[#allocation58_spill] sm:$0xff] }
 0x2f7   : > { %15165 = vst [vmem:[#allocation269_spill] sm:$0xff] %v9452_v5 }
 0x2f8   : > { %2787 = vperm.xlu1 %7197, %v8711_v8   ;;  %1857 = vperm.xlu0 %7204, %v9393_v24   ;;  %v9470_v8 = vld [vmem:[%s14737_s11 + $0x8] sm:$0xff] }
 0x2f9   : > { %v9456_v61 = vpop.permute.xlu1 %2197 }
 0x2fa   : > { %15166 = vst [vmem:[#allocation270_spill] sm:$0xff] %v9456_v61  ;;  %v9458_v3 = vpop.permute.xlu0 %1665 }
 0x2fb   : > { %15167 = vst [vmem:[#allocation271_spill] sm:$0xff] %v9458_v3 }
 0x2fc   : > { %2797 = vperm.xlu1 %7197, %v8722_v27   ;;  %1865 = vperm.xlu0 %7204, %v9404_v15   ;;  %v9481_v27 = vld [vmem:[%s14737_s11 + $0x20] sm:$0xff] }
 0x2fd   : > { %v9462_v28 = vpop.permute.xlu1 %2205 }
 0x2fe   : > { %15168 = vst [vmem:[#allocation272_spill] sm:$0xff] %v9462_v28  ;;  %v9464_v13 = vpop.permute.xlu0 %1673  ;;  %v15178_v28 = vld [vmem:[#allocation52_spill] sm:$0xff] }
 0x2ff   : > { %15169 = vst [vmem:[#allocation273_spill] sm:$0xff] %v9464_v13  ;;  %v9511_v61 = vsub.s32 1, %v15178_v28  ;;  %v9536_v10 = vsub.s32 3, %v15178_v28 }
 0x300   : > { %2807 = vperm.xlu1 %7197, %v8733_v14   ;;  %3551 = vperm.xlu0 %7204, %v9470_v8  }
 0x301   : > { %v9473_v5 = vpop.permute.xlu1 %2213  ;;  %15179 = vst [vmem:[#allocation52_spill] sm:$0xff] %v9511_v61  ;;  %15186 = vst [vmem:[#allocation58_spill] sm:$0xff] %v9536_v10 }
 0x302   : > { %15170 = vst [vmem:[#allocation274_spill] sm:$0xff] %v9473_v5  ;;  %v9475_v3 = vpop.permute.xlu0 %3351  ;;  %v9492_v5 = vld [vmem:[%s14737_s11 + $0x30] sm:$0xff] }
 0x303   : > { %15171 = vst [vmem:[#allocation275_spill] sm:$0xff] %v9475_v3 }
 0x304   : > { %2817 = vperm.xlu1 %7197, %v8744_v18   ;;  %3563 = vperm.xlu0 %7204, %v9481_v27  }
 0x305   : > { %v9484_v14 = vpop.permute.xlu1 %2221 }
 0x306   : > { %15172 = vst [vmem:[#allocation276_spill] sm:$0xff] %v9484_v14  ;;  %v9486_v13 = vpop.permute.xlu0 %3363  ;;  %v9503_v14 = vld [vmem:[%s14737_s11 + $0x40] sm:$0xff] }
 0x307   : > { %15173 = vst [vmem:[#allocation277_spill] sm:$0xff] %v9486_v13 }
 0x308   : > { %2827 = vperm.xlu1 %7197, %v15118_v21   ;;  %3571 = vperm.xlu0 %7204, %v9492_v5  }
 0x309   : > { %v9495_v18 = vpop.permute.xlu1 %2229 }
 0x30a   : > { %15174 = vst [vmem:[#allocation278_spill] sm:$0xff] %v9495_v18  ;;  %v9497_v3 = vpop.permute.xlu0 %3371 }
 0x30b   : > { %15175 = vst [vmem:[#allocation279_spill] sm:$0xff] %v9497_v3  ;;  %v9521_v3 = vsub.s32 2, %v15178_v28 }
 0x30c   : > { %2837 = vperm.xlu1 %7197, %v15121_v34   ;;  %3579 = vperm.xlu0 %7204, %v9503_v14   ;;  %v9517_v34 = vld [vmem:[%s14737_s11 + $0x50] sm:$0xff] }
 0x30d   : > { %v9506_v21 = vpop.permute.xlu1 %2237  ;;  %15180 = vst [vmem:[#allocation282_spill] sm:$0xff] %v9521_v3 }
 0x30e   : > { %15176 = vst [vmem:[#allocation280_spill] sm:$0xff] %v9506_v21  ;;  %v9508_v13 = vpop.permute.xlu0 %3379 }
 0x30f   : > { %15177 = vst [vmem:[#allocation281_spill] sm:$0xff] %v9508_v13  ;;  %v15183_v13 = vld [vmem:[#allocation63_spill] sm:$0xff] }
 0x310   : > { %2847 = vperm.xlu1 %7197, %v15124_v6   ;;  %3587 = vperm.xlu0 %7204, %v9517_v34   ;;  %v1094_v31 = vmul.f32 %v15184_v29, %v15183_v13  ;;  %v7265_v6 = vld [vmem:[%s14933_s15] sm:$0xff]  ;;  %v15187_v29 = vld [vmem:[#allocation96_spill] sm:$0xff] }
 0x311   : > { %v9523_v18 = vpop.permute.xlu1 %2245  ;;  %v9533_v38 = vrot.slane %v7265_v6, %v9511_v61  ;;  %v9551_v61 = vsub.s32 4, %v15178_v28 }
 0x312   : > { %15181 = vst [vmem:[#allocation283_spill] sm:$0xff] %v9523_v18  ;;  %v9525_v21 = vpop.permute.xlu0 %3387  ;;  %v9542_v18 = vld [vmem:[%s14737_s11 + $0x60] sm:$0xff] }
 0x313   : > { %15182 = vst [vmem:[#allocation284_spill] sm:$0xff] %v9525_v21  ;;  %15185 = vst [vmem:[#allocation63_spill] sm:$0xff] %v9533_v38  ;;  %v1290_v13 = vmul.f32 %v9533_v38, %v15187_v29  ;;  %v9548_v21 = vrot.slane %v7265_v6, %v9521_v3  ;;  %v9563_v29 = vrot.slane %v7265_v6, %v9536_v10  ;;  %v9566_v3 = vsub.s32 5, %v15178_v28 }
 0x314   : > { %2857 = vperm.xlu1 %7197, %v15127_v39   ;;  %3595 = vperm.xlu0 %7204, %v9542_v18   ;;  %15189 = vst [vmem:[#allocation285_spill] sm:$0xff] %v9551_v61  ;;  %v7267_v39 = vld [vmem:[%s14940_s0] ss:$0 sm:$0xff]  ;;  %v9582_v10 = vrot.slane %v7265_v6, %v9551_v61  ;;  %v9701_v61 = vld [vmem:[%s14737_s11 + $0xf0] sm:$0xff] }
 0x315   : > { %15188 = vst [vmem:[#allocation96_spill] sm:$0xff] %v9548_v21  ;;  %v9553_v63 = vpop.permute.xlu1 %2253  ;;  %v1126_v1 = vadd.f32 %v7267_v39, %v1094_v31  ;;  %v1486_v56 = vmul.f32 %v9548_v21, %v8845_v32  ;;  %15192 = vst [vmem:[#allocation288_spill] sm:$0xff] %v9566_v3  ;;  %v9576_v31 = vld [vmem:[%s14737_s11 + $0x70] sm:$0xff]  ;;  %v1682_v39 = vmul.f32 %v9563_v29, %v8948_v9  ;;  %v9585_v21 = vsub.s32 6, %v15178_v28 }
 0x316   : > { %15190 = vst [vmem:[#allocation286_spill] sm:$0xff] %v9553_v63  ;;  %v9555_v42 = vpop.permute.xlu0 %3395  ;;  %v7268_v63 = vld [vmem:[%s14732_s6] ss:$0 sm:$0xff]  ;;  %v1878_v38 = vmul.f32 %v9582_v10, %v9071_v36  ;;  %v9594_v15 = vrot.slane %v7265_v6, %v9566_v3  ;;  %v9612_v3 = vsub.s32 7, %v15178_v28 }
 0x317   : > { %15191 = vst [vmem:[#allocation287_spill] sm:$0xff] %v9555_v42  ;;  %v762_v42 = vmul.f32 %v7268_v63, %v15193_v20  ;;  %v1322_v32 = vadd.f32 %v1290_v13, %v1126_v1  ;;  %15194 = vst [vmem:[#allocation26_spill] sm:$0xff] %v9585_v21  ;;  %v7270_v1 = vld [vmem:[%s14733_s7] ss:$0 sm:$0xff] }
 0x318   : > { %2867 = vperm.xlu1 %7197, %v15130_v26   ;;  %3603 = vperm.xlu0 %7204, %v9576_v31   ;;  %v9603_v13 = vld [vmem:[%s14737_s11 + $0x80] sm:$0xff]  ;;  %v2074_v36 = vmul.f32 %v9594_v15, %v9235_v23  ;;  %15197 = vst [vmem:[#allocation291_spill] sm:$0xff] %v9612_v3  ;;  %v9624_v23 = vld [vmem:[%s14737_s11 + $0x90] sm:$0xff] }
 0x319   : > { %v9587_v63 = vpop.permute.xlu1 %2261  ;;  %v1518_v20 = vadd.f32 %v1486_v56, %v1322_v32  ;;  %v794_v9 = vadd.f32 %v7270_v1, %v762_v42  ;;  %v9609_v32 = vrot.slane %v7265_v6, %v9585_v21 }
 0x31a   : > { %15195 = vst [vmem:[#allocation289_spill] sm:$0xff] %v9587_v63  ;;  %v9589_v26 = vpop.permute.xlu0 %3403 }
 0x31b   : > { %15196 = vst [vmem:[#allocation290_spill] sm:$0xff] %v9589_v26  ;;  %v1714_v56 = vadd.f32 %v1682_v39, %v1518_v20  ;;  %v2270_v26 = vmul.f32 %v9609_v32, %v9408_v48  ;;  %v826_v28 = vmul.f32 0.5, %v794_v9  ;;  %v9628_v20 = vrot.slane %v7265_v6, %v9612_v3  ;;  %v9640_v9 = vld [vmem:[%s14737_s11 + $0xa0] sm:$0xff] }
 0x31c   : > { %2877 = vperm.xlu1 %7197, %v15133_v4   ;;  %3611 = vperm.xlu0 %7204, %v9603_v13  }
 0x31d   : > { %v1910_v1 = vadd.f32 %v1878_v38, %v1714_v56  ;;  %v524_v38 = vld [vmem:[%s15199_s9 + $0x10] sm:$0xff] }
 0x31e   : > { %v9614_v42 = vpop.permute.xlu1 %2337  ;;  %v9616_v4 = vpop.permute.xlu0 %3411  ;;  %v858_v6 = vadd.f32 %v826_v28, %v524_v38 }
 0x31f   : > { %15198 = vst [vmem:[#allocation292_spill] sm:$0xff] %v9616_v4  ;;  %v2106_v39 = vadd.f32 %v2074_v36, %v1910_v1  ;;  %v15201_v4 = vmov 1   ;;  %v9644_v1 = vstv %s521_s2 }
 0x320   : > { %2887 = vperm.xlu1 %7197, %v8821_v7   ;;  %3619 = vperm.xlu0 %7204, %v9624_v23   ;;  %15202 = vst [vmem:[#allocation294_spill] sm:$0xff] %v9644_v1 }
 0x321   : > { %v2302_v7 = vadd.f32 %v2270_v26, %v2106_v39 }
 0x322   : > { %v2342_v56 = vpop.permute.xlu1 %2341  ;;  %v9633_v48 = vpop.permute.xlu0 %3419 }
 0x323   : > { %15200 = vst [vmem:[#allocation293_spill] sm:$0xff] %v9633_v48  ;;  %v2466_v21 = vmul.f32 %v9628_v20, %v2342_v56  ;;  %v9668_v56 = vld [vmem:[%s14737_s11 + $0xc0] sm:$0xff] }
 0x324   : > { %7199 = vset.pattern.permute.xlu1 %v15201_v4  ;;  %3627 = vperm.xlu0 %7204, %v9640_v9   ;;  %v9655_v4 = vld [vmem:[%s14737_s11 + $0xb0] sm:$0xff] }
 0x325   : > { %v2498_v36 = vadd.f32 %v2466_v21, %v2302_v7  ;;  %2963 = vperm.xlu1 %7199, %v9470_v8  }
 0x326   : > { %v9646_v3 = vpop.permute.xlu1 %2349  ;;  %v9648_v26 = vpop.permute.xlu0 %3427 }
 0x327   : > { %15203 = vst [vmem:[#allocation295_spill] sm:$0xff] %v9646_v3  ;;  %15204 = vst [vmem:[#allocation296_spill] sm:$0xff] %v9648_v26  ;;  %v9650_v39 = vadd.f32 %v2498_v36, %v858_v6  ;;  %v9679_v36 = vld [vmem:[%s14737_s11 + $0xd0] sm:$0xff]  ;;  %v9690_v26 = vld [vmem:[%s14737_s11 + $0xe0] sm:$0xff] }
 0x328   : > { %3635 = vperm.xlu0 %7204, %v9655_v4  }
 0x329   : > { %15205 = vst [vmem:[#allocation297_spill] sm:$0xff] %v9650_v39  ;;  %v2563_v21 = vmul.f32 %v9644_v1, %v9650_v39  ;;  %2967 = vperm.xlu1 %7199, %v9420_v59   ;;  %v15216_v39 = vmov 5  }
 0x32a   : > { %v9661_v28 = vpop.permute.xlu1 %2357  ;;  %v9663_v38 = vpop.permute.xlu0 %3435 }
 0x32b   : > { %15206 = vst [vmem:[#allocation298_spill] sm:$0xff] %v9661_v28  ;;  %15207 = vst [vmem:[#allocation299_spill] sm:$0xff] %v9663_v38 }
 0x32c   : > { %2595 = vst [vmem:[#allocation12 + $0x10] sm:$0xff] %v2563_v21  ;;  %3643 = vperm.xlu0 %7204, %v9668_v56  }
 0x32d   : > { %2975 = vperm.xlu1 %7199, %v9481_v27  }
 0x32e   : > { %v9672_v7 = vpop.permute.xlu1 %2365  ;;  %v9674_v6 = vpop.permute.xlu0 %3443 }
 0x32f   : > { %15208 = vst [vmem:[#allocation300_spill] sm:$0xff] %v9672_v7  ;;  %15209 = vst [vmem:[#allocation301_spill] sm:$0xff] %v9674_v6 }
 0x330   : > { %3651 = vperm.xlu0 %7204, %v9679_v36  }
 0x331   : > { %2983 = vperm.xlu1 %7199, %v9492_v5  }
 0x332   : > { %v9683_v21 = vpop.permute.xlu1 %2373  ;;  %v9685_v38 = vpop.permute.xlu0 %3451 }
 0x333   : > { %15210 = vst [vmem:[#allocation302_spill] sm:$0xff] %v9683_v21  ;;  %15211 = vst [vmem:[#allocation303_spill] sm:$0xff] %v9685_v38 }
 0x334   : > { %3659 = vperm.xlu0 %7204, %v9690_v26  }
 0x335   : > { %2991 = vperm.xlu1 %7199, %v9503_v14  }
 0x336   : > { %v9694_v6 = vpop.permute.xlu1 %2381  ;;  %v9696_v48 = vpop.permute.xlu0 %3459 }
 0x337   : > { %15212 = vst [vmem:[#allocation304_spill] sm:$0xff] %v9694_v6  ;;  %15213 = vst [vmem:[#allocation305_spill] sm:$0xff] %v9696_v48 }
 0x338   : > { %3667 = vperm.xlu0 %7204, %v9701_v61  }
 0x339   : > { %2999 = vperm.xlu1 %7199, %v9517_v34  }
 0x33a   : > { %v9705_v38 = vpop.permute.xlu1 %2389  ;;  %v9707_v63 = vpop.permute.xlu0 %3467 }
 0x33b   : > { %15214 = vst [vmem:[#allocation306_spill] sm:$0xff] %v9705_v38  ;;  %15215 = vst [vmem:[#allocation307_spill] sm:$0xff] %v9707_v63 }
 0x33c   : > { %7206 = vset.pattern.permute.xlu0 %v15216_v39 }
 0x33d   : > { %3007 = vperm.xlu1 %7199, %v9542_v18   ;;  %1941 = vperm.xlu0 %7206, %v9021_v50  }
 0x33e   : > { %v9712_v48 = vpop.permute.xlu1 %2397  ;;  %v9714_v6 = vpop.permute.xlu0 %3475 }
 0x33f   : > { %15217 = vst [vmem:[#allocation308_spill] sm:$0xff] %v9712_v48  ;;  %15218 = vst [vmem:[#allocation309_spill] sm:$0xff] %v9714_v6 }
 0x341   : > { %3015 = vperm.xlu1 %7199, %v9576_v31   ;;  %1953 = vperm.xlu0 %7206, %v9032_v54  }
 0x342   : > { %v9718_v21 = vpop.permute.xlu1 %2405 }
 0x343   : > { %15219 = vst [vmem:[#allocation310_spill] sm:$0xff] %v9718_v21  ;;  %v9720_v7 = vpop.permute.xlu0 %1749 }
 0x345   : > { %3023 = vperm.xlu1 %7199, %v9603_v13   ;;  %1961 = vperm.xlu0 %7206, %v9043_v52  }
 0x346   : > { %v9724_v63 = vpop.permute.xlu1 %2413 }
 0x347   : > { %15220 = vst [vmem:[#allocation311_spill] sm:$0xff] %v9724_v63  ;;  %v9726_v38 = vpop.permute.xlu0 %1761 }
 0x349   : > { %3031 = vperm.xlu1 %7199, %v9624_v23   ;;  %1969 = vperm.xlu0 %7206, %v9054_v58  }
 0x34a   : > { %v9730_v50 = vpop.permute.xlu1 %2421 }
 0x34b   : > { %15221 = vst [vmem:[#allocation312_spill] sm:$0xff] %v9730_v50  ;;  %v9732_v6 = vpop.permute.xlu0 %1769 }
 0x34d   : > { %3039 = vperm.xlu1 %7199, %v9640_v9   ;;  %1977 = vperm.xlu0 %7206, %v9065_v60  }
 0x34e   : > { %v9736_v54 = vpop.permute.xlu1 %2429 }
 0x34f   : > { %15222 = vst [vmem:[#allocation313_spill] sm:$0xff] %v9736_v54  ;;  %v9738_v21 = vpop.permute.xlu0 %1777 }
 0x350   : > { %15223 = vst [vmem:[#allocation314_spill] sm:$0xff] %v9738_v21 }
 0x351   : > { %3047 = vperm.xlu1 %7199, %v9655_v4   ;;  %1985 = vperm.xlu0 %7206, %v9076_v62  }
 0x352   : > { %v9742_v52 = vpop.permute.xlu1 %2437 }
 0x353   : > { %15224 = vst [vmem:[#allocation315_spill] sm:$0xff] %v9742_v52  ;;  %v9744_v63 = vpop.permute.xlu0 %1785 }
 0x354   : > { %15225 = vst [vmem:[#allocation316_spill] sm:$0xff] %v9744_v63 }
 0x355   : > { %3055 = vperm.xlu1 %7199, %v9668_v56   ;;  %1993 = vperm.xlu0 %7206, %v9088_v0  }
 0x356   : > { %v9748_v58 = vpop.permute.xlu1 %2445 }
 0x357   : > { %15226 = vst [vmem:[#allocation317_spill] sm:$0xff] %v9748_v58  ;;  %v9750_v50 = vpop.permute.xlu0 %1793 }
 0x358   : > { %15227 = vst [vmem:[#allocation318_spill] sm:$0xff] %v9750_v50 }
 0x359   : > { %3063 = vperm.xlu1 %7199, %v9679_v36   ;;  %2001 = vperm.xlu0 %7206, %v9104_v55   ;;  %v15234_v55 = vmov 2  }
 0x35a   : > { %v9754_v60 = vpop.permute.xlu1 %2453 }
 0x35b   : > { %15228 = vst [vmem:[#allocation319_spill] sm:$0xff] %v9754_v60  ;;  %v9756_v54 = vpop.permute.xlu0 %1801 }
 0x35c   : > { %15229 = vst [vmem:[#allocation320_spill] sm:$0xff] %v9756_v54 }
 0x35d   : > { %3071 = vperm.xlu1 %7199, %v9690_v26   ;;  %2009 = vperm.xlu0 %7206, %v9115_v47   ;;  %v9775_v47 = vld [vmem:[%s14737_s11] sm:$0xff] }
 0x35f   : > { %v9760_v62 = vpop.permute.xlu1 %2732  ;;  %v9762_v52 = vpop.permute.xlu0 %1809 }
 0x360   : > { %15230 = vst [vmem:[#allocation321_spill] sm:$0xff] %v9760_v62  ;;  %15231 = vst [vmem:[#allocation322_spill] sm:$0xff] %v9762_v52 }
 0x361   : > { %3079 = vperm.xlu1 %7199, %v9701_v61   ;;  %2017 = vperm.xlu0 %7206, %v9126_v19  }
 0x363   : > { %v9766_v0 = vpop.permute.xlu1 %2742  ;;  %v9768_v58 = vpop.permute.xlu0 %1817 }
 0x364   : > { %15232 = vst [vmem:[#allocation323_spill] sm:$0xff] %v9766_v0  ;;  %15233 = vst [vmem:[#allocation324_spill] sm:$0xff] %v9768_v58 }
 0x365   : > { %7201 = vset.pattern.permute.xlu1 %v15234_v55  ;;  %2025 = vperm.xlu0 %7206, %v9137_v43   ;;  %v9792_v43 = vld [vmem:[%s14737_s11 + $0x18] sm:$0xff] }
 0x366   : > { %3155 = vperm.xlu1 %7201, %v9775_v47  }
 0x367   : > { %v9778_v62 = vpop.permute.xlu1 %2747  ;;  %v9780_v60 = vpop.permute.xlu0 %1825 }
 0x368   : > { %15235 = vst [vmem:[#allocation325_spill] sm:$0xff] %v9778_v62  ;;  %15236 = vst [vmem:[#allocation326_spill] sm:$0xff] %v9780_v60 }
 0x369   : > { %2033 = vperm.xlu0 %7206, %v9148_v17   ;;  %v9803_v17 = vld [vmem:[%s14737_s11 + $0x28] sm:$0xff] }
 0x36a   : > { %3163 = vperm.xlu1 %7201, %v9420_v59  }
 0x36b   : > { %v9784_v19 = vpop.permute.xlu1 %2757  ;;  %v9786_v55 = vpop.permute.xlu0 %1833 }
 0x36c   : > { %15237 = vst [vmem:[#allocation327_spill] sm:$0xff] %v9784_v19  ;;  %15238 = vst [vmem:[#allocation328_spill] sm:$0xff] %v9786_v55 }
 0x36d   : > { %2041 = vperm.xlu0 %7206, %v9159_v37  }
 0x36e   : > { %3167 = vperm.xlu1 %7201, %v9792_v43  }
 0x36f   : > { %v9795_v0 = vpop.permute.xlu1 %2767  ;;  %v9797_v62 = vpop.permute.xlu0 %1841 }
 0x370   : > { %15239 = vst [vmem:[#allocation329_spill] sm:$0xff] %v9795_v0  ;;  %15240 = vst [vmem:[#allocation330_spill] sm:$0xff] %v9797_v62  ;;  %v9814_v0 = vld [vmem:[%s14737_s11 + $0x38] sm:$0xff] }
 0x371   : > { %2049 = vperm.xlu0 %7206, %v9170_v35  }
 0x372   : > { %3175 = vperm.xlu1 %7201, %v9803_v17  }
 0x373   : > { %v9806_v37 = vpop.permute.xlu1 %2777  ;;  %v9808_v19 = vpop.permute.xlu0 %1849 }
 0x374   : > { %15241 = vst [vmem:[#allocation331_spill] sm:$0xff] %v9806_v37  ;;  %15242 = vst [vmem:[#allocation332_spill] sm:$0xff] %v9808_v19  ;;  %v9825_v37 = vld [vmem:[%s14737_s11 + $0x48] sm:$0xff] }
 0x375   : > { %2057 = vperm.xlu0 %7206, %v9181_v22  }
 0x376   : > { %3183 = vperm.xlu1 %7201, %v9814_v0  }
 0x377   : > { %v9817_v35 = vpop.permute.xlu1 %2787  ;;  %v9819_v62 = vpop.permute.xlu0 %1857 }
 0x378   : > { %15243 = vst [vmem:[#allocation333_spill] sm:$0xff] %v9817_v35  ;;  %15244 = vst [vmem:[#allocation334_spill] sm:$0xff] %v9819_v62  ;;  %v9836_v35 = vld [vmem:[%s14737_s11 + $0x58] sm:$0xff] }
 0x379   : > { %2065 = vperm.xlu0 %7206, %v9192_v40  }
 0x37a   : > { %3191 = vperm.xlu1 %7201, %v9825_v37  }
 0x37b   : > { %v9828_v22 = vpop.permute.xlu1 %2797  ;;  %v9830_v19 = vpop.permute.xlu0 %1865 }
 0x37c   : > { %15245 = vst [vmem:[#allocation335_spill] sm:$0xff] %v9828_v22  ;;  %15246 = vst [vmem:[#allocation336_spill] sm:$0xff] %v9830_v19  ;;  %v9847_v22 = vld [vmem:[%s14737_s11 + $0x68] sm:$0xff] }
 0x37d   : > { %3743 = vperm.xlu0 %7206, %v9775_v47  }
 0x37e   : > { %3199 = vperm.xlu1 %7201, %v9836_v35  }
 0x37f   : > { %v9839_v40 = vpop.permute.xlu1 %2807  ;;  %v9841_v62 = vpop.permute.xlu0 %3551 }
 0x380   : > { %15247 = vst [vmem:[#allocation337_spill] sm:$0xff] %v9839_v40  ;;  %15248 = vst [vmem:[#allocation338_spill] sm:$0xff] %v9841_v62  ;;  %v9858_v40 = vld [vmem:[%s14737_s11 + $0x78] sm:$0xff] }
 0x381   : > { %3755 = vperm.xlu0 %7206, %v9792_v43  }
 0x382   : > { %3207 = vperm.xlu1 %7201, %v9847_v22  }
 0x383   : > { %v9850_v19 = vpop.permute.xlu1 %2817  ;;  %v9852_v55 = vpop.permute.xlu0 %3563 }
 0x384   : > { %15249 = vst [vmem:[#allocation339_spill] sm:$0xff] %v9850_v19  ;;  %15250 = vst [vmem:[#allocation340_spill] sm:$0xff] %v9852_v55  ;;  %v9869_v19 = vld [vmem:[%s14737_s11 + $0x88] sm:$0xff] }
 0x385   : > { %3763 = vperm.xlu0 %7206, %v9803_v17  }
 0x386   : > { %3215 = vperm.xlu1 %7201, %v9858_v40  }
 0x387   : > { %v9861_v62 = vpop.permute.xlu1 %2827  ;;  %v9863_v48 = vpop.permute.xlu0 %3571 }
 0x388   : > { %15251 = vst [vmem:[#allocation341_spill] sm:$0xff] %v9861_v62  ;;  %15252 = vst [vmem:[#allocation342_spill] sm:$0xff] %v9863_v48  ;;  %v9880_v62 = vld [vmem:[%s14737_s11 + $0x98] sm:$0xff] }
 0x389   : > { %3771 = vperm.xlu0 %7206, %v9814_v0  }
 0x38a   : > { %3223 = vperm.xlu1 %7201, %v9869_v19  }
 0x38b   : > { %v9872_v55 = vpop.permute.xlu1 %2837  ;;  %v9874_v60 = vpop.permute.xlu0 %3579 }
 0x38c   : > { %15253 = vst [vmem:[#allocation343_spill] sm:$0xff] %v9872_v55  ;;  %15254 = vst [vmem:[#allocation344_spill] sm:$0xff] %v9874_v60  ;;  %v9891_v55 = vld [vmem:[%s14737_s11 + $0xa8] sm:$0xff] }
 0x38d   : > { %3779 = vperm.xlu0 %7206, %v9825_v37  }
 0x38e   : > { %3231 = vperm.xlu1 %7201, %v9880_v62  }
 0x38f   : > { %v9883_v48 = vpop.permute.xlu1 %2847  ;;  %v9885_v58 = vpop.permute.xlu0 %3587 }
 0x390   : > { %15255 = vst [vmem:[#allocation345_spill] sm:$0xff] %v9883_v48  ;;  %15256 = vst [vmem:[#allocation346_spill] sm:$0xff] %v9885_v58  ;;  %v9902_v48 = vld [vmem:[%s14737_s11 + $0xb8] sm:$0xff] }
 0x391   : > { %3787 = vperm.xlu0 %7206, %v9836_v35  }
 0x392   : > { %3239 = vperm.xlu1 %7201, %v9891_v55  }
 0x393   : > { %v9894_v60 = vpop.permute.xlu1 %2857  ;;  %v9896_v52 = vpop.permute.xlu0 %3595 }
 0x394   : > { %15257 = vst [vmem:[#allocation347_spill] sm:$0xff] %v9894_v60  ;;  %15258 = vst [vmem:[#allocation348_spill] sm:$0xff] %v9896_v52  ;;  %v9913_v60 = vld [vmem:[%s14737_s11 + $0xc8] sm:$0xff] }
 0x395   : > { %3795 = vperm.xlu0 %7206, %v9847_v22  }
 0x396   : > { %3247 = vperm.xlu1 %7201, %v9902_v48  }
 0x397   : > { %v9905_v58 = vpop.permute.xlu1 %2867  ;;  %v9907_v54 = vpop.permute.xlu0 %3603 }
 0x398   : > { %15259 = vst [vmem:[#allocation349_spill] sm:$0xff] %v9905_v58  ;;  %15260 = vst [vmem:[#allocation350_spill] sm:$0xff] %v9907_v54  ;;  %v9924_v58 = vld [vmem:[%s14737_s11 + $0xd8] sm:$0xff] }
 0x399   : > { %3803 = vperm.xlu0 %7206, %v9858_v40  }
 0x39a   : > { %3255 = vperm.xlu1 %7201, %v9913_v60  }
 0x39b   : > { %v9916_v52 = vpop.permute.xlu1 %2877  ;;  %v9918_v50 = vpop.permute.xlu0 %3611 }
 0x39c   : > { %15261 = vst [vmem:[#allocation351_spill] sm:$0xff] %v9916_v52  ;;  %15262 = vst [vmem:[#allocation352_spill] sm:$0xff] %v9918_v50  ;;  %v9935_v52 = vld [vmem:[%s14737_s11 + $0xe8] sm:$0xff] }
 0x39d   : > { %3811 = vperm.xlu0 %7206, %v9869_v19  }
 0x39e   : > { %3263 = vperm.xlu1 %7201, %v9924_v58  }
 0x39f   : > { %v9927_v54 = vpop.permute.xlu1 %2887  ;;  %v9929_v28 = vpop.permute.xlu0 %3619 }
 0x3a0   : > { %15263 = vst [vmem:[#allocation353_spill] sm:$0xff] %v9927_v54  ;;  %15264 = vst [vmem:[#allocation354_spill] sm:$0xff] %v9929_v28  ;;  %v9946_v54 = vld [vmem:[%s14737_s11 + $0xf8] sm:$0xff] }
 0x3a1   : > { %3819 = vperm.xlu0 %7206, %v9880_v62  }
 0x3a2   : > { %3271 = vperm.xlu1 %7201, %v9935_v52  }
 0x3a3   : > { %v9938_v50 = vpop.permute.xlu0 %3627 }
 0x3a4   : > { %15265 = vst [vmem:[#allocation355_spill] sm:$0xff] %v9938_v50  ;;  %v9940_v1 = vpop.permute.xlu1 %2963 }
 0x3a5   : > { %15266 = vst [vmem:[#allocation356_spill] sm:$0xff] %v9940_v1  ;;  %3827 = vperm.xlu0 %7206, %v9891_v55  }
 0x3a6   : > { %3279 = vperm.xlu1 %7201, %v9946_v54  }
 0x3a7   : > { %v9949_v28 = vpop.permute.xlu0 %3635 }
 0x3a8   : > { %15267 = vst [vmem:[#allocation357_spill] sm:$0xff] %v9949_v28  ;;  %v9951_v63 = vpop.permute.xlu1 %2967 }
 0x3a9   : > { %15268 = vst [vmem:[#allocation358_spill] sm:$0xff] %v9951_v63  ;;  %3835 = vperm.xlu0 %7206, %v9902_v48  }
 0x3aa   : > { %7203 = vset.pattern.permute.xlu1 %v15070_v44 }
 0x3ab   : > { %3355 = vperm.xlu1 %7203, %v9470_v8   ;;  %v9956_v50 = vpop.permute.xlu0 %3643 }
 0x3ac   : > { %15269 = vst [vmem:[#allocation359_spill] sm:$0xff] %v9956_v50  ;;  %v9958_v1 = vpop.permute.xlu1 %2975 }
 0x3ad   : > { %15270 = vst [vmem:[#allocation360_spill] sm:$0xff] %v9958_v1  ;;  %3843 = vperm.xlu0 %7206, %v9913_v60   ;;  %v15278_v1 = vmov 6  }
 0x3af   : > { %3359 = vperm.xlu1 %7203, %v9420_v59   ;;  %v9962_v3 = vpop.permute.xlu0 %3651 }
 0x3b0   : > { %15271 = vst [vmem:[#allocation361_spill] sm:$0xff] %v9962_v3  ;;  %v9964_v21 = vpop.permute.xlu1 %2983 }
 0x3b1   : > { %15272 = vst [vmem:[#allocation362_spill] sm:$0xff] %v9964_v21  ;;  %3851 = vperm.xlu0 %7206, %v9924_v58  }
 0x3b3   : > { %3367 = vperm.xlu1 %7203, %v9481_v27   ;;  %v9968_v28 = vpop.permute.xlu0 %3659 }
 0x3b4   : > { %15273 = vst [vmem:[#allocation363_spill] sm:$0xff] %v9968_v28  ;;  %v9970_v44 = vpop.permute.xlu1 %2991 }
 0x3b5   : > { %15274 = vst [vmem:[#allocation364_spill] sm:$0xff] %v9970_v44  ;;  %3859 = vperm.xlu0 %7206, %v9935_v52  }
 0x3b7   : > { %3375 = vperm.xlu1 %7203, %v9492_v5   ;;  %v9974_v50 = vpop.permute.xlu0 %3667 }
 0x3b8   : > { %15275 = vst [vmem:[#allocation365_spill] sm:$0xff] %v9974_v50  ;;  %v9976_v63 = vpop.permute.xlu1 %2999 }
 0x3b9   : > { %15276 = vst [vmem:[#allocation366_spill] sm:$0xff] %v9976_v63  ;;  %3867 = vperm.xlu0 %7206, %v9946_v54  }
 0x3bb   : > { %3383 = vperm.xlu1 %7203, %v9503_v14  }
 0x3bc   : > { %v9980_v3 = vpop.permute.xlu1 %3007  ;;  %v9982_v21 = vpop.permute.xlu0 %1941 }
 0x3bd   : > { %15277 = vst [vmem:[#allocation367_spill] sm:$0xff] %v9980_v3  ;;  %7208 = vset.pattern.permute.xlu0 %v15278_v1 }
 0x3be   : > { %2141 = vperm.xlu0 %7208, %v9243_v46  }
 0x3bf   : > { %3391 = vperm.xlu1 %7203, %v9517_v34  }
 0x3c0   : > { %v9987_v28 = vpop.permute.xlu1 %3015  ;;  %v9989_v44 = vpop.permute.xlu0 %1953 }
 0x3c1   : > { %15279 = vst [vmem:[#allocation368_spill] sm:$0xff] %v9987_v28 }
 0x3c2   : > { %2153 = vperm.xlu0 %7208, %v9260_v33  }
 0x3c3   : > { %3399 = vperm.xlu1 %7203, %v9542_v18  }
 0x3c4   : > { %v9993_v50 = vpop.permute.xlu1 %3023  ;;  %v9995_v63 = vpop.permute.xlu0 %1961 }
 0x3c5   : > { %15280 = vst [vmem:[#allocation369_spill] sm:$0xff] %v9993_v50 }
 0x3c6   : > { %2161 = vperm.xlu0 %7208, %v9271_v57  }
 0x3c7   : > { %3407 = vperm.xlu1 %7203, %v9576_v31  }
 0x3c8   : > { %v9999_v3 = vpop.permute.xlu1 %3031  ;;  %v10001_v46 = vpop.permute.xlu0 %1969 }
 0x3c9   : > { %15281 = vst [vmem:[#allocation370_spill] sm:$0xff] %v9999_v3 }
 0x3ca   : > { %2169 = vperm.xlu0 %7208, %v9282_v30  }
 0x3cb   : > { %3415 = vperm.xlu1 %7203, %v9603_v13  }
 0x3cc   : > { %v10005_v28 = vpop.permute.xlu1 %3039  ;;  %v10007_v33 = vpop.permute.xlu0 %1977 }
 0x3cd   : > { %15282 = vst [vmem:[#allocation371_spill] sm:$0xff] %v10005_v28 }
 0x3ce   : > { %2177 = vperm.xlu0 %7208, %v9293_v41  }
 0x3cf   : > { %3423 = vperm.xlu1 %7203, %v9624_v23  }
 0x3d0   : > { %v10011_v50 = vpop.permute.xlu1 %3047  ;;  %v10013_v57 = vpop.permute.xlu0 %1985 }
 0x3d1   : > { %15283 = vst [vmem:[#allocation372_spill] sm:$0xff] %v10011_v50 }
 0x3d2   : > { %2185 = vperm.xlu0 %7208, %v9304_v11  }
 0x3d3   : > { %3431 = vperm.xlu1 %7203, %v9640_v9  }
 0x3d4   : > { %v10017_v3 = vpop.permute.xlu1 %3055  ;;  %v10019_v30 = vpop.permute.xlu0 %1993 }
 0x3d5   : > { %15284 = vst [vmem:[#allocation373_spill] sm:$0xff] %v10017_v3 }
 0x3d6   : > { %2193 = vperm.xlu0 %7208, %v9315_v49  }
 0x3d7   : > { %3439 = vperm.xlu1 %7203, %v9655_v4  }
 0x3d8   : > { %v10023_v28 = vpop.permute.xlu1 %3063  ;;  %v10025_v41 = vpop.permute.xlu0 %2001 }
 0x3d9   : > { %15285 = vst [vmem:[#allocation374_spill] sm:$0xff] %v10023_v28 }
 0x3da   : > { %2201 = vperm.xlu0 %7208, %v9326_v51  }
 0x3db   : > { %3447 = vperm.xlu1 %7203, %v9668_v56  }
 0x3dc   : > { %v10029_v50 = vpop.permute.xlu1 %3071  ;;  %v10031_v11 = vpop.permute.xlu0 %2009 }
 0x3dd   : > { %15286 = vst [vmem:[#allocation375_spill] sm:$0xff] %v10029_v50 }
 0x3de   : > { %2209 = vperm.xlu0 %7208, %v9337_v53  }
 0x3df   : > { %3455 = vperm.xlu1 %7203, %v9679_v36  }
 0x3e0   : > { %v10035_v3 = vpop.permute.xlu1 %3079  ;;  %v10037_v49 = vpop.permute.xlu0 %2017 }
 0x3e1   : > { %15287 = vst [vmem:[#allocation376_spill] sm:$0xff] %v10035_v3  ;;  %15288 = vst [vmem:[#allocation377_spill] sm:$0xff] %v10037_v49 }
 0x3e2   : > { %2217 = vperm.xlu0 %7208, %v9349_v16  }
 0x3e3   : > { %3463 = vperm.xlu1 %7203, %v9690_v26  }
 0x3e4   : > { %v10041_v28 = vpop.permute.xlu0 %2025 }
 0x3e5   : > { %15289 = vst [vmem:[#allocation378_spill] sm:$0xff] %v10041_v28  ;;  %v10043_v51 = vpop.permute.xlu1 %3155 }
 0x3e6   : > { %15290 = vst [vmem:[#allocation379_spill] sm:$0xff] %v10043_v51  ;;  %2225 = vperm.xlu0 %7208, %v9360_v2  }
 0x3e7   : > { %3471 = vperm.xlu1 %7203, %v9701_v61  }
 0x3e8   : > { %v10047_v50 = vpop.permute.xlu0 %2033 }
 0x3e9   : > { %15291 = vst [vmem:[#allocation380_spill] sm:$0xff] %v10047_v50  ;;  %v10049_v53 = vpop.permute.xlu1 %3163  ;;  %v15354_v50 = vld [vmem:[#allocation102_spill] sm:$0xff] }
 0x3ea   : > { %15292 = vst [vmem:[#allocation381_spill] sm:$0xff] %v10049_v53  ;;  %2233 = vperm.xlu0 %7208, %v9371_v45  }
 0x3eb   : > { %7205 = vset.pattern.permute.xlu1 %v15138_v25 }
 0x3ec   : > { %3547 = vperm.xlu1 %7205, %v9775_v47   ;;  %v10054_v16 = vpop.permute.xlu0 %2041  ;;  %v15299_v47 = vld [vmem:[#allocation256_spill] sm:$0xff] }
 0x3ed   : > { %15293 = vst [vmem:[#allocation382_spill] sm:$0xff] %v10054_v16  ;;  %v10056_v3 = vpop.permute.xlu1 %3167  ;;  %v540_v16 = vld [vmem:[%s15199_s9 + $0x90] sm:$0xff] }
 0x3ee   : > { %15294 = vst [vmem:[#allocation383_spill] sm:$0xff] %v10056_v3  ;;  %2241 = vperm.xlu0 %7208, %v9382_v12   ;;  %v15349_v3 = vld [vmem:[#allocation41_spill] sm:$0xff] }
 0x3f0   : > { %3555 = vperm.xlu1 %7205, %v9420_v59   ;;  %v10060_v2 = vpop.permute.xlu0 %2049 }
 0x3f1   : > { %15295 = vst [vmem:[#allocation384_spill] sm:$0xff] %v10060_v2  ;;  %v10062_v51 = vpop.permute.xlu1 %3175 }
 0x3f2   : > { %15296 = vst [vmem:[#allocation385_spill] sm:$0xff] %v10062_v51  ;;  %2249 = vperm.xlu0 %7208, %v9393_v24  }
 0x3f4   : > { %3559 = vperm.xlu1 %7205, %v9792_v43   ;;  %v10066_v45 = vpop.permute.xlu0 %2057 }
 0x3f5   : > { %15297 = vst [vmem:[#allocation386_spill] sm:$0xff] %v10066_v45  ;;  %v10068_v25 = vpop.permute.xlu1 %3183 }
 0x3f6   : > { %15298 = vst [vmem:[#allocation387_spill] sm:$0xff] %v10068_v25  ;;  %2257 = vperm.xlu0 %7208, %v15299_v47  }
 0x3f8   : > { %3567 = vperm.xlu1 %7205, %v9803_v17   ;;  %v10072_v53 = vpop.permute.xlu0 %2065 }
 0x3f9   : > { %15300 = vst [vmem:[#allocation256_spill] sm:$0xff] %v10072_v53  ;;  %v10074_v12 = vpop.permute.xlu1 %3191  ;;  %v838_v53 = vmul.f32 0.5, %v15349_v3 }
 0x3fa   : > { %15301 = vst [vmem:[#allocation388_spill] sm:$0xff] %v10074_v12  ;;  %3943 = vperm.xlu0 %7208, %v9470_v8  }
 0x3fc   : > { %3575 = vperm.xlu1 %7205, %v9814_v0   ;;  %v10078_v51 = vpop.permute.xlu0 %3743 }
 0x3fd   : > { %15302 = vst [vmem:[#allocation389_spill] sm:$0xff] %v10078_v51  ;;  %v10080_v24 = vpop.permute.xlu1 %3199 }
 0x3fe   : > { %15303 = vst [vmem:[#allocation390_spill] sm:$0xff] %v10080_v24  ;;  %3955 = vperm.xlu0 %7208, %v9481_v27  }
 0x400   : > { %3583 = vperm.xlu1 %7205, %v9825_v37   ;;  %v10084_v43 = vpop.permute.xlu0 %3755 }
 0x401   : > { %15304 = vst [vmem:[#allocation391_spill] sm:$0xff] %v10084_v43  ;;  %v10086_v47 = vpop.permute.xlu1 %3207 }
 0x402   : > { %15305 = vst [vmem:[#allocation392_spill] sm:$0xff] %v10086_v47  ;;  %3963 = vperm.xlu0 %7208, %v9492_v5   ;;  %v15348_v47 = vmov 7  }
 0x404   : > { %3591 = vperm.xlu1 %7205, %v9836_v35   ;;  %v10090_v17 = vpop.permute.xlu0 %3763 }
 0x405   : > { %15306 = vst [vmem:[#allocation393_spill] sm:$0xff] %v10090_v17  ;;  %v10092_v12 = vpop.permute.xlu1 %3215 }
 0x406   : > { %15307 = vst [vmem:[#allocation394_spill] sm:$0xff] %v10092_v12  ;;  %3971 = vperm.xlu0 %7208, %v9503_v14   ;;  %v530_v12 = vld [vmem:[%s15199_s9 + $0x40] sm:$0xff] }
 0x408   : > { %3599 = vperm.xlu1 %7205, %v9847_v22   ;;  %v10096_v0 = vpop.permute.xlu0 %3771 }
 0x409   : > { %15308 = vst [vmem:[#allocation395_spill] sm:$0xff] %v10096_v0  ;;  %v10098_v51 = vpop.permute.xlu1 %3223 }
 0x40a   : > { %15309 = vst [vmem:[#allocation396_spill] sm:$0xff] %v10098_v51  ;;  %3979 = vperm.xlu0 %7208, %v9517_v34  }
 0x40c   : > { %3607 = vperm.xlu1 %7205, %v9858_v40   ;;  %v10102_v37 = vpop.permute.xlu0 %3779 }
 0x40d   : > { %15310 = vst [vmem:[#allocation397_spill] sm:$0xff] %v10102_v37  ;;  %v10104_v43 = vpop.permute.xlu1 %3231 }
 0x40e   : > { %15311 = vst [vmem:[#allocation398_spill] sm:$0xff] %v10104_v43  ;;  %3987 = vperm.xlu0 %7208, %v9542_v18   ;;  %v15343_v43 = vld [vmem:[#allocation39_spill] sm:$0xff] }
 0x40f   : > { %v836_v51 = vmul.f32 0.5, %v15343_v43  ;;  %v15346_v43 = vld [vmem:[#allocation165_spill] sm:$0xff] }
 0x410   : > { %3615 = vperm.xlu1 %7205, %v9869_v19   ;;  %v10108_v35 = vpop.permute.xlu0 %3787 }
 0x411   : > { %15312 = vst [vmem:[#allocation399_spill] sm:$0xff] %v10108_v35  ;;  %v10110_v17 = vpop.permute.xlu1 %3239 }
 0x412   : > { %15313 = vst [vmem:[#allocation400_spill] sm:$0xff] %v10110_v17  ;;  %3995 = vperm.xlu0 %7208, %v9576_v31   ;;  %v15342_v17 = vld [vmem:[#allocation37_spill] sm:$0xff] }
 0x414   : > { %3623 = vperm.xlu1 %7205, %v9880_v62   ;;  %v10114_v22 = vpop.permute.xlu0 %3795 }
 0x415   : > { %15314 = vst [vmem:[#allocation401_spill] sm:$0xff] %v10114_v22  ;;  %v10116_v0 = vpop.permute.xlu1 %3247 }
 0x416   : > { %15315 = vst [vmem:[#allocation402_spill] sm:$0xff] %v10116_v0  ;;  %4003 = vperm.xlu0 %7208, %v9603_v13  }
 0x418   : > { %3631 = vperm.xlu1 %7205, %v9891_v55   ;;  %v10120_v40 = vpop.permute.xlu0 %3803 }
 0x419   : > { %15316 = vst [vmem:[#allocation403_spill] sm:$0xff] %v10120_v40  ;;  %v10122_v37 = vpop.permute.xlu1 %3255 }
 0x41a   : > { %15317 = vst [vmem:[#allocation404_spill] sm:$0xff] %v10122_v37  ;;  %4011 = vperm.xlu0 %7208, %v9624_v23  }
 0x41c   : > { %3639 = vperm.xlu1 %7205, %v9902_v48   ;;  %v10126_v19 = vpop.permute.xlu0 %3811 }
 0x41d   : > { %15318 = vst [vmem:[#allocation405_spill] sm:$0xff] %v10126_v19  ;;  %v10128_v35 = vpop.permute.xlu1 %3263 }
 0x41e   : > { %15319 = vst [vmem:[#allocation406_spill] sm:$0xff] %v10128_v35  ;;  %4019 = vperm.xlu0 %7208, %v9640_v9  }
 0x420   : > { %3647 = vperm.xlu1 %7205, %v9913_v60   ;;  %v10132_v62 = vpop.permute.xlu0 %3819 }
 0x421   : > { %15320 = vst [vmem:[#allocation407_spill] sm:$0xff] %v10132_v62  ;;  %v10134_v22 = vpop.permute.xlu1 %3271  ;;  %v15327_v62 = vld [vmem:[#allocation94_spill] sm:$0xff] }
 0x422   : > { %15321 = vst [vmem:[#allocation408_spill] sm:$0xff] %v10134_v22  ;;  %4027 = vperm.xlu0 %7208, %v9655_v4  }
 0x424   : > { %3655 = vperm.xlu1 %7205, %v9924_v58   ;;  %v10138_v55 = vpop.permute.xlu0 %3827  ;;  %v15328_v58 = vld [vmem:[#allocation63_spill] sm:$0xff] }
 0x425   : > { %15322 = vst [vmem:[#allocation409_spill] sm:$0xff] %v10138_v55  ;;  %v10140_v40 = vpop.permute.xlu1 %3279  ;;  %v1289_v22 = vmul.f32 %v15328_v58, %v15327_v62  ;;  %v15334_v62 = vld [vmem:[#allocation61_spill] sm:$0xff] }
 0x426   : > { %15323 = vst [vmem:[#allocation410_spill] sm:$0xff] %v10140_v40  ;;  %4035 = vperm.xlu0 %7208, %v9668_v56   ;;  %v15330_v56 = vld [vmem:[#allocation191_spill] sm:$0xff]  ;;  %v15331_v40 = vld [vmem:[#allocation96_spill] sm:$0xff] }
 0x428   : > { %3663 = vperm.xlu1 %7205, %v9935_v52   ;;  %v10144_v48 = vpop.permute.xlu0 %3835  ;;  %v1485_v52 = vmul.f32 %v15331_v40, %v15330_v56 }
 0x429   : > { %15324 = vst [vmem:[#allocation411_spill] sm:$0xff] %v10144_v48 }
 0x42a   : > { %v10146_v19 = vpop.permute.xlu1 %3355  ;;  %4043 = vperm.xlu0 %7208, %v9679_v36  }
 0x42b   : > { %15325 = vst [vmem:[#allocation412_spill] sm:$0xff] %v10146_v19  ;;  %v15333_v19 = vld [vmem:[#allocation29_spill] sm:$0xff] }
 0x42c   : > { %3671 = vperm.xlu1 %7205, %v9946_v54   ;;  %v10150_v60 = vpop.permute.xlu0 %3843  ;;  %v825_v36 = vmul.f32 0.5, %v15333_v19  ;;  %v523_v54 = vld [vmem:[%s15199_s9 + $0x8] sm:$0xff]  ;;  %v528_v19 = vld [vmem:[%s15199_s9 + $0x30] sm:$0xff] }
 0x42d   : > { %15326 = vst [vmem:[#allocation413_spill] sm:$0xff] %v10150_v60  ;;  %v1321_v60 = vadd.f32 %v1289_v22, %v15334_v62  ;;  %v15339_v62 = vld [vmem:[#allocation193_spill] sm:$0xff] }
 0x42e   : > { %v10154_v55 = vpop.permute.xlu1 %3359  ;;  %4051 = vperm.xlu0 %7208, %v9690_v26  }
 0x42f   : > { %15329 = vst [vmem:[#allocation94_spill] sm:$0xff] %v10154_v55  ;;  %v15335_v55 = vld [vmem:[#allocation98_spill] sm:$0xff]  ;;  %v1517_v22 = vadd.f32 %v1485_v52, %v1321_v60  ;;  %v532_v60 = vld [vmem:[%s15199_s9 + $0x50] sm:$0xff] }
 0x430   : > { %7207 = vset.pattern.permute.xlu1 %v15216_v39  ;;  %v10160_v48 = vpop.permute.xlu0 %3851  ;;  %v1292_v26 = vmul.f32 %v15328_v58, %v15335_v55  ;;  %v15337_v39 = vld [vmem:[#allocation31_spill] sm:$0xff]  ;;  %v1488_v55 = vmul.f32 %v15331_v40, %v15339_v62  ;;  %v534_v52 = vld [vmem:[%s15199_s9 + $0x60] sm:$0xff]  ;;  %v15345_v62 = vld [vmem:[#allocation100_spill] sm:$0xff] }
 0x431   : > { %15332 = vst [vmem:[#allocation63_spill] sm:$0xff] %v10160_v48  ;;  %3747 = vperm.xlu1 %7207, %v9470_v8   ;;  %v828_v56 = vmul.f32 0.5, %v15337_v39  ;;  %v15338_v48 = vld [vmem:[#allocation33_spill] sm:$0xff]  ;;  %v526_v8 = vld [vmem:[%s15199_s9 + $0x20] sm:$0xff]  ;;  %v10234_v2 = vadd.f32 %v836_v51, %v534_v52  ;;  %v15358_v52 = vld [vmem:[#allocation47_spill] sm:$0xff] }
 0x432   : > { %v10170_v35 = vpop.permute.xlu1 %3367  ;;  %4059 = vperm.xlu0 %7208, %v9701_v61   ;;  %v830_v37 = vmul.f32 0.5, %v15338_v48  ;;  %v15341_v61 = vld [vmem:[#allocation35_spill] sm:$0xff]  ;;  %v834_v48 = vmul.f32 0.5, %v15342_v17  ;;  %v1294_v17 = vmul.f32 %v15328_v58, %v15345_v62  ;;  %v7295_v62 = vld [vmem:[%s14734_s8] sm:$0xff] }
 0x433   : > { %15336 = vst [vmem:[#allocation191_spill] sm:$0xff] %v10170_v35  ;;  %v10185_v35 = vadd.f32 %v825_v36, %v523_v54  ;;  %v832_v39 = vmul.f32 0.5, %v15341_v61  ;;  %v15344_v36 = vld [vmem:[#allocation66_spill] sm:$0xff]  ;;  %v1877_v61 = vmul.f32 %v9582_v10, %v9720_v7  ;;  %v10210_v24 = vadd.f32 %v828_v56, %v526_v8  ;;  %v536_v7 = vld [vmem:[%s15199_s9 + $0x70] sm:$0xff]  ;;  %v15351_v8 = vld [vmem:[#allocation45_spill] sm:$0xff] }
 0x434   : > { %v10183_v0 = vpop.permute.xlu0 %3859  ;;  %v1324_v54 = vadd.f32 %v1292_v26, %v15344_v36  ;;  %v10212_v25 = vadd.f32 %v830_v37, %v528_v19  ;;  %v15350_v26 = vld [vmem:[#allocation43_spill] sm:$0xff]  ;;  %v538_v56 = vld [vmem:[%s15199_s9 + $0x80] sm:$0xff]  ;;  %v842_v37 = vmul.f32 0.5, %v15351_v8  ;;  %v1296_v8 = vmul.f32 %v15328_v58, %v15354_v50  ;;  %v15359_v50 = vld [vmem:[#allocation197_spill] sm:$0xff] }
 0x435   : > { %15340 = vst [vmem:[#allocation96_spill] sm:$0xff] %v10183_v0  ;;  %3751 = vperm.xlu1 %7207, %v9420_v59   ;;  %v1681_v59 = vmul.f32 %v9563_v29, %v15346_v43  ;;  %v840_v36 = vmul.f32 0.5, %v15350_v26  ;;  %v15352_v43 = vld [vmem:[#allocation195_spill] sm:$0xff]  ;;  %v10230_v45 = vadd.f32 %v832_v39, %v530_v12  ;;  %v1880_v39 = vmul.f32 %v9582_v10, %v9726_v38  ;;  %v542_v38 = vld [vmem:[%s15199_s9 + $0xa0] sm:$0xff] }
 0x436   : > { %v10207_v0 = vpop.permute.xlu1 %3375  ;;  %7210 = vset.pattern.permute.xlu0 %v15348_v47  ;;  %v1520_v19 = vadd.f32 %v1488_v55, %v1324_v54  ;;  %v1490_v3 = vmul.f32 %v15331_v40, %v15352_v43  ;;  %v15355_v55 = vld [vmem:[#allocation68_spill] sm:$0xff]  ;;  %v844_v43 = vmul.f32 0.5, %v15358_v52 }
 0x437   : > { %15347 = vst [vmem:[#allocation29_spill] sm:$0xff] %v10207_v0  ;;  %2333 = vperm.xlu0 %7210, %v7295_v62   ;;  %v1713_v26 = vadd.f32 %v1681_v59, %v1517_v22  ;;  %v10232_v62 = vadd.f32 %v834_v48, %v532_v60  ;;  %v1326_v54 = vadd.f32 %v1294_v17, %v15355_v55  ;;  %v15356_v22 = vld [vmem:[#allocation168_spill] sm:$0xff]  ;;  %v7296_v17 = vld [vmem:[%s14734_s8 + $0x18] sm:$0xff] }
 0x438   : > { %v10228_v0 = vpop.permute.xlu0 %3867  ;;  %v1684_v59 = vmul.f32 %v9563_v29, %v15356_v22  ;;  %v10249_v48 = vadd.f32 %v838_v53, %v536_v7  ;;  %v10251_v60 = vadd.f32 %v840_v36, %v538_v56  ;;  %v15360_v7 = vld [vmem:[#allocation229_spill] sm:$0xff]  ;;  %v15362_v22 = vld [vmem:[#allocation70_spill] sm:$0xff] }
 0x439   : > { %15353 = vst [vmem:[#allocation61_spill] sm:$0xff] %v10228_v0  ;;  %3759 = vperm.xlu1 %7207, %v9481_v27   ;;  %v1909_v12 = vadd.f32 %v1877_v61, %v1713_v26  ;;  %v1492_v27 = vmul.f32 %v15331_v40, %v15359_v50  ;;  %v10259_v61 = vadd.f32 %v842_v37, %v540_v16  ;;  %v15361_v26 = vld [vmem:[#allocation49_spill] sm:$0xff]  ;;  %v15363_v50 = vld [vmem:[#allocation104_spill] sm:$0xff] }
 0x43a   : > { %v10247_v51 = vpop.permute.xlu1 %3383  ;;  %v1522_v53 = vadd.f32 %v1490_v3, %v1326_v54  ;;  %v2073_v36 = vmul.f32 %v9594_v15, %v15360_v7  ;;  %v1716_v56 = vadd.f32 %v1684_v59, %v1520_v19  ;;  %v846_v55 = vmul.f32 0.5, %v15361_v26  ;;  %v544_v3 = vld [vmem:[%s15199_s9 + $0xb0] sm:$0xff]  ;;  %v15366_v26 = vld [vmem:[#allocation106_spill] sm:$0xff] }
 0x43b   : > { %15357 = vst [vmem:[#allocation98_spill] sm:$0xff] %v10247_v51  ;;  %2345 = vperm.xlu0 %7210, %v7296_v17   ;;  %v1328_v52 = vadd.f32 %v1296_v8, %v15362_v22  ;;  %v1298_v0 = vmul.f32 %v15328_v58, %v15363_v50  ;;  %v15364_v51 = vld [vmem:[#allocation170_spill] sm:$0xff]  ;;  %v1882_v19 = vmul.f32 %v9582_v10, %v9732_v6  ;;  %v15368_v6 = vld [vmem:[#allocation232_spill] sm:$0xff] }
 0x43c   : > { %v1686_v16 = vmul.f32 %v9563_v29, %v15364_v51  ;;  %v1912_v54 = vadd.f32 %v1880_v39, %v1716_v56  ;;  %v2105_v59 = vadd.f32 %v2073_v36, %v1909_v12  ;;  %v10281_v7 = vadd.f32 %v844_v43, %v542_v38  ;;  %v15367_v22 = vld [vmem:[#allocation198_spill] sm:$0xff]  ;;  %v7297_v39 = vld [vmem:[%s14734_s8 + $0x28] sm:$0xff] }
 0x43d   : > { %3767 = vperm.xlu1 %7207, %v9492_v5   ;;  %v2142_v37 = vpop.permute.xlu0 %2141  ;;  %v1300_v51 = vmul.f32 %v15328_v58, %v15366_v26  ;;  %v1524_v5 = vadd.f32 %v1492_v27, %v1328_v52  ;;  %v1494_v50 = vmul.f32 %v15331_v40, %v15367_v22  ;;  %v2076_v12 = vmul.f32 %v9594_v15, %v15368_v6  ;;  %v15370_v52 = vld [vmem:[#allocation172_spill] sm:$0xff]  ;;  %v15371_v22 = vld [vmem:[#allocation314_spill] sm:$0xff] }
 0x43e   : > { %v2269_v8 = vmul.f32 %v9609_v32, %v2142_v37  ;;  %v10279_v17 = vpop.permute.xlu1 %3391  ;;  %v2465_v36 = vmul.f32 %v9628_v20, %v9614_v42  ;;  %v1718_v43 = vadd.f32 %v1686_v16, %v1522_v53  ;;  %v10294_v56 = vadd.f32 %v846_v55, %v544_v3  ;;  %v15369_v37 = vld [vmem:[#allocation72_spill] sm:$0xff]  ;;  %v15373_v55 = vld [vmem:[#allocation74_spill] sm:$0xff] }
 0x43f   : > { %15365 = vst [vmem:[#allocation31_spill] sm:$0xff] %v10279_v17  ;;  %2353 = vperm.xlu0 %7210, %v7297_v39   ;;  %v1330_v27 = vadd.f32 %v1298_v0, %v15369_v37  ;;  %v1688_v26 = vmul.f32 %v9563_v29, %v15370_v52  ;;  %v1884_v17 = vmul.f32 %v9582_v10, %v15371_v22  ;;  %v15374_v0 = vld [vmem:[#allocation200_spill] sm:$0xff]  ;;  %v7298_v37 = vld [vmem:[%s14734_s8 + $0x38] sm:$0xff] }
 0x440   : > { %v2301_v38 = vadd.f32 %v2269_v8, %v2105_v59  ;;  %v1914_v28 = vadd.f32 %v1882_v19, %v1718_v43  ;;  %v2108_v49 = vadd.f32 %v2076_v12, %v1912_v54  ;;  %v1332_v16 = vadd.f32 %v1300_v51, %v15373_v55  ;;  %v15376_v54 = vld [vmem:[#allocation295_spill] sm:$0xff]  ;;  %v15379_v52 = vld [vmem:[#allocation316_spill] sm:$0xff] }
 0x441   : > { %3775 = vperm.xlu1 %7207, %v9503_v14   ;;  %v2154_v39 = vpop.permute.xlu0 %2153  ;;  %v1526_v3 = vadd.f32 %v1494_v50, %v1330_v27  ;;  %v1496_v59 = vmul.f32 %v15331_v40, %v15374_v0  ;;  %v1720_v8 = vadd.f32 %v1688_v26, %v1524_v5  ;;  %v15375_v14 = vld [vmem:[#allocation234_spill] sm:$0xff]  ;;  %v2468_v12 = vmul.f32 %v9628_v20, %v15376_v54  ;;  %v15377_v50 = vld [vmem:[#allocation108_spill] sm:$0xff] }
 0x442   : > { %v2497_v6 = vadd.f32 %v2465_v36, %v2301_v38  ;;  %v2272_v42 = vmul.f32 %v9609_v32, %v2154_v39  ;;  %v10303_v53 = vpop.permute.xlu1 %3399  ;;  %v2078_v19 = vmul.f32 %v9594_v15, %v15375_v14  ;;  %v1302_v43 = vmul.f32 %v15328_v58, %v15377_v50  ;;  %v15378_v38 = vld [vmem:[#allocation174_spill] sm:$0xff]  ;;  %v7299_v50 = vld [vmem:[%s14734_s8 + $0x48] sm:$0xff] }
 0x443   : > { %15372 = vst [vmem:[#allocation33_spill] sm:$0xff] %v10303_v53  ;;  %2361 = vperm.xlu0 %7210, %v7298_v37   ;;  %v1690_v5 = vmul.f32 %v9563_v29, %v15378_v38  ;;  %v1916_v27 = vadd.f32 %v1884_v17, %v1720_v8  ;;  %v1886_v26 = vmul.f32 %v9582_v10, %v15379_v52  ;;  %v15380_v39 = vld [vmem:[#allocation294_spill] sm:$0xff]  ;;  %v15384_v8 = vld [vmem:[#allocation109_spill] sm:$0xff]  ;;  %v15386_v52 = vld [vmem:[#allocation76_spill] sm:$0xff] }
 0x444   : > { %v10316_v36 = vadd.f32 %v2497_v6, %v10185_v35  ;;  %v2304_v51 = vadd.f32 %v2272_v42, %v2108_v49  ;;  %v2110_v35 = vadd.f32 %v2078_v19, %v1914_v28  ;;  %v15382_v42 = vld [vmem:[#allocation111_spill] sm:$0xff]  ;;  %v15383_v14 = vld [vmem:[#allocation202_spill] sm:$0xff]  ;;  %v2080_v54 = vmul.f32 %v9594_v15, %v15384_v8 }
 0x445   : > { %3783 = vperm.xlu1 %7207, %v9517_v34   ;;  %v2162_v22 = vpop.permute.xlu0 %2161  ;;  %v1304_v37 = vmul.f32 %v15328_v58, %v15382_v42  ;;  %v1498_v17 = vmul.f32 %v15331_v40, %v15383_v14  ;;  %v1722_v34 = vadd.f32 %v1690_v5, %v1526_v3  ;;  %v1528_v28 = vadd.f32 %v1496_v59, %v1332_v16  ;;  %v15385_v19 = vld [vmem:[#allocation298_spill] sm:$0xff]  ;;  %v15387_v42 = vld [vmem:[#allocation176_spill] sm:$0xff] }
 0x446   : > { %v2562_v55 = vmul.f32 %v15380_v39, %v10316_v36  ;;  %v2500_v0 = vadd.f32 %v2468_v12, %v2304_v51  ;;  %v2274_v49 = vmul.f32 %v9609_v32, %v2162_v22  ;;  %v10328_v6 = vpop.permute.xlu1 %3407  ;;  %v2470_v12 = vmul.f32 %v9628_v20, %v15385_v19  ;;  %v15391_v19 = vld [vmem:[#allocation204_spill] sm:$0xff] }
 0x447   : > { %15381 = vst [vmem:[#allocation193_spill] sm:$0xff] %v10328_v6  ;;  %2369 = vperm.xlu0 %7210, %v7299_v50   ;;  %v1334_v22 = vadd.f32 %v1302_v43, %v15386_v52  ;;  %v1692_v14 = vmul.f32 %v9563_v29, %v15387_v42  ;;  %v1918_v3 = vadd.f32 %v1886_v26, %v1722_v34  ;;  %v15388_v50 = vld [vmem:[#allocation318_spill] sm:$0xff]  ;;  %v15393_v34 = vld [vmem:[#allocation300_spill] sm:$0xff]  ;;  %v10797_v6 = vld [vmem:[%s14737_s11 + $0xc8] sm:$0xff] }
 0x448   : > { %2594 = vst [vmem:[#allocation12 + $0x8] sm:$0xff] %v2562_v55  ;;  %v10342_v51 = vadd.f32 %v2500_v0, %v10210_v24  ;;  %v2306_v38 = vadd.f32 %v2274_v49, %v2110_v35  ;;  %v2112_v5 = vadd.f32 %v2080_v54, %v1916_v27  ;;  %v1888_v16 = vmul.f32 %v9582_v10, %v15388_v50  ;;  %v15390_v43 = vld [vmem:[#allocation78_spill] sm:$0xff]  ;;  %v7300_v54 = vld [vmem:[%s14734_s8 + $0x58] sm:$0xff]  ;;  %v15396_v50 = vld [vmem:[#allocation320_spill] sm:$0xff] }
 0x449   : > { %3791 = vperm.xlu1 %7207, %v9542_v18   ;;  %v2170_v8 = vpop.permute.xlu0 %2169  ;;  %v1336_v35 = vadd.f32 %v1304_v37, %v15390_v43  ;;  %v1530_v49 = vadd.f32 %v1498_v17, %v1334_v22  ;;  %v1500_v26 = vmul.f32 %v15331_v40, %v15391_v19  ;;  %v15392_v18 = vld [vmem:[#allocation112_spill] sm:$0xff]  ;;  %v15394_v17 = vld [vmem:[#allocation114_spill] sm:$0xff]  ;;  %v1890_v43 = vmul.f32 %v9582_v10, %v15396_v50 }
 0x44a   : > { %v2565_v59 = vmul.f32 %v15380_v39, %v10342_v51  ;;  %v2502_v55 = vadd.f32 %v2470_v12, %v2306_v38  ;;  %v2276_v24 = vmul.f32 %v9609_v32, %v2170_v8  ;;  %v10353_v0 = vpop.permute.xlu1 %3415  ;;  %v2082_v27 = vmul.f32 %v9594_v15, %v15392_v18  ;;  %v15395_v42 = vld [vmem:[#allocation178_spill] sm:$0xff]  ;;  %v15403_v50 = vld [vmem:[#allocation180_spill] sm:$0xff] }
 0x44b   : > { %15389 = vst [vmem:[#allocation35_spill] sm:$0xff] %v10353_v0  ;;  %2377 = vperm.xlu0 %7210, %v7300_v54   ;;  %v2472_v12 = vmul.f32 %v9628_v20, %v15393_v34  ;;  %v1724_v38 = vadd.f32 %v1692_v14, %v1528_v28  ;;  %v1306_v22 = vmul.f32 %v15328_v58, %v15394_v17  ;;  %v15399_v34 = vld [vmem:[#allocation206_spill] sm:$0xff] }
 0x44c   : > { %2597 = vst [vmem:[#allocation12 + $0x20] sm:$0xff] %v2565_v59  ;;  %v10366_v52 = vadd.f32 %v2502_v55, %v10212_v25  ;;  %v2308_v37 = vadd.f32 %v2276_v24, %v2112_v5  ;;  %v1694_v8 = vmul.f32 %v9563_v29, %v15395_v42  ;;  %v2114_v19 = vadd.f32 %v2082_v27, %v1918_v3  ;;  %v15398_v59 = vld [vmem:[#allocation117_spill] sm:$0xff]  ;;  %v15400_v3 = vld [vmem:[#allocation115_spill] sm:$0xff]  ;;  %v15401_v27 = vld [vmem:[#allocation302_spill] sm:$0xff] }
 0x44d   : > { %3799 = vperm.xlu1 %7207, %v9576_v31   ;;  %v2178_v18 = vpop.permute.xlu0 %2177  ;;  %v1920_v54 = vadd.f32 %v1888_v16, %v1724_v38  ;;  %v1308_v55 = vmul.f32 %v15328_v58, %v15398_v59  ;;  %v1532_v24 = vadd.f32 %v1500_v26, %v1336_v35  ;;  %v1502_v17 = vmul.f32 %v15331_v40, %v15399_v34  ;;  %v7301_v31 = vld [vmem:[%s14734_s8 + $0x68] sm:$0xff]  ;;  %v15402_v26 = vld [vmem:[#allocation80_spill] sm:$0xff] }
 0x44e   : > { %v2567_v28 = vmul.f32 %v15380_v39, %v10366_v52  ;;  %v2504_v25 = vadd.f32 %v2472_v12, %v2308_v37  ;;  %v2278_v14 = vmul.f32 %v9609_v32, %v2178_v18  ;;  %v10378_v5 = vpop.permute.xlu1 %3423  ;;  %v1726_v42 = vadd.f32 %v1694_v8, %v1530_v49  ;;  %v15404_v18 = vld [vmem:[#allocation322_spill] sm:$0xff] }
 0x44f   : > { %15397 = vst [vmem:[#allocation37_spill] sm:$0xff] %v10378_v5  ;;  %2385 = vperm.xlu0 %7210, %v7301_v31   ;;  %v2084_v16 = vmul.f32 %v9594_v15, %v15400_v3  ;;  %v2474_v12 = vmul.f32 %v9628_v20, %v15401_v27  ;;  %v1338_v37 = vadd.f32 %v1306_v22, %v15402_v26  ;;  %v15406_v22 = vld [vmem:[#allocation82_spill] sm:$0xff] }
 0x450   : > { %2599 = vst [vmem:[#allocation12 + $0x30] sm:$0xff] %v2567_v28  ;;  %v10392_v38 = vadd.f32 %v2504_v25, %v10230_v45  ;;  %v2310_v35 = vadd.f32 %v2278_v14, %v2114_v19  ;;  %v1696_v49 = vmul.f32 %v9563_v29, %v15403_v50  ;;  %v1922_v8 = vadd.f32 %v1890_v43, %v1726_v42  ;;  %v15407_v14 = vld [vmem:[#allocation208_spill] sm:$0xff]  ;;  %v15408_v42 = vld [vmem:[#allocation118_spill] sm:$0xff] }
 0x451   : > { %v1892_v59 = vmul.f32 %v9582_v10, %v15404_v18  ;;  %3807 = vperm.xlu1 %7207, %v9603_v13   ;;  %v2186_v34 = vpop.permute.xlu0 %2185  ;;  %v2116_v3 = vadd.f32 %v2084_v16, %v1920_v54  ;;  %v1340_v25 = vadd.f32 %v1308_v55, %v15406_v22  ;;  %v1504_v43 = vmul.f32 %v15331_v40, %v15407_v14  ;;  %v7302_v13 = vld [vmem:[%s14734_s8 + $0x78] sm:$0xff]  ;;  %v15409_v54 = vld [vmem:[#allocation304_spill] sm:$0xff]  ;;  %v15519_v5 = vld [vmem:[#allocation34_spill] sm:$0xff] }
 0x452   : > { %v2569_v31 = vmul.f32 %v15380_v39, %v10392_v38  ;;  %v2506_v28 = vadd.f32 %v2474_v12, %v2310_v35  ;;  %v2280_v45 = vmul.f32 %v9609_v32, %v2186_v34  ;;  %v10403_v19 = vpop.permute.xlu1 %3431  ;;  %v2086_v27 = vmul.f32 %v9594_v15, %v15408_v42  ;;  %v15410_v50 = vld [vmem:[#allocation120_spill] sm:$0xff]  ;;  %v15411_v34 = vld [vmem:[#allocation182_spill] sm:$0xff]  ;;  %15520 = vst [vmem:[#allocation304_spill] sm:$0xff] %v10797_v6 }
 0x453   : > { %15405 = vst [vmem:[#allocation39_spill] sm:$0xff] %v10403_v19  ;;  %v1728_v26 = vadd.f32 %v1696_v49, %v1532_v24  ;;  %2393 = vperm.xlu0 %7210, %v7302_v13   ;;  %v1534_v12 = vadd.f32 %v1502_v17, %v1338_v37  ;;  %v2476_v16 = vmul.f32 %v9628_v20, %v15409_v54  ;;  %v15412_v17 = vld [vmem:[#allocation324_spill] sm:$0xff]  ;;  %v15417_v54 = vld [vmem:[#allocation306_spill] sm:$0xff]  ;;  %v833_v0 = vmul.f32 0.5, %v15519_v5 }
 0x454   : > { %2601 = vst [vmem:[#allocation12 + $0x40] sm:$0xff] %v2569_v31  ;;  %v10416_v35 = vadd.f32 %v2506_v28, %v10232_v62  ;;  %v2312_v55 = vadd.f32 %v2280_v45, %v2116_v3  ;;  %v1310_v18 = vmul.f32 %v15328_v58, %v15410_v50  ;;  %v1698_v24 = vmul.f32 %v9563_v29, %v15411_v34  ;;  %v15414_v45 = vld [vmem:[#allocation123_spill] sm:$0xff]  ;;  %v15523_v5 = vld [vmem:[#allocation40_spill] sm:$0xff] }
 0x455   : > { %v1924_v49 = vadd.f32 %v1892_v59, %v1728_v26  ;;  %3815 = vperm.xlu1 %7207, %v9624_v23   ;;  %v2118_v22 = vadd.f32 %v2086_v27, %v1922_v8  ;;  %v2194_v14 = vpop.permute.xlu0 %2193  ;;  %v1894_v37 = vmul.f32 %v9582_v10, %v15412_v17  ;;  %v1312_v42 = vmul.f32 %v15328_v58, %v15414_v45  ;;  %v15415_v59 = vld [vmem:[#allocation210_spill] sm:$0xff]  ;;  %v15416_v8 = vld [vmem:[#allocation121_spill] sm:$0xff]  ;;  %v7303_v26 = vld [vmem:[%s14734_s8 + $0x88] sm:$0xff] }
 0x456   : > { %v2571_v31 = vmul.f32 %v15380_v39, %v10416_v35  ;;  %v2508_v62 = vadd.f32 %v2476_v16, %v2312_v55  ;;  %v2282_v28 = vmul.f32 %v9609_v32, %v2194_v14  ;;  %v10428_v3 = vpop.permute.xlu1 %3439  ;;  %v1536_v13 = vadd.f32 %v1504_v43, %v1340_v25  ;;  %v15418_v43 = vld [vmem:[#allocation84_spill] sm:$0xff]  ;;  %v15420_v45 = vld [vmem:[#allocation326_spill] sm:$0xff] }
 0x457   : > { %15413 = vst [vmem:[#allocation66_spill] sm:$0xff] %v10428_v3  ;;  %v1506_v23 = vmul.f32 %v15331_v40, %v15415_v59  ;;  %v2088_v27 = vmul.f32 %v9594_v15, %v15416_v8  ;;  %2401 = vperm.xlu0 %7210, %v7303_v26   ;;  %v2478_v16 = vmul.f32 %v9628_v20, %v15417_v54  ;;  %v15419_v14 = vld [vmem:[#allocation184_spill] sm:$0xff] }
 0x458   : > { %v1730_v55 = vadd.f32 %v1698_v24, %v1534_v12  ;;  %2603 = vst [vmem:[#allocation12 + $0x50] sm:$0xff] %v2571_v31  ;;  %v10442_v50 = vadd.f32 %v2508_v62, %v10234_v2  ;;  %v2314_v25 = vadd.f32 %v2282_v28, %v2118_v22  ;;  %v1342_v34 = vadd.f32 %v1310_v18, %v15418_v43  ;;  %v15422_v18 = vld [vmem:[#allocation86_spill] sm:$0xff]  ;;  %v15423_v28 = vld [vmem:[#allocation212_spill] sm:$0xff] }
 0x459   : > { %v1700_v17 = vmul.f32 %v9563_v29, %v15419_v14  ;;  %v1896_v59 = vmul.f32 %v9582_v10, %v15420_v45  ;;  %3823 = vperm.xlu1 %7207, %v9640_v9   ;;  %v2120_v8 = vadd.f32 %v2088_v27, %v1924_v49  ;;  %v2202_v26 = vpop.permute.xlu0 %2201  ;;  %v1344_v31 = vadd.f32 %v1312_v42, %v15422_v18  ;;  %v7304_v9 = vld [vmem:[%s14734_s8 + $0x98] sm:$0xff]  ;;  %v15424_v49 = vld [vmem:[#allocation124_spill] sm:$0xff] }
 0x45a   : > { %v1926_v3 = vadd.f32 %v1894_v37, %v1730_v55  ;;  %v2573_v12 = vmul.f32 %v15380_v39, %v10442_v50  ;;  %v2510_v24 = vadd.f32 %v2478_v16, %v2314_v25  ;;  %v2284_v2 = vmul.f32 %v9609_v32, %v2202_v26  ;;  %v10453_v22 = vpop.permute.xlu1 %3447  ;;  %v15425_v27 = vld [vmem:[#allocation308_spill] sm:$0xff] }
 0x45b   : > { %15421 = vst [vmem:[#allocation100_spill] sm:$0xff] %v10453_v22  ;;  %v1538_v62 = vadd.f32 %v1506_v23, %v1342_v34  ;;  %v1508_v54 = vmul.f32 %v15331_v40, %v15423_v28  ;;  %v1732_v43 = vadd.f32 %v1700_v17, %v1536_v13  ;;  %2409 = vperm.xlu0 %7210, %v7304_v9   ;;  %v15426_v23 = vld [vmem:[#allocation126_spill] sm:$0xff]  ;;  %v15428_v17 = vld [vmem:[#allocation328_spill] sm:$0xff] }
 0x45c   : > { %v2090_v37 = vmul.f32 %v9594_v15, %v15424_v49  ;;  %v2480_v16 = vmul.f32 %v9628_v20, %v15425_v27  ;;  %2605 = vst [vmem:[#allocation12 + $0x60] sm:$0xff] %v2573_v12  ;;  %v10466_v55 = vadd.f32 %v2510_v24, %v10249_v48  ;;  %v2316_v42 = vadd.f32 %v2284_v2, %v2120_v8  ;;  %v15427_v13 = vld [vmem:[#allocation186_spill] sm:$0xff]  ;;  %v15430_v2 = vld [vmem:[#allocation128_spill] sm:$0xff]  ;;  %v7305_v27 = vld [vmem:[%s14734_s8 + $0xa8] sm:$0xff] }
 0x45d   : > { %v1314_v25 = vmul.f32 %v15328_v58, %v15426_v23  ;;  %v1702_v34 = vmul.f32 %v9563_v29, %v15427_v13  ;;  %v1928_v14 = vadd.f32 %v1896_v59, %v1732_v43  ;;  %v1898_v45 = vmul.f32 %v9582_v10, %v15428_v17  ;;  %3831 = vperm.xlu1 %7207, %v9655_v4   ;;  %v2210_v26 = vpop.permute.xlu0 %2209  ;;  %v15431_v9 = vld [vmem:[#allocation214_spill] sm:$0xff]  ;;  %v15435_v13 = vld [vmem:[#allocation88_spill] sm:$0xff] }
 0x45e   : > { %v2575_v12 = vmul.f32 %v15380_v39, %v10466_v55  ;;  %v2512_v18 = vadd.f32 %v2480_v16, %v2316_v42  ;;  %v2122_v48 = vadd.f32 %v2090_v37, %v1926_v3  ;;  %v2286_v8 = vmul.f32 %v9609_v32, %v2210_v26  ;;  %v10478_v24 = vpop.permute.xlu1 %3455  ;;  %v15432_v43 = vld [vmem:[#allocation242_spill] sm:$0xff]  ;;  %v15436_v26 = vld [vmem:[#allocation188_spill] sm:$0xff] }
 0x45f   : > { %15429 = vst [vmem:[#allocation165_spill] sm:$0xff] %v10478_v24  ;;  %v1316_v28 = vmul.f32 %v15328_v58, %v15430_v2  ;;  %v1510_v59 = vmul.f32 %v15331_v40, %v15431_v9  ;;  %v2092_v49 = vmul.f32 %v9594_v15, %v15432_v43  ;;  %v1734_v4 = vadd.f32 %v1702_v34, %v1538_v62  ;;  %v15433_v37 = vld [vmem:[#allocation310_spill] sm:$0xff] }
 0x460   : > { %2417 = vperm.xlu0 %7210, %v7305_v27   ;;  %v1540_v3 = vadd.f32 %v1508_v54, %v1344_v31  ;;  %v2482_v16 = vmul.f32 %v9628_v20, %v15433_v37  ;;  %2607 = vst [vmem:[#allocation12 + $0x70] sm:$0xff] %v2575_v12  ;;  %v10492_v42 = vadd.f32 %v2512_v18, %v10251_v60  ;;  %v7306_v34 = vld [vmem:[%s14737_s11 + $0xc0] sm:$0xff]  ;;  %v15441_v37 = vld [vmem:[#allocation244_spill] sm:$0xff] }
 0x461   : > { %v2318_v23 = vadd.f32 %v2286_v8, %v2122_v48  ;;  %v1346_v17 = vadd.f32 %v1314_v25, %v15435_v13  ;;  %v1704_v2 = vmul.f32 %v9563_v29, %v15436_v26  ;;  %v1930_v62 = vadd.f32 %v1898_v45, %v1734_v4  ;;  %3839 = vperm.xlu1 %7207, %v7306_v34   ;;  %v2218_v54 = vpop.permute.xlu0 %2217  ;;  %v15437_v9 = vld [vmem:[#allocation330_spill] sm:$0xff]  ;;  %v15440_v4 = vld [vmem:[#allocation216_spill] sm:$0xff]  ;;  %v15442_v13 = vld [vmem:[#allocation311_spill] sm:$0xff] }
 0x462   : > { %15434 = vst [vmem:[#allocation41_spill] sm:$0xff] %v10492_v42  ;;  %v2124_v31 = vadd.f32 %v2092_v49, %v1928_v14  ;;  %v1900_v12 = vmul.f32 %v9582_v10, %v15437_v9  ;;  %v2577_v60 = vmul.f32 %v15380_v39, %v10492_v42  ;;  %v2288_v25 = vmul.f32 %v9609_v32, %v2218_v54  ;;  %v10505_v48 = vpop.permute.xlu1 %3463  ;;  %v15439_v8 = vld [vmem:[#allocation90_spill] sm:$0xff]  ;;  %v7307_v49 = vld [vmem:[%s14734_s8 + $0xb8] sm:$0xff]  ;;  %v15446_v9 = vld [vmem:[#allocation332_spill] sm:$0xff] }
 0x463   : > { %v2514_v18 = vadd.f32 %v2482_v16, %v2318_v23  ;;  %15438 = vst [vmem:[#allocation43_spill] sm:$0xff] %v10505_v48  ;;  %v1348_v45 = vadd.f32 %v1316_v28, %v15439_v8  ;;  %v1542_v43 = vadd.f32 %v1510_v59, %v1346_v17  ;;  %v1512_v27 = vmul.f32 %v15331_v40, %v15440_v4  ;;  %v15444_v59 = vld [vmem:[#allocation129_spill] sm:$0xff]  ;;  %v15445_v34 = vld [vmem:[#allocation190_spill] sm:$0xff]  ;;  %v7308_v4 = vld [vmem:[%s14737_s11 + $0xd0] sm:$0xff] }
 0x464   : > { %v2094_v14 = vmul.f32 %v9594_v15, %v15441_v37  ;;  %2425 = vperm.xlu0 %7210, %v7307_v49   ;;  %v2484_v16 = vmul.f32 %v9628_v20, %v15442_v13  ;;  %v1736_v23 = vadd.f32 %v1704_v2, %v1540_v3  ;;  %2609 = vst [vmem:[#allocation12 + $0x80] sm:$0xff] %v2577_v60  ;;  %v15448_v37 = vld [vmem:[#allocation51_spill] sm:$0xff]  ;;  %v15516_v24 = vld [vmem:[#allocation130_spill] sm:$0xff] }
 0x465   : > { %v10518_v26 = vadd.f32 %v2514_v18, %v10259_v61  ;;  %v2320_v28 = vadd.f32 %v2288_v25, %v2124_v31  ;;  %v1318_v17 = vmul.f32 %v15328_v58, %v15444_v59  ;;  %v1706_v54 = vmul.f32 %v9563_v29, %v15445_v34  ;;  %3847 = vperm.xlu1 %7207, %v7308_v4   ;;  %v2226_v2 = vpop.permute.xlu0 %2225  ;;  %v15449_v59 = vld [vmem:[#allocation218_spill] sm:$0xff]  ;;  %v15454_v4 = vld [vmem:[#allocation192_spill] sm:$0xff] }
 0x466   : > { %v1902_v8 = vmul.f32 %v9582_v10, %v15446_v9  ;;  %v2126_v3 = vadd.f32 %v2094_v14, %v1930_v62  ;;  %v1932_v60 = vadd.f32 %v1900_v12, %v1736_v23  ;;  %v2290_v18 = vmul.f32 %v9609_v32, %v2226_v2  ;;  %v10532_v25 = vpop.permute.xlu1 %3471  ;;  %v7309_v62 = vld [vmem:[%s14734_s8 + $0xc8] sm:$0xff]  ;;  %v546_v12 = vld [vmem:[%s15199_s9 + $0xc0] sm:$0xff]  ;;  %v15451_v23 = vld [vmem:[#allocation312_spill] sm:$0xff] }
 0x467   : > { %15443 = vst [vmem:[#allocation45_spill] sm:$0xff] %v10518_v26  ;;  %v2579_v61 = vmul.f32 %v15380_v39, %v10518_v26  ;;  %v2516_v31 = vadd.f32 %v2484_v16, %v2320_v28  ;;  %15447 = vst [vmem:[#allocation195_spill] sm:$0xff] %v10532_v25  ;;  %v848_v49 = vmul.f32 0.5, %v15448_v37  ;;  %v1544_v13 = vadd.f32 %v1512_v27, %v1348_v45  ;;  %v15450_v14 = vld [vmem:[#allocation246_spill] sm:$0xff]  ;;  %v15453_v27 = vld [vmem:[#allocation92_spill] sm:$0xff] }
 0x468   : > { %v1514_v34 = vmul.f32 %v15331_v40, %v15449_v59  ;;  %v1738_v9 = vadd.f32 %v1706_v54, %v1542_v43  ;;  %2433 = vperm.xlu0 %7210, %v7309_v62   ;;  %v2096_v16 = vmul.f32 %v9594_v15, %v15450_v14  ;;  %v2486_v28 = vmul.f32 %v9628_v20, %v15451_v23  ;;  %v15455_v59 = vld [vmem:[#allocation334_spill] sm:$0xff]  ;;  %v15459_v25 = vld [vmem:[#allocation313_spill] sm:$0xff] }
 0x469   : > { %2611 = vst [vmem:[#allocation12 + $0x90] sm:$0xff] %v2579_v61  ;;  %v10548_v45 = vadd.f32 %v2516_v31, %v10281_v7  ;;  %v2322_v43 = vadd.f32 %v2290_v18, %v2126_v3  ;;  %v1350_v54 = vadd.f32 %v1318_v17, %v15453_v27  ;;  %v1708_v2 = vmul.f32 %v9563_v29, %v15454_v4  ;;  %v10558_v14 = vld [vmem:[%s14737_s11 + $0xe0] sm:$0xff]  ;;  %v2234_v61 = vpop.permute.xlu0 %2233  ;;  %v7311_v4 = vld [vmem:[%s14734_s8 + $0xd8] sm:$0xff] }
 0x46a   : > { %v1934_v37 = vadd.f32 %v1902_v8, %v1738_v9  ;;  %v1904_v62 = vmul.f32 %v9582_v10, %v15455_v59  ;;  %15456 = vst [vmem:[#allocation68_spill] sm:$0xff] %v10558_v14  ;;  %3855 = vperm.xlu1 %7207, %v10558_v14   ;;  %v2128_v17 = vadd.f32 %v2096_v16, %v1932_v60  ;;  %v15457_v8 = vld [vmem:[#allocation248_spill] sm:$0xff] }
 0x46b   : > { %15452 = vst [vmem:[#allocation102_spill] sm:$0xff] %v10548_v45  ;;  %v2581_v7 = vmul.f32 %v15380_v39, %v10548_v45  ;;  %v2518_v3 = vadd.f32 %v2486_v28, %v2322_v43  ;;  %v2292_v31 = vmul.f32 %v9609_v32, %v2234_v61  ;;  %v880_v18 = vadd.f32 %v848_v49, %v546_v12  ;;  %v10566_v27 = vpop.permute.xlu1 %3547  ;;  %v15461_v12 = vld [vmem:[#allocation54_spill] sm:$0xff]  ;;  %v15553_v45 = vld [vmem:[#allocation67_spill] sm:$0xff] }
 0x46c   : > { %v2098_v9 = vmul.f32 %v9594_v15, %v15457_v8  ;;  %v1740_v23 = vadd.f32 %v1708_v2, %v1544_v13  ;;  %15458 = vst [vmem:[#allocation168_spill] sm:$0xff] %v10566_v27  ;;  %2441 = vperm.xlu0 %7210, %v7311_v4   ;;  %v1546_v59 = vadd.f32 %v1514_v34, %v1350_v54  ;;  %v850_v16 = vmul.f32 0.5, %v15461_v12  ;;  %v15462_v28 = vld [vmem:[#allocation194_spill] sm:$0xff]  ;;  %v10582_v2 = vld [vmem:[%s14737_s11 + $0xf0] sm:$0xff] }
 0x46d   : > { %v2488_v48 = vmul.f32 %v9628_v20, %v15459_v25  ;;  %2613 = vst [vmem:[#allocation12 + $0xa0] sm:$0xff] %v2581_v7  ;;  %v10574_v60 = vadd.f32 %v2518_v3, %v10294_v56  ;;  %v2324_v49 = vadd.f32 %v2292_v31, %v2128_v17  ;;  %v1710_v13 = vmul.f32 %v9563_v29, %v15462_v28  ;;  %v2242_v25 = vpop.permute.xlu0 %2241  ;;  %v548_v56 = vld [vmem:[%s15199_s9 + $0xd0] sm:$0xff]  ;;  %v15465_v17 = vld [vmem:[#allocation250_spill] sm:$0xff]  ;;  %v15469_v28 = vld [vmem:[#allocation57_spill] sm:$0xff] }
 0x46e   : > { %v1936_v43 = vadd.f32 %v1904_v62, %v1740_v23  ;;  %15463 = vst [vmem:[#allocation197_spill] sm:$0xff] %v10582_v2  ;;  %3863 = vperm.xlu1 %7207, %v10582_v2   ;;  %v2130_v34 = vadd.f32 %v2098_v9, %v1934_v37  ;;  %v15464_v54 = vld [vmem:[#allocation336_spill] sm:$0xff]  ;;  %v2294_v3 = vmul.f32 %v9609_v32, %v2242_v25  ;;  %v7313_v37 = vld [vmem:[%s14734_s8 + $0xe8] sm:$0xff]  ;;  %v852_v25 = vmul.f32 0.5, %v15469_v28 }
 0x46f   : > { %15460 = vst [vmem:[#allocation47_spill] sm:$0xff] %v10574_v60  ;;  %v1906_v61 = vmul.f32 %v9582_v10, %v15464_v54  ;;  %v2583_v7 = vmul.f32 %v15380_v39, %v10574_v60  ;;  %v2520_v62 = vadd.f32 %v2488_v48, %v2324_v49  ;;  %v2100_v31 = vmul.f32 %v9594_v15, %v15465_v17  ;;  %v10595_v8 = vpop.permute.xlu1 %3555  ;;  %v15467_v9 = vld [vmem:[#allocation315_spill] sm:$0xff]  ;;  %v15552_v60 = vld [vmem:[#allocation65_spill] sm:$0xff] }
 0x470   : > { %15466 = vst [vmem:[#allocation229_spill] sm:$0xff] %v10595_v8  ;;  %2449 = vperm.xlu0 %7210, %v7313_v37   ;;  %v2490_v23 = vmul.f32 %v9628_v20, %v15467_v9  ;;  %v1742_v4 = vadd.f32 %v1710_v13, %v1546_v59  ;;  %v2326_v48 = vadd.f32 %v2294_v3, %v2130_v34  ;;  %v550_v8 = vld [vmem:[%s15199_s9 + $0xe0] sm:$0xff]  ;;  %v7315_v13 = vld [vmem:[%s14734_s8 + $0xf8] sm:$0xff] }
 0x471   : > { %2615 = vst [vmem:[#allocation12 + $0xb0] sm:$0xff] %v2583_v7  ;;  %v10602_v12 = vadd.f32 %v2520_v62, %v880_v18  ;;  %v882_v49 = vadd.f32 %v850_v16, %v548_v56  ;;  %v2132_v54 = vadd.f32 %v2100_v31, %v1936_v43  ;;  %v2250_v17 = vpop.permute.xlu0 %2249  ;;  %v10615_v16 = vld [vmem:[%s14737_s11] sm:$0xff]  ;;  %v15472_v43 = vld [vmem:[#allocation252_spill] sm:$0xff]  ;;  %v15473_v56 = vld [vmem:[#allocation317_spill] sm:$0xff]  ;;  %v884_v3 = vadd.f32 %v852_v25, %v550_v8 }
 0x472   : > { %7209 = vset.pattern.permute.xlu1 %v15278_v1  ;;  %v1938_v37 = vadd.f32 %v1906_v61, %v1742_v4  ;;  %v2522_v59 = vadd.f32 %v2490_v23, %v2326_v48  ;;  %v2296_v18 = vmul.f32 %v9609_v32, %v2250_v17  ;;  %15470 = vst [vmem:[#allocation70_spill] sm:$0xff] %v10615_v16  ;;  %v15475_v31 = vld [vmem:[#allocation60_spill] sm:$0xff]  ;;  %v15477_v25 = vld [vmem:[#allocation319_spill] sm:$0xff] }
 0x473   : > { %15468 = vst [vmem:[#allocation49_spill] sm:$0xff] %v10602_v12  ;;  %v2585_v9 = vmul.f32 %v15380_v39, %v10602_v12  ;;  %3939 = vperm.xlu1 %7209, %v10615_v16   ;;  %v10618_v1 = vpop.permute.xlu1 %3559  ;;  %v2102_v34 = vmul.f32 %v9594_v15, %v15472_v43  ;;  %v2492_v61 = vmul.f32 %v9628_v20, %v15473_v56  ;;  %v854_v23 = vmul.f32 0.5, %v15475_v31  ;;  %v10636_v43 = vld [vmem:[%s14737_s11 + $0x10] sm:$0xff]  ;;  %v10893_v12 = vld [vmem:[%s14737_s11 + $0xe8] sm:$0xff] }
 0x474   : > { %15471 = vst [vmem:[#allocation104_spill] sm:$0xff] %v10618_v1  ;;  %2457 = vperm.xlu0 %7210, %v7315_v13   ;;  %v10627_v7 = vadd.f32 %v2522_v59, %v882_v49  ;;  %v2328_v62 = vadd.f32 %v2296_v18, %v2132_v54  ;;  %v552_v8 = vld [vmem:[%s15199_s9 + $0xf0] sm:$0xff]  ;;  %v2494_v54 = vmul.f32 %v9628_v20, %v15477_v25  ;;  %v10693_v25 = vld [vmem:[%s14737_s11 + $0x48] sm:$0xff]  ;;  %v15515_v1 = vld [vmem:[#allocation30_spill] sm:$0xff] }
 0x475   : > { %2617 = vst [vmem:[#allocation12 + $0xc0] sm:$0xff] %v2585_v9  ;;  %v2258_v4 = vpop.permute.xlu0 %2257  ;;  %v2134_v17 = vadd.f32 %v2102_v34, %v1938_v37  ;;  %v886_v18 = vadd.f32 %v854_v23, %v552_v8  ;;  %15490 = vst [vmem:[#allocation111_spill] sm:$0xff] %v10693_v25  ;;  %v829_v27 = vmul.f32 0.5, %v15515_v1  ;;  %v1288_v22 = vmul.f32 %v15328_v58, %v15516_v24  ;;  %v529_v24 = vld [vmem:[%s15199_s9 + $0x38] sm:$0xff]  ;;  %v531_v1 = vld [vmem:[%s15199_s9 + $0x48] sm:$0xff] }
 0x476   : > { %15474 = vst [vmem:[#allocation170_spill] sm:$0xff] %v10627_v7  ;;  %v2587_v48 = vmul.f32 %v15380_v39, %v10627_v7  ;;  %v2524_v28 = vadd.f32 %v2492_v61, %v2328_v62  ;;  %v2298_v13 = vmul.f32 %v9609_v32, %v2258_v4  ;;  %v10656_v61 = vld [vmem:[%s14737_s11 + $0x18] sm:$0xff]  ;;  %v10671_v4 = vld [vmem:[%s14737_s11 + $0x28] sm:$0xff]  ;;  %v15537_v7 = vld [vmem:[#allocation64_spill] sm:$0xff] }
 0x477   : > { %3947 = vperm.xlu1 %7209, %v10636_v43   ;;  %v10642_v49 = vpop.permute.xlu1 %3567  ;;  %15480 = vst [vmem:[#allocation72_spill] sm:$0xff] %v10656_v61  ;;  %15484 = vst [vmem:[#allocation200_spill] sm:$0xff] %v10671_v4 }
 0x478   : > { %15476 = vst [vmem:[#allocation106_spill] sm:$0xff] %v10642_v49  ;;  %4135 = vperm.xlu0 %7210, %v10615_v16   ;;  %2619 = vst [vmem:[#allocation12 + $0xd0] sm:$0xff] %v2587_v48  ;;  %v10647_v37 = vadd.f32 %v2524_v28, %v884_v3  ;;  %v2330_v9 = vadd.f32 %v2298_v13, %v2134_v17  ;;  %v10682_v17 = vld [vmem:[%s14737_s11 + $0x38] sm:$0xff]  ;;  %v539_v16 = vld [vmem:[%s15199_s9 + $0x88] sm:$0xff] }
 0x479   : > { %v10649_v59 = vpop.permute.xlu0 %3943  ;;  %15487 = vst [vmem:[#allocation108_spill] sm:$0xff] %v10682_v17  ;;  %15545 = vst [vmem:[#allocation306_spill] sm:$0xff] %v10893_v12 }
 0x47a   : > { %15478 = vst [vmem:[#allocation198_spill] sm:$0xff] %v10647_v37  ;;  %15479 = vst [vmem:[#allocation232_spill] sm:$0xff] %v10649_v59  ;;  %v2589_v34 = vmul.f32 %v15380_v39, %v10647_v37  ;;  %v2526_v56 = vadd.f32 %v2494_v54, %v2330_v9  ;;  %v10737_v59 = vld [vmem:[%s14737_s11 + $0x88] sm:$0xff] }
 0x47b   : > { %3951 = vperm.xlu1 %7209, %v10656_v61   ;;  %v10659_v62 = vpop.permute.xlu1 %3575  ;;  %15502 = vst [vmem:[#allocation178_spill] sm:$0xff] %v10737_v59 }
 0x47c   : > { %15481 = vst [vmem:[#allocation172_spill] sm:$0xff] %v10659_v62  ;;  %4147 = vperm.xlu0 %7210, %v10656_v61   ;;  %2621 = vst [vmem:[#allocation12 + $0xe0] sm:$0xff] %v2589_v34  ;;  %v10662_v3 = vadd.f32 %v2526_v56, %v886_v18  ;;  %v10704_v18 = vld [vmem:[%s14737_s11 + $0x58] sm:$0xff]  ;;  %v15514_v62 = vld [vmem:[#allocation28_spill] sm:$0xff] }
 0x47d   : > { %v10664_v31 = vpop.permute.xlu0 %3955  ;;  %15493 = vst [vmem:[#allocation298_spill] sm:$0xff] %v10704_v18  ;;  %v827_v49 = vmul.f32 0.5, %v15514_v62  ;;  %v15518_v62 = vld [vmem:[#allocation32_spill] sm:$0xff] }
 0x47e   : > { %15482 = vst [vmem:[#allocation314_spill] sm:$0xff] %v10662_v3  ;;  %15483 = vst [vmem:[#allocation74_spill] sm:$0xff] %v10664_v31  ;;  %v2591_v23 = vmul.f32 %v15380_v39, %v10662_v3  ;;  %v831_v19 = vmul.f32 0.5, %v15518_v62  ;;  %v15522_v62 = vld [vmem:[#allocation38_spill] sm:$0xff]  ;;  %v10839_v3 = vadd.f32 %v833_v0, %v531_v1 }
 0x47f   : > { %3959 = vperm.xlu1 %7209, %v10671_v4   ;;  %v10674_v48 = vpop.permute.xlu1 %3583 }
 0x480   : > { %15485 = vst [vmem:[#allocation234_spill] sm:$0xff] %v10674_v48  ;;  %4155 = vperm.xlu0 %7210, %v10671_v4   ;;  %2623 = vst [vmem:[#allocation12 + $0xf0] sm:$0xff] %v2591_v23  ;;  %v10715_v23 = vld [vmem:[%s14737_s11 + $0x68] sm:$0xff]  ;;  %v10837_v61 = vadd.f32 %v831_v19, %v529_v24  ;;  %v541_v24 = vld [vmem:[%s15199_s9 + $0x98] sm:$0xff] }
 0x481   : > { %v10677_v28 = vpop.permute.xlu0 %3963  ;;  %15496 = vst [vmem:[#allocation318_spill] sm:$0xff] %v10715_v23 }
 0x482   : > { %15486 = vst [vmem:[#allocation295_spill] sm:$0xff] %v10677_v28  ;;  %v10726_v28 = vld [vmem:[%s14737_s11 + $0x78] sm:$0xff] }
 0x483   : > { %3967 = vperm.xlu1 %7209, %v10682_v17   ;;  %v10685_v13 = vpop.permute.xlu1 %3591  ;;  %15499 = vst [vmem:[#allocation112_spill] sm:$0xff] %v10726_v28 }
 0x484   : > { %15488 = vst [vmem:[#allocation174_spill] sm:$0xff] %v10685_v13  ;;  %4163 = vperm.xlu0 %7210, %v10682_v17   ;;  %v15513_v13 = vld [vmem:[#allocation27_spill] sm:$0xff] }
 0x485   : > { %v10688_v8 = vpop.permute.xlu0 %3971  ;;  %v824_v48 = vmul.f32 0.5, %v15513_v13  ;;  %v527_v13 = vld [vmem:[%s15199_s9 + $0x28] sm:$0xff] }
 0x486   : > { %15489 = vst [vmem:[#allocation316_spill] sm:$0xff] %v10688_v8 }
 0x487   : > { %3975 = vperm.xlu1 %7209, %v10693_v25   ;;  %v10696_v54 = vpop.permute.xlu1 %3599 }
 0x488   : > { %15491 = vst [vmem:[#allocation202_spill] sm:$0xff] %v10696_v54  ;;  %4171 = vperm.xlu0 %7210, %v10693_v25   ;;  %v533_v25 = vld [vmem:[%s15199_s9 + $0x58] sm:$0xff] }
 0x489   : > { %v10699_v9 = vpop.permute.xlu0 %3979 }
 0x48a   : > { %15492 = vst [vmem:[#allocation109_spill] sm:$0xff] %v10699_v9 }
 0x48b   : > { %3983 = vperm.xlu1 %7209, %v10704_v18   ;;  %v10707_v34 = vpop.permute.xlu1 %3607 }
 0x48c   : > { %15494 = vst [vmem:[#allocation76_spill] sm:$0xff] %v10707_v34  ;;  %4179 = vperm.xlu0 %7210, %v10704_v18  }
 0x48d   : > { %v10710_v56 = vpop.permute.xlu0 %3987 }
 0x48e   : > { %15495 = vst [vmem:[#allocation176_spill] sm:$0xff] %v10710_v56 }
 0x48f   : > { %3991 = vperm.xlu1 %7209, %v10715_v23   ;;  %v10718_v9 = vpop.permute.xlu1 %3615 }
 0x490   : > { %15497 = vst [vmem:[#allocation78_spill] sm:$0xff] %v10718_v9  ;;  %4187 = vperm.xlu0 %7210, %v10715_v23  }
 0x491   : > { %v10721_v8 = vpop.permute.xlu0 %3995 }
 0x492   : > { %15498 = vst [vmem:[#allocation204_spill] sm:$0xff] %v10721_v8 }
 0x493   : > { %3999 = vperm.xlu1 %7209, %v10726_v28   ;;  %v10729_v56 = vpop.permute.xlu1 %3623 }
 0x494   : > { %15500 = vst [vmem:[#allocation300_spill] sm:$0xff] %v10729_v56  ;;  %4195 = vperm.xlu0 %7210, %v10726_v28   ;;  %v10748_v56 = vld [vmem:[%s14737_s11 + $0x98] sm:$0xff] }
 0x495   : > { %v10732_v31 = vpop.permute.xlu0 %4003  ;;  %15505 = vst [vmem:[#allocation206_spill] sm:$0xff] %v10748_v56 }
 0x496   : > { %15501 = vst [vmem:[#allocation114_spill] sm:$0xff] %v10732_v31 }
 0x497   : > { %4007 = vperm.xlu1 %7209, %v10737_v59   ;;  %v10740_v8 = vpop.permute.xlu1 %3631 }
 0x498   : > { %15503 = vst [vmem:[#allocation320_spill] sm:$0xff] %v10740_v8  ;;  %4203 = vperm.xlu0 %7210, %v10737_v59   ;;  %v10759_v8 = vld [vmem:[%s14737_s11 + $0xa8] sm:$0xff] }
 0x499   : > { %v10743_v9 = vpop.permute.xlu0 %4011  ;;  %15508 = vst [vmem:[#allocation80_spill] sm:$0xff] %v10759_v8 }
 0x49a   : > { %15504 = vst [vmem:[#allocation117_spill] sm:$0xff] %v10743_v9 }
 0x49b   : > { %4015 = vperm.xlu1 %7209, %v10748_v56   ;;  %v10751_v31 = vpop.permute.xlu1 %3639 }
 0x49c   : > { %15506 = vst [vmem:[#allocation115_spill] sm:$0xff] %v10751_v31  ;;  %4211 = vperm.xlu0 %7210, %v10748_v56   ;;  %v10770_v31 = vld [vmem:[%s14737_s11 + $0xb8] sm:$0xff]  ;;  %v15524_v56 = vld [vmem:[#allocation132_spill] sm:$0xff] }
 0x49d   : > { %v10754_v34 = vpop.permute.xlu0 %4019  ;;  %15511 = vst [vmem:[#allocation82_spill] sm:$0xff] %v10770_v31  ;;  %v1484_v59 = vmul.f32 %v15331_v40, %v15524_v56  ;;  %v537_v56 = vld [vmem:[%s15199_s9 + $0x78] sm:$0xff] }
 0x49e   : > { %15507 = vst [vmem:[#allocation302_spill] sm:$0xff] %v10754_v34 }
 0x49f   : > { %4023 = vperm.xlu1 %7209, %v10759_v8   ;;  %v10762_v9 = vpop.permute.xlu1 %3647 }
 0x4a0   : > { %15509 = vst [vmem:[#allocation180_spill] sm:$0xff] %v10762_v9  ;;  %4219 = vperm.xlu0 %7210, %v10759_v8   ;;  %v522_v9 = vld [vmem:[%s15199_s9] sm:$0xff]  ;;  %v839_v8 = vmul.f32 0.5, %v15523_v5 }
 0x4a1   : > { %v10765_v54 = vpop.permute.xlu0 %4027  ;;  %v10814_v23 = vadd.f32 %v824_v48, %v522_v9  ;;  %v15527_v48 = vld [vmem:[#allocation42_spill] sm:$0xff] }
 0x4a2   : > { %15510 = vst [vmem:[#allocation322_spill] sm:$0xff] %v10765_v54  ;;  %v525_v54 = vld [vmem:[%s15199_s9 + $0x18] sm:$0xff]  ;;  %v10857_v19 = vadd.f32 %v839_v8, %v537_v56 }
 0x4a3   : > { %4031 = vperm.xlu1 %7209, %v10770_v31   ;;  %v10773_v34 = vpop.permute.xlu1 %3655  ;;  %v10816_v18 = vadd.f32 %v827_v49, %v525_v54  ;;  %v841_v49 = vmul.f32 0.5, %v15527_v48  ;;  %v15528_v54 = vld [vmem:[#allocation62_spill] sm:$0xff]  ;;  %v15539_v56 = vld [vmem:[#allocation133_spill] sm:$0xff] }
 0x4a4   : > { %15512 = vst [vmem:[#allocation208_spill] sm:$0xff] %v10773_v34  ;;  %4227 = vperm.xlu0 %7210, %v10770_v31   ;;  %v837_v31 = vmul.f32 0.5, %v15522_v62  ;;  %v15526_v62 = vld [vmem:[#allocation131_spill] sm:$0xff]  ;;  %v1320_v9 = vadd.f32 %v1288_v22, %v15528_v54  ;;  %v10850_v22 = vld [vmem:[%s14737_s11 + $0xd8] sm:$0xff] }
 0x4a5   : > { %v10787_v34 = vpop.permute.xlu0 %4035  ;;  %v1291_v5 = vmul.f32 %v15328_v58, %v15526_v62  ;;  %v15531_v62 = vld [vmem:[#allocation44_spill] sm:$0xff]  ;;  %15533 = vst [vmem:[#allocation324_spill] sm:$0xff] %v10850_v22  ;;  %v10870_v8 = vadd.f32 %v841_v49, %v539_v16 }
 0x4a6   : > { %15517 = vst [vmem:[#allocation118_spill] sm:$0xff] %v10787_v34  ;;  %v15521_v34 = vld [vmem:[#allocation36_spill] sm:$0xff]  ;;  %v1516_v1 = vadd.f32 %v1484_v59, %v1320_v9  ;;  %v545_v59 = vld [vmem:[%s15199_s9 + $0xb8] sm:$0xff]  ;;  %v1293_v9 = vmul.f32 %v15328_v58, %v15539_v56  ;;  %v15546_v56 = vld [vmem:[#allocation138_spill] sm:$0xff] }
 0x4a7   : > { %4039 = vperm.xlu1 %7209, %v10797_v6   ;;  %v835_v53 = vmul.f32 0.5, %v15521_v34  ;;  %v10811_v28 = vpop.permute.xlu1 %3663  ;;  %v535_v34 = vld [vmem:[%s15199_s9 + $0x68] sm:$0xff]  ;;  %v15543_v49 = vld [vmem:[#allocation136_spill] sm:$0xff] }
 0x4a8   : > { %15525 = vst [vmem:[#allocation120_spill] sm:$0xff] %v10811_v28  ;;  %4235 = vperm.xlu0 %7210, %v10797_v6   ;;  %v10829_v28 = vadd.f32 %v829_v27, %v527_v13  ;;  %v15529_v6 = vld [vmem:[#allocation243_spill] sm:$0xff]  ;;  %v843_v27 = vmul.f32 0.5, %v15531_v62  ;;  %v10855_v0 = vadd.f32 %v837_v31, %v535_v34  ;;  %v15535_v62 = vld [vmem:[#allocation46_spill] sm:$0xff] }
 0x4a9   : > { %v1680_v17 = vmul.f32 %v9563_v29, %v15529_v6  ;;  %v10835_v4 = vpop.permute.xlu0 %4043  ;;  %v15532_v13 = vld [vmem:[#allocation135_spill] sm:$0xff]  ;;  %v10853_v6 = vadd.f32 %v835_v53, %v533_v25  ;;  %v1323_v53 = vadd.f32 %v1291_v5, %v15537_v7  ;;  %v15538_v25 = vld [vmem:[#allocation245_spill] sm:$0xff] }
 0x4aa   : > { %15530 = vst [vmem:[#allocation182_spill] sm:$0xff] %v10835_v4  ;;  %v1487_v48 = vmul.f32 %v15331_v40, %v15532_v13  ;;  %v845_v13 = vmul.f32 0.5, %v15535_v62  ;;  %v15536_v4 = vld [vmem:[#allocation48_spill] sm:$0xff]  ;;  %v1683_v31 = vmul.f32 %v9563_v29, %v15538_v25  ;;  %v543_v34 = vld [vmem:[%s15199_s9 + $0xa8] sm:$0xff]  ;;  %v15540_v62 = vld [vmem:[#allocation134_spill] sm:$0xff]  ;;  %v10884_v25 = vadd.f32 %v843_v27, %v541_v24 }
 0x4ab   : > { %4047 = vperm.xlu1 %7209, %v10850_v22   ;;  %v10862_v54 = vpop.permute.xlu1 %3671  ;;  %v847_v37 = vmul.f32 0.5, %v15536_v4  ;;  %v1295_v4 = vmul.f32 %v15328_v58, %v15540_v62  ;;  %v1712_v7 = vadd.f32 %v1680_v17, %v1516_v1  ;;  %v1299_v17 = vmul.f32 %v15328_v58, %v15546_v56  ;;  %v15547_v1 = vld [vmem:[#allocation139_spill] sm:$0xff] }
 0x4ac   : > { %15534 = vst [vmem:[#allocation123_spill] sm:$0xff] %v10862_v54  ;;  %4243 = vperm.xlu0 %7210, %v10850_v22   ;;  %15542 = vst [vmem:[#allocation121_spill] sm:$0xff] %v10884_v25  ;;  %v1519_v16 = vadd.f32 %v1487_v48, %v1323_v53  ;;  %v1297_v54 = vmul.f32 %v15328_v58, %v15543_v49  ;;  %v15544_v22 = vld [vmem:[#allocation137_spill] sm:$0xff]  ;;  %v1491_v27 = vmul.f32 %v15331_v40, %v15547_v1  ;;  %v15548_v48 = vld [vmem:[#allocation196_spill] sm:$0xff] }
 0x4ad   : > { %v10882_v5 = vpop.permute.xlu0 %4051  ;;  %v1489_v2 = vmul.f32 %v15331_v40, %v15544_v22  ;;  %v1876_v24 = vmul.f32 %v9582_v10, %v15548_v48  ;;  %v2072_v53 = vmul.f32 %v9594_v15, %v9982_v21  ;;  %v10905_v22 = vadd.f32 %v845_v13, %v543_v34  ;;  %v15550_v49 = vld [vmem:[#allocation140_spill] sm:$0xff]  ;;  %v15554_v48 = vld [vmem:[#allocation247_spill] sm:$0xff]  ;;  %v15556_v13 = vld [vmem:[#allocation69_spill] sm:$0xff] }
 0x4ae   : > { %15541 = vst [vmem:[#allocation210_spill] sm:$0xff] %v10882_v5  ;;  %v10907_v62 = vadd.f32 %v847_v37, %v545_v59  ;;  %v1301_v5 = vmul.f32 %v15328_v58, %v15550_v49  ;;  %v1715_v14 = vadd.f32 %v1683_v31, %v1519_v16  ;;  %v1325_v1 = vadd.f32 %v1293_v9, %v15552_v60  ;;  %v15557_v37 = vld [vmem:[#allocation141_spill] sm:$0xff]  ;;  %v15560_v9 = vld [vmem:[#allocation71_spill] sm:$0xff] }
 0x4af   : > { %4055 = vperm.xlu1 %7209, %v10893_v12   ;;  %v1327_v26 = vadd.f32 %v1295_v4, %v15553_v45  ;;  %v1685_v25 = vmul.f32 %v9563_v29, %v15554_v48  ;;  %v1908_v21 = vadd.f32 %v1876_v24, %v1712_v7  ;;  %v1329_v34 = vadd.f32 %v1297_v54, %v15556_v13  ;;  %v10929_v45 = vld [vmem:[%s14737_s11 + $0xf8] sm:$0xff] }
 0x4b0   : > { %4251 = vperm.xlu0 %7210, %v10893_v12   ;;  %15549 = vst [vmem:[#allocation84_spill] sm:$0xff] %v10907_v62  ;;  %v10911_v56 = vpop.permute.xlu1 %3747  ;;  %v1493_v59 = vmul.f32 %v15331_v40, %v15557_v37  ;;  %v15558_v12 = vld [vmem:[#allocation199_spill] sm:$0xff]  ;;  %v2075_v16 = vmul.f32 %v9594_v15, %v9989_v44  ;;  %15559 = vst [vmem:[#allocation86_spill] sm:$0xff] %v10929_v45  ;;  %v1521_v60 = vadd.f32 %v1489_v2, %v1325_v1  ;;  %v15561_v24 = vld [vmem:[#allocation73_spill] sm:$0xff] }
 0x4b1   : > { %15551 = vst [vmem:[#allocation184_spill] sm:$0xff] %v10911_v56  ;;  %v10917_v42 = vpop.permute.xlu0 %4059  ;;  %v1879_v31 = vmul.f32 %v9582_v10, %v15558_v12  ;;  %v1331_v4 = vadd.f32 %v1299_v17, %v15560_v9  ;;  %v1523_v54 = vadd.f32 %v1491_v27, %v1327_v26  ;;  %v2104_v7 = vadd.f32 %v2072_v53, %v1908_v21  ;;  %v15562_v12 = vld [vmem:[#allocation249_spill] sm:$0xff]  ;;  %v15564_v37 = vld [vmem:[#allocation142_spill] sm:$0xff]  ;;  %v15565_v56 = vld [vmem:[#allocation143_spill] sm:$0xff] }
 0x4b2   : > { %15555 = vst [vmem:[#allocation326_spill] sm:$0xff] %v10917_v42  ;;  %v1333_v49 = vadd.f32 %v1301_v5, %v15561_v24  ;;  %v1687_v48 = vmul.f32 %v9563_v29, %v15562_v12  ;;  %v1303_v42 = vmul.f32 %v15328_v58, %v15564_v37  ;;  %v1495_v2 = vmul.f32 %v15331_v40, %v15565_v56  ;;  %v15566_v17 = vld [vmem:[#allocation254_spill] sm:$0xff]  ;;  %v15567_v53 = vld [vmem:[#allocation144_spill] sm:$0xff]  ;;  %v15568_v21 = vld [vmem:[#allocation201_spill] sm:$0xff] }
 0x4b3   : > { %4063 = vperm.xlu1 %7209, %v10929_v45   ;;  %v1911_v44 = vadd.f32 %v1879_v31, %v1715_v14  ;;  %v1717_v1 = vadd.f32 %v1685_v25, %v1521_v60  ;;  %v2268_v26 = vmul.f32 %v9609_v32, %v15566_v17  ;;  %v1525_v27 = vadd.f32 %v1493_v59, %v1329_v34  ;;  %v15569_v24 = vld [vmem:[#allocation50_spill] sm:$0xff]  ;;  %v10959_v34 = vld [vmem:[%s14737_s11 + $0x8] sm:$0xff] }
 0x4b4   : > { %4259 = vperm.xlu0 %7210, %v10929_v45   ;;  %v10937_v13 = vpop.permute.xlu1 %3751  ;;  %v1305_v5 = vmul.f32 %v15328_v58, %v15567_v53  ;;  %v1881_v9 = vmul.f32 %v9582_v10, %v15568_v21  ;;  %v10951_v12 = vmul.f32 0.5, %v15569_v24  ;;  %v2077_v25 = vmul.f32 %v9594_v15, %v9995_v63  ;;  %v15572_v37 = vld [vmem:[#allocation251_spill] sm:$0xff] }
 0x4b5   : > { %15563 = vst [vmem:[#allocation212_spill] sm:$0xff] %v10937_v13  ;;  %v2107_v14 = vadd.f32 %v2075_v16, %v1911_v44  ;;  %v2300_v56 = vadd.f32 %v2268_v26, %v2104_v7  ;;  %v14850_v59 = vmov 8   ;;  %v1719_v44 = vadd.f32 %v1687_v48, %v1523_v54  ;;  %v15573_v7 = vld [vmem:[#allocation258_spill] sm:$0xff]  ;;  %v15575_v53 = vld [vmem:[#allocation75_spill] sm:$0xff] }
 0x4b6   : > { %v2334_v31 = vpop.permute.xlu0 %2333  ;;  %15570 = vst [vmem:[#allocation124_spill] sm:$0xff] %v10951_v12  ;;  %v1689_v63 = vmul.f32 %v9563_v29, %v15572_v37  ;;  %v2271_v17 = vmul.f32 %v9609_v32, %v15573_v7  ;;  %v1335_v21 = vadd.f32 %v1303_v42, %v15575_v53  ;;  %v1913_v24 = vadd.f32 %v1881_v9, %v1717_v1  ;;  %v15578_v48 = vld [vmem:[#allocation203_spill] sm:$0xff] }
 0x4b7   : > { %7211 = vset.pattern.permute.xlu1 %v15348_v47  ;;  %v2464_v60 = vmul.f32 %v9628_v20, %v2334_v31  ;;  %v15571_v47 = vld [vmem:[#allocation145_spill] sm:$0xff]  ;;  %v1527_v31 = vadd.f32 %v1495_v2, %v1331_v4  ;;  %v1883_v37 = vmul.f32 %v9582_v10, %v15578_v48  ;;  %v2081_v53 = vmul.f32 %v9594_v15, %v10007_v33 }
 0x4b8   : > { %4139 = vperm.xlu1 %7211, %v10959_v34   ;;  %7213 = vset.pattern.permute.xlu0 %v14850_v59  ;;  %v1497_v16 = vmul.f32 %v15331_v40, %v15571_v47  ;;  %v10969_v26 = vpop.permute.xlu1 %3759  ;;  %v15576_v59 = vld [vmem:[#allocation77_spill] sm:$0xff]  ;;  %v15577_v47 = vld [vmem:[#allocation146_spill] sm:$0xff]  ;;  %v2303_v12 = vadd.f32 %v2271_v17, %v2107_v14  ;;  %v2109_v62 = vadd.f32 %v2077_v25, %v1913_v24  ;;  %v15582_v25 = vld [vmem:[#allocation79_spill] sm:$0xff] }
 0x4b9   : > { %15574 = vst [vmem:[#allocation308_spill] sm:$0xff] %v10969_v26  ;;  %4335 = vperm.xlu0 %7213, %v10959_v34   ;;  %v2496_v13 = vadd.f32 %v2464_v60, %v2300_v56  ;;  %v10974_v45 = vadd.f32 %v1305_v5, %v15576_v59  ;;  %v1307_v54 = vmul.f32 %v15328_v58, %v15577_v47  ;;  %v15579_v5 = vld [vmem:[#allocation253_spill] sm:$0xff]  ;;  %v10992_v14 = vld [vmem:[%s14737_s11 + $0x20] sm:$0xff] }
 0x4ba   : > { %v2346_v7 = vpop.permute.xlu0 %2345  ;;  %v2079_v26 = vmul.f32 %v9594_v15, %v10001_v46  ;;  %v1529_v2 = vadd.f32 %v1497_v16, %v1333_v49  ;;  %v1721_v1 = vadd.f32 %v1689_v63, %v1525_v27  ;;  %v1691_v9 = vmul.f32 %v9563_v29, %v15579_v5  ;;  %v15581_v46 = vld [vmem:[#allocation260_spill] sm:$0xff]  ;;  %v15583_v16 = vld [vmem:[#allocation147_spill] sm:$0xff]  ;;  %v15584_v63 = vld [vmem:[#allocation205_spill] sm:$0xff] }
 0x4bb   : > { %v2528_v42 = vadd.f32 %v2496_v13, %v10814_v23  ;;  %v2467_v4 = vmul.f32 %v9628_v20, %v2346_v7  ;;  %v1915_v56 = vadd.f32 %v1883_v37, %v1719_v44  ;;  %v2273_v23 = vmul.f32 %v9609_v32, %v15581_v46  ;;  %v15589_v46 = vld [vmem:[#allocation297_spill] sm:$0xff] }
 0x4bc   : > { %4143 = vperm.xlu1 %7211, %v10636_v43   ;;  %v10987_v60 = vpop.permute.xlu1 %3767  ;;  %v11000_v59 = vadd.f32 %v1307_v54, %v15582_v25  ;;  %v1499_v44 = vmul.f32 %v15331_v40, %v15583_v16  ;;  %v1885_v17 = vmul.f32 %v9582_v10, %v15584_v63  ;;  %v15585_v54 = vld [vmem:[#allocation148_spill] sm:$0xff]  ;;  %v1723_v7 = vadd.f32 %v1691_v9, %v1527_v31 }
 0x4bd   : > { %15580 = vst [vmem:[#allocation126_spill] sm:$0xff] %v10987_v60  ;;  %4347 = vperm.xlu0 %7213, %v10992_v14   ;;  %v2561_v13 = vmul.f32 %v15380_v39, %v2528_v42  ;;  %v2625_v49 = vpack.c.bf16 %v10316_v36, %v2528_v42  ;;  %v2499_v27 = vadd.f32 %v2467_v4, %v2303_v12  ;;  %v15586_v42 = vld [vmem:[#allocation255_spill] sm:$0xff] }
 0x4be   : > { %v2354_v24 = vpop.permute.xlu0 %2353  ;;  %v2111_v47 = vadd.f32 %v2079_v26, %v1915_v56  ;;  %v2305_v36 = vadd.f32 %v2273_v23, %v2109_v62  ;;  %v1309_v37 = vmul.f32 %v15328_v58, %v15585_v54  ;;  %v1693_v4 = vmul.f32 %v9563_v29, %v15586_v42  ;;  %v11020_v26 = vld [vmem:[%s14737_s11 + $0x30] sm:$0xff] }
 0x4bf   : > { %2593 = vst [vmem:[#allocation12] sm:$0xff] %v2561_v13  ;;  %2641 = vst [vmem:[#allocation2] sm:$0xff] %v2625_v49  ;;  %v2531_v48 = vadd.f32 %v2499_v27, %v10816_v18  ;;  %v2469_v12 = vmul.f32 %v9628_v20, %v2354_v24  ;;  %v1917_v5 = vadd.f32 %v1885_v17, %v1721_v1  ;;  %v15588_v18 = vld [vmem:[#allocation262_spill] sm:$0xff]  ;;  %v15590_v13 = vld [vmem:[#allocation149_spill] sm:$0xff] }
 0x4c0   : > { %4151 = vperm.xlu1 %7211, %v10992_v14   ;;  %v11015_v33 = vpop.permute.xlu1 %3775  ;;  %v2275_v62 = vmul.f32 %v9609_v32, %v15588_v18  ;;  %v1531_v23 = vadd.f32 %v1499_v44, %v1335_v21  ;;  %v1501_v1 = vmul.f32 %v15331_v40, %v15590_v13  ;;  %v15591_v49 = vld [vmem:[#allocation207_spill] sm:$0xff]  ;;  %v2083_v63 = vmul.f32 %v9594_v15, %v10013_v57  ;;  %v15592_v21 = vld [vmem:[#allocation81_spill] sm:$0xff]  ;;  %v15594_v54 = vld [vmem:[#allocation264_spill] sm:$0xff] }
 0x4c1   : > { %15587 = vst [vmem:[#allocation186_spill] sm:$0xff] %v11015_v33  ;;  %4355 = vperm.xlu0 %7213, %v11020_v26   ;;  %v2564_v56 = vmul.f32 %v15380_v39, %v2531_v48  ;;  %v2626_v31 = vpack.c.bf16 %v2531_v48, %v15589_v46  ;;  %v2501_v9 = vadd.f32 %v2469_v12, %v2305_v36  ;;  %v15593_v12 = vld [vmem:[#allocation257_spill] sm:$0xff]  ;;  %v15596_v18 = vld [vmem:[#allocation150_spill] sm:$0xff] }
 0x4c2   : > { %v1887_v27 = vmul.f32 %v9582_v10, %v15591_v49  ;;  %v2113_v25 = vadd.f32 %v2081_v53, %v1917_v5  ;;  %v2362_v16 = vpop.permute.xlu0 %2361  ;;  %v2307_v24 = vadd.f32 %v2275_v62, %v2111_v47  ;;  %v11037_v44 = vadd.f32 %v1309_v37, %v15592_v21 }
 0x4c3   : > { %2596 = vst [vmem:[#allocation12 + $0x18] sm:$0xff] %v2564_v56  ;;  %2642 = vst [vmem:[#allocation2 + $0x8] sm:$0xff] %v2626_v31  ;;  %v2533_v17 = vadd.f32 %v2501_v9, %v10829_v28  ;;  %v2471_v48 = vmul.f32 %v9628_v20, %v2362_v16  ;;  %v1725_v36 = vadd.f32 %v1693_v4, %v1529_v2  ;;  %v11048_v28 = vld [vmem:[%s14737_s11 + $0x40] sm:$0xff]  ;;  %v15597_v56 = vld [vmem:[#allocation209_spill] sm:$0xff] }
 0x4c4   : > { %4159 = vperm.xlu1 %7211, %v11020_v26   ;;  %v1695_v53 = vmul.f32 %v9563_v29, %v15593_v12  ;;  %v2277_v42 = vmul.f32 %v9609_v32, %v15594_v54  ;;  %v11043_v57 = vpop.permute.xlu1 %3783  ;;  %v1919_v47 = vadd.f32 %v1887_v27, %v1723_v7  ;;  %v1533_v5 = vadd.f32 %v1501_v1, %v10974_v45  ;;  %v15598_v45 = vld [vmem:[#allocation151_spill] sm:$0xff] }
 0x4c5   : > { %15595 = vst [vmem:[#allocation328_spill] sm:$0xff] %v11043_v57  ;;  %4363 = vperm.xlu0 %7213, %v11048_v28   ;;  %v2566_v37 = vmul.f32 %v15380_v39, %v2533_v17  ;;  %v2627_v2 = vpack.c.bf16 %v2533_v17, %v10342_v51  ;;  %v2503_v4 = vadd.f32 %v2471_v48, %v2307_v24  ;;  %v15599_v16 = vld [vmem:[#allocation259_spill] sm:$0xff]  ;;  %v15927_v57 = vld [vmem:[#allocation233_spill] sm:$0xff] }
 0x4c6   : > { %v1311_v62 = vmul.f32 %v15328_v58, %v15596_v18  ;;  %v1889_v46 = vmul.f32 %v9582_v10, %v15597_v56  ;;  %v2309_v31 = vadd.f32 %v2277_v42, %v2113_v25  ;;  %v2370_v9 = vpop.permute.xlu0 %2369  ;;  %v2115_v13 = vadd.f32 %v2083_v63, %v1919_v47  ;;  %v15602_v12 = vld [vmem:[#allocation83_spill] sm:$0xff] }
 0x4c7   : > { %v2085_v49 = vmul.f32 %v9594_v15, %v10019_v30  ;;  %2598 = vst [vmem:[#allocation12 + $0x28] sm:$0xff] %v2566_v37  ;;  %2643 = vst [vmem:[#allocation2 + $0x10] sm:$0xff] %v2627_v2  ;;  %v2535_v7 = vadd.f32 %v2503_v4, %v10837_v61  ;;  %v2473_v51 = vmul.f32 %v9628_v20, %v2370_v9  ;;  %v11072_v30 = vld [vmem:[%s14737_s11 + $0x50] sm:$0xff]  ;;  %v15601_v61 = vld [vmem:[#allocation266_spill] sm:$0xff] }
 0x4c8   : > { %4167 = vperm.xlu1 %7211, %v11048_v28   ;;  %v1503_v1 = vmul.f32 %v15331_v40, %v15598_v45  ;;  %v1727_v27 = vadd.f32 %v1695_v53, %v1531_v23  ;;  %v1697_v25 = vmul.f32 %v9563_v29, %v15599_v16  ;;  %v1921_v17 = vadd.f32 %v1889_v46, %v1725_v36  ;;  %v11067_v63 = vpop.permute.xlu1 %3791  ;;  %v15603_v36 = vld [vmem:[#allocation152_spill] sm:$0xff]  ;;  %v15604_v42 = vld [vmem:[#allocation211_spill] sm:$0xff]  ;;  %v15608_v45 = vld [vmem:[#allocation85_spill] sm:$0xff] }
 0x4c9   : > { %15600 = vst [vmem:[#allocation128_spill] sm:$0xff] %v11067_v63  ;;  %4371 = vperm.xlu0 %7213, %v11072_v30   ;;  %v2279_v24 = vmul.f32 %v9609_v32, %v15601_v61  ;;  %v2568_v48 = vmul.f32 %v15380_v39, %v2535_v7  ;;  %v2628_v23 = vpack.c.bf16 %v2535_v7, %v10366_v52  ;;  %v15925_v63 = vld [vmem:[#allocation231_spill] sm:$0xff] }
 0x4ca   : > { %v2505_v21 = vadd.f32 %v2473_v51, %v2309_v31  ;;  %v11080_v53 = vadd.f32 %v1311_v62, %v15602_v12  ;;  %v1313_v54 = vmul.f32 %v15328_v58, %v15603_v36  ;;  %v1891_v47 = vmul.f32 %v9582_v10, %v15604_v42  ;;  %v2378_v2 = vpop.permute.xlu0 %2377  ;;  %v15605_v31 = vld [vmem:[#allocation261_spill] sm:$0xff]  ;;  %v15611_v12 = vld [vmem:[#allocation154_spill] sm:$0xff]  ;;  %v15612_v42 = vld [vmem:[#allocation263_spill] sm:$0xff] }
 0x4cb   : > { %v2087_v37 = vmul.f32 %v9594_v15, %v10025_v41  ;;  %v2117_v4 = vadd.f32 %v2085_v49, %v1921_v17  ;;  %2600 = vst [vmem:[#allocation12 + $0x38] sm:$0xff] %v2568_v48  ;;  %2644 = vst [vmem:[#allocation2 + $0x18] sm:$0xff] %v2628_v23  ;;  %v2311_v52 = vadd.f32 %v2279_v24, %v2115_v13  ;;  %v11099_v41 = vld [vmem:[%s14737_s11 + $0x60] sm:$0xff] }
 0x4cc   : > { %v2537_v18 = vadd.f32 %v2505_v21, %v10839_v3  ;;  %v2475_v56 = vmul.f32 %v9628_v20, %v2378_v2  ;;  %4175 = vperm.xlu1 %7211, %v11072_v30   ;;  %v1535_v62 = vadd.f32 %v1503_v1, %v11000_v59  ;;  %v1729_v46 = vadd.f32 %v1697_v25, %v1533_v5  ;;  %v11094_v51 = vpop.permute.xlu1 %3799  ;;  %v15607_v3 = vld [vmem:[#allocation268_spill] sm:$0xff]  ;;  %v15610_v25 = vld [vmem:[#allocation213_spill] sm:$0xff] }
 0x4cd   : > { %v1699_v9 = vmul.f32 %v9563_v29, %v15605_v31  ;;  %v1923_v7 = vadd.f32 %v1891_v47, %v1727_v27  ;;  %15606 = vst [vmem:[#allocation214_spill] sm:$0xff] %v11094_v51  ;;  %4379 = vperm.xlu0 %7213, %v11099_v41   ;;  %v2281_v13 = vmul.f32 %v9609_v32, %v15607_v3  ;;  %v15609_v27 = vld [vmem:[#allocation153_spill] sm:$0xff]  ;;  %v15615_v31 = vld [vmem:[#allocation155_spill] sm:$0xff] }
 0x4ce   : > { %v2570_v49 = vmul.f32 %v15380_v39, %v2537_v18  ;;  %v2629_v59 = vpack.c.bf16 %v2537_v18, %v10392_v38  ;;  %v2507_v5 = vadd.f32 %v2475_v56, %v2311_v52  ;;  %v11107_v1 = vadd.f32 %v1313_v54, %v15608_v45  ;;  %v2386_v24 = vpop.permute.xlu0 %2385 }
 0x4cf   : > { %v1505_v16 = vmul.f32 %v15331_v40, %v15609_v27  ;;  %v1893_v17 = vmul.f32 %v9582_v10, %v15610_v25  ;;  %v2119_v61 = vadd.f32 %v2087_v37, %v1923_v7  ;;  %v2089_v48 = vmul.f32 %v9594_v15, %v10031_v11  ;;  %v15613_v37 = vld [vmem:[#allocation270_spill] sm:$0xff]  ;;  %v15616_v7 = vld [vmem:[#allocation215_spill] sm:$0xff]  ;;  %v15619_v25 = vld [vmem:[#allocation265_spill] sm:$0xff] }
 0x4d0   : > { %2602 = vst [vmem:[#allocation12 + $0x48] sm:$0xff] %v2570_v49  ;;  %2645 = vst [vmem:[#allocation2 + $0x20] sm:$0xff] %v2629_v59  ;;  %v2539_v23 = vadd.f32 %v2507_v5, %v10853_v6  ;;  %v2313_v38 = vadd.f32 %v2281_v13, %v2117_v4  ;;  %v2477_v21 = vmul.f32 %v9628_v20, %v2386_v24  ;;  %4183 = vperm.xlu1 %7211, %v11099_v41   ;;  %v11124_v11 = vpop.permute.xlu1 %3807  ;;  %v11129_v6 = vld [vmem:[%s14737_s11 + $0x70] sm:$0xff]  ;;  %v15617_v5 = vld [vmem:[#allocation377_spill] sm:$0xff] }
 0x4d1   : > { %v1315_v36 = vmul.f32 %v15328_v58, %v15611_v12  ;;  %v1731_v54 = vadd.f32 %v1699_v9, %v1535_v62  ;;  %v1701_v47 = vmul.f32 %v9563_v29, %v15612_v42  ;;  %v2283_v2 = vmul.f32 %v9609_v32, %v15613_v37  ;;  %15614 = vst [vmem:[#allocation242_spill] sm:$0xff] %v11124_v11 }
 0x4d2   : > { %4387 = vperm.xlu0 %7213, %v11129_v6   ;;  %v1925_v4 = vadd.f32 %v1893_v17, %v1729_v46  ;;  %v2572_v18 = vmul.f32 %v15380_v39, %v2539_v23  ;;  %v2630_v52 = vpack.c.bf16 %v2539_v23, %v10416_v35  ;;  %v2509_v56 = vadd.f32 %v2477_v21, %v2313_v38  ;;  %v2394_v49 = vpop.permute.xlu0 %2393 }
 0x4d3   : > { %v1537_v62 = vadd.f32 %v1505_v16, %v11037_v44  ;;  %v1507_v9 = vmul.f32 %v15331_v40, %v15615_v31  ;;  %v1895_v3 = vmul.f32 %v9582_v10, %v15616_v7  ;;  %v2315_v13 = vadd.f32 %v2283_v2, %v2119_v61  ;;  %v15618_v44 = vld [vmem:[#allocation87_spill] sm:$0xff]  ;;  %v15624_v2 = vld [vmem:[#allocation378_spill] sm:$0xff] }
 0x4d4   : > { %v2121_v59 = vadd.f32 %v2089_v48, %v1925_v4  ;;  %v2091_v45 = vmul.f32 %v9594_v15, %v15617_v5  ;;  %2604 = vst [vmem:[#allocation12 + $0x58] sm:$0xff] %v2572_v18  ;;  %2646 = vst [vmem:[#allocation2 + $0x28] sm:$0xff] %v2630_v52  ;;  %v2541_v46 = vadd.f32 %v2509_v56, %v10855_v0  ;;  %4191 = vperm.xlu1 %7211, %v11129_v6   ;;  %v11147_v24 = vpop.permute.xlu1 %3815  ;;  %v11152_v48 = vld [vmem:[%s14737_s11 + $0x80] sm:$0xff]  ;;  %v15621_v0 = vld [vmem:[#allocation272_spill] sm:$0xff] }
 0x4d5   : > { %v2479_v35 = vmul.f32 %v9628_v20, %v2394_v49  ;;  %v1347_v27 = vadd.f32 %v1315_v36, %v15618_v44  ;;  %v1733_v16 = vadd.f32 %v1701_v47, %v1537_v62  ;;  %v1703_v17 = vmul.f32 %v9563_v29, %v15619_v25  ;;  %15620 = vst [vmem:[#allocation310_spill] sm:$0xff] %v11147_v24  ;;  %v15623_v47 = vld [vmem:[#allocation217_spill] sm:$0xff]  ;;  %v15626_v7 = vld [vmem:[#allocation267_spill] sm:$0xff]  ;;  %v11178_v5 = vld [vmem:[%s14737_s11 + $0x90] sm:$0xff] }
 0x4d6   : > { %v1927_v61 = vadd.f32 %v1895_v3, %v1731_v54  ;;  %4395 = vperm.xlu0 %7213, %v11152_v48   ;;  %v2285_v23 = vmul.f32 %v9609_v32, %v15621_v0  ;;  %v2574_v38 = vmul.f32 %v15380_v39, %v2541_v46  ;;  %v2631_v21 = vpack.c.bf16 %v2541_v46, %v10442_v50  ;;  %v15622_v54 = vld [vmem:[#allocation157_spill] sm:$0xff]  ;;  %v2402_v18 = vpop.permute.xlu0 %2401 }
 0x4d7   : > { %v2511_v12 = vadd.f32 %v2479_v35, %v2315_v13  ;;  %v1539_v36 = vadd.f32 %v1507_v9, %v11080_v53  ;;  %v1509_v42 = vmul.f32 %v15331_v40, %v15622_v54  ;;  %v1897_v37 = vmul.f32 %v9582_v10, %v15623_v47  ;;  %v15625_v53 = vld [vmem:[#allocation156_spill] sm:$0xff]  ;;  %v15633_v47 = vld [vmem:[#allocation269_spill] sm:$0xff] }
 0x4d8   : > { %v2093_v4 = vmul.f32 %v9594_v15, %v15624_v2  ;;  %v2123_v52 = vadd.f32 %v2091_v45, %v1927_v61  ;;  %2606 = vst [vmem:[#allocation12 + $0x68] sm:$0xff] %v2574_v38  ;;  %2647 = vst [vmem:[#allocation2 + $0x30] sm:$0xff] %v2631_v21  ;;  %v2317_v62 = vadd.f32 %v2285_v23, %v2121_v59  ;;  %4199 = vperm.xlu1 %7211, %v11152_v48   ;;  %v11173_v49 = vpop.permute.xlu1 %3823  ;;  %v15631_v38 = vld [vmem:[#allocation380_spill] sm:$0xff] }
 0x4d9   : > { %v2543_v56 = vadd.f32 %v2511_v12, %v10857_v19  ;;  %v2481_v50 = vmul.f32 %v9628_v20, %v2402_v18  ;;  %v1317_v31 = vmul.f32 %v15328_v58, %v15625_v53  ;;  %v1735_v9 = vadd.f32 %v1703_v17, %v1539_v36  ;;  %15627 = vst [vmem:[#allocation88_spill] sm:$0xff] %v11173_v49  ;;  %v15628_v19 = vld [vmem:[#allocation274_spill] sm:$0xff]  ;;  %v15630_v17 = vld [vmem:[#allocation219_spill] sm:$0xff]  ;;  %v15634_v2 = vld [vmem:[#allocation276_spill] sm:$0xff] }
 0x4da   : > { %v1705_v3 = vmul.f32 %v9563_v29, %v15626_v7  ;;  %v1929_v13 = vadd.f32 %v1897_v37, %v1733_v16  ;;  %4403 = vperm.xlu0 %7213, %v11178_v5   ;;  %v2287_v59 = vmul.f32 %v9609_v32, %v15628_v19  ;;  %v1541_v44 = vadd.f32 %v1509_v42, %v11107_v1  ;;  %v15629_v16 = vld [vmem:[#allocation159_spill] sm:$0xff]  ;;  %v2410_v23 = vpop.permute.xlu0 %2409  ;;  %v15632_v1 = vld [vmem:[#allocation89_spill] sm:$0xff] }
 0x4db   : > { %v2576_v45 = vmul.f32 %v15380_v39, %v2543_v56  ;;  %v2632_v46 = vpack.c.bf16 %v2543_v56, %v10466_v55  ;;  %v2513_v35 = vadd.f32 %v2481_v50, %v2317_v62  ;;  %v1511_v25 = vmul.f32 %v15331_v40, %v15629_v16  ;;  %v15636_v62 = vld [vmem:[#allocation41_spill] sm:$0xff] }
 0x4dc   : > { %v1899_v61 = vmul.f32 %v9582_v10, %v15630_v17  ;;  %v2125_v0 = vadd.f32 %v2093_v4, %v1929_v13  ;;  %v2095_v21 = vmul.f32 %v9594_v15, %v15631_v38  ;;  %v2319_v36 = vadd.f32 %v2287_v59, %v2123_v52  ;;  %4207 = vperm.xlu1 %7211, %v11178_v5   ;;  %v11200_v18 = vpop.permute.xlu1 %3831  ;;  %v15637_v7 = vld [vmem:[#allocation161_spill] sm:$0xff] }
 0x4dd   : > { %2608 = vst [vmem:[#allocation12 + $0x78] sm:$0xff] %v2576_v45  ;;  %2648 = vst [vmem:[#allocation2 + $0x38] sm:$0xff] %v2632_v46  ;;  %v2545_v12 = vadd.f32 %v2513_v35, %v10870_v8  ;;  %v2483_v55 = vmul.f32 %v9628_v20, %v2410_v23  ;;  %v1349_v54 = vadd.f32 %v1317_v31, %v15632_v1  ;;  %v11205_v8 = vld [vmem:[%s14737_s11 + $0xa0] sm:$0xff]  ;;  %v15638_v13 = vld [vmem:[#allocation221_spill] sm:$0xff] }
 0x4de   : > { %v1737_v42 = vadd.f32 %v1705_v3, %v1541_v44  ;;  %v1707_v37 = vmul.f32 %v9563_v29, %v15633_v47  ;;  %v2289_v4 = vmul.f32 %v9609_v32, %v15634_v2  ;;  %15635 = vst [vmem:[#allocation188_spill] sm:$0xff] %v11200_v18  ;;  %4411 = vperm.xlu0 %7213, %v11205_v8   ;;  %v15639_v35 = vld [vmem:[#allocation382_spill] sm:$0xff]  ;;  %v15642_v23 = vld [vmem:[#allocation271_spill] sm:$0xff] }
 0x4df   : > { %v1931_v52 = vadd.f32 %v1899_v61, %v1735_v9  ;;  %v2578_v56 = vmul.f32 %v15380_v39, %v2545_v12  ;;  %v2633_v50 = vpack.c.bf16 %v2545_v12, %v15636_v62  ;;  %v2515_v53 = vadd.f32 %v2483_v55, %v2319_v36  ;;  %v2418_v45 = vpop.permute.xlu0 %2417  ;;  %v15640_v9 = vld [vmem:[#allocation121_spill] sm:$0xff]  ;;  %v11228_v12 = vld [vmem:[%s14737_s11 + $0xb0] sm:$0xff]  ;;  %v15644_v36 = vld [vmem:[#allocation278_spill] sm:$0xff] }
 0x4e0   : > { %v1543_v31 = vadd.f32 %v1511_v25, %v1347_v27  ;;  %v1513_v3 = vmul.f32 %v15331_v40, %v15637_v7  ;;  %v1901_v19 = vmul.f32 %v9582_v10, %v15638_v13  ;;  %v2321_v59 = vadd.f32 %v2289_v4, %v2125_v0  ;;  %4215 = vperm.xlu1 %7211, %v11205_v8   ;;  %v15641_v27 = vld [vmem:[#allocation158_spill] sm:$0xff]  ;;  %v15646_v4 = vld [vmem:[#allocation163_spill] sm:$0xff]  ;;  %v15648_v62 = vld [vmem:[#allocation384_spill] sm:$0xff] }
 0x4e1   : > { %v2127_v46 = vadd.f32 %v2095_v21, %v1931_v52  ;;  %v2097_v44 = vmul.f32 %v9594_v15, %v15639_v35  ;;  %2610 = vst [vmem:[#allocation12 + $0x88] sm:$0xff] %v2578_v56  ;;  %2649 = vst [vmem:[#allocation2 + $0x40] sm:$0xff] %v2633_v50  ;;  %v2547_v16 = vadd.f32 %v2515_v53, %v15640_v9  ;;  %v11223_v21 = vpop.permute.xlu1 %3839  ;;  %v15647_v52 = vld [vmem:[#allocation223_spill] sm:$0xff] }
 0x4e2   : > { %v2485_v17 = vmul.f32 %v9628_v20, %v2418_v45  ;;  %v1319_v25 = vmul.f32 %v15328_v58, %v15641_v27  ;;  %v1739_v61 = vadd.f32 %v1707_v37, %v1543_v31  ;;  %v1709_v0 = vmul.f32 %v9563_v29, %v15642_v23  ;;  %15643 = vst [vmem:[#allocation330_spill] sm:$0xff] %v11223_v21  ;;  %v15645_v58 = vld [vmem:[#allocation45_spill] sm:$0xff]  ;;  %v15917_v21 = vld [vmem:[#allocation220_spill] sm:$0xff] }
 0x4e3   : > { %v1933_v38 = vadd.f32 %v1901_v19, %v1737_v42  ;;  %4419 = vperm.xlu0 %7213, %v11228_v12   ;;  %v2291_v55 = vmul.f32 %v9609_v32, %v15644_v36  ;;  %v2580_v1 = vmul.f32 %v15380_v39, %v2547_v16  ;;  %v2634_v47 = vpack.c.bf16 %v2547_v16, %v15645_v58  ;;  %v2426_v53 = vpop.permute.xlu0 %2425  ;;  %v15654_v23 = vld [vmem:[#allocation225_spill] sm:$0xff]  ;;  %v15656_v58 = vld [vmem:[#allocation84_spill] sm:$0xff] }
 0x4e4   : > { %v2517_v37 = vadd.f32 %v2485_v17, %v2321_v59  ;;  %v1545_v2 = vadd.f32 %v1513_v3, %v1349_v54  ;;  %v1515_v42 = vmul.f32 %v15331_v40, %v15646_v4  ;;  %v1903_v56 = vmul.f32 %v9582_v10, %v15647_v52  ;;  %4223 = vperm.xlu1 %7211, %v11228_v12   ;;  %v15649_v54 = vld [vmem:[#allocation91_spill] sm:$0xff]  ;;  %v15650_v59 = vld [vmem:[#allocation273_spill] sm:$0xff]  ;;  %v15657_v4 = vld [vmem:[#allocation124_spill] sm:$0xff] }
 0x4e5   : > { %v2099_v50 = vmul.f32 %v9594_v15, %v15648_v62  ;;  %v2129_v31 = vadd.f32 %v2097_v44, %v1933_v38  ;;  %2612 = vst [vmem:[#allocation12 + $0x98] sm:$0xff] %v2580_v1  ;;  %2650 = vst [vmem:[#allocation2 + $0x48] sm:$0xff] %v2634_v47  ;;  %v2323_v13 = vadd.f32 %v2291_v55, %v2127_v46  ;;  %v11247_v9 = vpop.permute.xlu1 %3847  ;;  %v11252_v44 = vld [vmem:[%s14737_s11 + $0xc0] sm:$0xff]  ;;  %v15652_v46 = vld [vmem:[#allocation280_spill] sm:$0xff] }
 0x4e6   : > { %v2549_v7 = vadd.f32 %v2517_v37, %v10905_v22  ;;  %v2487_v19 = vmul.f32 %v9628_v20, %v2426_v53  ;;  %v1351_v3 = vadd.f32 %v1319_v25, %v15649_v54  ;;  %v1741_v40 = vadd.f32 %v1709_v0, %v1545_v2  ;;  %15651 = vst [vmem:[#allocation90_spill] sm:$0xff] %v11247_v9  ;;  %v547_v22 = vld [vmem:[%s15199_s9 + $0xc8] sm:$0xff]  ;;  %v15655_v55 = vld [vmem:[#allocation386_spill] sm:$0xff] }
 0x4e7   : > { %v1711_v45 = vmul.f32 %v9563_v29, %v15650_v59  ;;  %v1935_v35 = vadd.f32 %v1903_v56, %v1739_v61  ;;  %4427 = vperm.xlu0 %7213, %v11252_v44   ;;  %v2293_v16 = vmul.f32 %v9609_v32, %v15652_v46  ;;  %v15653_v29 = vld [vmem:[#allocation102_spill] sm:$0xff]  ;;  %v1905_v0 = vmul.f32 %v9582_v10, %v15654_v23  ;;  %v2434_v36 = vpop.permute.xlu0 %2433  ;;  %v15659_v53 = vld [vmem:[#allocation283_spill] sm:$0xff]  ;;  %v15664_v23 = vld [vmem:[#allocation56_spill] sm:$0xff] }
 0x4e8   : > { %v2582_v17 = vmul.f32 %v15380_v39, %v2549_v7  ;;  %v2635_v27 = vpack.c.bf16 %v2549_v7, %v15653_v29  ;;  %v2519_v25 = vadd.f32 %v2487_v19, %v2323_v13  ;;  %v1547_v61 = vadd.f32 %v1515_v42, %v1351_v3  ;;  %4231 = vperm.xlu1 %7211, %v11252_v44   ;;  %v15658_v42 = vld [vmem:[#allocation53_spill] sm:$0xff]  ;;  %v11278_v13 = vld [vmem:[%s14737_s11 + $0xd0] sm:$0xff]  ;;  %v15661_v3 = vld [vmem:[#allocation47_spill] sm:$0xff] }
 0x4e9   : > { %v2131_v38 = vadd.f32 %v2099_v50, %v1935_v35  ;;  %v2101_v1 = vmul.f32 %v9594_v15, %v15655_v55  ;;  %v2325_v37 = vadd.f32 %v2293_v16, %v2129_v31  ;;  %v2489_v2 = vmul.f32 %v9628_v20, %v2434_v36  ;;  %v11273_v7 = vpop.permute.xlu1 %3855  ;;  %v549_v31 = vld [vmem:[%s15199_s9 + $0xd8] sm:$0xff]  ;;  %v15662_v35 = vld [vmem:[#allocation227_spill] sm:$0xff]  ;;  %v15663_v29 = vld [vmem:[#allocation256_spill] sm:$0xff] }
 0x4ea   : > { %2614 = vst [vmem:[#allocation12 + $0xa8] sm:$0xff] %v2582_v17  ;;  %2651 = vst [vmem:[#allocation2 + $0x50] sm:$0xff] %v2635_v27  ;;  %v2551_v47 = vadd.f32 %v2519_v25, %v15656_v58  ;;  %v881_v52 = vadd.f32 %v15657_v4, %v547_v22  ;;  %v851_v56 = vmul.f32 0.5, %v15658_v42  ;;  %v1743_v62 = vadd.f32 %v1711_v45, %v1547_v61 }
 0x4eb   : > { %v2295_v50 = vmul.f32 %v9609_v32, %v15659_v53  ;;  %15660 = vst [vmem:[#allocation216_spill] sm:$0xff] %v11273_v7  ;;  %4435 = vperm.xlu0 %7213, %v11278_v13   ;;  %v1937_v19 = vadd.f32 %v1905_v0, %v1741_v40  ;;  %v2521_v45 = vadd.f32 %v2489_v2, %v2325_v37  ;;  %v2442_v16 = vpop.permute.xlu0 %2441  ;;  %v853_v0 = vmul.f32 0.5, %v15664_v23  ;;  %v11307_v53 = vld [vmem:[%s14737_s11 + $0xe0] sm:$0xff]  ;;  %v15913_v7 = vld [vmem:[#allocation189_spill] sm:$0xff] }
 0x4ec   : > { %v2584_v54 = vmul.f32 %v15380_v39, %v2551_v47  ;;  %v2636_v59 = vpack.c.bf16 %v2551_v47, %v15661_v3  ;;  %v1907_v22 = vmul.f32 %v9582_v10, %v15662_v35  ;;  %v2103_v27 = vmul.f32 %v9594_v15, %v15663_v29  ;;  %4239 = vperm.xlu1 %7211, %v11278_v13   ;;  %v15666_v10 = vld [vmem:[#allocation68_spill] sm:$0xff]  ;;  %v15667_v15 = vld [vmem:[#allocation286_spill] sm:$0xff]  ;;  %v15668_v47 = vld [vmem:[#allocation49_spill] sm:$0xff] }
 0x4ed   : > { %v2327_v46 = vadd.f32 %v2295_v50, %v2131_v38  ;;  %v2133_v17 = vadd.f32 %v2101_v1, %v1937_v19  ;;  %v2553_v25 = vadd.f32 %v2521_v45, %v881_v52  ;;  %v2491_v61 = vmul.f32 %v9628_v20, %v2442_v16  ;;  %v11293_v55 = vpop.permute.xlu1 %3863  ;;  %v551_v38 = vld [vmem:[%s15199_s9 + $0xe8] sm:$0xff]  ;;  %v15672_v35 = vld [vmem:[#allocation170_spill] sm:$0xff] }
 0x4ee   : > { %2616 = vst [vmem:[#allocation12 + $0xb8] sm:$0xff] %v2584_v54  ;;  %2652 = vst [vmem:[#allocation2 + $0x58] sm:$0xff] %v2636_v59  ;;  %v883_v40 = vadd.f32 %v851_v56, %v549_v31  ;;  %v1939_v36 = vadd.f32 %v1907_v22, %v1743_v62  ;;  %v2297_v1 = vmul.f32 %v9609_v32, %v15667_v15  ;;  %v15669_v31 = vld [vmem:[#allocation59_spill] sm:$0xff]  ;;  %v15670_v54 = vld [vmem:[#allocation289_spill] sm:$0xff] }
 0x4ef   : > { %15665 = vst [vmem:[#allocation244_spill] sm:$0xff] %v11293_v55  ;;  %4443 = vperm.xlu0 %7213, %v15666_v10   ;;  %v2586_v58 = vmul.f32 %v15380_v39, %v2553_v25  ;;  %v2637_v37 = vpack.c.bf16 %v2553_v25, %v15668_v47  ;;  %v2523_v2 = vadd.f32 %v2491_v61, %v2327_v46  ;;  %v2450_v4 = vpop.permute.xlu0 %2449  ;;  %v855_v19 = vmul.f32 0.5, %v15669_v31  ;;  %v15671_v59 = vld [vmem:[#allocation197_spill] sm:$0xff]  ;;  %v11325_v61 = vld [vmem:[%s14737_s11 + $0xf0] sm:$0xff]  ;;  %v15912_v55 = vld [vmem:[#allocation187_spill] sm:$0xff] }
 0x4f0   : > { %v2135_v52 = vadd.f32 %v2103_v27, %v1939_v36  ;;  %v2329_v56 = vadd.f32 %v2297_v1, %v2133_v17  ;;  %v2493_v62 = vmul.f32 %v9628_v20, %v2450_v4  ;;  %4247 = vperm.xlu1 %7211, %v11307_v53   ;;  %v885_v50 = vadd.f32 %v853_v0, %v551_v38  ;;  %v553_v17 = vld [vmem:[%s15199_s9 + $0xf8] sm:$0xff]  ;;  %v15674_v36 = vld [vmem:[#allocation198_spill] sm:$0xff] }
 0x4f1   : > { %2618 = vst [vmem:[#allocation12 + $0xc8] sm:$0xff] %v2586_v58  ;;  %2653 = vst [vmem:[#allocation2 + $0x60] sm:$0xff] %v2637_v37  ;;  %v2555_v42 = vadd.f32 %v2523_v2, %v883_v40  ;;  %v2299_v3 = vmul.f32 %v9609_v32, %v15670_v54  ;;  %v14853_v40 = vmov 9   ;;  %v887_v23 = vadd.f32 %v855_v19, %v553_v17  ;;  %v15676_v1 = vld [vmem:[#allocation70_spill] sm:$0xff]  ;;  %v15687_v54 = vld [vmem:[#allocation108_spill] sm:$0xff] }
 0x4f2   : > { %v2525_v46 = vadd.f32 %v2493_v62, %v2329_v56  ;;  %v11316_v16 = vpop.permute.xlu1 %3939  ;;  %v15678_v47 = vmov 8   ;;  %v15679_v2 = vld [vmem:[#allocation314_spill] sm:$0xff] }
 0x4f3   : > { %4451 = vperm.xlu0 %7213, %v15671_v59   ;;  %v2588_v45 = vmul.f32 %v15380_v39, %v2555_v42  ;;  %v2638_v22 = vpack.c.bf16 %v2555_v42, %v15672_v35  ;;  %15673 = vst [vmem:[#allocation311_spill] sm:$0xff] %v11316_v16  ;;  %v2458_v29 = vpop.permute.xlu0 %2457  ;;  %v2331_v25 = vadd.f32 %v2299_v3, %v2135_v52  ;;  %v15681_v42 = vld [vmem:[#allocation72_spill] sm:$0xff] }
 0x4f4   : > { %v2557_v27 = vadd.f32 %v2525_v46, %v885_v50  ;;  %v2495_v32 = vmul.f32 %v9628_v20, %v2458_v29  ;;  %4255 = vperm.xlu1 %7211, %v11325_v61   ;;  %v15684_v50 = vld [vmem:[#allocation200_spill] sm:$0xff]  ;;  %v15696_v29 = vld [vmem:[#allocation318_spill] sm:$0xff] }
 0x4f5   : > { %2620 = vst [vmem:[#allocation12 + $0xd8] sm:$0xff] %v2588_v45  ;;  %2654 = vst [vmem:[#allocation2 + $0x68] sm:$0xff] %v2638_v22  ;;  %v15690_v45 = vld [vmem:[#allocation111_spill] sm:$0xff]  ;;  %v15693_v22 = vld [vmem:[#allocation298_spill] sm:$0xff] }
 0x4f6   : > { %v2590_v0 = vmul.f32 %v15380_v39, %v2557_v27  ;;  %v2639_v10 = vpack.c.bf16 %v2557_v27, %v15674_v36  ;;  %v2527_v38 = vadd.f32 %v2495_v32, %v2331_v25  ;;  %v11331_v15 = vpop.permute.xlu1 %3947  ;;  %v15699_v32 = vld [vmem:[#allocation112_spill] sm:$0xff]  ;;  %v15702_v36 = vld [vmem:[#allocation178_spill] sm:$0xff] }
 0x4f7   : > { %7214 = vset.pattern.permute.xlu0 %v14853_v40  ;;  %15675 = vst [vmem:[#allocation129_spill] sm:$0xff] %v11331_v15  ;;  %v11334_v20 = vpop.permute.xlu0 %4135  ;;  %v15720_v40 = vld [vmem:[#allocation306_spill] sm:$0xff]  ;;  %v15904_v15 = vld [vmem:[#allocation173_spill] sm:$0xff] }
 0x4f8   : > { %4527 = vperm.xlu0 %7214, %v15676_v1   ;;  %15677 = vst [vmem:[#allocation190_spill] sm:$0xff] %v11334_v20  ;;  %2622 = vst [vmem:[#allocation12 + $0xe8] sm:$0xff] %v2590_v0  ;;  %v2559_v58 = vadd.f32 %v2527_v38, %v887_v23  ;;  %7212 = vset.pattern.permute.xlu1 %v15678_v47 }
 0x4f9   : > { %2655 = vst [vmem:[#allocation2 + $0x70] sm:$0xff] %v2639_v10  ;;  %4331 = vperm.xlu1 %7212, %v15676_v1   ;;  %v15705_v1 = vld [vmem:[#allocation206_spill] sm:$0xff] }
 0x4fa   : > { %v2592_v37 = vmul.f32 %v15380_v39, %v2559_v58  ;;  %v2640_v4 = vpack.c.bf16 %v2559_v58, %v15679_v2  ;;  %v11340_v52 = vpop.permute.xlu1 %3951 }
 0x4fb   : > { %15680 = vst [vmem:[#allocation332_spill] sm:$0xff] %v11340_v52  ;;  %v11343_v56 = vpop.permute.xlu0 %4147 }
 0x4fc   : > { %4539 = vperm.xlu0 %7214, %v15681_v42   ;;  %15682 = vst [vmem:[#allocation51_spill] sm:$0xff] %v11343_v56  ;;  %2624 = vst [vmem:[#allocation12 + $0xf8] sm:$0xff] %v2592_v37  ;;  %v15708_v37 = vld [vmem:[#allocation80_spill] sm:$0xff] }
 0x4fd   : > { %2656 = vst [vmem:[#allocation2 + $0x78] sm:$0xff] %v2640_v4  ;;  %4339 = vperm.xlu1 %7212, %v10636_v43  }
 0x4fe   : > { %v11346_v62 = vpop.permute.xlu1 %3959 }
 0x4ff   : > { %15683 = vst [vmem:[#allocation218_spill] sm:$0xff] %v11346_v62  ;;  %v11349_v31 = vpop.permute.xlu0 %4155 }
 0x500   : > { %4547 = vperm.xlu0 %7214, %v15684_v50   ;;  %15685 = vst [vmem:[#allocation246_spill] sm:$0xff] %v11349_v31 }
 0x501   : > { %4343 = vperm.xlu1 %7212, %v15681_v42   ;;  %v15711_v42 = vld [vmem:[#allocation82_spill] sm:$0xff] }
 0x502   : > { %v11352_v19 = vpop.permute.xlu1 %3967 }
 0x503   : > { %15686 = vst [vmem:[#allocation312_spill] sm:$0xff] %v11352_v19  ;;  %v11355_v3 = vpop.permute.xlu0 %4163 }
 0x504   : > { %4555 = vperm.xlu0 %7214, %v15687_v54   ;;  %15688 = vst [vmem:[#allocation92_spill] sm:$0xff] %v11355_v3  ;;  %v15899_v3 = vld [vmem:[#allocation164_spill] sm:$0xff] }
 0x505   : > { %4351 = vperm.xlu1 %7212, %v15684_v50  }
 0x506   : > { %v11358_v59 = vpop.permute.xlu1 %3975 }
 0x507   : > { %15689 = vst [vmem:[#allocation192_spill] sm:$0xff] %v11358_v59  ;;  %v11361_v43 = vpop.permute.xlu0 %4171  ;;  %v15905_v59 = vld [vmem:[#allocation175_spill] sm:$0xff] }
 0x508   : > { %4563 = vperm.xlu0 %7214, %v15690_v45   ;;  %15691 = vst [vmem:[#allocation334_spill] sm:$0xff] %v11361_v43 }
 0x509   : > { %4359 = vperm.xlu1 %7212, %v15687_v54  }
 0x50a   : > { %v11364_v35 = vpop.permute.xlu1 %3983 }
 0x50b   : > { %15692 = vst [vmem:[#allocation248_spill] sm:$0xff] %v11364_v35  ;;  %v11367_v46 = vpop.permute.xlu0 %4179  ;;  %v15888_v35 = vmov 13  }
 0x50c   : > { %4571 = vperm.xlu0 %7214, %v15693_v22   ;;  %15694 = vst [vmem:[#allocation313_spill] sm:$0xff] %v11367_v46 }
 0x50d   : > { %4367 = vperm.xlu1 %7212, %v15690_v45   ;;  %v15714_v45 = vld [vmem:[#allocation304_spill] sm:$0xff] }
 0x50e   : > { %v11370_v17 = vpop.permute.xlu1 %3991 }
 0x50f   : > { %15695 = vst [vmem:[#allocation54_spill] sm:$0xff] %v11370_v17  ;;  %v11373_v27 = vpop.permute.xlu0 %4187 }
 0x510   : > { %4579 = vperm.xlu0 %7214, %v15696_v29   ;;  %15697 = vst [vmem:[#allocation194_spill] sm:$0xff] %v11373_v27 }
 0x511   : > { %4375 = vperm.xlu1 %7212, %v15693_v22  }
 0x512   : > { %v11376_v25 = vpop.permute.xlu1 %3999 }
 0x513   : > { %15698 = vst [vmem:[#allocation336_spill] sm:$0xff] %v11376_v25  ;;  %v11379_v23 = vpop.permute.xlu0 %4195 }
 0x514   : > { %4587 = vperm.xlu0 %7214, %v15699_v32   ;;  %15700 = vst [vmem:[#allocation250_spill] sm:$0xff] %v11379_v23 }
 0x515   : > { %4383 = vperm.xlu1 %7212, %v15696_v29  }
 0x516   : > { %v11382_v0 = vpop.permute.xlu1 %4007 }
 0x517   : > { %15701 = vst [vmem:[#allocation315_spill] sm:$0xff] %v11382_v0  ;;  %v11385_v10 = vpop.permute.xlu0 %4203 }
 0x518   : > { %4595 = vperm.xlu0 %7214, %v15702_v36   ;;  %15703 = vst [vmem:[#allocation57_spill] sm:$0xff] %v11385_v10 }
 0x519   : > { %4391 = vperm.xlu1 %7212, %v15699_v32   ;;  %v15717_v32 = vld [vmem:[#allocation324_spill] sm:$0xff] }
 0x51a   : > { %v11388_v38 = vpop.permute.xlu1 %4015 }
 0x51b   : > { %15704 = vst [vmem:[#allocation252_spill] sm:$0xff] %v11388_v38  ;;  %v11391_v58 = vpop.permute.xlu0 %4211  ;;  %v14857_v38 = vmov 12  }
 0x51c   : > { %4603 = vperm.xlu0 %7214, %v15705_v1   ;;  %15706 = vst [vmem:[#allocation317_spill] sm:$0xff] %v11391_v58 }
 0x51d   : > { %4399 = vperm.xlu1 %7212, %v15702_v36  }
 0x51e   : > { %v11394_v47 = vpop.permute.xlu1 %4023 }
 0x51f   : > { %15707 = vst [vmem:[#allocation60_spill] sm:$0xff] %v11394_v47  ;;  %v11397_v2 = vpop.permute.xlu0 %4219 }
 0x520   : > { %4611 = vperm.xlu0 %7214, %v15708_v37   ;;  %15709 = vst [vmem:[#allocation319_spill] sm:$0xff] %v11397_v2 }
 0x521   : > { %4407 = vperm.xlu1 %7212, %v15705_v1  }
 0x522   : > { %v11400_v4 = vpop.permute.xlu1 %4031 }
 0x523   : > { %15710 = vst [vmem:[#allocation27_spill] sm:$0xff] %v11400_v4  ;;  %v11403_v50 = vpop.permute.xlu0 %4227 }
 0x524   : > { %4619 = vperm.xlu0 %7214, %v15711_v42   ;;  %15712 = vst [vmem:[#allocation28_spill] sm:$0xff] %v11403_v50 }
 0x525   : > { %4415 = vperm.xlu1 %7212, %v15708_v37  }
 0x526   : > { %v11406_v54 = vpop.permute.xlu1 %4039 }
 0x527   : > { %15713 = vst [vmem:[#allocation30_spill] sm:$0xff] %v11406_v54  ;;  %v11409_v22 = vpop.permute.xlu0 %4235 }
 0x528   : > { %4627 = vperm.xlu0 %7214, %v15714_v45   ;;  %15715 = vst [vmem:[#allocation130_spill] sm:$0xff] %v11409_v22  ;;  %v15723_v22 = vld [vmem:[#allocation86_spill] sm:$0xff] }
 0x529   : > { %4423 = vperm.xlu1 %7212, %v15711_v42  }
 0x52a   : > { %v11412_v29 = vpop.permute.xlu1 %4047 }
 0x52b   : > { %15716 = vst [vmem:[#allocation32_spill] sm:$0xff] %v11412_v29  ;;  %v11415_v36 = vpop.permute.xlu0 %4243  ;;  %v14855_v29 = vmov 10  }
 0x52c   : > { %4635 = vperm.xlu0 %7214, %v15717_v32   ;;  %15718 = vst [vmem:[#allocation34_spill] sm:$0xff] %v11415_v36 }
 0x52d   : > { %4431 = vperm.xlu1 %7212, %v15714_v45  }
 0x52e   : > { %v11418_v1 = vpop.permute.xlu1 %4055 }
 0x52f   : > { %15719 = vst [vmem:[#allocation36_spill] sm:$0xff] %v11418_v1  ;;  %v11421_v37 = vpop.permute.xlu0 %4251 }
 0x530   : > { %4643 = vperm.xlu0 %7214, %v15720_v40   ;;  %15721 = vst [vmem:[#allocation38_spill] sm:$0xff] %v11421_v37 }
 0x531   : > { %4439 = vperm.xlu1 %7212, %v15717_v32  }
 0x532   : > { %v11424_v39 = vpop.permute.xlu1 %4063 }
 0x533   : > { %15722 = vst [vmem:[#allocation40_spill] sm:$0xff] %v11424_v39  ;;  %v11427_v42 = vpop.permute.xlu0 %4259  ;;  %v15764_v39 = vmov 10  }
 0x534   : > { %4651 = vperm.xlu0 %7214, %v15723_v22   ;;  %15724 = vst [vmem:[#allocation132_spill] sm:$0xff] %v11427_v42  ;;  %v15729_v42 = vmov 9  }
 0x535   : > { %4447 = vperm.xlu1 %7212, %v15720_v40  }
 0x537   : > { %v11431_v45 = vpop.permute.xlu1 %4139 }
 0x538   : > { %7217 = vset.pattern.permute.xlu0 %v14855_v29  ;;  %15725 = vst [vmem:[#allocation131_spill] sm:$0xff] %v11431_v45  ;;  %v11434_v36 = vpop.permute.xlu0 %4335 }
 0x539   : > { %4727 = vperm.xlu0 %7217, %v10959_v34   ;;  %15726 = vst [vmem:[#allocation42_spill] sm:$0xff] %v11434_v36  ;;  %4455 = vperm.xlu1 %7212, %v15723_v22   ;;  %v11452_v22 = vld [vmem:[%s14737_s11 + $0x10] sm:$0xff] }
 0x53b   : > { %v11437_v32 = vpop.permute.xlu1 %4143 }
 0x53c   : > { %15727 = vst [vmem:[#allocation62_spill] sm:$0xff] %v11437_v32  ;;  %v11440_v37 = vpop.permute.xlu0 %4347 }
 0x53d   : > { %4739 = vperm.xlu0 %7217, %v10992_v14   ;;  %15728 = vst [vmem:[#allocation243_spill] sm:$0xff] %v11440_v37  ;;  %7215 = vset.pattern.permute.xlu1 %v15729_v42 }
 0x53e   : > { %4531 = vperm.xlu1 %7215, %v10959_v34  }
 0x53f   : > { %v11444_v40 = vpop.permute.xlu1 %4151 }
 0x540   : > { %15730 = vst [vmem:[#allocation44_spill] sm:$0xff] %v11444_v40  ;;  %v11447_v29 = vpop.permute.xlu0 %4355 }
 0x541   : > { %4747 = vperm.xlu0 %7217, %v11020_v26   ;;  %15731 = vst [vmem:[#allocation135_spill] sm:$0xff] %v11447_v29 }
 0x542   : > { %4535 = vperm.xlu1 %7215, %v11452_v22  }
 0x543   : > { %v11455_v32 = vpop.permute.xlu1 %4159 }
 0x544   : > { %15732 = vst [vmem:[#allocation46_spill] sm:$0xff] %v11455_v32  ;;  %v11458_v42 = vpop.permute.xlu0 %4363 }
 0x545   : > { %4755 = vperm.xlu0 %7217, %v11048_v28   ;;  %15733 = vst [vmem:[#allocation48_spill] sm:$0xff] %v11458_v42 }
 0x546   : > { %4543 = vperm.xlu1 %7215, %v10992_v14  }
 0x547   : > { %v11461_v34 = vpop.permute.xlu1 %4167 }
 0x548   : > { %15734 = vst [vmem:[#allocation64_spill] sm:$0xff] %v11461_v34  ;;  %v11464_v29 = vpop.permute.xlu0 %4371 }
 0x549   : > { %4763 = vperm.xlu0 %7217, %v11072_v30   ;;  %15735 = vst [vmem:[#allocation245_spill] sm:$0xff] %v11464_v29 }
 0x54a   : > { %4551 = vperm.xlu1 %7215, %v11020_v26  }
 0x54b   : > { %v11467_v37 = vpop.permute.xlu1 %4175 }
 0x54c   : > { %15736 = vst [vmem:[#allocation133_spill] sm:$0xff] %v11467_v37  ;;  %v11470_v40 = vpop.permute.xlu0 %4379 }
 0x54d   : > { %4771 = vperm.xlu0 %7217, %v11099_v41   ;;  %15737 = vst [vmem:[#allocation134_spill] sm:$0xff] %v11470_v40 }
 0x54e   : > { %4559 = vperm.xlu1 %7215, %v11048_v28  }
 0x54f   : > { %v11473_v32 = vpop.permute.xlu1 %4183 }
 0x550   : > { %15738 = vst [vmem:[#allocation136_spill] sm:$0xff] %v11473_v32 }
 0x551   : > { %4779 = vperm.xlu0 %7217, %v11129_v6   ;;  %v11476_v42 = vpop.permute.xlu0 %4387 }
 0x552   : > { %15739 = vst [vmem:[#allocation137_spill] sm:$0xff] %v11476_v42  ;;  %4567 = vperm.xlu1 %7215, %v11072_v30  }
 0x553   : > { %v11479_v34 = vpop.permute.xlu1 %4191 }
 0x554   : > { %15740 = vst [vmem:[#allocation138_spill] sm:$0xff] %v11479_v34 }
 0x555   : > { %4787 = vperm.xlu0 %7217, %v11152_v48   ;;  %v11482_v29 = vpop.permute.xlu0 %4395 }
 0x556   : > { %15741 = vst [vmem:[#allocation139_spill] sm:$0xff] %v11482_v29  ;;  %4575 = vperm.xlu1 %7215, %v11099_v41  }
 0x557   : > { %v11485_v37 = vpop.permute.xlu1 %4199 }
 0x558   : > { %15742 = vst [vmem:[#allocation196_spill] sm:$0xff] %v11485_v37 }
 0x559   : > { %4795 = vperm.xlu0 %7217, %v11178_v5   ;;  %v11488_v40 = vpop.permute.xlu0 %4403 }
 0x55a   : > { %15743 = vst [vmem:[#allocation140_spill] sm:$0xff] %v11488_v40  ;;  %4583 = vperm.xlu1 %7215, %v11129_v6  }
 0x55b   : > { %v11491_v32 = vpop.permute.xlu1 %4207 }
 0x55c   : > { %15744 = vst [vmem:[#allocation65_spill] sm:$0xff] %v11491_v32 }
 0x55d   : > { %4803 = vperm.xlu0 %7217, %v11205_v8   ;;  %v11494_v42 = vpop.permute.xlu0 %4411 }
 0x55e   : > { %15745 = vst [vmem:[#allocation67_spill] sm:$0xff] %v11494_v42  ;;  %4591 = vperm.xlu1 %7215, %v11152_v48  }
 0x55f   : > { %v11497_v34 = vpop.permute.xlu1 %4215 }
 0x560   : > { %15746 = vst [vmem:[#allocation247_spill] sm:$0xff] %v11497_v34 }
 0x561   : > { %4811 = vperm.xlu0 %7217, %v11228_v12  }
 0x562   : > { %v11500_v29 = vpop.permute.xlu0 %4419  ;;  %4599 = vperm.xlu1 %7215, %v11178_v5  }
 0x563   : > { %15747 = vst [vmem:[#allocation69_spill] sm:$0xff] %v11500_v29  ;;  %v11503_v37 = vpop.permute.xlu1 %4223 }
 0x564   : > { %15748 = vst [vmem:[#allocation141_spill] sm:$0xff] %v11503_v37 }
 0x565   : > { %4819 = vperm.xlu0 %7217, %v11252_v44  }
 0x566   : > { %v11506_v40 = vpop.permute.xlu0 %4427  ;;  %4607 = vperm.xlu1 %7215, %v11205_v8  }
 0x567   : > { %15749 = vst [vmem:[#allocation199_spill] sm:$0xff] %v11506_v40  ;;  %v11509_v32 = vpop.permute.xlu1 %4231 }
 0x568   : > { %15750 = vst [vmem:[#allocation71_spill] sm:$0xff] %v11509_v32 }
 0x569   : > { %4827 = vperm.xlu0 %7217, %v11278_v13  }
 0x56a   : > { %v11512_v42 = vpop.permute.xlu0 %4435  ;;  %4615 = vperm.xlu1 %7215, %v11228_v12  }
 0x56b   : > { %15751 = vst [vmem:[#allocation73_spill] sm:$0xff] %v11512_v42  ;;  %v11515_v34 = vpop.permute.xlu1 %4239  ;;  %v14856_v42 = vmov 11  }
 0x56c   : > { %15752 = vst [vmem:[#allocation249_spill] sm:$0xff] %v11515_v34  ;;  %v11533_v34 = vld [vmem:[%s14737_s11] sm:$0xff] }
 0x56d   : > { %4835 = vperm.xlu0 %7217, %v11307_v53  }
 0x56e   : > { %v11518_v29 = vpop.permute.xlu0 %4443  ;;  %4623 = vperm.xlu1 %7215, %v11252_v44  }
 0x56f   : > { %15753 = vst [vmem:[#allocation142_spill] sm:$0xff] %v11518_v29  ;;  %v11521_v37 = vpop.permute.xlu1 %4247 }
 0x570   : > { %15754 = vst [vmem:[#allocation143_spill] sm:$0xff] %v11521_v37 }
 0x571   : > { %4843 = vperm.xlu0 %7217, %v11325_v61  }
 0x572   : > { %v11524_v40 = vpop.permute.xlu0 %4451  ;;  %4631 = vperm.xlu1 %7215, %v11278_v13  }
 0x573   : > { %15755 = vst [vmem:[#allocation254_spill] sm:$0xff] %v11524_v40  ;;  %v11527_v32 = vpop.permute.xlu1 %4255  ;;  %v11544_v40 = vld [vmem:[%s14737_s11 + $0x18] sm:$0xff] }
 0x574   : > { %15756 = vst [vmem:[#allocation144_spill] sm:$0xff] %v11527_v32  ;;  %15759 = vst [vmem:[#allocation145_spill] sm:$0xff] %v11544_v40 }
 0x575   : > { %7218 = vset.pattern.permute.xlu0 %v14856_v42 }
 0x576   : > { %4919 = vperm.xlu0 %7218, %v11533_v34   ;;  %4639 = vperm.xlu1 %7215, %v11307_v53  }
 0x577   : > { %v11536_v29 = vpop.permute.xlu0 %4527 }
 0x578   : > { %15757 = vst [vmem:[#allocation201_spill] sm:$0xff] %v11536_v29  ;;  %v11539_v37 = vpop.permute.xlu1 %4331  ;;  %v11555_v29 = vld [vmem:[%s14737_s11 + $0x28] sm:$0xff] }
 0x579   : > { %15758 = vst [vmem:[#allocation50_spill] sm:$0xff] %v11539_v37  ;;  %15762 = vst [vmem:[#allocation75_spill] sm:$0xff] %v11555_v29 }
 0x57a   : > { %4931 = vperm.xlu0 %7218, %v11544_v40   ;;  %4647 = vperm.xlu1 %7215, %v11325_v61  }
 0x57b   : > { %v11547_v42 = vpop.permute.xlu0 %4539 }
 0x57c   : > { %15760 = vst [vmem:[#allocation251_spill] sm:$0xff] %v11547_v42  ;;  %v11550_v32 = vpop.permute.xlu1 %4339  ;;  %v11567_v42 = vld [vmem:[%s14737_s11 + $0x38] sm:$0xff] }
 0x57d   : > { %15761 = vst [vmem:[#allocation258_spill] sm:$0xff] %v11550_v32  ;;  %15766 = vst [vmem:[#allocation203_spill] sm:$0xff] %v11567_v42 }
 0x57e   : > { %4939 = vperm.xlu0 %7218, %v11555_v29   ;;  %7216 = vset.pattern.permute.xlu1 %v15764_v39  ;;  %v11578_v39 = vld [vmem:[%s14737_s11 + $0x48] sm:$0xff] }
 0x57f   : > { %v11558_v37 = vpop.permute.xlu0 %4547  ;;  %4723 = vperm.xlu1 %7216, %v11533_v34   ;;  %15769 = vst [vmem:[#allocation79_spill] sm:$0xff] %v11578_v39 }
 0x580   : > { %15763 = vst [vmem:[#allocation77_spill] sm:$0xff] %v11558_v37  ;;  %v11562_v1 = vpop.permute.xlu1 %4343 }
 0x581   : > { %15765 = vst [vmem:[#allocation146_spill] sm:$0xff] %v11562_v1 }
 0x582   : > { %4947 = vperm.xlu0 %7218, %v11567_v42  }
 0x583   : > { %v11570_v32 = vpop.permute.xlu0 %4555  ;;  %4731 = vperm.xlu1 %7216, %v11452_v22  }
 0x584   : > { %15767 = vst [vmem:[#allocation253_spill] sm:$0xff] %v11570_v32  ;;  %v11573_v36 = vpop.permute.xlu1 %4351  ;;  %v11589_v32 = vld [vmem:[%s14737_s11 + $0x58] sm:$0xff] }
 0x585   : > { %15768 = vst [vmem:[#allocation260_spill] sm:$0xff] %v11573_v36 }
 0x586   : > { %4955 = vperm.xlu0 %7218, %v11578_v39  }
 0x587   : > { %v11581_v37 = vpop.permute.xlu0 %4563  ;;  %4735 = vperm.xlu1 %7216, %v11544_v40  }
 0x588   : > { %15770 = vst [vmem:[#allocation147_spill] sm:$0xff] %v11581_v37  ;;  %v11584_v1 = vpop.permute.xlu1 %4359  ;;  %v11600_v37 = vld [vmem:[%s14737_s11 + $0x68] sm:$0xff] }
 0x589   : > { %15771 = vst [vmem:[#allocation205_spill] sm:$0xff] %v11584_v1 }
 0x58a   : > { %4963 = vperm.xlu0 %7218, %v11589_v32  }
 0x58b   : > { %v11592_v36 = vpop.permute.xlu0 %4571  ;;  %4743 = vperm.xlu1 %7216, %v11555_v29  }
 0x58c   : > { %15772 = vst [vmem:[#allocation148_spill] sm:$0xff] %v11592_v36  ;;  %v11595_v50 = vpop.permute.xlu1 %4367  ;;  %v11611_v36 = vld [vmem:[%s14737_s11 + $0x78] sm:$0xff] }
 0x58d   : > { %15773 = vst [vmem:[#allocation255_spill] sm:$0xff] %v11595_v50 }
 0x58e   : > { %4971 = vperm.xlu0 %7218, %v11600_v37  }
 0x58f   : > { %v11603_v1 = vpop.permute.xlu0 %4579  ;;  %4751 = vperm.xlu1 %7216, %v11567_v42  }
 0x590   : > { %15774 = vst [vmem:[#allocation262_spill] sm:$0xff] %v11603_v1  ;;  %v11606_v2 = vpop.permute.xlu1 %4375  ;;  %v11622_v1 = vld [vmem:[%s14737_s11 + $0x88] sm:$0xff] }
 0x591   : > { %15775 = vst [vmem:[#allocation297_spill] sm:$0xff] %v11606_v2 }
 0x592   : > { %4979 = vperm.xlu0 %7218, %v11611_v36  }
 0x593   : > { %v11614_v50 = vpop.permute.xlu0 %4587  ;;  %4759 = vperm.xlu1 %7216, %v11578_v39  }
 0x594   : > { %15776 = vst [vmem:[#allocation149_spill] sm:$0xff] %v11614_v50  ;;  %v11617_v58 = vpop.permute.xlu1 %4383  ;;  %v11633_v50 = vld [vmem:[%s14737_s11 + $0x98] sm:$0xff] }
 0x595   : > { %15777 = vst [vmem:[#allocation207_spill] sm:$0xff] %v11617_v58 }
 0x596   : > { %4987 = vperm.xlu0 %7218, %v11622_v1  }
 0x597   : > { %v11625_v2 = vpop.permute.xlu0 %4595  ;;  %4767 = vperm.xlu1 %7216, %v11589_v32  }
 0x598   : > { %15778 = vst [vmem:[#allocation81_spill] sm:$0xff] %v11625_v2  ;;  %v11628_v10 = vpop.permute.xlu1 %4391  ;;  %v11644_v2 = vld [vmem:[%s14737_s11 + $0xa8] sm:$0xff] }
 0x599   : > { %15779 = vst [vmem:[#allocation257_spill] sm:$0xff] %v11628_v10 }
 0x59a   : > { %4995 = vperm.xlu0 %7218, %v11633_v50  }
 0x59b   : > { %v11636_v58 = vpop.permute.xlu0 %4603  ;;  %4775 = vperm.xlu1 %7216, %v11600_v37  }
 0x59c   : > { %15780 = vst [vmem:[#allocation264_spill] sm:$0xff] %v11636_v58  ;;  %v11639_v23 = vpop.permute.xlu1 %4399  ;;  %v11655_v58 = vld [vmem:[%s14737_s11 + $0xb8] sm:$0xff] }
 0x59d   : > { %15781 = vst [vmem:[#allocation150_spill] sm:$0xff] %v11639_v23 }
 0x59e   : > { %5003 = vperm.xlu0 %7218, %v11644_v2  }
 0x59f   : > { %v11647_v10 = vpop.permute.xlu0 %4611  ;;  %4783 = vperm.xlu1 %7216, %v11611_v36  }
 0x5a0   : > { %15782 = vst [vmem:[#allocation209_spill] sm:$0xff] %v11647_v10  ;;  %v11650_v27 = vpop.permute.xlu1 %4407  ;;  %v11666_v10 = vld [vmem:[%s14737_s11 + $0xc8] sm:$0xff] }
 0x5a1   : > { %15783 = vst [vmem:[#allocation151_spill] sm:$0xff] %v11650_v27 }
 0x5a2   : > { %5011 = vperm.xlu0 %7218, %v11655_v58  }
 0x5a3   : > { %v11658_v23 = vpop.permute.xlu0 %4619  ;;  %4791 = vperm.xlu1 %7216, %v11622_v1  }
 0x5a4   : > { %15784 = vst [vmem:[#allocation259_spill] sm:$0xff] %v11658_v23  ;;  %v11661_v45 = vpop.permute.xlu1 %4415  ;;  %v11677_v23 = vld [vmem:[%s14737_s11 + $0xd8] sm:$0xff] }
 0x5a5   : > { %15785 = vst [vmem:[#allocation266_spill] sm:$0xff] %v11661_v45 }
 0x5a6   : > { %5019 = vperm.xlu0 %7218, %v11666_v10  }
 0x5a7   : > { %v11669_v27 = vpop.permute.xlu0 %4627  ;;  %4799 = vperm.xlu1 %7216, %v11633_v50  }
 0x5a8   : > { %15786 = vst [vmem:[#allocation83_spill] sm:$0xff] %v11669_v27  ;;  %v11672_v54 = vpop.permute.xlu1 %4423  ;;  %v11688_v27 = vld [vmem:[%s14737_s11 + $0xe8] sm:$0xff] }
 0x5a9   : > { %15787 = vst [vmem:[#allocation152_spill] sm:$0xff] %v11672_v54 }
 0x5aa   : > { %5027 = vperm.xlu0 %7218, %v11677_v23  }
 0x5ab   : > { %v11680_v45 = vpop.permute.xlu0 %4635  ;;  %4807 = vperm.xlu1 %7216, %v11644_v2  }
 0x5ac   : > { %15788 = vst [vmem:[#allocation211_spill] sm:$0xff] %v11680_v45  ;;  %v11683_v46 = vpop.permute.xlu1 %4431  ;;  %v11699_v45 = vld [vmem:[%s14737_s11 + $0xf8] sm:$0xff] }
 0x5ad   : > { %15789 = vst [vmem:[#allocation261_spill] sm:$0xff] %v11683_v46 }
 0x5ae   : > { %5035 = vperm.xlu0 %7218, %v11688_v27  }
 0x5af   : > { %v11691_v54 = vpop.permute.xlu0 %4643  ;;  %4815 = vperm.xlu1 %7216, %v11655_v58  }
 0x5b0   : > { %15790 = vst [vmem:[#allocation268_spill] sm:$0xff] %v11691_v54  ;;  %v11694_v4 = vpop.permute.xlu1 %4439 }
 0x5b1   : > { %15791 = vst [vmem:[#allocation85_spill] sm:$0xff] %v11694_v4  ;;  %v11711_v4 = vld [vmem:[%s14737_s11 + $0x8] sm:$0xff] }
 0x5b2   : > { %5043 = vperm.xlu0 %7218, %v11699_v45  }
 0x5b3   : > { %v11702_v46 = vpop.permute.xlu0 %4651  ;;  %4823 = vperm.xlu1 %7216, %v11666_v10  }
 0x5b4   : > { %15792 = vst [vmem:[#allocation153_spill] sm:$0xff] %v11702_v46  ;;  %v11705_v47 = vpop.permute.xlu1 %4447 }
 0x5b5   : > { %15793 = vst [vmem:[#allocation213_spill] sm:$0xff] %v11705_v47 }
 0x5b6   : > { %7221 = vset.pattern.permute.xlu0 %v14857_v38 }
 0x5b7   : > { %5119 = vperm.xlu0 %7221, %v11711_v4   ;;  %4831 = vperm.xlu1 %7216, %v11677_v23  }
 0x5b8   : > { %v11714_v54 = vpop.permute.xlu0 %4727  ;;  %v11717_v0 = vpop.permute.xlu1 %4455 }
 0x5b9   : > { %15794 = vst [vmem:[#allocation154_spill] sm:$0xff] %v11714_v54  ;;  %15795 = vst [vmem:[#allocation263_spill] sm:$0xff] %v11717_v0  ;;  %v15801_v0 = vmov 11  }
 0x5bb   : > { %5131 = vperm.xlu0 %7221, %v10992_v14   ;;  %4839 = vperm.xlu1 %7216, %v11688_v27  }
 0x5bc   : > { %v11720_v46 = vpop.permute.xlu0 %4739 }
 0x5bd   : > { %15796 = vst [vmem:[#allocation270_spill] sm:$0xff] %v11720_v46  ;;  %v11723_v38 = vpop.permute.xlu1 %4531 }
 0x5be   : > { %15797 = vst [vmem:[#allocation155_spill] sm:$0xff] %v11723_v38 }
 0x5bf   : > { %5139 = vperm.xlu0 %7221, %v11020_v26   ;;  %4847 = vperm.xlu1 %7216, %v11699_v45  }
 0x5c0   : > { %v11726_v47 = vpop.permute.xlu0 %4747 }
 0x5c1   : > { %15798 = vst [vmem:[#allocation215_spill] sm:$0xff] %v11726_v47  ;;  %v11729_v25 = vpop.permute.xlu1 %4535 }
 0x5c2   : > { %15799 = vst [vmem:[#allocation377_spill] sm:$0xff] %v11729_v25 }
 0x5c3   : > { %5147 = vperm.xlu0 %7221, %v11048_v28   ;;  %7219 = vset.pattern.permute.xlu1 %v15801_v0  ;;  %v11750_v0 = vld [vmem:[%s14737_s11 + $0x20] sm:$0xff] }
 0x5c4   : > { %v11732_v54 = vpop.permute.xlu0 %4755  ;;  %4923 = vperm.xlu1 %7219, %v11711_v4  }
 0x5c5   : > { %15800 = vst [vmem:[#allocation87_spill] sm:$0xff] %v11732_v54  ;;  %v11736_v14 = vpop.permute.xlu1 %4543 }
 0x5c6   : > { %15802 = vst [vmem:[#allocation265_spill] sm:$0xff] %v11736_v14 }
 0x5c7   : > { %5155 = vperm.xlu0 %7221, %v11072_v30  }
 0x5c8   : > { %v11739_v46 = vpop.permute.xlu0 %4763  ;;  %4927 = vperm.xlu1 %7219, %v11452_v22  }
 0x5c9   : > { %15803 = vst [vmem:[#allocation272_spill] sm:$0xff] %v11739_v46  ;;  %v11742_v47 = vpop.permute.xlu1 %4551 }
 0x5ca   : > { %15804 = vst [vmem:[#allocation157_spill] sm:$0xff] %v11742_v47 }
 0x5cb   : > { %5163 = vperm.xlu0 %7221, %v11099_v41  }
 0x5cc   : > { %v11745_v25 = vpop.permute.xlu0 %4771  ;;  %4935 = vperm.xlu1 %7219, %v11750_v0  }
 0x5cd   : > { %15805 = vst [vmem:[#allocation217_spill] sm:$0xff] %v11745_v25  ;;  %v11753_v54 = vpop.permute.xlu1 %4559 }
 0x5ce   : > { %15806 = vst [vmem:[#allocation378_spill] sm:$0xff] %v11753_v54 }
 0x5cf   : > { %5171 = vperm.xlu0 %7221, %v11129_v6  }
 0x5d0   : > { %v11756_v46 = vpop.permute.xlu0 %4779  ;;  %4943 = vperm.xlu1 %7219, %v11020_v26  }
 0x5d1   : > { %15807 = vst [vmem:[#allocation156_spill] sm:$0xff] %v11756_v46  ;;  %v11759_v47 = vpop.permute.xlu1 %4567 }
 0x5d2   : > { %15808 = vst [vmem:[#allocation267_spill] sm:$0xff] %v11759_v47  ;;  %v15882_v47 = vld [vmem:[#allocation122_spill] sm:$0xff] }
 0x5d3   : > { %5179 = vperm.xlu0 %7221, %v11152_v48  }
 0x5d4   : > { %v11762_v25 = vpop.permute.xlu0 %4787  ;;  %4951 = vperm.xlu1 %7219, %v11048_v28  }
 0x5d5   : > { %15809 = vst [vmem:[#allocation274_spill] sm:$0xff] %v11762_v25  ;;  %v11765_v14 = vpop.permute.xlu1 %4575 }
 0x5d6   : > { %15810 = vst [vmem:[#allocation159_spill] sm:$0xff] %v11765_v14  ;;  %v15880_v14 = vld [vmem:[#allocation116_spill] sm:$0xff] }
 0x5d7   : > { %5187 = vperm.xlu0 %7221, %v11178_v5  }
 0x5d8   : > { %v11768_v38 = vpop.permute.xlu0 %4795  ;;  %4959 = vperm.xlu1 %7219, %v11072_v30  }
 0x5d9   : > { %15811 = vst [vmem:[#allocation219_spill] sm:$0xff] %v11768_v38  ;;  %v11771_v54 = vpop.permute.xlu1 %4583 }
 0x5da   : > { %15812 = vst [vmem:[#allocation380_spill] sm:$0xff] %v11771_v54  ;;  %v15878_v54 = vld [vmem:[#allocation110_spill] sm:$0xff] }
 0x5db   : > { %5195 = vperm.xlu0 %7221, %v11205_v8  }
 0x5dc   : > { %v11774_v26 = vpop.permute.xlu0 %4803  ;;  %4967 = vperm.xlu1 %7219, %v11099_v41  }
 0x5dd   : > { %15813 = vst [vmem:[#allocation89_spill] sm:$0xff] %v11774_v26  ;;  %v11777_v46 = vpop.permute.xlu1 %4591 }
 0x5de   : > { %15814 = vst [vmem:[#allocation269_spill] sm:$0xff] %v11777_v46 }
 0x5df   : > { %5203 = vperm.xlu0 %7221, %v11228_v12  }
 0x5e0   : > { %v11780_v28 = vpop.permute.xlu0 %4811  ;;  %4975 = vperm.xlu1 %7219, %v11129_v6  }
 0x5e1   : > { %15815 = vst [vmem:[#allocation276_spill] sm:$0xff] %v11780_v28  ;;  %v11783_v25 = vpop.permute.xlu1 %4599 }
 0x5e2   : > { %15816 = vst [vmem:[#allocation41_spill] sm:$0xff] %v11783_v25  ;;  %v15876_v25 = vld [vmem:[#allocation105_spill] sm:$0xff] }
 0x5e3   : > { %5211 = vperm.xlu0 %7221, %v11252_v44  }
 0x5e4   : > { %v11786_v30 = vpop.permute.xlu0 %4819  ;;  %4983 = vperm.xlu1 %7219, %v11152_v48  }
 0x5e5   : > { %15817 = vst [vmem:[#allocation161_spill] sm:$0xff] %v11786_v30  ;;  %v11789_v38 = vpop.permute.xlu1 %4607 }
 0x5e6   : > { %15818 = vst [vmem:[#allocation221_spill] sm:$0xff] %v11789_v38 }
 0x5e7   : > { %5219 = vperm.xlu0 %7221, %v11278_v13  }
 0x5e8   : > { %v11792_v41 = vpop.permute.xlu0 %4827  ;;  %4991 = vperm.xlu1 %7219, %v11178_v5  }
 0x5e9   : > { %15819 = vst [vmem:[#allocation382_spill] sm:$0xff] %v11792_v41  ;;  %v11795_v26 = vpop.permute.xlu1 %4615  ;;  %v14858_v41 = vmov 13  }
 0x5ea   : > { %15820 = vst [vmem:[#allocation121_spill] sm:$0xff] %v11795_v26 }
 0x5eb   : > { %5227 = vperm.xlu0 %7221, %v11307_v53  }
 0x5ec   : > { %v11798_v6 = vpop.permute.xlu0 %4835  ;;  %4999 = vperm.xlu1 %7219, %v11205_v8  }
 0x5ed   : > { %15821 = vst [vmem:[#allocation158_spill] sm:$0xff] %v11798_v6  ;;  %v11801_v28 = vpop.permute.xlu1 %4623 }
 0x5ee   : > { %15822 = vst [vmem:[#allocation271_spill] sm:$0xff] %v11801_v28  ;;  %v15874_v28 = vld [vmem:[#allocation101_spill] sm:$0xff] }
 0x5ef   : > { %5235 = vperm.xlu0 %7221, %v11325_v61  }
 0x5f0   : > { %v11804_v48 = vpop.permute.xlu0 %4843  ;;  %5007 = vperm.xlu1 %7219, %v11228_v12  }
 0x5f1   : > { %15823 = vst [vmem:[#allocation278_spill] sm:$0xff] %v11804_v48  ;;  %v11807_v30 = vpop.permute.xlu1 %4631 }
 0x5f2   : > { %15824 = vst [vmem:[#allocation45_spill] sm:$0xff] %v11807_v30 }
 0x5f3   : > { %7222 = vset.pattern.permute.xlu0 %v14858_v41 }
 0x5f4   : > { %5311 = vperm.xlu0 %7222, %v11533_v34   ;;  %5015 = vperm.xlu1 %7219, %v11252_v44  }
 0x5f5   : > { %v11811_v5 = vpop.permute.xlu0 %4919  ;;  %v11814_v8 = vpop.permute.xlu1 %4639 }
 0x5f6   : > { %15825 = vst [vmem:[#allocation163_spill] sm:$0xff] %v11811_v5  ;;  %15826 = vst [vmem:[#allocation223_spill] sm:$0xff] %v11814_v8  ;;  %v15873_v8 = vld [vmem:[#allocation99_spill] sm:$0xff] }
 0x5f8   : > { %5323 = vperm.xlu0 %7222, %v11544_v40   ;;  %5023 = vperm.xlu1 %7219, %v11278_v13  }
 0x5f9   : > { %v11817_v6 = vpop.permute.xlu0 %4931  ;;  %v11820_v12 = vpop.permute.xlu1 %4647 }
 0x5fa   : > { %15827 = vst [vmem:[#allocation384_spill] sm:$0xff] %v11817_v6  ;;  %15828 = vst [vmem:[#allocation91_spill] sm:$0xff] %v11820_v12  ;;  %v15834_v6 = vmov 12  }
 0x5fc   : > { %5331 = vperm.xlu0 %7222, %v11555_v29   ;;  %5031 = vperm.xlu1 %7219, %v11307_v53  }
 0x5fd   : > { %v11823_v48 = vpop.permute.xlu0 %4939 }
 0x5fe   : > { %15829 = vst [vmem:[#allocation273_spill] sm:$0xff] %v11823_v48  ;;  %v11826_v41 = vpop.permute.xlu1 %4723 }
 0x5ff   : > { %15830 = vst [vmem:[#allocation280_spill] sm:$0xff] %v11826_v41  ;;  %v15872_v41 = vld [vmem:[#allocation97_spill] sm:$0xff] }
 0x600   : > { %5339 = vperm.xlu0 %7222, %v11567_v42   ;;  %5039 = vperm.xlu1 %7219, %v11325_v61  }
 0x601   : > { %v11829_v44 = vpop.permute.xlu0 %4947 }
 0x602   : > { %15831 = vst [vmem:[#allocation102_spill] sm:$0xff] %v11829_v44  ;;  %v11832_v5 = vpop.permute.xlu1 %4731 }
 0x603   : > { %15832 = vst [vmem:[#allocation225_spill] sm:$0xff] %v11832_v5 }
 0x604   : > { %5347 = vperm.xlu0 %7222, %v11578_v39   ;;  %7220 = vset.pattern.permute.xlu1 %v15834_v6 }
 0x605   : > { %v11835_v13 = vpop.permute.xlu0 %4955  ;;  %5115 = vperm.xlu1 %7220, %v11533_v34  }
 0x606   : > { %15833 = vst [vmem:[#allocation386_spill] sm:$0xff] %v11835_v13  ;;  %v11839_v48 = vpop.permute.xlu1 %4735 }
 0x607   : > { %15835 = vst [vmem:[#allocation84_spill] sm:$0xff] %v11839_v48 }
 0x608   : > { %5355 = vperm.xlu0 %7222, %v11589_v32  }
 0x609   : > { %v11842_v53 = vpop.permute.xlu0 %4963  ;;  %5123 = vperm.xlu1 %7220, %v11452_v22  }
 0x60a   : > { %15836 = vst [vmem:[#allocation124_spill] sm:$0xff] %v11842_v53  ;;  %v11845_v44 = vpop.permute.xlu1 %4743 }
 0x60b   : > { %15837 = vst [vmem:[#allocation53_spill] sm:$0xff] %v11845_v44 }
 0x60c   : > { %5363 = vperm.xlu0 %7222, %v11600_v37  }
 0x60d   : > { %v11848_v61 = vpop.permute.xlu0 %4971  ;;  %5127 = vperm.xlu1 %7220, %v11544_v40  }
 0x60e   : > { %15838 = vst [vmem:[#allocation283_spill] sm:$0xff] %v11848_v61  ;;  %v11851_v13 = vpop.permute.xlu1 %4751 }
 0x60f   : > { %15839 = vst [vmem:[#allocation47_spill] sm:$0xff] %v11851_v13 }
 0x610   : > { %5371 = vperm.xlu0 %7222, %v11611_v36  }
 0x611   : > { %v11854_v6 = vpop.permute.xlu0 %4979  ;;  %5135 = vperm.xlu1 %7220, %v11555_v29   ;;  %v15940_v29 = vld [vmem:[#allocation240_spill] sm:$0xff] }
 0x612   : > { %15840 = vst [vmem:[#allocation227_spill] sm:$0xff] %v11854_v6  ;;  %v11857_v48 = vpop.permute.xlu1 %4759 }
 0x613   : > { %15841 = vst [vmem:[#allocation256_spill] sm:$0xff] %v11857_v48 }
 0x614   : > { %5379 = vperm.xlu0 %7222, %v11622_v1  }
 0x615   : > { %v11860_v53 = vpop.permute.xlu0 %4987  ;;  %5143 = vperm.xlu1 %7220, %v11567_v42  }
 0x616   : > { %15842 = vst [vmem:[#allocation56_spill] sm:$0xff] %v11860_v53  ;;  %v11863_v44 = vpop.permute.xlu1 %4767 }
 0x617   : > { %15843 = vst [vmem:[#allocation68_spill] sm:$0xff] %v11863_v44 }
 0x618   : > { %5387 = vperm.xlu0 %7222, %v11633_v50  }
 0x619   : > { %v11866_v61 = vpop.permute.xlu0 %4995  ;;  %5151 = vperm.xlu1 %7220, %v11578_v39  }
 0x61a   : > { %15844 = vst [vmem:[#allocation286_spill] sm:$0xff] %v11866_v61  ;;  %v11869_v13 = vpop.permute.xlu1 %4775 }
 0x61b   : > { %15845 = vst [vmem:[#allocation49_spill] sm:$0xff] %v11869_v13 }
 0x61c   : > { %5395 = vperm.xlu0 %7222, %v11644_v2  }
 0x61d   : > { %v11872_v6 = vpop.permute.xlu0 %5003  ;;  %5159 = vperm.xlu1 %7220, %v11589_v32  }
 0x61e   : > { %15846 = vst [vmem:[#allocation59_spill] sm:$0xff] %v11872_v6  ;;  %v11875_v48 = vpop.permute.xlu1 %4783 }
 0x61f   : > { %15847 = vst [vmem:[#allocation289_spill] sm:$0xff] %v11875_v48  ;;  %v11964_v48 = vld [vmem:[%s15870_s1] ss:$0 sm:$0xff] }
 0x620   : > { %5403 = vperm.xlu0 %7222, %v11655_v58  }
 0x621   : > { %v11878_v53 = vpop.permute.xlu0 %5011  ;;  %5167 = vperm.xlu1 %7220, %v11600_v37  }
 0x622   : > { %15848 = vst [vmem:[#allocation197_spill] sm:$0xff] %v11878_v53  ;;  %v11881_v44 = vpop.permute.xlu1 %4791 }
 0x623   : > { %15849 = vst [vmem:[#allocation170_spill] sm:$0xff] %v11881_v44 }
 0x624   : > { %5411 = vperm.xlu0 %7222, %v11666_v10  }
 0x625   : > { %v11884_v61 = vpop.permute.xlu0 %5019  ;;  %5175 = vperm.xlu1 %7220, %v11611_v36  }
 0x626   : > { %15850 = vst [vmem:[#allocation198_spill] sm:$0xff] %v11884_v61  ;;  %v11887_v13 = vpop.permute.xlu1 %4799 }
 0x627   : > { %15851 = vst [vmem:[#allocation70_spill] sm:$0xff] %v11887_v13 }
 0x628   : > { %5419 = vperm.xlu0 %7222, %v11677_v23  }
 0x629   : > { %v11890_v32 = vpop.permute.xlu0 %5027  ;;  %5183 = vperm.xlu1 %7220, %v11622_v1  }
 0x62a   : > { %15852 = vst [vmem:[#allocation314_spill] sm:$0xff] %v11890_v32  ;;  %v11893_v6 = vpop.permute.xlu1 %4807  ;;  %v14859_v32 = vmov 14  }
 0x62b   : > { %15853 = vst [vmem:[#allocation72_spill] sm:$0xff] %v11893_v6 }
 0x62c   : > { %5427 = vperm.xlu0 %7222, %v11688_v27  }
 0x62d   : > { %v11896_v37 = vpop.permute.xlu0 %5035  ;;  %5191 = vperm.xlu1 %7220, %v11633_v50  }
 0x62e   : > { %15854 = vst [vmem:[#allocation200_spill] sm:$0xff] %v11896_v37  ;;  %v11899_v53 = vpop.permute.xlu1 %4815 }
 0x62f   : > { %15855 = vst [vmem:[#allocation108_spill] sm:$0xff] %v11899_v53 }
 0x630   : > { %5435 = vperm.xlu0 %7222, %v11699_v45  }
 0x631   : > { %v11902_v36 = vpop.permute.xlu0 %5043  ;;  %5199 = vperm.xlu1 %7220, %v11644_v2  }
 0x632   : > { %15856 = vst [vmem:[#allocation111_spill] sm:$0xff] %v11902_v36  ;;  %v11905_v61 = vpop.permute.xlu1 %4823 }
 0x633   : > { %15857 = vst [vmem:[#allocation298_spill] sm:$0xff] %v11905_v61 }
 0x634   : > { %7225 = vset.pattern.permute.xlu0 %v14859_v32  ;;  %v11923_v32 = vld [vmem:[%s14737_s11 + $0x30] sm:$0xff] }
 0x635   : > { %5511 = vperm.xlu0 %7225, %v11711_v4   ;;  %5207 = vperm.xlu1 %7220, %v11655_v58   ;;  %v11931_v58 = vld [vmem:[%s15863_s10] sm:$0xff] }
 0x636   : > { %v11909_v1 = vpop.permute.xlu0 %5119  ;;  %v11912_v50 = vpop.permute.xlu1 %4831 }
 0x637   : > { %15858 = vst [vmem:[#allocation318_spill] sm:$0xff] %v11909_v1  ;;  %15859 = vst [vmem:[#allocation112_spill] sm:$0xff] %v11912_v50  ;;  %v15886_v1 = vld [vmem:[#allocation52_spill] sm:$0xff] }
 0x639   : > { %5523 = vperm.xlu0 %7225, %v11750_v0   ;;  %5215 = vperm.xlu1 %7220, %v11666_v10   ;;  %v11939_v10 = vld [vmem:[%s14737_s11 + $0x40] sm:$0xff] }
 0x63a   : > { %v11915_v37 = vpop.permute.xlu0 %5131  ;;  %v11918_v2 = vpop.permute.xlu1 %4839 }
 0x63b   : > { %15860 = vst [vmem:[#allocation178_spill] sm:$0xff] %v11915_v37  ;;  %15861 = vst [vmem:[#allocation206_spill] sm:$0xff] %v11918_v2  ;;  %v15865_v2 = vld [vmem:[#allocation55_spill] sm:$0xff] }
 0x63c   : > { %v11944_v61 = vrot.slane %v11931_v58, %v15865_v2 }
 0x63d   : > { %5531 = vperm.xlu0 %7225, %v11923_v32   ;;  %5223 = vperm.xlu1 %7220, %v11677_v23   ;;  %v11954_v23 = vld [vmem:[%s14737_s11 + $0x50] sm:$0xff] }
 0x63e   : > { %v11926_v36 = vpop.permute.xlu0 %5139  ;;  %v11934_v50 = vpop.permute.xlu1 %4847  ;;  %v2900_v12 = vmul.f32 %v11944_v61, %v15872_v41  ;;  %v2902_v30 = vmul.f32 %v11944_v61, %v15873_v8  ;;  %v2904_v26 = vmul.f32 %v11944_v61, %v15874_v28  ;;  %v2908_v46 = vmul.f32 %v11944_v61, %v15876_v25  ;;  %v11996_v25 = vld [vmem:[%s14737_s11 + $0x60] sm:$0xff] }
 0x63f   : > { %15862 = vst [vmem:[#allocation80_spill] sm:$0xff] %v11926_v36  ;;  %15864 = vst [vmem:[#allocation82_spill] sm:$0xff] %v11934_v50  ;;  %v15868_v50 = vld [vmem:[#allocation93_spill] sm:$0xff]  ;;  %v2912_v41 = vmul.f32 %v11944_v61, %v15878_v54  ;;  %v2916_v28 = vmul.f32 %v11944_v61, %v15880_v14  ;;  %v15881_v36 = vld [vmem:[#allocation119_spill] sm:$0xff] }
 0x640   : > { %v2895_v13 = vmul.f32 %v11944_v61, %v15868_v50  ;;  %v15875_v50 = vld [vmem:[#allocation103_spill] sm:$0xff]  ;;  %v12016_v17 = vadd.f32 %v11964_v48, %v2900_v12 }
 0x641   : > { %5539 = vperm.xlu0 %7225, %v11939_v10   ;;  %5231 = vperm.xlu1 %7220, %v11688_v27   ;;  %v15871_v27 = vld [vmem:[#allocation95_spill] sm:$0xff]  ;;  %v2906_v38 = vmul.f32 %v11944_v61, %v15875_v50  ;;  %v2920_v50 = vmul.f32 %v11944_v61, %v15882_v47  ;;  %v12008_v47 = vrot.slane %v11931_v58, %v15886_v1 }
 0x642   : > { %v11946_v53 = vpop.permute.xlu0 %5147  ;;  %v2898_v5 = vmul.f32 %v11944_v61, %v15871_v27  ;;  %v12000_v54 = vadd.f32 %v11964_v48, %v2895_v13  ;;  %v12019_v13 = vadd.f32 %v11964_v48, %v2902_v30  ;;  %v12029_v1 = vadd.f32 %v11964_v48, %v2908_v46 }
 0x643   : > { %15866 = vst [vmem:[#allocation304_spill] sm:$0xff] %v11946_v53  ;;  %v11949_v6 = vpop.permute.xlu1 %4923  ;;  %v15879_v53 = vld [vmem:[#allocation113_spill] sm:$0xff]  ;;  %v12035_v12 = vadd.f32 %v11964_v48, %v2912_v41  ;;  %v12048_v46 = vadd.f32 %v11964_v48, %v2920_v50 }
 0x644   : > { %15867 = vst [vmem:[#allocation324_spill] sm:$0xff] %v11949_v6  ;;  %v2914_v8 = vmul.f32 %v11944_v61, %v15879_v53  ;;  %v15885_v53 = vld [vmem:[#allocation127_spill] sm:$0xff]  ;;  %v12013_v6 = vadd.f32 %v11964_v48, %v2898_v5 }
 0x645   : > { %5547 = vperm.xlu0 %7225, %v11954_v23   ;;  %5239 = vperm.xlu1 %7220, %v11699_v45   ;;  %v2918_v45 = vmul.f32 %v11944_v61, %v15881_v36  ;;  %v2924_v36 = vmul.f32 %v11944_v61, %v15885_v53  ;;  %v12026_v53 = vadd.f32 %v11964_v48, %v2906_v38 }
 0x646   : > { %v11959_v44 = vpop.permute.xlu0 %5155  ;;  %v12039_v30 = vadd.f32 %v11964_v48, %v2914_v8  ;;  %15891 = vst [vmem:[#allocation99_spill] sm:$0xff] %v12048_v46  ;;  %v15895_v8 = vld [vmem:[#allocation160_spill] sm:$0xff]  ;;  %v15976_v46 = vld [vmem:[#allocation301_spill] sm:$0xff] }
 0x647   : > { %15869 = vst [vmem:[#allocation306_spill] sm:$0xff] %v11959_v44  ;;  %v15877_v44 = vld [vmem:[#allocation107_spill] sm:$0xff]  ;;  %v11991_v37 = vpop.permute.xlu1 %4927  ;;  %v12062_v41 = vadd.f32 %v11964_v48, %v2924_v36  ;;  %v15900_v36 = vld [vmem:[#allocation166_spill] sm:$0xff] }
 0x648   : > { %v2910_v27 = vmul.f32 %v11944_v61, %v15877_v44  ;;  %15883 = vst [vmem:[#allocation86_spill] sm:$0xff] %v11991_v37  ;;  %v15884_v44 = vld [vmem:[#allocation125_spill] sm:$0xff]  ;;  %v12084_v31 = vmul.f32 %v12008_v47, %v15900_v36  ;;  %v12104_v36 = vmul.f32 %v12008_v47, %v15905_v59 }
 0x649   : > { %5555 = vperm.xlu0 %7225, %v11996_v25   ;;  %v2922_v14 = vmul.f32 %v11944_v61, %v15884_v44  ;;  %v12022_v44 = vadd.f32 %v11964_v48, %v2904_v26  ;;  %7223 = vset.pattern.permute.xlu1 %v15888_v35  ;;  %v12042_v26 = vadd.f32 %v11964_v48, %v2916_v28 }
 0x64a   : > { %v12010_v37 = vpop.permute.xlu0 %5163  ;;  %v12032_v5 = vadd.f32 %v11964_v48, %v2910_v27  ;;  %5315 = vperm.xlu1 %7223, %v11711_v4   ;;  %v12045_v35 = vadd.f32 %v11964_v48, %v2918_v45  ;;  %v12055_v27 = vld [vmem:[%s14737_s11 + $0x70] sm:$0xff]  ;;  %15894 = vst [vmem:[#allocation105_spill] sm:$0xff] %v12062_v41  ;;  %v12066_v28 = vmul.f32 %v12008_v47, %v15895_v8  ;;  %v15896_v45 = vld [vmem:[#allocation282_spill] sm:$0xff]  ;;  %v15901_v8 = vld [vmem:[#allocation167_spill] sm:$0xff] }
 0x64b   : > { %15887 = vst [vmem:[#allocation93_spill] sm:$0xff] %v12010_v37  ;;  %15889 = vst [vmem:[#allocation95_spill] sm:$0xff] %v12042_v26  ;;  %v12050_v38 = vpop.permute.xlu1 %4935  ;;  %v12059_v4 = vadd.f32 %v11964_v48, %v2922_v14  ;;  %v12070_v50 = vrot.slane %v11931_v58, %v15896_v45  ;;  %v12080_v14 = vmul.f32 %v12008_v47, %v15899_v3  ;;  %v15902_v45 = vld [vmem:[#allocation169_spill] sm:$0xff] }
 0x64c   : > { %15890 = vst [vmem:[#allocation97_spill] sm:$0xff] %v12045_v35  ;;  %15892 = vst [vmem:[#allocation101_spill] sm:$0xff] %v12050_v38  ;;  %v15898_v38 = vld [vmem:[#allocation162_spill] sm:$0xff]  ;;  %v12088_v56 = vmul.f32 %v12008_v47, %v15901_v8  ;;  %v12092_v20 = vmul.f32 %v12008_v47, %v15902_v45  ;;  %v12100_v3 = vmul.f32 %v12008_v47, %v15904_v15  ;;  %v15906_v8 = vld [vmem:[#allocation177_spill] sm:$0xff] }
 0x64d   : > { %5563 = vperm.xlu0 %7225, %v12055_v27   ;;  %15893 = vst [vmem:[#allocation103_spill] sm:$0xff] %v12059_v4  ;;  %v12076_v43 = vmul.f32 %v12008_v47, %v15898_v38  ;;  %v12109_v19 = vmul.f32 %v12008_v47, %v15906_v8  ;;  %v15907_v45 = vld [vmem:[#allocation179_spill] sm:$0xff]  ;;  %v15911_v8 = vld [vmem:[#allocation185_spill] sm:$0xff]  ;;  %v12151_v18 = vmul.f32 %v12070_v50, %v15917_v21 }
 0x64e   : > { %v12072_v37 = vpop.permute.xlu0 %5171  ;;  %5319 = vperm.xlu1 %7223, %v11452_v22   ;;  %v12113_v62 = vmul.f32 %v12008_v47, %v15907_v45  ;;  %v15909_v15 = vld [vmem:[#allocation183_spill] sm:$0xff]  ;;  %v12128_v22 = vld [vmem:[%s14737_s11 + $0x80] sm:$0xff]  ;;  %v12133_v45 = vmul.f32 %v12008_v47, %v15911_v8 }
 0x64f   : > { %15897 = vst [vmem:[#allocation107_spill] sm:$0xff] %v12072_v37  ;;  %v15903_v37 = vld [vmem:[#allocation171_spill] sm:$0xff]  ;;  %v12121_v16 = vmul.f32 %v12008_v47, %v15909_v15  ;;  %v12123_v59 = vpop.permute.xlu1 %4943  ;;  %v12141_v15 = vmul.f32 %v12008_v47, %v15913_v7  ;;  %v15918_v8 = vld [vmem:[#allocation222_spill] sm:$0xff] }
 0x650   : > { %v12096_v38 = vmul.f32 %v12008_v47, %v15903_v37  ;;  %v15908_v37 = vld [vmem:[#allocation181_spill] sm:$0xff]  ;;  %15910 = vst [vmem:[#allocation110_spill] sm:$0xff] %v12123_v59  ;;  %v15914_v59 = vld [vmem:[#allocation58_spill] sm:$0xff]  ;;  %v12155_v49 = vmul.f32 %v12070_v50, %v15918_v8  ;;  %v12175_v8 = vmul.f32 %v12070_v50, %v15925_v63 }
 0x651   : > { %v12117_v52 = vmul.f32 %v12008_v47, %v15908_v37  ;;  %5571 = vperm.xlu0 %7225, %v12128_v22   ;;  %v12137_v37 = vmul.f32 %v12008_v47, %v15912_v55  ;;  %v12145_v2 = vrot.slane %v11931_v58, %v15914_v59  ;;  %v15919_v55 = vld [vmem:[#allocation224_spill] sm:$0xff]  ;;  %v15920_v7 = vld [vmem:[#allocation226_spill] sm:$0xff] }
 0x652   : > { %v12147_v9 = vpop.permute.xlu0 %5179  ;;  %v12159_v24 = vmul.f32 %v12070_v50, %v15919_v55  ;;  %v12163_v11 = vmul.f32 %v12070_v50, %v15920_v7  ;;  %v15921_v59 = vld [vmem:[#allocation228_spill] sm:$0xff]  ;;  %15926 = vst [vmem:[#allocation125_spill] sm:$0xff] %v12175_v8  ;;  %v12179_v55 = vmul.f32 %v12070_v50, %v15927_v57  ;;  %5327 = vperm.xlu1 %7223, %v11750_v0   ;;  %v15929_v7 = vld [vmem:[#allocation235_spill] sm:$0xff]  ;;  %v15935_v63 = vld [vmem:[#allocation238_spill] sm:$0xff] }
 0x653   : > { %15915 = vst [vmem:[#allocation113_spill] sm:$0xff] %v12145_v2  ;;  %15916 = vst [vmem:[#allocation116_spill] sm:$0xff] %v12147_v9  ;;  %v12167_v51 = vmul.f32 %v12070_v50, %v15921_v59  ;;  %v15923_v9 = vld [vmem:[#allocation230_spill] sm:$0xff]  ;;  %v12184_v33 = vmul.f32 %v12070_v50, %v15929_v7  ;;  %v15931_v59 = vld [vmem:[#allocation236_spill] sm:$0xff]  ;;  %v12196_v42 = vmul.f32 %v12070_v50, %v15935_v63  ;;  %v12198_v57 = vpop.permute.xlu1 %4951 }
 0x654   : > { %v12171_v21 = vmul.f32 %v12070_v50, %v15923_v9  ;;  %15928 = vst [vmem:[#allocation127_spill] sm:$0xff] %v12179_v55  ;;  %v12188_v60 = vmul.f32 %v12070_v50, %v15931_v59  ;;  %v15933_v9 = vld [vmem:[#allocation237_spill] sm:$0xff]  ;;  %15937 = vst [vmem:[#allocation167_spill] sm:$0xff] %v12198_v57  ;;  %v12203_v0 = vld [vmem:[%s14737_s11 + $0x90] sm:$0xff]  ;;  %v12291_v35 = vmul.f32 %v12145_v2, %v15976_v46 }
 0x655   : > { %15922 = vst [vmem:[#allocation119_spill] sm:$0xff] %v12167_v51  ;;  %15930 = vst [vmem:[#allocation160_spill] sm:$0xff] %v12184_v33  ;;  %v12192_v39 = vmul.f32 %v12070_v50, %v15933_v9  ;;  %5579 = vperm.xlu0 %7225, %v12203_v0   ;;  %v15938_v7 = vld [vmem:[#allocation239_spill] sm:$0xff]  ;;  %v12212_v9 = vmul.f32 %v12070_v50, %v15940_v29  ;;  %v15944_v57 = vld [vmem:[#allocation285_spill] sm:$0xff] }
 0x656   : > { %15924 = vst [vmem:[#allocation122_spill] sm:$0xff] %v12171_v21  ;;  %15932 = vst [vmem:[#allocation162_spill] sm:$0xff] %v12188_v60  ;;  %v12208_v59 = vmul.f32 %v12070_v50, %v15938_v7  ;;  %v12222_v60 = vpop.permute.xlu0 %5187  ;;  %v15946_v33 = vld [vmem:[#allocation275_spill] sm:$0xff]  ;;  %v15948_v7 = vld [vmem:[#allocation277_spill] sm:$0xff]  ;;  %5335 = vperm.xlu1 %7223, %v11923_v32  }
 0x657   : > { %15934 = vst [vmem:[#allocation164_spill] sm:$0xff] %v12192_v39  ;;  %15936 = vst [vmem:[#allocation166_spill] sm:$0xff] %v12196_v42  ;;  %v15942_v39 = vld [vmem:[#allocation241_spill] sm:$0xff]  ;;  %v12220_v42 = vrot.slane %v11931_v58, %v15944_v57  ;;  %v12226_v40 = vmul.f32 %v12145_v2, %v15946_v33  ;;  %v15950_v29 = vld [vmem:[#allocation279_spill] sm:$0xff] }
 0x658   : > { %15939 = vst [vmem:[#allocation169_spill] sm:$0xff] %v12208_v59  ;;  %15941 = vst [vmem:[#allocation171_spill] sm:$0xff] %v12212_v9  ;;  %v12216_v63 = vmul.f32 %v12070_v50, %v15942_v39  ;;  %v12230_v59 = vmul.f32 %v12145_v2, %v15948_v7  ;;  %v12234_v9 = vmul.f32 %v12145_v2, %v15950_v29  ;;  %v15952_v39 = vld [vmem:[#allocation321_spill] sm:$0xff]  ;;  %v15958_v7 = vld [vmem:[#allocation327_spill] sm:$0xff] }
 0x659   : > { %15945 = vst [vmem:[#allocation175_spill] sm:$0xff] %v12222_v60  ;;  %15947 = vst [vmem:[#allocation177_spill] sm:$0xff] %v12226_v40  ;;  %v15953_v55 = vld [vmem:[#allocation281_spill] sm:$0xff]  ;;  %v15955_v60 = vld [vmem:[#allocation284_spill] sm:$0xff] }
 0x65a   : > { %15943 = vst [vmem:[#allocation173_spill] sm:$0xff] %v12216_v63  ;;  %15949 = vst [vmem:[#allocation179_spill] sm:$0xff] %v12230_v59  ;;  %v2894_v63 = vmul.f32 %v11944_v61, %v15952_v39  ;;  %v12240_v57 = vmul.f32 %v12145_v2, %v15953_v55  ;;  %v12244_v41 = vmul.f32 %v12145_v2, %v15955_v60  ;;  %v15957_v33 = vld [vmem:[#allocation325_spill] sm:$0xff]  ;;  %v15959_v29 = vld [vmem:[#allocation287_spill] sm:$0xff]  ;;  %v12287_v8 = vpop.permute.xlu0 %5195  ;;  %5343 = vperm.xlu1 %7223, %v11939_v10  }
 0x65b   : > { %15951 = vst [vmem:[#allocation181_spill] sm:$0xff] %v12234_v9  ;;  %v2897_v40 = vmul.f32 %v11944_v61, %v15957_v33  ;;  %v2899_v59 = vmul.f32 %v11944_v61, %v15958_v7  ;;  %v12253_v9 = vmul.f32 %v12145_v2, %v15959_v29  ;;  %v15961_v39 = vld [vmem:[#allocation290_spill] sm:$0xff]  ;;  %v12263_v33 = vpop.permute.xlu1 %4959  ;;  %v15967_v7 = vld [vmem:[#allocation292_spill] sm:$0xff]  ;;  %15975 = vst [vmem:[#allocation231_spill] sm:$0xff] %v12287_v8 }
 0x65c   : > { %15954 = vst [vmem:[#allocation183_spill] sm:$0xff] %v12240_v57  ;;  %15956 = vst [vmem:[#allocation185_spill] sm:$0xff] %v12244_v41  ;;  %v12257_v55 = vmul.f32 %v12145_v2, %v15961_v39  ;;  %v15963_v57 = vld [vmem:[#allocation329_spill] sm:$0xff]  ;;  %v15964_v41 = vld [vmem:[#allocation331_spill] sm:$0xff]  ;;  %v12273_v29 = vmul.f32 %v12145_v2, %v15967_v7  ;;  %v2926_v7 = vadd.f32 %v11964_v48, %v2894_v63 }
 0x65d   : > { %15960 = vst [vmem:[#allocation187_spill] sm:$0xff] %v12253_v9  ;;  %v2901_v60 = vmul.f32 %v11944_v61, %v15963_v57  ;;  %v2903_v4 = vmul.f32 %v11944_v61, %v15964_v41  ;;  %15965 = vst [vmem:[#allocation220_spill] sm:$0xff] %v12263_v33  ;;  %v12268_v32 = vld [vmem:[%s14737_s11 + $0xa0] sm:$0xff]  ;;  %v15969_v39 = vld [vmem:[#allocation293_spill] sm:$0xff]  ;;  %v2931_v8 = vadd.f32 %v11964_v48, %v2899_v59 }
 0x65e   : > { %15962 = vst [vmem:[#allocation189_spill] sm:$0xff] %v12257_v55  ;;  %15966 = vst [vmem:[#allocation222_spill] sm:$0xff] %v12268_v32  ;;  %5587 = vperm.xlu0 %7225, %v12268_v32   ;;  %v12277_v55 = vmul.f32 %v12145_v2, %v15969_v39  ;;  %v15971_v57 = vld [vmem:[#allocation296_spill] sm:$0xff]  ;;  %v15973_v33 = vld [vmem:[#allocation299_spill] sm:$0xff]  ;;  %5351 = vperm.xlu1 %7223, %v11954_v23  }
 0x65f   : > { %15968 = vst [vmem:[#allocation224_spill] sm:$0xff] %v12273_v29  ;;  %v12281_v41 = vmul.f32 %v12145_v2, %v15971_v57  ;;  %v12285_v9 = vmul.f32 %v12145_v2, %v15973_v33  ;;  %15977 = vst [vmem:[#allocation233_spill] sm:$0xff] %v12291_v35  ;;  %v15978_v29 = vld [vmem:[#allocation323_spill] sm:$0xff]  ;;  %v2929_v33 = vadd.f32 %v11964_v48, %v2897_v40  ;;  %v15983_v63 = vld [vmem:[#allocation305_spill] sm:$0xff] }
 0x660   : > { %15970 = vst [vmem:[#allocation226_spill] sm:$0xff] %v12277_v55  ;;  %v2896_v39 = vmul.f32 %v11944_v61, %v15978_v29  ;;  %v15979_v55 = vld [vmem:[#allocation333_spill] sm:$0xff]  ;;  %v15980_v57 = vld [vmem:[#allocation303_spill] sm:$0xff]  ;;  %v12309_v35 = vmul.f32 %v12145_v2, %v15983_v63  ;;  %v2933_v29 = vadd.f32 %v11964_v48, %v2901_v60  ;;  %v12320_v40 = vld [vmem:[%s14737_s11 + $0xb0] sm:$0xff] }
 0x661   : > { %15972 = vst [vmem:[#allocation228_spill] sm:$0xff] %v12281_v41  ;;  %15974 = vst [vmem:[#allocation230_spill] sm:$0xff] %v12285_v9  ;;  %v2905_v32 = vmul.f32 %v11944_v61, %v15979_v55  ;;  %v12300_v41 = vmul.f32 %v12145_v2, %v15980_v57  ;;  %v15982_v9 = vld [vmem:[#allocation335_spill] sm:$0xff]  ;;  %v2935_v55 = vadd.f32 %v11964_v48, %v2903_v4  ;;  %v15985_v21 = vld [vmem:[#allocation337_spill] sm:$0xff] }
 0x662   : > { %v2907_v46 = vmul.f32 %v11944_v61, %v15982_v9  ;;  %15984 = vst [vmem:[#allocation236_spill] sm:$0xff] %v12309_v35  ;;  %v2909_v57 = vmul.f32 %v11944_v61, %v15985_v21  ;;  %15987 = vst [vmem:[#allocation238_spill] sm:$0xff] %v12320_v40  ;;  %5595 = vperm.xlu0 %7225, %v12320_v40   ;;  %v15988_v10 = vld [vmem:[#allocation307_spill] sm:$0xff]  ;;  %v15990_v9 = vld [vmem:[#allocation309_spill] sm:$0xff]  ;;  %v12335_v35 = vpop.permute.xlu0 %5203  ;;  %v12338_v26 = vadd.f32 %v11964_v48, %v2896_v39 }
 0x663   : > { %15981 = vst [vmem:[#allocation235_spill] sm:$0xff] %v12300_v41  ;;  %v12315_v41 = vpop.permute.xlu1 %4967  ;;  %v12325_v59 = vmul.f32 %v12145_v2, %v15988_v10  ;;  %v12329_v60 = vmul.f32 %v12145_v2, %v15990_v9  ;;  %v15992_v4 = vld [vmem:[#allocation339_spill] sm:$0xff]  ;;  %v15993_v63 = vld [vmem:[#allocation341_spill] sm:$0xff]  ;;  %15994 = vst [vmem:[#allocation241_spill] sm:$0xff] %v12335_v35  ;;  %v2937_v40 = vadd.f32 %v11964_v48, %v2905_v32  ;;  %5359 = vperm.xlu1 %7223, %v11996_v25  }
 0x664   : > { %15986 = vst [vmem:[#allocation237_spill] sm:$0xff] %v12315_v41  ;;  %v2911_v21 = vmul.f32 %v11944_v61, %v15992_v4  ;;  %v2913_v41 = vmul.f32 %v11944_v61, %v15993_v63  ;;  %v15995_v51 = vld [vmem:[#allocation343_spill] sm:$0xff]  ;;  %v2939_v9 = vadd.f32 %v11964_v48, %v2907_v46  ;;  %v12350_v63 = vadd.f32 %v12076_v43, %v2929_v33  ;;  %v12370_v43 = vld [vmem:[%s14737_s11 + $0xc0] sm:$0xff]  ;;  %v16000_v33 = vld [vmem:[#allocation288_spill] sm:$0xff] }
 0x665   : > { %15989 = vst [vmem:[#allocation239_spill] sm:$0xff] %v12325_v59  ;;  %15991 = vst [vmem:[#allocation240_spill] sm:$0xff] %v12329_v60  ;;  %v2915_v10 = vmul.f32 %v11944_v61, %v15995_v51  ;;  %v12344_v59 = vadd.f32 %v12066_v28, %v2926_v7  ;;  %v15996_v60 = vld [vmem:[#allocation345_spill] sm:$0xff]  ;;  %v12353_v35 = vadd.f32 %v12080_v14, %v2931_v8  ;;  %v15997_v39 = vld [vmem:[#allocation347_spill] sm:$0xff] }
 0x666   : > { %v2917_v4 = vmul.f32 %v11944_v61, %v15996_v60  ;;  %v2941_v32 = vadd.f32 %v11964_v48, %v2909_v57  ;;  %v2919_v51 = vmul.f32 %v11944_v61, %v15997_v39  ;;  %v12360_v28 = vadd.f32 %v12084_v31, %v2933_v29  ;;  %5603 = vperm.xlu0 %7225, %v12370_v43   ;;  %v15999_v8 = vld [vmem:[#allocation349_spill] sm:$0xff]  ;;  %v12381_v29 = vpop.permute.xlu0 %5211  ;;  %v16003_v39 = vld [vmem:[#allocation351_spill] sm:$0xff] }
 0x667   : > { %v12363_v7 = vadd.f32 %v12088_v56, %v2935_v55  ;;  %v12365_v46 = vpop.permute.xlu1 %4975  ;;  %v2943_v23 = vadd.f32 %v11964_v48, %v2911_v21  ;;  %v2945_v14 = vadd.f32 %v11964_v48, %v2913_v41  ;;  %v2921_v31 = vmul.f32 %v11944_v61, %v15999_v8  ;;  %16001 = vst [vmem:[#allocation277_spill] sm:$0xff] %v12381_v29  ;;  %v16002_v55 = vld [vmem:[#allocation338_spill] sm:$0xff]  ;;  %v16006_v2 = vld [vmem:[#allocation353_spill] sm:$0xff] }
 0x668   : > { %15998 = vst [vmem:[#allocation275_spill] sm:$0xff] %v12365_v46  ;;  %v12379_v56 = vrot.slane %v11931_v58, %v16000_v33  ;;  %v12385_v57 = vmul.f32 %v12220_v42, %v16002_v55  ;;  %v2947_v60 = vadd.f32 %v11964_v48, %v2915_v10  ;;  %v2923_v21 = vmul.f32 %v11944_v61, %v16003_v39  ;;  %v16004_v46 = vld [vmem:[#allocation340_spill] sm:$0xff]  ;;  %v16007_v10 = vld [vmem:[#allocation342_spill] sm:$0xff] }
 0x669   : > { %v12391_v41 = vadd.f32 %v12092_v20, %v2937_v40  ;;  %v12395_v8 = vmul.f32 %v12220_v42, %v16004_v46  ;;  %v2949_v33 = vadd.f32 %v11964_v48, %v2917_v4  ;;  %v2925_v29 = vmul.f32 %v11944_v61, %v16006_v2  ;;  %v16008_v40 = vld [vmem:[#allocation356_spill] sm:$0xff]  ;;  %5367 = vperm.xlu1 %7223, %v12055_v27  }
 0x66a   : > { %v12401_v55 = vadd.f32 %v12096_v38, %v2939_v9  ;;  %v12406_v39 = vmul.f32 %v12220_v42, %v16007_v10  ;;  %v2951_v20 = vadd.f32 %v11964_v48, %v2919_v51  ;;  %v3091_v46 = vmul.f32 %v12008_v47, %v16008_v40  ;;  %v12419_v61 = vld [vmem:[%s14737_s11 + $0xd0] sm:$0xff]  ;;  %v16013_v51 = vld [vmem:[#allocation346_spill] sm:$0xff] }
 0x66b   : > { %16005 = vst [vmem:[#allocation279_spill] sm:$0xff] %v12395_v8  ;;  %v12412_v8 = vadd.f32 %v12100_v3, %v2941_v32  ;;  %v12414_v4 = vpop.permute.xlu1 %4983  ;;  %5611 = vperm.xlu0 %7225, %v12419_v61   ;;  %v16010_v2 = vld [vmem:[#allocation344_spill] sm:$0xff]  ;;  %v2953_v38 = vadd.f32 %v11964_v48, %v2921_v31  ;;  %v12428_v9 = vadd.f32 %v12104_v36, %v2943_v23  ;;  %v12433_v32 = vpop.permute.xlu0 %5219  ;;  %v16016_v23 = vld [vmem:[#allocation362_spill] sm:$0xff] }
 0x66c   : > { %16009 = vst [vmem:[#allocation321_spill] sm:$0xff] %v12414_v4  ;;  %v12424_v25 = vmul.f32 %v12220_v42, %v16010_v2  ;;  %v12431_v3 = vadd.f32 %v12109_v19, %v2945_v14  ;;  %16012 = vst [vmem:[#allocation284_spill] sm:$0xff] %v12433_v32  ;;  %v12437_v10 = vmul.f32 %v12220_v42, %v16013_v51  ;;  %v16014_v4 = vld [vmem:[#allocation360_spill] sm:$0xff] }
 0x66d   : > { %v2955_v40 = vadd.f32 %v11964_v48, %v2923_v21  ;;  %v3094_v2 = vmul.f32 %v12008_v47, %v16014_v4  ;;  %v16015_v31 = vld [vmem:[#allocation348_spill] sm:$0xff]  ;;  %v2957_v19 = vadd.f32 %v11964_v48, %v2925_v29  ;;  %v3096_v14 = vmul.f32 %v12008_v47, %v16016_v23  ;;  %v16017_v21 = vld [vmem:[#allocation350_spill] sm:$0xff]  ;;  %5375 = vperm.xlu1 %7223, %v12128_v22  }
 0x66e   : > { %16011 = vst [vmem:[#allocation281_spill] sm:$0xff] %v12424_v25  ;;  %v12443_v25 = vadd.f32 %v12113_v62, %v2947_v60  ;;  %v12447_v36 = vmul.f32 %v12220_v42, %v16015_v31  ;;  %v12453_v51 = vadd.f32 %v12117_v52, %v2949_v33  ;;  %v12458_v4 = vmul.f32 %v12220_v42, %v16017_v21  ;;  %v16019_v60 = vld [vmem:[#allocation358_spill] sm:$0xff]  ;;  %v16021_v27 = vld [vmem:[#allocation352_spill] sm:$0xff]  ;;  %v16027_v21 = vld [vmem:[#allocation355_spill] sm:$0xff] }
 0x66f   : > { %v3123_v62 = vadd.f32 %v3091_v46, %v12000_v54  ;;  %v3092_v31 = vmul.f32 %v12008_v47, %v16019_v60  ;;  %v12464_v32 = vadd.f32 %v12121_v16, %v2951_v20  ;;  %v12466_v48 = vpop.permute.xlu1 %4991  ;;  %v12471_v52 = vld [vmem:[%s14737_s11 + $0xe0] sm:$0xff]  ;;  %v12476_v33 = vmul.f32 %v12220_v42, %v16021_v27  ;;  %v16025_v46 = vld [vmem:[#allocation364_spill] sm:$0xff]  ;;  %v12487_v23 = vpop.permute.xlu0 %5227 }
 0x670   : > { %16018 = vst [vmem:[#allocation325_spill] sm:$0xff] %v12458_v4  ;;  %16020 = vst [vmem:[#allocation327_spill] sm:$0xff] %v12466_v48  ;;  %5619 = vperm.xlu0 %7225, %v12471_v52   ;;  %v16023_v54 = vld [vmem:[#allocation354_spill] sm:$0xff]  ;;  %v3098_v16 = vmul.f32 %v12008_v47, %v16025_v46  ;;  %v12485_v20 = vadd.f32 %v12133_v45, %v2953_v38  ;;  %v12491_v60 = vmul.f32 %v12220_v42, %v16027_v21  ;;  %v16032_v38 = vld [vmem:[#allocation367_spill] sm:$0xff] }
 0x671   : > { %16022 = vst [vmem:[#allocation287_spill] sm:$0xff] %v12476_v33  ;;  %v12480_v29 = vmul.f32 %v12220_v42, %v16023_v54  ;;  %16026 = vst [vmem:[#allocation329_spill] sm:$0xff] %v12487_v23  ;;  %v3126_v48 = vadd.f32 %v3094_v2, %v12013_v6  ;;  %v16029_v27 = vld [vmem:[#allocation366_spill] sm:$0xff]  ;;  %v12497_v54 = vadd.f32 %v12137_v37, %v2955_v40  ;;  %v16033_v2 = vld [vmem:[#allocation359_spill] sm:$0xff]  ;;  %5383 = vperm.xlu1 %7223, %v12203_v0  }
 0x672   : > { %16028 = vst [vmem:[#allocation331_spill] sm:$0xff] %v12491_v60  ;;  %v3100_v33 = vmul.f32 %v12008_v47, %v16029_v27  ;;  %v3128_v45 = vadd.f32 %v3096_v14, %v12016_v17  ;;  %v3102_v23 = vmul.f32 %v12008_v47, %v16032_v38  ;;  %v12507_v21 = vadd.f32 %v12141_v15, %v2957_v19  ;;  %v16035_v40 = vld [vmem:[#allocation368_spill] sm:$0xff]  ;;  %v16041_v38 = vld [vmem:[#allocation370_spill] sm:$0xff]  ;;  %v16051_v0 = vld [vmem:[#allocation375_spill] sm:$0xff] }
 0x673   : > { %16024 = vst [vmem:[#allocation290_spill] sm:$0xff] %v12480_v29  ;;  %v16030_v29 = vld [vmem:[#allocation357_spill] sm:$0xff]  ;;  %v12511_v6 = vadd.f32 %v3092_v31, %v12338_v26  ;;  %v12515_v37 = vmul.f32 %v12220_v42, %v16033_v2  ;;  %v12520_v17 = vadd.f32 %v12151_v18, %v3123_v62  ;;  %v12522_v14 = vpop.permute.xlu1 %4999  ;;  %v12527_v15 = vld [vmem:[%s14737_s11 + $0xf0] sm:$0xff]  ;;  %v3130_v19 = vadd.f32 %v3098_v16, %v12019_v13  ;;  %v12537_v18 = vpop.permute.xlu0 %5235 }
 0x674   : > { %v12501_v46 = vmul.f32 %v12220_v42, %v16030_v29  ;;  %v3104_v29 = vmul.f32 %v12008_v47, %v16035_v40  ;;  %16036 = vst [vmem:[#allocation296_spill] sm:$0xff] %v12522_v14  ;;  %5627 = vperm.xlu0 %7225, %v12527_v15   ;;  %v16037_v26 = vld [vmem:[#allocation361_spill] sm:$0xff]  ;;  %16040 = vst [vmem:[#allocation301_spill] sm:$0xff] %v12537_v18  ;;  %v3132_v62 = vadd.f32 %v3100_v33, %v12022_v44  ;;  %v16042_v40 = vld [vmem:[#allocation371_spill] sm:$0xff] }
 0x675   : > { %16034 = vst [vmem:[#allocation293_spill] sm:$0xff] %v12515_v37  ;;  %v12532_v22 = vmul.f32 %v12220_v42, %v16037_v26  ;;  %v16039_v31 = vld [vmem:[#allocation369_spill] sm:$0xff]  ;;  %v3108_v2 = vmul.f32 %v12008_v47, %v16041_v38  ;;  %v3110_v14 = vmul.f32 %v12008_v47, %v16042_v40  ;;  %v12545_v37 = vadd.f32 %v12155_v49, %v3126_v48  ;;  %v16043_v26 = vld [vmem:[#allocation363_spill] sm:$0xff]  ;;  %v16045_v16 = vld [vmem:[#allocation372_spill] sm:$0xff] }
 0x676   : > { %16031 = vst [vmem:[#allocation292_spill] sm:$0xff] %v12501_v46  ;;  %v3106_v27 = vmul.f32 %v12008_v47, %v16039_v31  ;;  %v3134_v13 = vadd.f32 %v3102_v23, %v12026_v53  ;;  %v3112_v31 = vmul.f32 %v12008_v47, %v16045_v16  ;;  %v12555_v44 = vadd.f32 %v12159_v24, %v3128_v45  ;;  %v16046_v33 = vld [vmem:[#allocation365_spill] sm:$0xff] }
 0x677   : > { %16038 = vst [vmem:[#allocation299_spill] sm:$0xff] %v12532_v22  ;;  %v12549_v22 = vmul.f32 %v12220_v42, %v16043_v26  ;;  %v12560_v38 = vmul.f32 %v12220_v42, %v16046_v33  ;;  %v3136_v49 = vadd.f32 %v3104_v29, %v12029_v1  ;;  %v16048_v48 = vld [vmem:[#allocation373_spill] sm:$0xff]  ;;  %v16049_v26 = vld [vmem:[#allocation374_spill] sm:$0xff]  ;;  %v12567_v23 = vpop.permute.xlu1 %5007  ;;  %v14868_v16 = vmov 15   ;;  %v16052_v33 = vld [vmem:[#allocation376_spill] sm:$0xff] }
 0x678   : > { %v3114_v40 = vmul.f32 %v12008_v47, %v16048_v48  ;;  %v3116_v53 = vmul.f32 %v12008_v47, %v16049_v26  ;;  %16050 = vst [vmem:[#allocation303_spill] sm:$0xff] %v12567_v23  ;;  %7226 = vset.pattern.permute.xlu0 %v14868_v16  ;;  %v3138_v24 = vadd.f32 %v3106_v27, %v12032_v5  ;;  %v16053_v26 = vld [vmem:[#allocation379_spill] sm:$0xff]  ;;  %v12586_v27 = vpop.permute.xlu0 %5311 }
 0x679   : > { %16044 = vst [vmem:[#allocation323_spill] sm:$0xff] %v12549_v22  ;;  %16047 = vst [vmem:[#allocation333_spill] sm:$0xff] %v12560_v38  ;;  %v3118_v45 = vmul.f32 %v12008_v47, %v16051_v0  ;;  %v3120_v18 = vmul.f32 %v12008_v47, %v16052_v33  ;;  %v12576_v1 = vadd.f32 %v12163_v11, %v3130_v19  ;;  %5703 = vperm.xlu0 %7226, %v11533_v34   ;;  %v16054_v23 = vld [vmem:[#allocation119_spill] sm:$0xff]  ;;  %v16058_v19 = vld [vmem:[#allocation385_spill] sm:$0xff] }
 0x67a   : > { %v3140_v29 = vadd.f32 %v3108_v2, %v12035_v12  ;;  %v3142_v48 = vadd.f32 %v3110_v14, %v12039_v30  ;;  %v3286_v16 = vmul.f32 %v12070_v50, %v16053_v26  ;;  %v12584_v5 = vadd.f32 %v16054_v23, %v3132_v62  ;;  %16055 = vst [vmem:[#allocation335_spill] sm:$0xff] %v12586_v27  ;;  %v16056_v0 = vld [vmem:[#allocation95_spill] sm:$0xff]  ;;  %v16059_v33 = vld [vmem:[#allocation122_spill] sm:$0xff]  ;;  %v16061_v14 = vld [vmem:[#allocation97_spill] sm:$0xff] }
 0x67b   : > { %v3144_v38 = vadd.f32 %v3112_v31, %v16056_v0  ;;  %v16057_v47 = vld [vmem:[#allocation383_spill] sm:$0xff]  ;;  %v3291_v34 = vmul.f32 %v12070_v50, %v16058_v19  ;;  %v12594_v12 = vadd.f32 %v16059_v33, %v3134_v13  ;;  %v16060_v30 = vld [vmem:[#allocation222_spill] sm:$0xff]  ;;  %v3146_v2 = vadd.f32 %v3114_v40, %v16061_v14  ;;  %v16064_v22 = vld [vmem:[#allocation125_spill] sm:$0xff]  ;;  %v12604_v0 = vpop.permute.xlu1 %5015 }
 0x67c   : > { %v3289_v11 = vmul.f32 %v12070_v50, %v16057_v47  ;;  %5391 = vperm.xlu1 %7223, %v16060_v30   ;;  %v16062_v26 = vld [vmem:[#allocation99_spill] sm:$0xff]  ;;  %v12602_v31 = vadd.f32 %v16064_v22, %v3136_v49  ;;  %16065 = vst [vmem:[#allocation305_spill] sm:$0xff] %v12604_v0  ;;  %v16067_v19 = vld [vmem:[#allocation105_spill] sm:$0xff]  ;;  %v16068_v13 = vld [vmem:[#allocation388_spill] sm:$0xff] }
 0x67d   : > { %v3148_v62 = vadd.f32 %v3116_v53, %v16062_v26  ;;  %v16063_v23 = vld [vmem:[#allocation387_spill] sm:$0xff]  ;;  %v3152_v60 = vadd.f32 %v3120_v18, %v16067_v19  ;;  %v3295_v33 = vmul.f32 %v12070_v50, %v16068_v13  ;;  %v16070_v40 = vld [vmem:[#allocation145_spill] sm:$0xff]  ;;  %v3318_v53 = vadd.f32 %v3286_v16, %v12344_v59  ;;  %v16072_v49 = vld [vmem:[#allocation160_spill] sm:$0xff]  ;;  %v12623_v18 = vpop.permute.xlu0 %5323 }
 0x67e   : > { %v3293_v27 = vmul.f32 %v12070_v50, %v16063_v23  ;;  %v16066_v47 = vld [vmem:[#allocation103_spill] sm:$0xff]  ;;  %5715 = vperm.xlu0 %7226, %v16070_v40   ;;  %v16071_v14 = vld [vmem:[#allocation381_spill] sm:$0xff]  ;;  %v12618_v26 = vadd.f32 %v16072_v49, %v3140_v29  ;;  %v16073_v23 = vld [vmem:[#allocation162_spill] sm:$0xff]  ;;  %16074 = vst [vmem:[#allocation337_spill] sm:$0xff] %v12623_v18 }
 0x67f   : > { %v3150_v46 = vadd.f32 %v3118_v45, %v16066_v47  ;;  %v16069_v30 = vld [vmem:[#allocation127_spill] sm:$0xff]  ;;  %v3288_v22 = vmul.f32 %v12070_v50, %v16071_v14  ;;  %v12621_v45 = vadd.f32 %v16073_v23, %v3142_v48  ;;  %v3321_v47 = vadd.f32 %v3289_v11, %v12350_v63  ;;  %v16075_v19 = vld [vmem:[#allocation390_spill] sm:$0xff]  ;;  %v16078_v40 = vld [vmem:[#allocation392_spill] sm:$0xff] }
 0x680   : > { %v12611_v4 = vadd.f32 %v16069_v30, %v3138_v24  ;;  %v3323_v24 = vadd.f32 %v3291_v34, %v12353_v35  ;;  %v3297_v13 = vmul.f32 %v12070_v50, %v16075_v19  ;;  %v16076_v30 = vld [vmem:[#allocation164_spill] sm:$0xff]  ;;  %v16077_v16 = vld [vmem:[#allocation238_spill] sm:$0xff]  ;;  %v3325_v29 = vadd.f32 %v3293_v27, %v12360_v28  ;;  %v16080_v23 = vld [vmem:[#allocation169_spill] sm:$0xff]  ;;  %v12642_v35 = vpop.permute.xlu1 %5023 }
 0x681   : > { %v12630_v59 = vadd.f32 %v16076_v30, %v3144_v38  ;;  %5399 = vperm.xlu1 %7223, %v16077_v16   ;;  %v3299_v48 = vmul.f32 %v12070_v50, %v16078_v40  ;;  %v16079_v14 = vld [vmem:[#allocation166_spill] sm:$0xff]  ;;  %v12640_v63 = vadd.f32 %v16080_v23, %v3148_v62  ;;  %16081 = vst [vmem:[#allocation307_spill] sm:$0xff] %v12642_v35  ;;  %v16083_v19 = vld [vmem:[#allocation171_spill] sm:$0xff]  ;;  %v16084_v28 = vld [vmem:[#allocation173_spill] sm:$0xff] }
 0x682   : > { %v12637_v49 = vadd.f32 %v16079_v14, %v3146_v2  ;;  %v3327_v11 = vadd.f32 %v3295_v33, %v12363_v7  ;;  %v16082_v34 = vld [vmem:[#allocation394_spill] sm:$0xff]  ;;  %v12648_v30 = vadd.f32 %v16083_v19, %v3150_v46  ;;  %v12651_v27 = vadd.f32 %v16084_v28, %v3152_v60  ;;  %v16085_v16 = vld [vmem:[#allocation75_spill] sm:$0xff]  ;;  %v16086_v62 = vld [vmem:[#allocation396_spill] sm:$0xff] }
 0x683   : > { %v3301_v38 = vmul.f32 %v12070_v50, %v16082_v34  ;;  %5723 = vperm.xlu0 %7226, %v16085_v16   ;;  %v12655_v2 = vadd.f32 %v3288_v22, %v12511_v6  ;;  %v3303_v40 = vmul.f32 %v12070_v50, %v16086_v62  ;;  %v16087_v14 = vld [vmem:[#allocation398_spill] sm:$0xff]  ;;  %v16088_v33 = vld [vmem:[#allocation177_spill] sm:$0xff]  ;;  %v12664_v34 = vpop.permute.xlu0 %5331  ;;  %v3329_v46 = vadd.f32 %v3297_v13, %v12391_v41  ;;  %v16090_v60 = vld [vmem:[#allocation400_spill] sm:$0xff] }
 0x684   : > { %v3305_v7 = vmul.f32 %v12070_v50, %v16087_v14  ;;  %v12662_v23 = vadd.f32 %v16088_v33, %v3318_v53  ;;  %16089 = vst [vmem:[#allocation309_spill] sm:$0xff] %v12664_v34  ;;  %v3307_v19 = vmul.f32 %v12070_v50, %v16090_v60  ;;  %v16091_v28 = vld [vmem:[#allocation179_spill] sm:$0xff]  ;;  %v16092_v6 = vld [vmem:[#allocation181_spill] sm:$0xff]  ;;  %v3331_v53 = vadd.f32 %v3299_v48, %v12401_v55  ;;  %v16094_v33 = vld [vmem:[#allocation402_spill] sm:$0xff]  ;;  %v12686_v60 = vpop.permute.xlu1 %5031 }
 0x685   : > { %v12670_v16 = vadd.f32 %v16091_v28, %v3321_v47  ;;  %v12673_v22 = vadd.f32 %v16092_v6, %v3323_v24  ;;  %5407 = vperm.xlu1 %7223, %v12370_v43   ;;  %v16093_v62 = vld [vmem:[#allocation389_spill] sm:$0xff]  ;;  %v3309_v41 = vmul.f32 %v12070_v50, %v16094_v33  ;;  %v16095_v13 = vld [vmem:[#allocation183_spill] sm:$0xff]  ;;  %16096 = vst [vmem:[#allocation339_spill] sm:$0xff] %v12686_v60  ;;  %v16097_v24 = vld [vmem:[#allocation404_spill] sm:$0xff] }
 0x686   : > { %v12678_v14 = vmul.f32 %v12379_v56, %v16093_v62  ;;  %v12684_v34 = vadd.f32 %v16095_v13, %v3325_v29  ;;  %v3333_v47 = vadd.f32 %v3301_v38, %v12412_v8  ;;  %v3311_v28 = vmul.f32 %v12070_v50, %v16097_v24  ;;  %v16098_v43 = vld [vmem:[#allocation26_spill] sm:$0xff]  ;;  %v16099_v62 = vld [vmem:[#allocation185_spill] sm:$0xff]  ;;  %v16100_v55 = vld [vmem:[#allocation203_spill] sm:$0xff] }
 0x687   : > { %v12693_v6 = vrot.slane %v11931_v58, %v16098_v43  ;;  %v12696_v18 = vadd.f32 %v16099_v62, %v3327_v11  ;;  %5731 = vperm.xlu0 %7226, %v16100_v55   ;;  %v16101_v48 = vld [vmem:[#allocation391_spill] sm:$0xff]  ;;  %v3335_v33 = vadd.f32 %v3303_v40, %v12428_v9  ;;  %v3337_v8 = vadd.f32 %v3305_v7, %v12431_v3  ;;  %v16102_v38 = vld [vmem:[#allocation406_spill] sm:$0xff]  ;;  %v12707_v24 = vpop.permute.xlu0 %5339  ;;  %v16104_v60 = vld [vmem:[#allocation393_spill] sm:$0xff] }
 0x688   : > { %v12701_v29 = vmul.f32 %v12379_v56, %v16101_v48  ;;  %v3313_v13 = vmul.f32 %v12070_v50, %v16102_v38  ;;  %16103 = vst [vmem:[#allocation341_spill] sm:$0xff] %v12707_v24  ;;  %v12711_v35 = vmul.f32 %v12379_v56, %v16104_v60  ;;  %v3339_v11 = vadd.f32 %v3307_v19, %v12443_v25  ;;  %v16105_v62 = vld [vmem:[#allocation408_spill] sm:$0xff]  ;;  %v16106_v48 = vld [vmem:[#allocation187_spill] sm:$0xff]  ;;  %v16107_v3 = vld [vmem:[#allocation410_spill] sm:$0xff]  ;;  %v12728_v25 = vpop.permute.xlu1 %5039 }
 0x689   : > { %v3315_v55 = vmul.f32 %v12070_v50, %v16105_v62  ;;  %v12717_v0 = vadd.f32 %v16106_v48, %v3329_v46  ;;  %5415 = vperm.xlu1 %7223, %v12419_v61   ;;  %v3341_v9 = vadd.f32 %v3309_v41, %v12453_v51  ;;  %v3317_v40 = vmul.f32 %v12070_v50, %v16107_v3  ;;  %v16108_v7 = vld [vmem:[#allocation412_spill] sm:$0xff]  ;;  %v16109_v38 = vld [vmem:[#allocation113_spill] sm:$0xff]  ;;  %v16112_v19 = vld [vmem:[#allocation395_spill] sm:$0xff] }
 0x68a   : > { %v3483_v24 = vmul.f32 %v16109_v38, %v16108_v7  ;;  %v16110_v60 = vld [vmem:[#allocation189_spill] sm:$0xff]  ;;  %16111 = vst [vmem:[#allocation343_spill] sm:$0xff] %v12728_v25  ;;  %v12732_v62 = vmul.f32 %v12379_v56, %v16112_v19  ;;  %v3343_v51 = vadd.f32 %v3311_v28, %v12464_v32  ;;  %v16115_v41 = vld [vmem:[#allocation224_spill] sm:$0xff]  ;;  %v16116_v48 = vld [vmem:[#allocation79_spill] sm:$0xff]  ;;  %v3345_v7 = vadd.f32 %v3313_v13, %v12485_v20 }
 0x68b   : > { %v12726_v43 = vadd.f32 %v16110_v60, %v3331_v53  ;;  %v16114_v46 = vld [vmem:[#allocation397_spill] sm:$0xff]  ;;  %v12740_v50 = vadd.f32 %v16115_v41, %v3333_v47  ;;  %5739 = vperm.xlu0 %7226, %v16116_v48   ;;  %v16117_v3 = vld [vmem:[#allocation399_spill] sm:$0xff]  ;;  %v16119_v60 = vld [vmem:[#allocation226_spill] sm:$0xff]  ;;  %v3347_v28 = vadd.f32 %v3315_v55, %v12497_v54 }
 0x68c   : > { %16113 = vst [vmem:[#allocation345_spill] sm:$0xff] %v12732_v62  ;;  %v12736_v61 = vmul.f32 %v12379_v56, %v16114_v46  ;;  %v12745_v53 = vmul.f32 %v12379_v56, %v16117_v3  ;;  %v12749_v19 = vadd.f32 %v16119_v60, %v3335_v33  ;;  %v16120_v25 = vld [vmem:[#allocation228_spill] sm:$0xff]  ;;  %v12754_v46 = vpop.permute.xlu0 %5347  ;;  %v16122_v32 = vld [vmem:[#allocation401_spill] sm:$0xff]  ;;  %v16123_v41 = vld [vmem:[#allocation191_spill] sm:$0xff]  ;;  %v3515_v13 = vadd.f32 %v3483_v24, %v12520_v17 }
 0x68d   : > { %v12752_v62 = vadd.f32 %v16120_v25, %v3337_v8  ;;  %16121 = vst [vmem:[#allocation349_spill] sm:$0xff] %v12754_v46  ;;  %v12758_v47 = vmul.f32 %v12379_v56, %v16122_v32  ;;  %v3486_v48 = vmul.f32 %v16109_v38, %v16123_v41  ;;  %v16124_v3 = vld [vmem:[#allocation230_spill] sm:$0xff]  ;;  %5423 = vperm.xlu1 %7223, %v12471_v52   ;;  %v16125_v20 = vld [vmem:[#allocation403_spill] sm:$0xff]  ;;  %v16126_v25 = vld [vmem:[#allocation233_spill] sm:$0xff]  ;;  %v12787_v46 = vpop.permute.xlu1 %5115 }
 0x68e   : > { %16118 = vst [vmem:[#allocation347_spill] sm:$0xff] %v12745_v53  ;;  %v12764_v53 = vadd.f32 %v16124_v3, %v3339_v11  ;;  %v12769_v33 = vmul.f32 %v12379_v56, %v16125_v20  ;;  %v3349_v8 = vadd.f32 %v3317_v40, %v12507_v21  ;;  %v12774_v60 = vadd.f32 %v16126_v25, %v3341_v9  ;;  %v16127_v54 = vld [vmem:[#allocation405_spill] sm:$0xff]  ;;  %v16129_v32 = vld [vmem:[#allocation94_spill] sm:$0xff]  ;;  %v16131_v3 = vld [vmem:[#allocation235_spill] sm:$0xff] }
 0x68f   : > { %v12778_v55 = vmul.f32 %v12379_v56, %v16127_v54  ;;  %v3484_v11 = vmul.f32 %v16109_v38, %v16129_v32  ;;  %v16130_v41 = vld [vmem:[#allocation29_spill] sm:$0xff]  ;;  %v12785_v20 = vadd.f32 %v16131_v3, %v3343_v51  ;;  %16132 = vst [vmem:[#allocation351_spill] sm:$0xff] %v12787_v46  ;;  %v16134_v17 = vld [vmem:[#allocation407_spill] sm:$0xff]  ;;  %v16138_v25 = vld [vmem:[#allocation98_spill] sm:$0xff] }
 0x690   : > { %v3488_v52 = vmul.f32 %v16109_v38, %v16130_v41  ;;  %v12792_v21 = vld [vmem:[%s14737_s11 + $0x58] sm:$0xff]  ;;  %v12797_v24 = vmul.f32 %v12379_v56, %v16134_v17  ;;  %v3490_v51 = vmul.f32 %v16109_v38, %v16138_v25  ;;  %v16139_v54 = vld [vmem:[#allocation236_spill] sm:$0xff]  ;;  %v12808_v41 = vpop.permute.xlu0 %5355  ;;  %v16141_v3 = vld [vmem:[#allocation411_spill] sm:$0xff] }
 0x691   : > { %16128 = vst [vmem:[#allocation338_spill] sm:$0xff] %v12778_v55  ;;  %16133 = vst [vmem:[#allocation340_spill] sm:$0xff] %v12792_v21  ;;  %5747 = vperm.xlu0 %7226, %v12792_v21   ;;  %v16136_v9 = vld [vmem:[#allocation409_spill] sm:$0xff]  ;;  %v12806_v32 = vadd.f32 %v16139_v54, %v3345_v7  ;;  %v12812_v46 = vmul.f32 %v12379_v56, %v16141_v3  ;;  %v3518_v21 = vadd.f32 %v3486_v48, %v12545_v37  ;;  %v16142_v17 = vld [vmem:[#allocation31_spill] sm:$0xff] }
 0x692   : > { %16135 = vst [vmem:[#allocation353_spill] sm:$0xff] %v12797_v24  ;;  %v12801_v40 = vmul.f32 %v12379_v56, %v16136_v9  ;;  %16140 = vst [vmem:[#allocation356_spill] sm:$0xff] %v12808_v41  ;;  %v3492_v24 = vmul.f32 %v16109_v38, %v16142_v17  ;;  %v16143_v55 = vld [vmem:[#allocation239_spill] sm:$0xff]  ;;  %5431 = vperm.xlu1 %7223, %v12527_v15   ;;  %v16144_v25 = vld [vmem:[#allocation413_spill] sm:$0xff]  ;;  %v12831_v37 = vadd.f32 %v12385_v57, %v3515_v13 }
 0x693   : > { %v12818_v9 = vadd.f32 %v16143_v55, %v3347_v28  ;;  %v12823_v7 = vmul.f32 %v12379_v56, %v16144_v25  ;;  %v16146_v54 = vld [vmem:[#allocation33_spill] sm:$0xff]  ;;  %v12834_v48 = vadd.f32 %v3484_v11, %v12655_v2  ;;  %v16148_v28 = vld [vmem:[#allocation63_spill] sm:$0xff]  ;;  %v3520_v15 = vadd.f32 %v3488_v52, %v12555_v44  ;;  %v16153_v57 = vld [vmem:[#allocation96_spill] sm:$0xff] }
 0x694   : > { %16137 = vst [vmem:[#allocation342_spill] sm:$0xff] %v12801_v40  ;;  %v3494_v41 = vmul.f32 %v16109_v38, %v16146_v54  ;;  %v16147_v40 = vld [vmem:[#allocation240_spill] sm:$0xff]  ;;  %v12838_v55 = vmul.f32 %v12379_v56, %v16148_v28  ;;  %v16150_v17 = vld [vmem:[#allocation193_spill] sm:$0xff]  ;;  %v12853_v2 = vmul.f32 %v12379_v56, %v16153_v57  ;;  %v3522_v13 = vadd.f32 %v3490_v51, %v12576_v1  ;;  %v16155_v11 = vld [vmem:[#allocation35_spill] sm:$0xff]  ;;  %v12860_v54 = vpop.permute.xlu0 %5363 }
 0x695   : > { %16145 = vst [vmem:[#allocation344_spill] sm:$0xff] %v12823_v7  ;;  %v12828_v3 = vadd.f32 %v16147_v40, %v3349_v8  ;;  %v3496_v25 = vmul.f32 %v16109_v38, %v16150_v17  ;;  %v12843_v7 = vpop.permute.xlu1 %5123  ;;  %v12848_v8 = vld [vmem:[%s14737_s11 + $0x68] sm:$0xff]  ;;  %v3498_v44 = vmul.f32 %v16109_v38, %v16155_v11  ;;  %v16156_v52 = vld [vmem:[#allocation37_spill] sm:$0xff]  ;;  %16157 = vst [vmem:[#allocation350_spill] sm:$0xff] %v12860_v54  ;;  %v16161_v1 = vmov 14  }
 0x696   : > { %16149 = vst [vmem:[#allocation346_spill] sm:$0xff] %v12838_v55  ;;  %16151 = vst [vmem:[#allocation360_spill] sm:$0xff] %v12843_v7  ;;  %5755 = vperm.xlu0 %7226, %v12848_v8   ;;  %v3500_v40 = vmul.f32 %v16109_v38, %v16156_v52  ;;  %v3524_v28 = vadd.f32 %v3492_v24, %v12584_v5  ;;  %v16158_v17 = vld [vmem:[#allocation39_spill] sm:$0xff]  ;;  %7224 = vset.pattern.permute.xlu1 %v16161_v1  ;;  %v16162_v51 = vld [vmem:[#allocation61_spill] sm:$0xff] }
 0x697   : > { %16152 = vst [vmem:[#allocation348_spill] sm:$0xff] %v12848_v8  ;;  %16154 = vst [vmem:[#allocation362_spill] sm:$0xff] %v12853_v2  ;;  %v3502_v7 = vmul.f32 %v16109_v38, %v16158_v17  ;;  %v16159_v8 = vld [vmem:[#allocation66_spill] sm:$0xff]  ;;  %v16160_v57 = vld [vmem:[#allocation279_spill] sm:$0xff]  ;;  %v12873_v11 = vmul.f32 %v12379_v56, %v16162_v51  ;;  %v3526_v52 = vadd.f32 %v3494_v41, %v12594_v12 }
 0x698   : > { %v3504_v55 = vmul.f32 %v16109_v38, %v16159_v8  ;;  %v12868_v2 = vadd.f32 %v16160_v57, %v3518_v21  ;;  %v16164_v54 = vld [vmem:[#allocation100_spill] sm:$0xff]  ;;  %v16165_v24 = vld [vmem:[#allocation165_spill] sm:$0xff]  ;;  %v7381_v8 = vld [vmem:[%s14737_s11] sm:$0xff]  ;;  %v3528_v21 = vadd.f32 %v3496_v25, %v12602_v31  ;;  %v12889_v12 = vadd.f32 %v12406_v39, %v3520_v15  ;;  %v12906_v39 = vpop.permute.xlu0 %5371 }
 0x699   : > { %16163 = vst [vmem:[#allocation358_spill] sm:$0xff] %v12873_v11  ;;  %v3506_v5 = vmul.f32 %v16109_v38, %v16164_v54  ;;  %v3508_v17 = vmul.f32 %v16109_v38, %v16165_v24  ;;  %5507 = vperm.xlu1 %7224, %v7381_v8   ;;  %v16166_v57 = vld [vmem:[#allocation43_spill] sm:$0xff]  ;;  %v12891_v41 = vpop.permute.xlu1 %5127  ;;  %v12896_v54 = vld [vmem:[%s14737_s11 + $0x78] sm:$0xff]  ;;  %v3530_v31 = vadd.f32 %v3498_v44, %v12611_v4  ;;  %v16171_v24 = vld [vmem:[#allocation168_spill] sm:$0xff] }
 0x69a   : > { %v3510_v1 = vmul.f32 %v16109_v38, %v16166_v57  ;;  %v16167_v51 = vld [vmem:[#allocation195_spill] sm:$0xff]  ;;  %16168 = vst [vmem:[#allocation352_spill] sm:$0xff] %v12889_v12  ;;  %16169 = vst [vmem:[#allocation354_spill] sm:$0xff] %v12891_v41  ;;  %5763 = vperm.xlu0 %7226, %v12896_v54   ;;  %v3532_v25 = vadd.f32 %v3500_v40, %v12618_v26  ;;  %v3678_v8 = vmul.f32 %v12220_v42, %v16171_v24  ;;  %v16174_v41 = vld [vmem:[#allocation104_spill] sm:$0xff] }
 0x69b   : > { %v3512_v11 = vmul.f32 %v16109_v38, %v16167_v51  ;;  %16170 = vst [vmem:[#allocation364_spill] sm:$0xff] %v12896_v54  ;;  %v16172_v38 = vld [vmem:[#allocation281_spill] sm:$0xff]  ;;  %16173 = vst [vmem:[#allocation355_spill] sm:$0xff] %v12906_v39  ;;  %v3534_v15 = vadd.f32 %v3502_v7, %v12621_v45  ;;  %v3536_v51 = vadd.f32 %v3504_v55, %v12630_v59  ;;  %v16175_v44 = vld [vmem:[#allocation106_spill] sm:$0xff] }
 0x69c   : > { %v12904_v57 = vadd.f32 %v16172_v38, %v3522_v13  ;;  %v3681_v12 = vmul.f32 %v12220_v42, %v16174_v41  ;;  %v12913_v54 = vadd.f32 %v12437_v10, %v3524_v28  ;;  %v3538_v4 = vadd.f32 %v3506_v5, %v12637_v49  ;;  %v12925_v45 = vld [vmem:[%s14737_s11 + $0x10] sm:$0xff]  ;;  %v16178_v7 = vld [vmem:[#allocation325_spill] sm:$0xff]  ;;  %v16184_v24 = vld [vmem:[#allocation234_spill] sm:$0xff] }
 0x69d   : > { %v3540_v26 = vadd.f32 %v3508_v17, %v12640_v63  ;;  %v3683_v13 = vmul.f32 %v12220_v42, %v16175_v44  ;;  %v12920_v40 = vadd.f32 %v12447_v36, %v3526_v52  ;;  %16176 = vst [vmem:[#allocation366_spill] sm:$0xff] %v12925_v45  ;;  %5515 = vperm.xlu1 %7224, %v12925_v45   ;;  %v16177_v49 = vld [vmem:[#allocation172_spill] sm:$0xff]  ;;  %v12935_v28 = vpop.permute.xlu1 %5135  ;;  %v12940_v36 = vld [vmem:[%s14737_s11 + $0x88] sm:$0xff]  ;;  %v16182_v17 = vld [vmem:[#allocation290_spill] sm:$0xff] }
 0x69e   : > { %v3542_v10 = vadd.f32 %v3510_v1, %v12648_v30  ;;  %v3544_v59 = vadd.f32 %v3512_v11, %v12651_v27  ;;  %v3685_v63 = vmul.f32 %v12220_v42, %v16177_v49  ;;  %v12933_v55 = vadd.f32 %v16178_v7, %v3528_v21  ;;  %16179 = vst [vmem:[#allocation357_spill] sm:$0xff] %v12935_v28  ;;  %v16180_v30 = vld [vmem:[#allocation229_spill] sm:$0xff]  ;;  %v16181_v11 = vld [vmem:[#allocation287_spill] sm:$0xff]  ;;  %v12952_v1 = vpop.permute.xlu0 %5379 }
 0x69f   : > { %5771 = vperm.xlu0 %7226, %v12940_v36   ;;  %v3710_v52 = vadd.f32 %v3678_v8, %v12662_v23  ;;  %v3680_v27 = vmul.f32 %v12220_v42, %v16180_v30  ;;  %v12947_v5 = vadd.f32 %v16181_v11, %v3530_v31  ;;  %v12950_v21 = vadd.f32 %v16182_v17, %v3532_v25  ;;  %v16185_v44 = vld [vmem:[#allocation331_spill] sm:$0xff]  ;;  %v16186_v23 = vld [vmem:[#allocation292_spill] sm:$0xff]  ;;  %v16187_v31 = vld [vmem:[#allocation174_spill] sm:$0xff] }
 0x6a0   : > { %16183 = vst [vmem:[#allocation367_spill] sm:$0xff] %v12952_v1  ;;  %v3713_v41 = vadd.f32 %v3681_v12, %v12670_v16  ;;  %v3687_v38 = vmul.f32 %v12220_v42, %v16184_v24  ;;  %v12958_v49 = vadd.f32 %v16185_v44, %v3534_v15  ;;  %v12961_v8 = vadd.f32 %v16186_v23, %v3536_v51  ;;  %v16188_v25 = vld [vmem:[#allocation293_spill] sm:$0xff]  ;;  %v16189_v17 = vld [vmem:[#allocation299_spill] sm:$0xff]  ;;  %v16190_v15 = vld [vmem:[#allocation202_spill] sm:$0xff] }
 0x6a1   : > { %v3715_v7 = vadd.f32 %v3683_v13, %v12673_v22  ;;  %v3689_v30 = vmul.f32 %v12220_v42, %v16187_v31  ;;  %v12967_v11 = vadd.f32 %v16188_v25, %v3538_v4  ;;  %v12970_v1 = vadd.f32 %v16189_v17, %v3540_v26  ;;  %v7385_v16 = vld [vmem:[%s14737_s11 + $0x18] sm:$0xff]  ;;  %v16191_v22 = vld [vmem:[#allocation323_spill] sm:$0xff]  ;;  %v12984_v4 = vpop.permute.xlu1 %5143 }
 0x6a2   : > { %5519 = vperm.xlu1 %7224, %v7385_v16   ;;  %v3717_v12 = vadd.f32 %v3685_v63, %v12684_v34  ;;  %v3691_v51 = vmul.f32 %v12220_v42, %v16190_v15  ;;  %v12979_v13 = vadd.f32 %v16191_v22, %v3542_v10  ;;  %v16192_v24 = vld [vmem:[#allocation333_spill] sm:$0xff]  ;;  %16193 = vst [vmem:[#allocation359_spill] sm:$0xff] %v12984_v4  ;;  %v16194_v63 = vld [vmem:[#allocation76_spill] sm:$0xff]  ;;  %v16195_v10 = vld [vmem:[#allocation78_spill] sm:$0xff]  ;;  %v13002_v25 = vpop.permute.xlu0 %5387 }
 0x6a3   : > { %v12982_v44 = vadd.f32 %v16192_v24, %v3544_v59  ;;  %v12989_v26 = vld [vmem:[%s14737_s11 + $0x98] sm:$0xff]  ;;  %v12993_v34 = vadd.f32 %v3680_v27, %v12834_v48  ;;  %v3693_v23 = vmul.f32 %v12220_v42, %v16194_v63  ;;  %v3695_v31 = vmul.f32 %v12220_v42, %v16195_v10  ;;  %16196 = vst [vmem:[#allocation368_spill] sm:$0xff] %v13002_v25  ;;  %v16197_v16 = vld [vmem:[#allocation300_spill] sm:$0xff]  ;;  %v16198_v22 = vld [vmem:[#allocation291_spill] sm:$0xff] }
 0x6a4   : > { %5779 = vperm.xlu0 %7226, %v12989_v26   ;;  %v13000_v59 = vadd.f32 %v12678_v14, %v3710_v52  ;;  %v3719_v17 = vadd.f32 %v3687_v38, %v12696_v18  ;;  %v3697_v15 = vmul.f32 %v12220_v42, %v16197_v16  ;;  %v13009_v48 = vrot.slane %v11931_v58, %v16198_v22  ;;  %v16199_v24 = vld [vmem:[#allocation232_spill] sm:$0xff]  ;;  %v7387_v58 = vld [vmem:[%s14737_s11 + $0x28] sm:$0xff]  ;;  %v16201_v38 = vld [vmem:[#allocation74_spill] sm:$0xff] }
 0x6a5   : > { %v13012_v27 = vadd.f32 %v12701_v29, %v3713_v41  ;;  %v13016_v63 = vmul.f32 %v12693_v6, %v16199_v24  ;;  %v3721_v14 = vadd.f32 %v3689_v30, %v12717_v0  ;;  %v16200_v52 = vld [vmem:[#allocation320_spill] sm:$0xff]  ;;  %v13022_v18 = vadd.f32 %v12711_v35, %v3715_v7  ;;  %v16202_v16 = vld [vmem:[#allocation115_spill] sm:$0xff]  ;;  %v16203_v30 = vld [vmem:[#allocation345_spill] sm:$0xff] }
 0x6a6   : > { %v3699_v10 = vmul.f32 %v12220_v42, %v16200_v52  ;;  %5527 = vperm.xlu1 %7224, %v7387_v58   ;;  %v13029_v29 = vmul.f32 %v12693_v6, %v16201_v38  ;;  %v3723_v41 = vadd.f32 %v3691_v51, %v12726_v43  ;;  %v3701_v0 = vmul.f32 %v12220_v42, %v16202_v16  ;;  %v13037_v52 = vpop.permute.xlu1 %5151  ;;  %v13042_v35 = vld [vmem:[%s14737_s11 + $0xa8] sm:$0xff]  ;;  %v16206_v38 = vld [vmem:[#allocation180_spill] sm:$0xff]  ;;  %v13053_v16 = vpop.permute.xlu0 %5395  ;;  %v16223_v28 = vld [vmem:[#allocation353_spill] sm:$0xff] }
 0x6a7   : > { %v13035_v24 = vadd.f32 %v16203_v30, %v3717_v12  ;;  %16204 = vst [vmem:[#allocation361_spill] sm:$0xff] %v13037_v52  ;;  %v16205_v7 = vld [vmem:[#allocation295_spill] sm:$0xff]  ;;  %v3725_v43 = vadd.f32 %v3693_v23, %v12740_v50  ;;  %v3727_v51 = vadd.f32 %v3695_v31, %v12749_v19  ;;  %v3703_v12 = vmul.f32 %v12220_v42, %v16206_v38  ;;  %v16208_v30 = vld [vmem:[#allocation316_spill] sm:$0xff]  ;;  %v16210_v50 = vld [vmem:[#allocation109_spill] sm:$0xff] }
 0x6a8   : > { %5787 = vperm.xlu0 %7226, %v13042_v35   ;;  %v13047_v58 = vmul.f32 %v12693_v6, %v16205_v7  ;;  %16207 = vst [vmem:[#allocation369_spill] sm:$0xff] %v13053_v16  ;;  %v13057_v25 = vmul.f32 %v12693_v6, %v16208_v30  ;;  %v3729_v39 = vadd.f32 %v3697_v15, %v12752_v62  ;;  %v16209_v52 = vld [vmem:[#allocation208_spill] sm:$0xff]  ;;  %v16212_v16 = vld [vmem:[#allocation347_spill] sm:$0xff]  ;;  %v7389_v62 = vld [vmem:[%s14737_s11 + $0x38] sm:$0xff] }
 0x6a9   : > { %v3705_v4 = vmul.f32 %v12220_v42, %v16209_v52  ;;  %v13063_v7 = vadd.f32 %v12736_v61, %v3719_v17  ;;  %v13067_v19 = vmul.f32 %v12693_v6, %v16210_v50  ;;  %v3731_v23 = vadd.f32 %v3699_v10, %v12764_v53  ;;  %v16211_v31 = vld [vmem:[#allocation120_spill] sm:$0xff]  ;;  %v16214_v52 = vld [vmem:[#allocation123_spill] sm:$0xff] }
 0x6aa   : > { %v3707_v38 = vmul.f32 %v12220_v42, %v16211_v31  ;;  %v13073_v30 = vadd.f32 %v16212_v16, %v3721_v14  ;;  %5535 = vperm.xlu1 %7224, %v7389_v62   ;;  %v16213_v15 = vld [vmem:[#allocation176_spill] sm:$0xff]  ;;  %v3733_v17 = vadd.f32 %v3701_v0, %v12774_v60  ;;  %v3709_v53 = vmul.f32 %v12220_v42, %v16214_v52  ;;  %v13088_v50 = vpop.permute.xlu1 %5159  ;;  %v13093_v14 = vld [vmem:[%s14737_s11 + $0xb8] sm:$0xff]  ;;  %v13107_v0 = vpop.permute.xlu0 %5403  ;;  %v16221_v62 = vld [vmem:[#allocation114_spill] sm:$0xff] }
 0x6ab   : > { %v13080_v61 = vmul.f32 %v12693_v6, %v16213_v15  ;;  %v13086_v10 = vadd.f32 %v12758_v47, %v3723_v41  ;;  %16215 = vst [vmem:[#allocation370_spill] sm:$0xff] %v13088_v50  ;;  %16216 = vst [vmem:[#allocation371_spill] sm:$0xff] %v13093_v14  ;;  %v16217_v16 = vld [vmem:[#allocation204_spill] sm:$0xff]  ;;  %v3735_v60 = vadd.f32 %v3703_v12, %v12785_v20  ;;  %v16218_v47 = vld [vmem:[#allocation338_spill] sm:$0xff] }
 0x6ac   : > { %5795 = vperm.xlu0 %7226, %v13093_v14   ;;  %v13098_v31 = vmul.f32 %v12693_v6, %v16217_v16  ;;  %v13102_v42 = vadd.f32 %v12769_v33, %v3725_v43  ;;  %v13105_v41 = vadd.f32 %v16218_v47, %v3727_v51  ;;  %16220 = vst [vmem:[#allocation372_spill] sm:$0xff] %v13107_v0  ;;  %v16222_v50 = vld [vmem:[#allocation184_spill] sm:$0xff]  ;;  %v16225_v20 = vld [vmem:[#allocation117_spill] sm:$0xff]  ;;  %v16226_v43 = vld [vmem:[#allocation302_spill] sm:$0xff] }
 0x6ad   : > { %v13111_v15 = vmul.f32 %v12693_v6, %v16221_v62  ;;  %v3737_v52 = vadd.f32 %v3705_v4, %v12806_v32  ;;  %v3875_v16 = vmul.f32 %v12379_v56, %v16222_v50  ;;  %v13117_v22 = vadd.f32 %v16223_v28, %v3729_v39  ;;  %v16227_v47 = vld [vmem:[#allocation342_spill] sm:$0xff]  ;;  %v7391_v32 = vld [vmem:[%s14737_s11 + $0x48] sm:$0xff]  ;;  %v16230_v50 = vld [vmem:[#allocation308_spill] sm:$0xff] }
 0x6ae   : > { %16219 = vst [vmem:[#allocation363_spill] sm:$0xff] %v13105_v41  ;;  %v13121_v33 = vmul.f32 %v12693_v6, %v16225_v20  ;;  %v13125_v51 = vmul.f32 %v12693_v6, %v16226_v43  ;;  %v3739_v12 = vadd.f32 %v3707_v38, %v12818_v9  ;;  %v13129_v62 = vadd.f32 %v16227_v47, %v3731_v23  ;;  %v16229_v39 = vld [vmem:[#allocation322_spill] sm:$0xff]  ;;  %v13144_v9 = vpop.permute.xlu1 %5167  ;;  %v13149_v23 = vld [vmem:[%s14737_s11 + $0xc8] sm:$0xff] }
 0x6af   : > { %16224 = vst [vmem:[#allocation365_spill] sm:$0xff] %v13117_v22  ;;  %5543 = vperm.xlu1 %7224, %v7391_v32   ;;  %v13136_v28 = vmul.f32 %v12693_v6, %v16229_v39  ;;  %v3741_v4 = vadd.f32 %v3709_v53, %v12828_v3  ;;  %v3878_v20 = vmul.f32 %v12379_v56, %v16230_v50  ;;  %16232 = vst [vmem:[#allocation375_spill] sm:$0xff] %v13144_v9  ;;  %v16234_v38 = vld [vmem:[#allocation118_spill] sm:$0xff]  ;;  %v13163_v50 = vpop.permute.xlu0 %5411 }
 0x6b0   : > { %16228 = vst [vmem:[#allocation373_spill] sm:$0xff] %v13129_v62  ;;  %v13142_v43 = vadd.f32 %v12812_v46, %v3733_v17  ;;  %16233 = vst [vmem:[#allocation376_spill] sm:$0xff] %v13149_v23  ;;  %5803 = vperm.xlu0 %7226, %v13149_v23   ;;  %v13154_v47 = vmul.f32 %v12693_v6, %v16234_v38  ;;  %v16235_v3 = vld [vmem:[#allocation126_spill] sm:$0xff]  ;;  %v16237_v17 = vld [vmem:[#allocation344_spill] sm:$0xff]  ;;  %v3907_v45 = vadd.f32 %v3875_v16, %v12831_v37 }
 0x6b1   : > { %v3880_v53 = vmul.f32 %v12379_v56, %v16235_v3  ;;  %v16236_v32 = vld [vmem:[#allocation186_spill] sm:$0xff]  ;;  %v13161_v39 = vadd.f32 %v16237_v17, %v3735_v60  ;;  %16239 = vst [vmem:[#allocation119_spill] sm:$0xff] %v13163_v50  ;;  %v16241_v23 = vld [vmem:[#allocation328_spill] sm:$0xff]  ;;  %v3910_v16 = vadd.f32 %v3878_v20, %v12868_v2 }
 0x6b2   : > { %16231 = vst [vmem:[#allocation374_spill] sm:$0xff] %v13142_v43  ;;  %v3882_v46 = vmul.f32 %v12379_v56, %v16236_v32  ;;  %v16240_v0 = vld [vmem:[#allocation182_spill] sm:$0xff]  ;;  %v3884_v38 = vmul.f32 %v12379_v56, %v16241_v23  ;;  %v16245_v60 = vld [vmem:[#allocation212_spill] sm:$0xff] }
 0x6b3   : > { %16238 = vst [vmem:[#allocation379_spill] sm:$0xff] %v13161_v39  ;;  %v13167_v9 = vmul.f32 %v12693_v6, %v16240_v0  ;;  %v16242_v14 = vld [vmem:[#allocation346_spill] sm:$0xff]  ;;  %v3876_v17 = vmul.f32 %v12379_v56, %v16245_v60  ;;  %v16246_v50 = vld [vmem:[#allocation128_spill] sm:$0xff]  ;;  %v13195_v60 = vpop.permute.xlu1 %5175 }
 0x6b4   : > { %v13173_v43 = vadd.f32 %v16242_v14, %v3737_v52  ;;  %v16244_v3 = vld [vmem:[#allocation210_spill] sm:$0xff]  ;;  %v3886_v39 = vmul.f32 %v12379_v56, %v16246_v50  ;;  %v16249_v37 = vld [vmem:[#allocation340_spill] sm:$0xff]  ;;  %16254 = vst [vmem:[#allocation122_spill] sm:$0xff] %v13195_v60  ;;  %v3914_v20 = vadd.f32 %v3882_v46, %v12904_v57 }
 0x6b5   : > { %v13177_v32 = vmul.f32 %v12693_v6, %v16244_v3  ;;  %v16247_v0 = vld [vmem:[#allocation362_spill] sm:$0xff]  ;;  %5551 = vperm.xlu1 %7224, %v16249_v37   ;;  %v16256_v50 = vld [vmem:[#allocation352_spill] sm:$0xff] }
 0x6b6   : > { %16243 = vst [vmem:[#allocation95_spill] sm:$0xff] %v13173_v43  ;;  %v13184_v62 = vadd.f32 %v16247_v0, %v3739_v12  ;;  %v16250_v23 = vld [vmem:[#allocation214_spill] sm:$0xff]  ;;  %v13200_v12 = vld [vmem:[%s14737_s11 + $0xd8] sm:$0xff]  ;;  %v3912_v2 = vadd.f32 %v3880_v53, %v16256_v50  ;;  %v3916_v53 = vadd.f32 %v3884_v38, %v12913_v54  ;;  %v16262_v57 = vld [vmem:[#allocation188_spill] sm:$0xff]  ;;  %v13224_v50 = vadd.f32 %v13016_v63, %v3907_v45 }
 0x6b7   : > { %v3888_v14 = vmul.f32 %v12379_v56, %v16250_v23  ;;  %v16251_v52 = vld [vmem:[#allocation242_spill] sm:$0xff]  ;;  %16255 = vst [vmem:[#allocation222_spill] sm:$0xff] %v13200_v12  ;;  %5811 = vperm.xlu0 %7226, %v13200_v12   ;;  %v16258_v23 = vld [vmem:[#allocation88_spill] sm:$0xff]  ;;  %v3896_v46 = vmul.f32 %v12379_v56, %v16262_v57  ;;  %v16266_v57 = vld [vmem:[#allocation55_spill] sm:$0xff] }
 0x6b8   : > { %16248 = vst [vmem:[#allocation383_spill] sm:$0xff] %v13184_v62  ;;  %v3890_v3 = vmul.f32 %v12379_v56, %v16251_v52  ;;  %v16252_v43 = vld [vmem:[#allocation358_spill] sm:$0xff]  ;;  %v13214_v52 = vpop.permute.xlu0 %5419  ;;  %v13253_v63 = vadd.f32 %v13047_v58, %v3912_v2  ;;  %v16271_v2 = vld [vmem:[#allocation311_spill] sm:$0xff] }
 0x6b9   : > { %v13193_v22 = vadd.f32 %v16252_v43, %v3741_v4  ;;  %v16257_v0 = vld [vmem:[#allocation310_spill] sm:$0xff]  ;;  %v3894_v4 = vmul.f32 %v12379_v56, %v16258_v23  ;;  %v13212_v43 = vld [vmem:[%s15863_s10 + $0x8] sm:$0xff]  ;;  %16260 = vst [vmem:[#allocation99_spill] sm:$0xff] %v13214_v52  ;;  %v3918_v23 = vadd.f32 %v3886_v39, %v12920_v40  ;;  %v3920_v54 = vadd.f32 %v3888_v14, %v12933_v55  ;;  %v13242_v40 = vpop.permute.xlu1 %5183 }
 0x6ba   : > { %v3892_v37 = vmul.f32 %v12379_v56, %v16257_v0  ;;  %16259 = vst [vmem:[#allocation97_spill] sm:$0xff] %v13212_v43  ;;  %v16261_v60 = vld [vmem:[#allocation326_spill] sm:$0xff]  ;;  %v3908_v0 = vadd.f32 %v3876_v17, %v12993_v34  ;;  %v3922_v38 = vadd.f32 %v3890_v3, %v12947_v5  ;;  %v13237_v45 = vrot.slane %v13212_v43, %v16266_v57  ;;  %v16270_v3 = vld [vmem:[#allocation244_spill] sm:$0xff]  ;;  %v16279_v57 = vld [vmem:[#allocation129_spill] sm:$0xff] }
 0x6bb   : > { %16253 = vst [vmem:[#allocation385_spill] sm:$0xff] %v13193_v22  ;;  %v13218_v12 = vmul.f32 %v12693_v6, %v16261_v60  ;;  %v16263_v22 = vld [vmem:[#allocation330_spill] sm:$0xff]  ;;  %v16265_v60 = vld [vmem:[#allocation348_spill] sm:$0xff]  ;;  %v13240_v34 = vadd.f32 %v13029_v29, %v3910_v16  ;;  %16267 = vst [vmem:[#allocation387_spill] sm:$0xff] %v13242_v40  ;;  %v3926_v5 = vadd.f32 %v3894_v4, %v12958_v49 }
 0x6bc   : > { %v3898_v62 = vmul.f32 %v12379_v56, %v16263_v22  ;;  %v16264_v52 = vld [vmem:[#allocation90_spill] sm:$0xff]  ;;  %5559 = vperm.xlu1 %7224, %v16265_v60   ;;  %v13247_v22 = vld [vmem:[%s14737_s11 + $0xe8] sm:$0xff]  ;;  %v3924_v55 = vadd.f32 %v3892_v37, %v12950_v21  ;;  %v13256_v39 = vadd.f32 %v13057_v25, %v3914_v20  ;;  %v13258_v29 = vpop.permute.xlu0 %5427  ;;  %v3928_v17 = vadd.f32 %v3896_v46, %v12961_v8  ;;  %v16269_v16 = vld [vmem:[#allocation216_spill] sm:$0xff] }
 0x6bd   : > { %v3900_v41 = vmul.f32 %v12379_v56, %v16264_v52  ;;  %5819 = vperm.xlu0 %7226, %v13247_v22   ;;  %16268 = vst [vmem:[#allocation125_spill] sm:$0xff] %v13258_v29  ;;  %v3902_v14 = vmul.f32 %v12379_v56, %v16269_v16  ;;  %v3904_v52 = vmul.f32 %v12379_v56, %v16270_v3  ;;  %v16272_v8 = vld [vmem:[#allocation364_spill] sm:$0xff]  ;;  %v16274_v46 = vld [vmem:[#allocation218_spill] sm:$0xff]  ;;  %v16338_v40 = vld [vmem:[#allocation133_spill] sm:$0xff] }
 0x6be   : > { %v13266_v21 = vadd.f32 %v13067_v19, %v3916_v53  ;;  %v3930_v49 = vadd.f32 %v3898_v62, %v12967_v11  ;;  %v4070_v25 = vmul.f32 %v12693_v6, %v16271_v2  ;;  %v13273_v20 = vadd.f32 %v13080_v61, %v3918_v23  ;;  %v16273_v37 = vld [vmem:[#allocation332_spill] sm:$0xff]  ;;  %v13291_v61 = vld [vmem:[%s14737_s11 + $0xf8] sm:$0xff] }
 0x6bf   : > { %v3932_v58 = vadd.f32 %v3900_v41, %v12970_v1  ;;  %v4073_v4 = vmul.f32 %v12693_v6, %v16273_v37  ;;  %v4075_v56 = vmul.f32 %v12693_v6, %v16274_v46  ;;  %v13281_v19 = vadd.f32 %v13098_v31, %v3920_v54  ;;  %v13286_v1 = vpop.permute.xlu1 %5191  ;;  %v16276_v41 = vld [vmem:[#allocation312_spill] sm:$0xff] }
 0x6c0   : > { %5567 = vperm.xlu1 %7224, %v16272_v8   ;;  %v13284_v11 = vadd.f32 %v13111_v15, %v3922_v38  ;;  %16275 = vst [vmem:[#allocation103_spill] sm:$0xff] %v13286_v1  ;;  %v4077_v62 = vmul.f32 %v12693_v6, %v16276_v41  ;;  %v16277_v53 = vld [vmem:[#allocation192_spill] sm:$0xff]  ;;  %v13299_v31 = vadd.f32 %v13121_v33, %v3924_v55  ;;  %v13304_v60 = vpop.permute.xlu0 %5435  ;;  %v16280_v8 = vld [vmem:[#allocation190_spill] sm:$0xff] }
 0x6c1   : > { %5827 = vperm.xlu0 %7226, %v13291_v61   ;;  %v4079_v23 = vmul.f32 %v12693_v6, %v16277_v53  ;;  %v13302_v15 = vadd.f32 %v13125_v51, %v3926_v5  ;;  %16278 = vst [vmem:[#allocation105_spill] sm:$0xff] %v13304_v60  ;;  %v3934_v54 = vadd.f32 %v3902_v14, %v12979_v13  ;;  %v16288_v41 = vld [vmem:[#allocation336_spill] sm:$0xff] }
 0x6c2   : > { %v3936_v38 = vadd.f32 %v3904_v52, %v12982_v44  ;;  %v4072_v16 = vmul.f32 %v12693_v6, %v16279_v57  ;;  %v13311_v3 = vadd.f32 %v13136_v28, %v3928_v17  ;;  %v4102_v2 = vadd.f32 %v4070_v25, %v13000_v59  ;;  %v16281_v44 = vld [vmem:[#allocation51_spill] sm:$0xff]  ;;  %v16282_v17 = vld [vmem:[#allocation246_spill] sm:$0xff]  ;;  %v16284_v52 = vld [vmem:[#allocation92_spill] sm:$0xff] }
 0x6c3   : > { %v4266_v33 = vmul.f32 %v13009_v48, %v16280_v8  ;;  %v13317_v51 = vadd.f32 %v13154_v47, %v3930_v49  ;;  %v13320_v55 = vadd.f32 %v13167_v9, %v3932_v58  ;;  %v4105_v13 = vadd.f32 %v4073_v4, %v13012_v27  ;;  %v13329_v14 = vpop.permute.xlu1 %5199  ;;  %v16286_v25 = vld [vmem:[#allocation248_spill] sm:$0xff] }
 0x6c4   : > { %5575 = vperm.xlu1 %7224, %v12940_v36   ;;  %v4269_v5 = vmul.f32 %v13009_v48, %v16281_v44  ;;  %v4107_v28 = vadd.f32 %v4075_v56, %v13022_v18  ;;  %v4271_v59 = vmul.f32 %v13009_v48, %v16282_v17  ;;  %16283 = vst [vmem:[#allocation388_spill] sm:$0xff] %v13329_v14  ;;  %v16285_v36 = vld [vmem:[#allocation334_spill] sm:$0xff] }
 0x6c5   : > { %v4109_v47 = vadd.f32 %v4077_v62, %v13035_v24  ;;  %v4273_v9 = vmul.f32 %v13009_v48, %v16284_v52  ;;  %v4111_v49 = vadd.f32 %v4079_v23, %v13063_v7  ;;  %v4275_v27 = vmul.f32 %v13009_v48, %v16285_v36  ;;  %v13347_v24 = vpop.permute.xlu0 %5511  ;;  %v16287_v56 = vld [vmem:[#allocation54_spill] sm:$0xff]  ;;  %v16289_v62 = vld [vmem:[#allocation52_spill] sm:$0xff]  ;;  %v16290_v23 = vld [vmem:[#allocation315_spill] sm:$0xff] }
 0x6c6   : > { %v13337_v58 = vadd.f32 %v4072_v16, %v3908_v0  ;;  %v4081_v18 = vmul.f32 %v12693_v6, %v16286_v25  ;;  %v13342_v37 = vadd.f32 %v13177_v32, %v3934_v54  ;;  %v13345_v4 = vadd.f32 %v13218_v12, %v3936_v38  ;;  %v16291_v38 = vld [vmem:[#allocation252_spill] sm:$0xff]  ;;  %v16297_v36 = vld [vmem:[#allocation131_spill] sm:$0xff] }
 0x6c7   : > { %v13349_v46 = vadd.f32 %v4266_v33, %v4102_v2  ;;  %v4083_v7 = vmul.f32 %v12693_v6, %v16287_v56  ;;  %v4085_v0 = vmul.f32 %v12693_v6, %v16288_v41  ;;  %v13357_v53 = vrot.slane %v13212_v43, %v16289_v62  ;;  %v13368_v16 = vpop.permute.xlu1 %5207  ;;  %v16293_v33 = vld [vmem:[#allocation60_spill] sm:$0xff]  ;;  %v16299_v41 = vld [vmem:[#allocation250_spill] sm:$0xff] }
 0x6c8   : > { %5583 = vperm.xlu1 %7224, %v12989_v26   ;;  %v13360_v32 = vadd.f32 %v4269_v5, %v4105_v13  ;;  %v13362_v12 = vadd.f32 %v4271_v59, %v4107_v28  ;;  %v4087_v54 = vmul.f32 %v12693_v6, %v16290_v23  ;;  %v4089_v57 = vmul.f32 %v12693_v6, %v16291_v38  ;;  %v16294_v26 = vld [vmem:[#allocation27_spill] sm:$0xff]  ;;  %v16295_v28 = vld [vmem:[#allocation313_spill] sm:$0xff]  ;;  %v16296_v59 = vld [vmem:[#allocation30_spill] sm:$0xff] }
 0x6c9   : > { %16292 = vst [vmem:[#allocation127_spill] sm:$0xff] %v13368_v16  ;;  %v13370_v2 = vadd.f32 %v4273_v9, %v4109_v47  ;;  %v13372_v8 = vadd.f32 %v4275_v27, %v4111_v49  ;;  %v4091_v44 = vmul.f32 %v12693_v6, %v16293_v33  ;;  %v4093_v13 = vmul.f32 %v12693_v6, %v16294_v26  ;;  %v13385_v9 = vpop.permute.xlu0 %5523  ;;  %v16298_v27 = vld [vmem:[#allocation194_spill] sm:$0xff]  ;;  %v16301_v23 = vld [vmem:[#allocation57_spill] sm:$0xff] }
 0x6ca   : > { %v4113_v5 = vadd.f32 %v4081_v18, %v13073_v30  ;;  %v4277_v17 = vmul.f32 %v13009_v48, %v16295_v28  ;;  %v4095_v52 = vmul.f32 %v12693_v6, %v16296_v59  ;;  %v4267_v47 = vmul.f32 %v13009_v48, %v16297_v36  ;;  %v16300_v18 = vld [vmem:[#allocation363_spill] sm:$0xff]  ;;  %v16302_v33 = vld [vmem:[#allocation365_spill] sm:$0xff] }
 0x6cb   : > { %v4115_v49 = vadd.f32 %v4083_v7, %v13086_v10  ;;  %v4279_v25 = vmul.f32 %v13009_v48, %v16298_v27  ;;  %v4117_v56 = vadd.f32 %v4085_v0, %v13102_v42  ;;  %v4281_v30 = vmul.f32 %v13009_v48, %v16299_v41  ;;  %v16303_v28 = vld [vmem:[#allocation317_spill] sm:$0xff]  ;;  %v13400_v7 = vpop.permute.xlu1 %5215  ;;  %v16306_v42 = vld [vmem:[#allocation319_spill] sm:$0xff]  ;;  %v16307_v27 = vld [vmem:[#allocation374_spill] sm:$0xff] }
 0x6cc   : > { %5591 = vperm.xlu1 %7224, %v13042_v35   ;;  %v4119_v62 = vadd.f32 %v4087_v54, %v16300_v18  ;;  %v4283_v38 = vmul.f32 %v13009_v48, %v16301_v23  ;;  %v4121_v26 = vadd.f32 %v4089_v57, %v16302_v33  ;;  %v4285_v10 = vmul.f32 %v13009_v48, %v16303_v28  ;;  %v16305_v59 = vld [vmem:[#allocation373_spill] sm:$0xff]  ;;  %v16308_v35 = vld [vmem:[#allocation28_spill] sm:$0xff]  ;;  %v16309_v18 = vld [vmem:[#allocation379_spill] sm:$0xff] }
 0x6cd   : > { %16304 = vst [vmem:[#allocation145_spill] sm:$0xff] %v13400_v7  ;;  %v4123_v36 = vadd.f32 %v4091_v44, %v16305_v59  ;;  %v4287_v0 = vmul.f32 %v13009_v48, %v16306_v42  ;;  %v4125_v41 = vadd.f32 %v4093_v13, %v16307_v27  ;;  %v4289_v54 = vmul.f32 %v13009_v48, %v16308_v35  ;;  %v16310_v23 = vld [vmem:[#allocation130_spill] sm:$0xff]  ;;  %v13414_v7 = vpop.permute.xlu0 %5531  ;;  %v16312_v42 = vld [vmem:[#allocation32_spill] sm:$0xff] }
 0x6ce   : > { %v4127_v60 = vadd.f32 %v4095_v52, %v16309_v18  ;;  %v4291_v57 = vmul.f32 %v13009_v48, %v16310_v23  ;;  %v4299_v33 = vadd.f32 %v4267_v47, %v13224_v50  ;;  %v16311_v28 = vld [vmem:[#allocation42_spill] sm:$0xff]  ;;  %v13416_v44 = vadd.f32 %v4277_v17, %v4113_v5  ;;  %v16313_v52 = vld [vmem:[#allocation371_spill] sm:$0xff]  ;;  %v16315_v18 = vld [vmem:[#allocation36_spill] sm:$0xff] }
 0x6cf   : > { %v4463_v29 = vmul.f32 %v13237_v45, %v16311_v28  ;;  %v13418_v59 = vadd.f32 %v4279_v25, %v4115_v49  ;;  %v13420_v13 = vadd.f32 %v4281_v30, %v4117_v56  ;;  %v4097_v27 = vmul.f32 %v12693_v6, %v16312_v42  ;;  %v16316_v47 = vld [vmem:[#allocation155_spill] sm:$0xff]  ;;  %v16317_v28 = vld [vmem:[#allocation282_spill] sm:$0xff]  ;;  %v13435_v17 = vpop.permute.xlu1 %5223  ;;  %v16322_v30 = vld [vmem:[#allocation40_spill] sm:$0xff] }
 0x6d0   : > { %5599 = vperm.xlu1 %7224, %v16313_v52   ;;  %v13425_v35 = vadd.f32 %v4283_v38, %v4119_v62  ;;  %v4099_v50 = vmul.f32 %v12693_v6, %v16315_v18  ;;  %v4659_v23 = vmul.f32 %v13357_v53, %v16316_v47  ;;  %v13433_v5 = vrot.slane %v13212_v43, %v16317_v28  ;;  %v16324_v42 = vld [vmem:[#allocation34_spill] sm:$0xff]  ;;  %v16325_v47 = vld [vmem:[#allocation44_spill] sm:$0xff] }
 0x6d1   : > { %16318 = vst [vmem:[#allocation160_spill] sm:$0xff] %v13435_v17  ;;  %v13437_v49 = vadd.f32 %v4285_v10, %v4121_v26  ;;  %v13439_v25 = vadd.f32 %v4287_v0, %v4123_v36  ;;  %v13441_v56 = vadd.f32 %v4289_v54, %v4125_v41  ;;  %v4101_v62 = vmul.f32 %v12693_v6, %v16322_v30  ;;  %v13451_v16 = vpop.permute.xlu0 %5539  ;;  %v16326_v26 = vld [vmem:[#allocation95_spill] sm:$0xff]  ;;  %v16327_v36 = vld [vmem:[#allocation38_spill] sm:$0xff]  ;;  %v16329_v6 = vld [vmem:[#allocation64_spill] sm:$0xff] }
 0x6d2   : > { %16314 = vst [vmem:[#allocation381_spill] sm:$0xff] %v13425_v35  ;;  %v13445_v38 = vadd.f32 %v4291_v57, %v4127_v60  ;;  %v4293_v52 = vmul.f32 %v13009_v48, %v16324_v42  ;;  %v4495_v18 = vadd.f32 %v4463_v29, %v4299_v33  ;;  %v4270_v28 = vmul.f32 %v13009_v48, %v16325_v47  ;;  %v16328_v41 = vld [vmem:[#allocation46_spill] sm:$0xff]  ;;  %v16330_v57 = vld [vmem:[#allocation376_spill] sm:$0xff]  ;;  %v16331_v30 = vld [vmem:[#allocation383_spill] sm:$0xff] }
 0x6d3   : > { %16319 = vst [vmem:[#allocation162_spill] sm:$0xff] %v13437_v49  ;;  %16320 = vst [vmem:[#allocation390_spill] sm:$0xff] %v13439_v25  ;;  %v4129_v10 = vadd.f32 %v4097_v27, %v16326_v26  ;;  %v4295_v0 = vmul.f32 %v13009_v48, %v16327_v36  ;;  %v4272_v54 = vmul.f32 %v13009_v48, %v16328_v41  ;;  %v16332_v42 = vld [vmem:[#allocation154_spill] sm:$0xff]  ;;  %v13468_v26 = vpop.permute.xlu1 %5231  ;;  %v16335_v36 = vld [vmem:[#allocation385_spill] sm:$0xff] }
 0x6d4   : > { %16321 = vst [vmem:[#allocation164_spill] sm:$0xff] %v13441_v56  ;;  %16323 = vst [vmem:[#allocation238_spill] sm:$0xff] %v13445_v38  ;;  %v4274_v60 = vmul.f32 %v13009_v48, %v16329_v6  ;;  %5607 = vperm.xlu1 %7224, %v16330_v57   ;;  %v4131_v29 = vadd.f32 %v4099_v50, %v16331_v30  ;;  %v4691_v33 = vadd.f32 %v4659_v23, %v4495_v18  ;;  %v16333_v17 = vld [vmem:[#allocation58_spill] sm:$0xff]  ;;  %v16336_v41 = vld [vmem:[#allocation132_spill] sm:$0xff] }
 0x6d5   : > { %v4855_v47 = vmul.f32 %v13433_v5, %v16332_v42  ;;  %v13466_v27 = vrot.slane %v13212_v43, %v16333_v17  ;;  %16334 = vst [vmem:[#allocation392_spill] sm:$0xff] %v13468_v26  ;;  %v4133_v14 = vadd.f32 %v4101_v62, %v16335_v36  ;;  %v4297_v1 = vmul.f32 %v13009_v48, %v16336_v41  ;;  %v16337_v6 = vld [vmem:[#allocation62_spill] sm:$0xff]  ;;  %v16339_v18 = vld [vmem:[#allocation243_spill] sm:$0xff]  ;;  %v16340_v17 = vld [vmem:[#allocation324_spill] sm:$0xff]  ;;  %v13486_v36 = vpop.permute.xlu0 %5547 }
 0x6d6   : > { %v4268_v57 = vmul.f32 %v13009_v48, %v16337_v6  ;;  %v4276_v50 = vmul.f32 %v13009_v48, %v16338_v40  ;;  %v4302_v23 = vadd.f32 %v4270_v28, %v13240_v34  ;;  %v4466_v30 = vmul.f32 %v13237_v45, %v16339_v18  ;;  %v16341_v26 = vld [vmem:[#allocation285_spill] sm:$0xff]  ;;  %v16342_v6 = vld [vmem:[#allocation135_spill] sm:$0xff]  ;;  %v16343_v34 = vld [vmem:[#allocation48_spill] sm:$0xff] }
 0x6d7   : > { %v5051_v42 = vmul.f32 %v13466_v27, %v16340_v17  ;;  %v13484_v62 = vrot.slane %v13212_v43, %v16341_v26  ;;  %v4304_v41 = vadd.f32 %v4272_v54, %v13253_v63  ;;  %v4468_v38 = vmul.f32 %v13237_v45, %v16342_v6  ;;  %v16344_v18 = vld [vmem:[#allocation222_spill] sm:$0xff]  ;;  %v16347_v25 = vld [vmem:[#allocation265_spill] sm:$0xff]  ;;  %v13501_v35 = vpop.permute.xlu1 %5239 }
 0x6d8   : > { %v4306_v40 = vadd.f32 %v4274_v60, %v13256_v39  ;;  %v4470_v28 = vmul.f32 %v13237_v45, %v16343_v34  ;;  %5615 = vperm.xlu1 %7224, %v16344_v18   ;;  %v13495_v56 = vadd.f32 %v4293_v52, %v4129_v10  ;;  %v13497_v17 = vadd.f32 %v4295_v0, %v4131_v29  ;;  %v16350_v60 = vld [vmem:[#allocation245_spill] sm:$0xff]  ;;  %v16351_v0 = vld [vmem:[#allocation318_spill] sm:$0xff] }
 0x6d9   : > { %v4887_v26 = vadd.f32 %v4855_v47, %v4691_v33  ;;  %v4662_v49 = vmul.f32 %v13357_v53, %v16347_v25  ;;  %16348 = vst [vmem:[#allocation394_spill] sm:$0xff] %v13501_v35  ;;  %v13503_v63 = vadd.f32 %v4297_v1, %v4133_v14  ;;  %v13506_v54 = vadd.f32 %v4268_v57, %v13337_v58  ;;  %v16352_v33 = vld [vmem:[#allocation26_spill] sm:$0xff]  ;;  %v13517_v47 = vpop.permute.xlu0 %5555  ;;  %v16353_v58 = vld [vmem:[#allocation136_spill] sm:$0xff]  ;;  %v16356_v34 = vld [vmem:[#allocation157_spill] sm:$0xff] }
 0x6da   : > { %16345 = vst [vmem:[#allocation166_spill] sm:$0xff] %v13495_v56  ;;  %16346 = vst [vmem:[#allocation169_spill] sm:$0xff] %v13497_v17  ;;  %v4308_v39 = vadd.f32 %v4276_v50, %v13266_v21  ;;  %v4472_v6 = vmul.f32 %v13237_v45, %v16350_v60  ;;  %v4498_v52 = vadd.f32 %v4466_v30, %v4302_v23  ;;  %v16354_v21 = vld [vmem:[#allocation134_spill] sm:$0xff]  ;;  %v16367_v56 = vld [vmem:[#allocation140_spill] sm:$0xff] }
 0x6db   : > { %16349 = vst [vmem:[#allocation171_spill] sm:$0xff] %v13503_v63  ;;  %v5083_v10 = vadd.f32 %v5051_v42, %v4887_v26  ;;  %v5247_v29 = vmul.f32 %v13484_v62, %v16351_v0  ;;  %v13515_v25 = vrot.slane %v13212_v43, %v16352_v33  ;;  %v4500_v1 = vadd.f32 %v4468_v38, %v4304_v41  ;;  %v16355_v30 = vld [vmem:[#allocation270_spill] sm:$0xff]  ;;  %v16357_v26 = vld [vmem:[#allocation288_spill] sm:$0xff] }
 0x6dc   : > { %v4502_v14 = vadd.f32 %v4470_v28, %v4306_v40  ;;  %v4278_v57 = vmul.f32 %v13009_v48, %v16353_v58  ;;  %v4474_v50 = vmul.f32 %v13237_v45, %v16354_v21  ;;  %5623 = vperm.xlu1 %7224, %v13247_v22   ;;  %v4694_v23 = vadd.f32 %v4662_v49, %v4498_v52  ;;  %v16358_v41 = vld [vmem:[#allocation138_spill] sm:$0xff]  ;;  %v16359_v28 = vld [vmem:[#allocation137_spill] sm:$0xff]  ;;  %v16360_v33 = vld [vmem:[#allocation196_spill] sm:$0xff]  ;;  %v5316_v49 = vpop.permute.xlu1 %5315 }
 0x6dd   : > { %v4858_v42 = vmul.f32 %v13433_v5, %v16355_v30  ;;  %v4664_v18 = vmul.f32 %v13357_v53, %v16356_v34  ;;  %v13530_v60 = vrot.slane %v13212_v43, %v16357_v26  ;;  %v4504_v38 = vadd.f32 %v4472_v6, %v4308_v39  ;;  %v16361_v58 = vld [vmem:[#allocation101_spill] sm:$0xff]  ;;  %v13543_v39 = vpop.permute.xlu0 %5563  ;;  %v16364_v35 = vld [vmem:[#allocation378_spill] sm:$0xff] }
 0x6de   : > { %v4280_v40 = vmul.f32 %v13009_v48, %v16358_v41  ;;  %v4476_v0 = vmul.f32 %v13237_v45, %v16359_v28  ;;  %v4282_v22 = vmul.f32 %v13009_v48, %v16360_v33  ;;  %v5279_v52 = vadd.f32 %v5247_v29, %v5083_v10  ;;  %v16362_v26 = vld [vmem:[#allocation65_spill] sm:$0xff]  ;;  %v16363_v28 = vld [vmem:[#allocation247_spill] sm:$0xff] }
 0x6df   : > { %v5054_v21 = vmul.f32 %v13466_v27, %v16361_v58  ;;  %v5443_v30 = vmul.f32 %v13530_v60, %v5316_v49  ;;  %v5639_v34 = vmul.f32 %v13515_v25, %v13347_v24  ;;  %v4310_v6 = vadd.f32 %v4278_v57, %v13273_v20  ;;  %v16365_v58 = vld [vmem:[#allocation215_spill] sm:$0xff] }
 0x6e0   : > { %v4284_v41 = vmul.f32 %v13009_v48, %v16362_v26  ;;  %v4286_v33 = vmul.f32 %v13009_v48, %v16363_v28  ;;  %v4666_v10 = vmul.f32 %v13357_v53, %v16364_v35  ;;  %5631 = vperm.xlu1 %7224, %v13291_v61   ;;  %v4890_v29 = vadd.f32 %v4858_v42, %v4694_v23  ;;  %v16366_v57 = vld [vmem:[#allocation139_spill] sm:$0xff]  ;;  %v13561_v43 = vpop.permute.xlu1 %5319  ;;  %v16368_v61 = vld [vmem:[#allocation178_spill] sm:$0xff] }
 0x6e1   : > { %v4696_v49 = vadd.f32 %v4664_v18, %v4500_v1  ;;  %v4860_v24 = vmul.f32 %v13433_v5, %v16365_v58  ;;  %v5475_v63 = vadd.f32 %v5443_v30, %v5279_v52  ;;  %v4312_v17 = vadd.f32 %v4280_v40, %v13281_v19  ;;  %v16369_v23 = vld [vmem:[#allocation110_spill] sm:$0xff]  ;;  %v13569_v19 = vpop.permute.xlu0 %5571 }
 0x6e2   : > { %v4314_v20 = vadd.f32 %v4282_v22, %v13284_v11  ;;  %v4478_v26 = vmul.f32 %v13237_v45, %v16366_v57  ;;  %v4480_v28 = vmul.f32 %v13237_v45, %v16367_v56  ;;  %v5086_v35 = vadd.f32 %v5054_v21, %v4890_v29  ;;  %v16370_v22 = vld [vmem:[#allocation87_spill] sm:$0xff] }
 0x6e3   : > { %v5250_v1 = vmul.f32 %v13484_v62, %v16368_v61  ;;  %v5056_v42 = vmul.f32 %v13466_v27, %v16369_v23  ;;  %v13567_v18 = vadd.f32 %v5639_v34, %v5475_v63  ;;  %v4316_v11 = vadd.f32 %v4284_v41, %v13299_v31  ;;  %v16371_v56 = vld [vmem:[#allocation267_spill] sm:$0xff] }
 0x6e4   : > { %v4698_v40 = vadd.f32 %v4666_v10, %v4502_v14  ;;  %v4862_v52 = vmul.f32 %v13433_v5, %v16370_v22  ;;  %v4668_v30 = vmul.f32 %v13357_v53, %v16371_v56  ;;  %v16372_v21 = vmov 15   ;;  %v16373_v57 = vld [vmem:[#allocation67_spill] sm:$0xff]  ;;  %v16374_v10 = vld [vmem:[#allocation80_spill] sm:$0xff] }
 0x6e5   : > { %7227 = vset.pattern.permute.xlu1 %v16372_v21  ;;  %v4506_v29 = vadd.f32 %v4474_v50, %v4310_v6  ;;  %v4318_v58 = vadd.f32 %v4286_v33, %v13302_v15  ;;  %v4482_v63 = vmul.f32 %v13237_v45, %v16373_v57  ;;  %v4892_v34 = vadd.f32 %v4860_v24, %v4696_v49  ;;  %v7396_v31 = vld [vmem:[%s14737_s11 + $0x8] sm:$0xff]  ;;  %v5328_v6 = vpop.permute.xlu1 %5327  ;;  %v13592_v24 = vpop.permute.xlu0 %5579  ;;  %v16377_v57 = vld [vmem:[#allocation69_spill] sm:$0xff] }
 0x6e6   : > { %5707 = vperm.xlu1 %7227, %v7396_v31   ;;  %v4508_v14 = vadd.f32 %v4476_v0, %v4312_v17  ;;  %v13583_v41 = vadd.f32 %v4478_v26, %v4314_v20  ;;  %v5252_v61 = vmul.f32 %v13484_v62, %v16374_v10  ;;  %v16375_v23 = vld [vmem:[#allocation167_spill] sm:$0xff]  ;;  %v5282_v15 = vadd.f32 %v5250_v1, %v5086_v35  ;;  %v16376_v20 = vld [vmem:[#allocation272_spill] sm:$0xff]  ;;  %v16379_v31 = vld [vmem:[#allocation366_spill] sm:$0xff] }
 0x6e7   : > { %v5058_v50 = vmul.f32 %v13466_v27, %v16375_v23  ;;  %v5088_v33 = vadd.f32 %v5056_v42, %v4892_v34  ;;  %v5446_v22 = vmul.f32 %v13530_v60, %v5328_v6  ;;  %v5642_v49 = vmul.f32 %v13515_v25, %v13385_v9  ;;  %v16378_v1 = vld [vmem:[#allocation159_spill] sm:$0xff]  ;;  %v16380_v9 = vld [vmem:[#allocation141_spill] sm:$0xff] }
 0x6e8   : > { %v13594_v56 = vadd.f32 %v4480_v28, %v4316_v11  ;;  %v4894_v17 = vadd.f32 %v4862_v52, %v4698_v40  ;;  %v4700_v0 = vadd.f32 %v4668_v30, %v4504_v38  ;;  %v4864_v26 = vmul.f32 %v13433_v5, %v16376_v20  ;;  %v16381_v40 = vld [vmem:[#allocation304_spill] sm:$0xff] }
 0x6e9   : > { %v13598_v21 = vadd.f32 %v4482_v63, %v4318_v58  ;;  %v4484_v35 = vmul.f32 %v13237_v45, %v16377_v57  ;;  %v4670_v42 = vmul.f32 %v13357_v53, %v16378_v1  ;;  %v5478_v34 = vadd.f32 %v5446_v22, %v5282_v15  ;;  %v16382_v52 = vld [vmem:[#allocation220_spill] sm:$0xff]  ;;  %v5336_v58 = vpop.permute.xlu1 %5335  ;;  %v13616_v15 = vpop.permute.xlu0 %5587  ;;  %v16383_v22 = vld [vmem:[#allocation71_spill] sm:$0xff] }
 0x6ea   : > { %5711 = vperm.xlu1 %7227, %v16379_v31   ;;  %v4288_v28 = vmul.f32 %v13009_v48, %v16380_v9  ;;  %v5090_v11 = vadd.f32 %v5058_v50, %v4894_v17  ;;  %v5254_v38 = vmul.f32 %v13484_v62, %v16381_v40  ;;  %v5060_v30 = vmul.f32 %v13466_v27, %v16382_v52  ;;  %v16384_v17 = vld [vmem:[#allocation199_spill] sm:$0xff]  ;;  %v16385_v1 = vld [vmem:[#allocation380_spill] sm:$0xff]  ;;  %v7397_v40 = vld [vmem:[%s14737_s11 + $0x20] sm:$0xff] }
 0x6eb   : > { %v5284_v63 = vadd.f32 %v5252_v61, %v5088_v33  ;;  %v13611_v10 = vadd.f32 %v5642_v49, %v5478_v34  ;;  %v5448_v23 = vmul.f32 %v13530_v60, %v5336_v58  ;;  %v5644_v6 = vmul.f32 %v13515_v25, %v13414_v7  ;;  %v16386_v61 = vld [vmem:[#allocation249_spill] sm:$0xff] }
 0x6ec   : > { %v4290_v50 = vmul.f32 %v13009_v48, %v16383_v22  ;;  %v4486_v20 = vmul.f32 %v13237_v45, %v16384_v17  ;;  %v4896_v57 = vadd.f32 %v4864_v26, %v4700_v0  ;;  %v4672_v31 = vmul.f32 %v13357_v53, %v16385_v1  ;;  %v16387_v34 = vld [vmem:[#allocation217_spill] sm:$0xff]  ;;  %v16388_v26 = vld [vmem:[#allocation306_spill] sm:$0xff] }
 0x6ed   : > { %v4292_v33 = vmul.f32 %v13009_v48, %v16386_v61  ;;  %v4702_v49 = vadd.f32 %v4670_v42, %v4506_v29  ;;  %v4866_v9 = vmul.f32 %v13433_v5, %v16387_v34  ;;  %v5480_v7 = vadd.f32 %v5448_v23, %v5284_v63  ;;  %v5344_v17 = vpop.permute.xlu1 %5343  ;;  %v16389_v1 = vld [vmem:[#allocation237_spill] sm:$0xff]  ;;  %v13641_v61 = vpop.permute.xlu0 %5595 }
 0x6ee   : > { %5719 = vperm.xlu1 %7227, %v7397_v40   ;;  %v4320_v52 = vadd.f32 %v4288_v28, %v13311_v3  ;;  %v5286_v58 = vadd.f32 %v5254_v38, %v5090_v11  ;;  %v5092_v0 = vadd.f32 %v5060_v30, %v4896_v57  ;;  %v5256_v22 = vmul.f32 %v13484_v62, %v16388_v26  ;;  %v16390_v11 = vld [vmem:[#allocation156_spill] sm:$0xff]  ;;  %v16391_v30 = vld [vmem:[#allocation269_spill] sm:$0xff] }
 0x6ef   : > { %v5062_v29 = vmul.f32 %v13466_v27, %v16389_v1  ;;  %v13636_v42 = vadd.f32 %v5644_v6, %v5480_v7  ;;  %v5450_v63 = vmul.f32 %v13530_v60, %v5344_v17  ;;  %v5646_v23 = vmul.f32 %v13515_v25, %v13451_v16  ;;  %v16392_v6 = vld [vmem:[#allocation73_spill] sm:$0xff]  ;;  %v7398_v16 = vld [vmem:[%s14737_s11 + $0x30] sm:$0xff]  ;;  %v16394_v17 = vld [vmem:[#allocation275_spill] sm:$0xff] }
 0x6f0   : > { %v4322_v3 = vadd.f32 %v4290_v50, %v13317_v51  ;;  %v4704_v28 = vadd.f32 %v4672_v31, %v4508_v14  ;;  %v4868_v38 = vmul.f32 %v13433_v5, %v16390_v11  ;;  %v4674_v57 = vmul.f32 %v13357_v53, %v16391_v30  ;;  %v16393_v50 = vld [vmem:[#allocation93_spill] sm:$0xff] }
 0x6f1   : > { %v4324_v34 = vadd.f32 %v4292_v33, %v13320_v55  ;;  %v4488_v7 = vmul.f32 %v13237_v45, %v16392_v6  ;;  %v4898_v40 = vadd.f32 %v4866_v9, %v4702_v49  ;;  %v5482_v26 = vadd.f32 %v5450_v63, %v5286_v58  ;;  %v5352_v55 = vpop.permute.xlu1 %5351  ;;  %v13665_v58 = vpop.permute.xlu0 %5603  ;;  %v16397_v6 = vld [vmem:[#allocation41_spill] sm:$0xff] }
 0x6f2   : > { %5727 = vperm.xlu1 %7227, %v7398_v16   ;;  %v13654_v51 = vadd.f32 %v4484_v35, %v4320_v52  ;;  %v5288_v14 = vadd.f32 %v5256_v22, %v5092_v0  ;;  %v5258_v31 = vmul.f32 %v13484_v62, %v16393_v50  ;;  %v5064_v1 = vmul.f32 %v13466_v27, %v16394_v17  ;;  %v16395_v22 = vld [vmem:[#allocation274_spill] sm:$0xff] }
 0x6f3   : > { %v5094_v33 = vadd.f32 %v5062_v29, %v4898_v40  ;;  %v13660_v11 = vadd.f32 %v5646_v23, %v5482_v26  ;;  %v5452_v49 = vmul.f32 %v13530_v60, %v5352_v55  ;;  %v5648_v9 = vmul.f32 %v13515_v25, %v13486_v36  ;;  %v16396_v29 = vld [vmem:[#allocation142_spill] sm:$0xff] }
 0x6f4   : > { %v13667_v35 = vadd.f32 %v4486_v20, %v4322_v3  ;;  %v4900_v52 = vadd.f32 %v4868_v38, %v4704_v28  ;;  %v4706_v0 = vadd.f32 %v4674_v57, %v13583_v41  ;;  %v4870_v63 = vmul.f32 %v13433_v5, %v16395_v22  ;;  %v7399_v36 = vld [vmem:[%s14737_s11 + $0x40] sm:$0xff]  ;;  %v16398_v20 = vld [vmem:[#allocation143_spill] sm:$0xff]  ;;  %v16400_v57 = vld [vmem:[#allocation321_spill] sm:$0xff] }
 0x6f5   : > { %v13672_v30 = vadd.f32 %v4488_v7, %v4324_v34  ;;  %v4490_v23 = vmul.f32 %v13237_v45, %v16396_v29  ;;  %v4676_v40 = vmul.f32 %v13357_v53, %v16397_v6  ;;  %v5484_v26 = vadd.f32 %v5452_v49, %v5288_v14  ;;  %v16399_v28 = vld [vmem:[#allocation107_spill] sm:$0xff]  ;;  %v5360_v7 = vpop.permute.xlu1 %5359  ;;  %v13692_v55 = vpop.permute.xlu0 %5611  ;;  %v16401_v49 = vld [vmem:[#allocation144_spill] sm:$0xff]  ;;  %v16403_v6 = vld [vmem:[#allocation221_spill] sm:$0xff] }
 0x6f6   : > { %5735 = vperm.xlu1 %7227, %v7399_v36   ;;  %v4294_v41 = vmul.f32 %v13009_v48, %v16398_v20  ;;  %v5096_v3 = vadd.f32 %v5064_v1, %v4900_v52  ;;  %v5260_v38 = vmul.f32 %v13484_v62, %v16399_v28  ;;  %v5066_v34 = vmul.f32 %v13466_v27, %v16400_v57  ;;  %v16402_v52 = vld [vmem:[#allocation254_spill] sm:$0xff]  ;;  %v16406_v57 = vld [vmem:[#allocation116_spill] sm:$0xff] }
 0x6f7   : > { %v5290_v16 = vadd.f32 %v5258_v31, %v5094_v33  ;;  %v13687_v50 = vadd.f32 %v5648_v9, %v5484_v26  ;;  %v5454_v14 = vmul.f32 %v13530_v60, %v5360_v7  ;;  %v5650_v17 = vmul.f32 %v13515_v25, %v13517_v47  ;;  %v16404_v31 = vld [vmem:[#allocation50_spill] sm:$0xff]  ;;  %v16405_v26 = vld [vmem:[#allocation219_spill] sm:$0xff] }
 0x6f8   : > { %v4296_v1 = vmul.f32 %v13009_v48, %v16401_v49  ;;  %v4492_v22 = vmul.f32 %v13237_v45, %v16402_v52  ;;  %v4902_v29 = vadd.f32 %v4870_v63, %v4706_v0  ;;  %v4678_v36 = vmul.f32 %v13357_v53, %v16403_v6  ;;  %v7400_v48 = vld [vmem:[%s14737_s11 + $0x50] sm:$0xff]  ;;  %v16407_v52 = vld [vmem:[#allocation327_spill] sm:$0xff] }
 0x6f9   : > { %v4462_v33 = vmul.f32 %v13237_v45, %v16404_v31  ;;  %v4708_v9 = vadd.f32 %v4676_v40, %v13594_v56  ;;  %v4872_v47 = vmul.f32 %v13433_v5, %v16405_v26  ;;  %v5486_v20 = vadd.f32 %v5454_v14, %v5290_v16  ;;  %v5368_v49 = vpop.permute.xlu1 %5367  ;;  %v13718_v6 = vpop.permute.xlu0 %5619  ;;  %v16410_v31 = vld [vmem:[#allocation201_spill] sm:$0xff] }
 0x6fa   : > { %5743 = vperm.xlu1 %7227, %v7400_v48   ;;  %v4326_v28 = vadd.f32 %v4294_v41, %v13342_v37  ;;  %v5292_v0 = vadd.f32 %v5260_v38, %v5096_v3  ;;  %v5098_v63 = vadd.f32 %v5066_v34, %v4902_v29  ;;  %v5262_v7 = vmul.f32 %v13484_v62, %v16406_v57  ;;  %v16408_v3 = vld [vmem:[#allocation89_spill] sm:$0xff]  ;;  %v16412_v57 = vld [vmem:[#allocation296_spill] sm:$0xff] }
 0x6fb   : > { %v5068_v56 = vmul.f32 %v13466_v27, %v16407_v52  ;;  %v13713_v40 = vadd.f32 %v5650_v17, %v5486_v20  ;;  %v5456_v16 = vmul.f32 %v13530_v60, %v5368_v49  ;;  %v5652_v14 = vmul.f32 %v13515_v25, %v13543_v39  ;;  %v16409_v34 = vld [vmem:[#allocation121_spill] sm:$0xff]  ;;  %v7401_v39 = vld [vmem:[%s14737_s11 + $0x60] sm:$0xff] }
 0x6fc   : > { %v4328_v37 = vadd.f32 %v4296_v1, %v13345_v4  ;;  %v4710_v41 = vadd.f32 %v4678_v36, %v13598_v21  ;;  %v4874_v38 = vmul.f32 %v13433_v5, %v16408_v3  ;;  %v4680_v29 = vmul.f32 %v13357_v53, %v16409_v34  ;;  %v16411_v1 = vld [vmem:[#allocation175_spill] sm:$0xff] }
 0x6fd   : > { %v4494_v17 = vadd.f32 %v4462_v33, %v13349_v46  ;;  %v4658_v26 = vmul.f32 %v13357_v53, %v16410_v31  ;;  %v4904_v20 = vadd.f32 %v4872_v47, %v4708_v9  ;;  %v5488_v48 = vadd.f32 %v5456_v16, %v5292_v0  ;;  %v5376_v46 = vpop.permute.xlu1 %5375  ;;  %v13743_v0 = vpop.permute.xlu0 %5627  ;;  %v16415_v34 = vld [vmem:[#allocation271_spill] sm:$0xff] }
 0x6fe   : > { %5751 = vperm.xlu1 %7227, %v7401_v39   ;;  %v13732_v4 = vadd.f32 %v4490_v23, %v4326_v28  ;;  %v5294_v21 = vadd.f32 %v5262_v7, %v5098_v63  ;;  %v5264_v36 = vmul.f32 %v13484_v62, %v16411_v1  ;;  %v5070_v49 = vmul.f32 %v13466_v27, %v16412_v57  ;;  %v16413_v7 = vld [vmem:[#allocation276_spill] sm:$0xff]  ;;  %v16419_v57 = vld [vmem:[#allocation146_spill] sm:$0xff] }
 0x6ff   : > { %v5100_v33 = vadd.f32 %v5068_v56, %v4904_v20  ;;  %v13738_v52 = vadd.f32 %v5652_v14, %v5488_v48  ;;  %v5458_v9 = vmul.f32 %v13530_v60, %v5376_v46  ;;  %v5654_v47 = vmul.f32 %v13515_v25, %v13569_v19  ;;  %v16414_v56 = vld [vmem:[#allocation251_spill] sm:$0xff]  ;;  %v7402_v19 = vld [vmem:[%s14737_s11 + $0x70] sm:$0xff] }
 0x700   : > { %v13745_v23 = vadd.f32 %v4492_v22, %v4328_v37  ;;  %v4906_v28 = vadd.f32 %v4874_v38, %v4710_v41  ;;  %v4712_v63 = vadd.f32 %v4680_v29, %v13654_v51  ;;  %v4876_v16 = vmul.f32 %v13433_v5, %v16413_v7  ;;  %v16416_v22 = vld [vmem:[#allocation258_spill] sm:$0xff]  ;;  %v16417_v41 = vld [vmem:[#allocation231_spill] sm:$0xff]  ;;  %v16421_v7 = vld [vmem:[#allocation45_spill] sm:$0xff] }
 0x701   : > { %v13750_v3 = vadd.f32 %v4658_v26, %v4494_v17  ;;  %v4661_v14 = vmul.f32 %v13357_v53, %v16414_v56  ;;  %v4682_v31 = vmul.f32 %v13357_v53, %v16415_v34  ;;  %v5490_v20 = vadd.f32 %v5458_v9, %v5294_v21  ;;  %v16418_v29 = vld [vmem:[#allocation303_spill] sm:$0xff]  ;;  %v5384_v26 = vpop.permute.xlu1 %5383  ;;  %v16420_v9 = vld [vmem:[#allocation77_spill] sm:$0xff]  ;;  %v16422_v34 = vld [vmem:[#allocation260_spill] sm:$0xff] }
 0x702   : > { %5759 = vperm.xlu1 %7227, %v7402_v19   ;;  %v4464_v51 = vmul.f32 %v13237_v45, %v16416_v22  ;;  %v5102_v37 = vadd.f32 %v5070_v49, %v4906_v28  ;;  %v5266_v38 = vmul.f32 %v13484_v62, %v16417_v41  ;;  %v5072_v17 = vmul.f32 %v13466_v27, %v16418_v29  ;;  %v13784_v22 = vpop.permute.xlu0 %5703  ;;  %v16424_v29 = vld [vmem:[#allocation241_spill] sm:$0xff] }
 0x703   : > { %v5296_v48 = vadd.f32 %v5264_v36, %v5100_v33  ;;  %v13765_v39 = vadd.f32 %v5654_v47, %v5490_v20  ;;  %v5460_v21 = vmul.f32 %v13530_v60, %v5384_v26  ;;  %v5656_v1 = vmul.f32 %v13515_v25, %v13592_v24  ;;  %v16423_v47 = vld [vmem:[#allocation161_spill] sm:$0xff]  ;;  %v7403_v24 = vld [vmem:[%s14737_s11 + $0x80] sm:$0xff] }
 0x704   : > { %v4465_v46 = vmul.f32 %v13237_v45, %v16419_v57  ;;  %v4663_v49 = vmul.f32 %v13357_v53, %v16420_v9  ;;  %v4908_v28 = vadd.f32 %v4876_v16, %v4712_v63  ;;  %v4684_v56 = vmul.f32 %v13357_v53, %v16421_v7  ;;  %v16426_v7 = vld [vmem:[#allocation253_spill] sm:$0xff] }
 0x705   : > { %v4467_v36 = vmul.f32 %v13237_v45, %v16422_v34  ;;  %v4714_v33 = vadd.f32 %v4682_v31, %v13667_v35  ;;  %v4878_v20 = vmul.f32 %v13433_v5, %v16423_v47  ;;  %v5492_v19 = vadd.f32 %v5460_v21, %v5296_v48  ;;  %v5392_v35 = vpop.permute.xlu1 %5391  ;;  %v16425_v31 = vld [vmem:[#allocation305_spill] sm:$0xff] }
 0x706   : > { %5767 = vperm.xlu1 %7227, %v7403_v24   ;;  %v13787_v63 = vadd.f32 %v4464_v51, %v13506_v54  ;;  %v5298_v16 = vadd.f32 %v5266_v38, %v5102_v37  ;;  %v5104_v41 = vadd.f32 %v5072_v17, %v4908_v28  ;;  %v5268_v26 = vmul.f32 %v13484_v62, %v16424_v29  ;;  %v16427_v37 = vld [vmem:[#allocation382_spill] sm:$0xff]  ;;  %v16428_v17 = vld [vmem:[#allocation223_spill] sm:$0xff]  ;;  %v13810_v24 = vpop.permute.xlu0 %5715 }
 0x707   : > { %v5074_v57 = vmul.f32 %v13466_v27, %v16425_v31  ;;  %v13793_v48 = vadd.f32 %v5656_v1, %v5492_v19  ;;  %v5462_v21 = vmul.f32 %v13530_v60, %v5392_v35  ;;  %v5658_v9 = vmul.f32 %v13515_v25, %v13616_v15  ;;  %v7404_v15 = vld [vmem:[%s14737_s11 + $0x90] sm:$0xff]  ;;  %v16430_v35 = vld [vmem:[#allocation277_spill] sm:$0xff] }
 0x708   : > { %v4665_v54 = vmul.f32 %v13357_v53, %v16426_v7  ;;  %v4716_v51 = vadd.f32 %v4684_v56, %v13672_v30  ;;  %v4880_v38 = vmul.f32 %v13433_v5, %v16427_v37  ;;  %v4686_v28 = vmul.f32 %v13357_v53, %v16428_v17  ;;  %v16429_v30 = vld [vmem:[#allocation205_spill] sm:$0xff]  ;;  %v16431_v7 = vld [vmem:[#allocation307_spill] sm:$0xff] }
 0x709   : > { %v4497_v34 = vadd.f32 %v4465_v46, %v13360_v32  ;;  %v4499_v1 = vadd.f32 %v4467_v36, %v13362_v12  ;;  %v4910_v47 = vadd.f32 %v4878_v20, %v4714_v33  ;;  %v5494_v19 = vadd.f32 %v5462_v21, %v5298_v16  ;;  %v5400_v12 = vpop.permute.xlu1 %5399  ;;  %v16432_v16 = vld [vmem:[#allocation255_spill] sm:$0xff] }
 0x70a   : > { %5775 = vperm.xlu1 %7227, %v7404_v15   ;;  %v4469_v56 = vmul.f32 %v13237_v45, %v16429_v30  ;;  %v5300_v29 = vadd.f32 %v5268_v26, %v5104_v41  ;;  %v5270_v31 = vmul.f32 %v13484_v62, %v16430_v35  ;;  %v5076_v32 = vmul.f32 %v13466_v27, %v16431_v7  ;;  %v16433_v26 = vld [vmem:[#allocation158_spill] sm:$0xff]  ;;  %v16434_v30 = vld [vmem:[#allocation147_spill] sm:$0xff] }
 0x70b   : > { %v5106_v46 = vadd.f32 %v5074_v57, %v4910_v47  ;;  %v13818_v36 = vadd.f32 %v5658_v9, %v5494_v19  ;;  %v5464_v33 = vmul.f32 %v13530_v60, %v5400_v12  ;;  %v5660_v20 = vmul.f32 %v13515_v25, %v13641_v61  ;;  %v16435_v9 = vld [vmem:[#allocation91_spill] sm:$0xff]  ;;  %v7405_v61 = vld [vmem:[%s14737_s11 + $0xa0] sm:$0xff] }
 0x70c   : > { %v4471_v21 = vmul.f32 %v13237_v45, %v16432_v16  ;;  %v4912_v37 = vadd.f32 %v4880_v38, %v4716_v51  ;;  %v4718_v41 = vadd.f32 %v4686_v28, %v13732_v4  ;;  %v4882_v17 = vmul.f32 %v13433_v5, %v16433_v26  ;;  %v16436_v38 = vld [vmem:[#allocation284_spill] sm:$0xff]  ;;  %v13848_v16 = vpop.permute.xlu0 %5723 }
 0x70d   : > { %v13828_v15 = vadd.f32 %v4661_v14, %v4497_v34  ;;  %v4667_v57 = vmul.f32 %v13357_v53, %v16434_v30  ;;  %v4688_v47 = vmul.f32 %v13357_v53, %v16435_v9  ;;  %v5496_v19 = vadd.f32 %v5464_v33, %v5300_v29  ;;  %v16437_v14 = vld [vmem:[#allocation339_spill] sm:$0xff]  ;;  %v5408_v35 = vpop.permute.xlu1 %5407  ;;  %v16439_v30 = vld [vmem:[#allocation148_spill] sm:$0xff] }
 0x70e   : > { %5783 = vperm.xlu1 %7227, %v7405_v61   ;;  %v13837_v51 = vadd.f32 %v4663_v49, %v4499_v1  ;;  %v5108_v4 = vadd.f32 %v5076_v32, %v4912_v37  ;;  %v5272_v28 = vmul.f32 %v13484_v62, %v16436_v38  ;;  %v5078_v34 = vmul.f32 %v13466_v27, %v16437_v14  ;;  %v16438_v32 = vld [vmem:[#allocation297_spill] sm:$0xff]  ;;  %v16443_v38 = vld [vmem:[#allocation343_spill] sm:$0xff] }
 0x70f   : > { %v5302_v7 = vadd.f32 %v5270_v31, %v5106_v46  ;;  %v13843_v12 = vadd.f32 %v5660_v20, %v5496_v19  ;;  %v5466_v29 = vmul.f32 %v13530_v60, %v5408_v35  ;;  %v5662_v33 = vmul.f32 %v13515_v25, %v13665_v58  ;;  %v16440_v20 = vld [vmem:[#allocation278_spill] sm:$0xff]  ;;  %v7406_v58 = vld [vmem:[%s14737_s11 + $0xb0] sm:$0xff] }
 0x710   : > { %v4501_v49 = vadd.f32 %v4469_v56, %v13370_v2  ;;  %v4503_v1 = vadd.f32 %v4471_v21, %v13372_v8  ;;  %v4473_v37 = vmul.f32 %v13237_v45, %v16438_v32  ;;  %v4914_v26 = vadd.f32 %v4882_v17, %v4718_v41  ;;  %v16441_v2 = vld [vmem:[#allocation280_spill] sm:$0xff]  ;;  %v16442_v41 = vld [vmem:[#allocation329_spill] sm:$0xff]  ;;  %v16445_v32 = vld [vmem:[#allocation207_spill] sm:$0xff] }
 0x711   : > { %v4669_v31 = vmul.f32 %v13357_v53, %v16439_v30  ;;  %v4720_v46 = vadd.f32 %v4688_v47, %v13745_v23  ;;  %v4884_v9 = vmul.f32 %v13433_v5, %v16440_v20  ;;  %v5498_v19 = vadd.f32 %v5466_v29, %v5302_v7  ;;  %v5416_v61 = vpop.permute.xlu1 %5415  ;;  %v16446_v30 = vld [vmem:[#allocation377_spill] sm:$0xff] }
 0x712   : > { %5791 = vperm.xlu1 %7227, %v7406_v58   ;;  %v4854_v8 = vmul.f32 %v13433_v5, %v16441_v2  ;;  %v5304_v56 = vadd.f32 %v5272_v28, %v5108_v4  ;;  %v5110_v21 = vadd.f32 %v5078_v34, %v4914_v26  ;;  %v5274_v17 = vmul.f32 %v13484_v62, %v16442_v41  ;;  %v16444_v28 = vld [vmem:[#allocation262_spill] sm:$0xff] }
 0x713   : > { %v5080_v23 = vmul.f32 %v13466_v27, %v16443_v38  ;;  %v13868_v47 = vadd.f32 %v5662_v33, %v5498_v19  ;;  %v5468_v14 = vmul.f32 %v13530_v60, %v5416_v61  ;;  %v5664_v35 = vmul.f32 %v13515_v25, %v13692_v55  ;;  %v7407_v55 = vld [vmem:[%s14737_s11 + $0xc0] sm:$0xff]  ;;  %v16449_v38 = vld [vmem:[#allocation257_spill] sm:$0xff] }
 0x714   : > { %v13873_v7 = vadd.f32 %v4665_v54, %v4501_v49  ;;  %v13875_v29 = vadd.f32 %v4667_v57, %v4503_v1  ;;  %v4505_v4 = vadd.f32 %v4473_v37, %v13416_v44  ;;  %v4671_v34 = vmul.f32 %v13357_v53, %v16444_v28  ;;  %v13887_v54 = vpop.permute.xlu0 %5731  ;;  %v16447_v57 = vld [vmem:[#allocation163_spill] sm:$0xff]  ;;  %v16448_v37 = vld [vmem:[#allocation301_spill] sm:$0xff] }
 0x715   : > { %v4475_v26 = vmul.f32 %v13237_v45, %v16445_v32  ;;  %v4660_v33 = vmul.f32 %v13357_v53, %v16446_v30  ;;  %v4916_v20 = vadd.f32 %v4884_v9, %v4720_v46  ;;  %v5500_v19 = vadd.f32 %v5468_v14, %v5304_v56  ;;  %v5424_v2 = vpop.permute.xlu1 %5423  ;;  %v16452_v28 = vld [vmem:[#allocation81_spill] sm:$0xff]  ;;  %v16454_v30 = vld [vmem:[#allocation84_spill] sm:$0xff] }
 0x716   : > { %5799 = vperm.xlu1 %7227, %v7407_v55   ;;  %v4886_v44 = vadd.f32 %v4854_v8, %v13750_v3  ;;  %v5050_v49 = vmul.f32 %v13466_v27, %v16447_v57  ;;  %v5306_v1 = vadd.f32 %v5274_v17, %v5110_v21  ;;  %v5276_v58 = vmul.f32 %v13484_v62, %v16448_v37  ;;  %v16450_v8 = vld [vmem:[#allocation149_spill] sm:$0xff]  ;;  %v16451_v17 = vld [vmem:[#allocation351_spill] sm:$0xff]  ;;  %v16455_v57 = vld [vmem:[#allocation86_spill] sm:$0xff] }
 0x717   : > { %v5112_v41 = vadd.f32 %v5080_v23, %v4916_v20  ;;  %v13894_v46 = vadd.f32 %v5664_v35, %v5500_v19  ;;  %v5470_v9 = vmul.f32 %v13530_v60, %v5424_v2  ;;  %v5666_v56 = vmul.f32 %v13515_v25, %v13718_v6  ;;  %v16453_v35 = vld [vmem:[#allocation225_spill] sm:$0xff] }
 0x718   : > { %v13899_v61 = vadd.f32 %v4669_v31, %v4505_v4  ;;  %v4477_v3 = vmul.f32 %v13237_v45, %v16449_v38  ;;  %v4673_v21 = vmul.f32 %v13357_v53, %v16450_v8  ;;  %v5246_v14 = vmul.f32 %v13484_v62, %v16451_v17  ;;  %v7408_v4 = vld [vmem:[%s14737_s11 + $0xd0] sm:$0xff] }
 0x719   : > { %v13909_v23 = vmul.f32 %v13357_v53, %v16452_v28  ;;  %v4856_v32 = vmul.f32 %v13433_v5, %v16453_v35  ;;  %v4857_v6 = vmul.f32 %v13433_v5, %v16454_v30  ;;  %v5502_v31 = vadd.f32 %v5470_v9, %v5306_v1  ;;  %v5432_v2 = vpop.permute.xlu1 %5431  ;;  %v13927_v9 = vpop.permute.xlu0 %5739 }
 0x71a   : > { %5807 = vperm.xlu1 %7227, %v7408_v4   ;;  %v4507_v20 = vadd.f32 %v4475_v26, %v13418_v59  ;;  %v4692_v19 = vadd.f32 %v4660_v33, %v13787_v63  ;;  %v5082_v55 = vadd.f32 %v5050_v49, %v4886_v44  ;;  %v5052_v37 = vmul.f32 %v13466_v27, %v16455_v57  ;;  %v16457_v26 = vld [vmem:[#allocation335_spill] sm:$0xff]  ;;  %v16459_v44 = vld [vmem:[#allocation97_spill] sm:$0xff]  ;;  %v16465_v57 = vld [vmem:[#allocation354_spill] sm:$0xff] }
 0x71b   : > { %v5308_v38 = vadd.f32 %v5276_v58, %v5112_v41  ;;  %v13922_v8 = vadd.f32 %v5666_v56, %v5502_v31  ;;  %v5472_v17 = vmul.f32 %v13530_v60, %v5432_v2  ;;  %v5668_v1 = vmul.f32 %v13515_v25, %v13743_v0  ;;  %v16458_v33 = vld [vmem:[#allocation291_spill] sm:$0xff]  ;;  %v16460_v56 = vld [vmem:[#allocation384_spill] sm:$0xff]  ;;  %v7409_v0 = vld [vmem:[%s14737_s11 + $0xe0] sm:$0xff] }
 0x71c   : > { %v4509_v28 = vadd.f32 %v4477_v3, %v13420_v13  ;;  %v5278_v59 = vadd.f32 %v5246_v14, %v5082_v55  ;;  %v5442_v63 = vmul.f32 %v13530_v60, %v16457_v26  ;;  %v13934_v49 = vrot.slane %v16459_v44, %v16458_v33  ;;  %v16461_v3 = vld [vmem:[#allocation264_spill] sm:$0xff]  ;;  %v16462_v31 = vld [vmem:[#allocation53_spill] sm:$0xff] }
 0x71d   : > { %16456 = vst [vmem:[#allocation173_spill] sm:$0xff] %v13922_v8  ;;  %v4888_v58 = vadd.f32 %v4856_v32, %v4692_v19  ;;  %v4889_v41 = vadd.f32 %v4857_v6, %v13828_v15  ;;  %v5053_v35 = vmul.f32 %v13466_v27, %v16460_v56  ;;  %v5504_v30 = vadd.f32 %v5472_v17, %v5308_v38  ;;  %v16463_v32 = vld [vmem:[#allocation360_spill] sm:$0xff]  ;;  %v16464_v6 = vld [vmem:[#allocation150_spill] sm:$0xff]  ;;  %v16467_v56 = vld [vmem:[#allocation151_spill] sm:$0xff] }
 0x71e   : > { %5815 = vperm.xlu1 %7227, %v7409_v0   ;;  %v13942_v13 = vadd.f32 %v4671_v34, %v4507_v20  ;;  %v4677_v14 = vmul.f32 %v13357_v53, %v16461_v3  ;;  %v4859_v4 = vmul.f32 %v13433_v5, %v16462_v31  ;;  %v5248_v15 = vmul.f32 %v13484_v62, %v16463_v32  ;;  %v5508_v34 = vpop.permute.xlu1 %5507  ;;  %v16468_v0 = vld [vmem:[#allocation47_spill] sm:$0xff]  ;;  %v16470_v3 = vld [vmem:[#allocation381_spill] sm:$0xff] }
 0x71f   : > { %v4479_v19 = vmul.f32 %v13237_v45, %v16464_v6  ;;  %v5084_v55 = vadd.f32 %v5052_v37, %v4888_v58  ;;  %v5249_v2 = vmul.f32 %v13484_v62, %v16465_v57  ;;  %v13954_v38 = vadd.f32 %v5668_v1, %v5504_v30  ;;  %v16469_v30 = vld [vmem:[#allocation273_spill] sm:$0xff] }
 0x720   : > { %v5474_v20 = vadd.f32 %v5442_v63, %v5278_v59  ;;  %v5444_v17 = vmul.f32 %v13530_v60, %v13561_v43  ;;  %v5638_v26 = vmul.f32 %v13515_v25, %v5508_v34  ;;  %v5834_v33 = vmul.f32 %v13934_v49, %v13784_v22  ;;  %v7410_v59 = vld [vmem:[%s14737_s11 + $0xf0] sm:$0xff]  ;;  %v13970_v43 = vpop.permute.xlu0 %5747  ;;  %v16472_v6 = vld [vmem:[#allocation337_spill] sm:$0xff]  ;;  %v2657_v34 = vld [vmem:[%s16473_s22] sm:$0xff] }
 0x721   : > { %16466 = vst [vmem:[#allocation75_spill] sm:$0xff] %v13954_v38  ;;  %v13961_v44 = vadd.f32 %v4673_v21, %v4509_v28  ;;  %v4481_v37 = vmul.f32 %v13237_v45, %v16467_v56  ;;  %v5085_v58 = vadd.f32 %v5053_v35, %v4889_v41  ;;  %v4861_v1 = vmul.f32 %v13433_v5, %v16468_v0  ;;  %v16471_v41 = vld [vmem:[#allocation209_spill] sm:$0xff] }
 0x722   : > { %5823 = vperm.xlu1 %7227, %v7410_v59   ;;  %v4891_v63 = vadd.f32 %v4859_v4, %v13837_v51  ;;  %v5055_v22 = vmul.f32 %v13466_v27, %v16469_v30  ;;  %v5280_v21 = vadd.f32 %v5248_v15, %v5084_v55  ;;  %v5670_v28 = vadd.f32 %v5638_v26, %v5474_v20  ;;  %v5516_v56 = vpop.permute.xlu1 %5515  ;;  %v16474_v51 = vld [vmem:[#allocation357_spill] sm:$0xff]  ;;  %v16477_v59 = vld [vmem:[#allocation256_spill] sm:$0xff] }
 0x723   : > { %v4511_v31 = vadd.f32 %v4479_v19, %v16470_v3  ;;  %v4679_v35 = vmul.f32 %v13357_v53, %v16471_v41  ;;  %v5281_v32 = vadd.f32 %v5249_v2, %v5085_v58  ;;  %v5445_v57 = vmul.f32 %v13530_v60, %v16472_v6  ;;  %v16475_v19 = vld [vmem:[#allocation162_spill] sm:$0xff] }
 0x724   : > { %v5251_v4 = vmul.f32 %v13484_v62, %v16474_v51  ;;  %v5476_v0 = vadd.f32 %v5444_v17, %v5280_v21  ;;  %v5866_v15 = vadd.f32 %v5834_v33, %v5670_v28  ;;  %v5640_v55 = vmul.f32 %v13515_v25, %v5516_v56  ;;  %v16476_v2 = vld [vmem:[#allocation102_spill] sm:$0xff]  ;;  %v16479_v21 = vld [vmem:[#allocation309_spill] sm:$0xff]  ;;  %v14005_v51 = vpop.permute.xlu0 %5755 }
 0x725   : > { %v4513_v20 = vadd.f32 %v4481_v37, %v16475_v19  ;;  %v4893_v26 = vadd.f32 %v4861_v1, %v13873_v7  ;;  %v5057_v58 = vmul.f32 %v13466_v27, %v16476_v2  ;;  %v4863_v30 = vmul.f32 %v13433_v5, %v16477_v59  ;;  %v16478_v3 = vld [vmem:[#allocation266_spill] sm:$0xff]  ;;  %v16480_v1 = vld [vmem:[#allocation359_spill] sm:$0xff] }
 0x726   : > { %v4483_v41 = vmul.f32 %v13237_v45, %v16478_v3  ;;  %v5087_v6 = vadd.f32 %v5055_v22, %v4891_v63  ;;  %v13994_v38 = vadd.f32 %v5866_v15, %v2657_v34  ;;  %v13996_v17 = vadd.f32 %v5640_v55, %v5476_v0  ;;  %v5520_v56 = vpop.permute.xlu1 %5519  ;;  %v16481_v2 = vld [vmem:[#allocation294_spill] sm:$0xff]  ;;  %v16483_v0 = vld [vmem:[#allocation68_spill] sm:$0xff]  ;;  %v16485_v3 = vld [vmem:[#allocation259_spill] sm:$0xff] }
 0x727   : > { %v13999_v33 = vadd.f32 %v13909_v23, %v4511_v31  ;;  %v5477_v37 = vadd.f32 %v5445_v57, %v5281_v32  ;;  %v5447_v7 = vmul.f32 %v13530_v60, %v16479_v21  ;;  %v5253_v28 = vmul.f32 %v13484_v62, %v16480_v1  ;;  %v16482_v57 = vld [vmem:[#allocation386_spill] sm:$0xff]  ;;  %v16486_v1 = vld [vmem:[#allocation83_spill] sm:$0xff] }
 0x728   : > { %v5283_v19 = vadd.f32 %v5251_v4, %v5087_v6  ;;  %v5930_v63 = vmul.f32 %v13994_v38, %v16481_v2  ;;  %v5641_v22 = vmul.f32 %v13515_v25, %v5520_v56  ;;  %v5837_v23 = vmul.f32 %v13934_v49, %v13810_v24  ;;  %v16484_v4 = vld [vmem:[#allocation390_spill] sm:$0xff] }
 0x729   : > { %v5089_v31 = vadd.f32 %v5057_v58, %v4893_v26  ;;  %v4895_v32 = vadd.f32 %v4863_v30, %v13875_v29  ;;  %v5059_v34 = vmul.f32 %v13466_v27, %v16482_v57  ;;  %v4865_v15 = vmul.f32 %v13433_v5, %v16483_v0  ;;  %v16487_v26 = vld [vmem:[#allocation341_spill] sm:$0xff] }
 0x72a   : > { %v14017_v55 = vadd.f32 %v4677_v14, %v4513_v20  ;;  %v4515_v59 = vadd.f32 %v4483_v41, %v16484_v4  ;;  %v4681_v6 = vmul.f32 %v13357_v53, %v16485_v3  ;;  %5962 = vst [vmem:[#allocation12 + $0x100] sm:$0xff] %v5930_v63  ;;  %v5673_v21 = vadd.f32 %v5641_v22, %v5477_v37  ;;  %v16488_v30 = vld [vmem:[#allocation361_spill] sm:$0xff]  ;;  %v5528_v20 = vpop.permute.xlu1 %5527 }
 0x72b   : > { %v14024_v24 = vmul.f32 %v13357_v53, %v16486_v1  ;;  %v5285_v29 = vadd.f32 %v5253_v28, %v5089_v31  ;;  %v5449_v58 = vmul.f32 %v13530_v60, %v16487_v26  ;;  %v5255_v56 = vmul.f32 %v13484_v62, %v16488_v30  ;;  %v2660_v14 = vld [vmem:[%s16473_s22 + $0x18] sm:$0xff]  ;;  %v16489_v31 = vld [vmem:[#allocation124_spill] sm:$0xff]  ;;  %v14041_v1 = vpop.permute.xlu0 %5763 }
 0x72c   : > { %v5479_v41 = vadd.f32 %v5447_v7, %v5283_v19  ;;  %v5869_v57 = vadd.f32 %v5837_v23, %v5673_v21  ;;  %v5643_v37 = vmul.f32 %v13515_v25, %v5528_v20  ;;  %v5839_v63 = vmul.f32 %v13934_v49, %v13848_v16  ;;  %v16490_v4 = vld [vmem:[#allocation49_spill] sm:$0xff]  ;;  %v16491_v7 = vld [vmem:[#allocation152_spill] sm:$0xff]  ;;  %v2662_v20 = vld [vmem:[%s16473_s22 + $0x28] sm:$0xff] }
 0x72d   : > { %v5091_v22 = vadd.f32 %v5059_v34, %v4895_v32  ;;  %v4897_v28 = vadd.f32 %v4865_v15, %v13899_v61  ;;  %v5061_v0 = vmul.f32 %v13466_v27, %v16489_v31  ;;  %v4867_v3 = vmul.f32 %v13433_v5, %v16490_v4  ;;  %v16492_v34 = vld [vmem:[#allocation349_spill] sm:$0xff]  ;;  %v16493_v15 = vld [vmem:[#allocation370_spill] sm:$0xff]  ;;  %v16496_v4 = vld [vmem:[#allocation164_spill] sm:$0xff] }
 0x72e   : > { %v14043_v26 = vadd.f32 %v4679_v35, %v4515_v59  ;;  %v4485_v19 = vmul.f32 %v13237_v45, %v16491_v7  ;;  %v14047_v23 = vadd.f32 %v5869_v57, %v2660_v14  ;;  %v5675_v21 = vadd.f32 %v5643_v37, %v5479_v41  ;;  %v5536_v35 = vpop.permute.xlu1 %5535  ;;  %v16494_v41 = vld [vmem:[#allocation283_spill] sm:$0xff]  ;;  %v16495_v37 = vld [vmem:[#allocation289_spill] sm:$0xff] }
 0x72f   : > { %v5481_v16 = vadd.f32 %v5449_v58, %v5285_v29  ;;  %v5287_v32 = vadd.f32 %v5255_v56, %v5091_v22  ;;  %v5451_v61 = vmul.f32 %v13530_v60, %v16492_v34  ;;  %v5257_v30 = vmul.f32 %v13484_v62, %v16493_v15  ;;  %v16497_v34 = vld [vmem:[#allocation211_spill] sm:$0xff] }
 0x730   : > { %v5933_v59 = vmul.f32 %v14047_v23, %v16481_v2  ;;  %v5871_v31 = vadd.f32 %v5839_v63, %v5675_v21  ;;  %v5645_v14 = vmul.f32 %v13515_v25, %v5536_v35  ;;  %v5841_v29 = vmul.f32 %v13934_v49, %v13887_v54 }
 0x731   : > { %v5093_v58 = vadd.f32 %v5061_v0, %v4897_v28  ;;  %v4899_v56 = vadd.f32 %v4867_v3, %v13942_v13  ;;  %v5063_v57 = vmul.f32 %v13466_v27, %v16494_v41  ;;  %v4869_v22 = vmul.f32 %v13433_v5, %v16495_v37  ;;  %v16498_v0 = vld [vmem:[#allocation356_spill] sm:$0xff]  ;;  %v16499_v3 = vld [vmem:[#allocation375_spill] sm:$0xff]  ;;  %v14080_v37 = vpop.permute.xlu0 %5771 }
 0x732   : > { %v4517_v7 = vadd.f32 %v4485_v19, %v16496_v4  ;;  %v14069_v15 = vmul.f32 %v13357_v53, %v16497_v34  ;;  %5965 = vst [vmem:[#allocation12 + $0x118] sm:$0xff] %v5933_v59  ;;  %v14071_v63 = vadd.f32 %v5871_v31, %v2662_v20  ;;  %v5677_v21 = vadd.f32 %v5645_v14, %v5481_v16  ;;  %v2664_v19 = vld [vmem:[%s16473_s22 + $0x38] sm:$0xff]  ;;  %v5544_v41 = vpop.permute.xlu1 %5543  ;;  %v16500_v31 = vld [vmem:[#allocation227_spill] sm:$0xff] }
 0x733   : > { %v5483_v54 = vadd.f32 %v5451_v61, %v5287_v32  ;;  %v5289_v28 = vadd.f32 %v5257_v30, %v5093_v58  ;;  %v5453_v13 = vmul.f32 %v13530_v60, %v16498_v0  ;;  %v5259_v35 = vmul.f32 %v13484_v62, %v16499_v3  ;;  %v16501_v58 = vld [vmem:[#allocation170_spill] sm:$0xff]  ;;  %v16502_v0 = vld [vmem:[#allocation261_spill] sm:$0xff] }
 0x734   : > { %v5935_v20 = vmul.f32 %v14071_v63, %v16481_v2  ;;  %v5873_v59 = vadd.f32 %v5841_v29, %v5677_v21  ;;  %v5647_v16 = vmul.f32 %v13515_v25, %v5544_v41  ;;  %v5843_v32 = vmul.f32 %v13934_v49, %v13927_v9 }
 0x735   : > { %v5095_v61 = vadd.f32 %v5063_v57, %v4899_v56  ;;  %v4901_v30 = vadd.f32 %v4869_v22, %v13961_v44  ;;  %v5065_v14 = vmul.f32 %v13466_v27, %v16500_v31  ;;  %v4871_v4 = vmul.f32 %v13433_v5, %v16501_v58  ;;  %v16503_v56 = vld [vmem:[#allocation350_spill] sm:$0xff]  ;;  %v14115_v58 = vpop.permute.xlu0 %5779 }
 0x736   : > { %v14092_v34 = vadd.f32 %v4681_v6, %v4517_v7  ;;  %v4487_v3 = vmul.f32 %v13237_v45, %v16502_v0  ;;  %5967 = vst [vmem:[#allocation12 + $0x128] sm:$0xff] %v5935_v20  ;;  %v14096_v29 = vadd.f32 %v5873_v59, %v2664_v19  ;;  %v5679_v21 = vadd.f32 %v5647_v16, %v5483_v54  ;;  %v16504_v57 = vld [vmem:[#allocation122_spill] sm:$0xff]  ;;  %v2666_v6 = vld [vmem:[%s16473_s22 + $0x48] sm:$0xff]  ;;  %v5552_v7 = vpop.permute.xlu1 %5551 }
 0x737   : > { %v5485_v41 = vadd.f32 %v5453_v13, %v5289_v28  ;;  %v5291_v9 = vadd.f32 %v5259_v35, %v5095_v61  ;;  %v5455_v44 = vmul.f32 %v13530_v60, %v16503_v56  ;;  %v5261_v22 = vmul.f32 %v13484_v62, %v16504_v57  ;;  %v16505_v35 = vld [vmem:[#allocation56_spill] sm:$0xff]  ;;  %v16506_v16 = vld [vmem:[#allocation70_spill] sm:$0xff] }
 0x738   : > { %v5937_v31 = vmul.f32 %v14096_v29, %v16481_v2  ;;  %v5875_v20 = vadd.f32 %v5843_v32, %v5679_v21  ;;  %v5649_v19 = vmul.f32 %v13515_v25, %v5552_v7  ;;  %v5845_v54 = vmul.f32 %v13934_v49, %v13970_v43  ;;  %v16507_v0 = vld [vmem:[#allocation238_spill] sm:$0xff]  ;;  %v16508_v57 = vld [vmem:[#allocation268_spill] sm:$0xff]  ;;  %v16510_v7 = vld [vmem:[#allocation387_spill] sm:$0xff] }
 0x739   : > { %v5097_v28 = vadd.f32 %v5065_v14, %v4901_v30  ;;  %v4903_v13 = vadd.f32 %v4871_v4, %v13999_v33  ;;  %v5067_v59 = vmul.f32 %v13466_v27, %v16505_v35  ;;  %v4873_v61 = vmul.f32 %v13433_v5, %v16506_v16  ;;  %v16509_v14 = vld [vmem:[#allocation355_spill] sm:$0xff] }
 0x73a   : > { %v4519_v56 = vadd.f32 %v4487_v3, %v16507_v0  ;;  %v14120_v32 = vmul.f32 %v13357_v53, %v16508_v57  ;;  %5969 = vst [vmem:[#allocation12 + $0x138] sm:$0xff] %v5937_v31  ;;  %v14122_v21 = vadd.f32 %v5875_v20, %v2666_v6  ;;  %v5681_v43 = vadd.f32 %v5649_v19, %v5485_v41  ;;  %v2668_v3 = vld [vmem:[%s16473_s22 + $0x58] sm:$0xff]  ;;  %v16512_v19 = vld [vmem:[#allocation72_spill] sm:$0xff] }
 0x73b   : > { %v5487_v30 = vadd.f32 %v5455_v44, %v5291_v9  ;;  %v5293_v33 = vadd.f32 %v5261_v22, %v5097_v28  ;;  %v5457_v4 = vmul.f32 %v13530_v60, %v16509_v14  ;;  %v5263_v35 = vmul.f32 %v13484_v62, %v16510_v7  ;;  %v5560_v16 = vpop.permute.xlu1 %5559  ;;  %v16511_v22 = vld [vmem:[#allocation286_spill] sm:$0xff]  ;;  %v16513_v14 = vld [vmem:[#allocation85_spill] sm:$0xff] }
 0x73c   : > { %v5939_v0 = vmul.f32 %v14122_v21, %v16481_v2  ;;  %v5877_v31 = vadd.f32 %v5845_v54, %v5681_v43  ;;  %v5651_v6 = vmul.f32 %v13515_v25, %v5560_v16  ;;  %v5847_v41 = vmul.f32 %v13934_v49, %v14005_v51 }
 0x73d   : > { %v5099_v9 = vadd.f32 %v5067_v59, %v4903_v13  ;;  %v4905_v44 = vadd.f32 %v4873_v61, %v14017_v55  ;;  %v5069_v20 = vmul.f32 %v13466_v27, %v16511_v22  ;;  %v4875_v28 = vmul.f32 %v13433_v5, %v16512_v19  ;;  %v16514_v13 = vld [vmem:[#allocation367_spill] sm:$0xff] }
 0x73e   : > { %v4715_v57 = vadd.f32 %v14024_v24, %v4519_v56  ;;  %v4489_v7 = vmul.f32 %v13237_v45, %v16513_v14  ;;  %5971 = vst [vmem:[#allocation12 + $0x148] sm:$0xff] %v5939_v0  ;;  %v14144_v54 = vadd.f32 %v5877_v31, %v2668_v3  ;;  %v5683_v43 = vadd.f32 %v5651_v6, %v5487_v30  ;;  %v16515_v59 = vld [vmem:[#allocation103_spill] sm:$0xff]  ;;  %v14153_v56 = vpop.permute.xlu0 %5787  ;;  %v16518_v14 = vld [vmem:[#allocation166_spill] sm:$0xff] }
 0x73f   : > { %v5489_v16 = vadd.f32 %v5457_v4, %v5293_v33  ;;  %v5295_v51 = vadd.f32 %v5263_v35, %v5099_v9  ;;  %v5459_v55 = vmul.f32 %v13530_v60, %v16514_v13  ;;  %v5265_v61 = vmul.f32 %v13484_v62, %v16515_v59  ;;  %v2670_v22 = vld [vmem:[%s16473_s22 + $0x68] sm:$0xff]  ;;  %v5568_v24 = vpop.permute.xlu1 %5567  ;;  %v16517_v9 = vld [vmem:[#allocation108_spill] sm:$0xff]  ;;  %v16519_v59 = vld [vmem:[#allocation153_spill] sm:$0xff] }
 0x740   : > { %v5941_v3 = vmul.f32 %v14144_v54, %v16481_v2  ;;  %v5879_v0 = vadd.f32 %v5847_v41, %v5683_v43  ;;  %v5653_v30 = vmul.f32 %v13515_v25, %v5568_v24  ;;  %v5849_v33 = vmul.f32 %v13934_v49, %v14041_v1  ;;  %v16516_v31 = vld [vmem:[#allocation59_spill] sm:$0xff] }
 0x741   : > { %v5101_v4 = vadd.f32 %v5069_v20, %v4905_v44  ;;  %v4907_v35 = vadd.f32 %v4875_v28, %v14043_v26  ;;  %v5071_v6 = vmul.f32 %v13466_v27, %v16516_v31  ;;  %v4877_v19 = vmul.f32 %v13433_v5, %v16517_v9  ;;  %v16520_v20 = vld [vmem:[#allocation368_spill] sm:$0xff] }
 0x742   : > { %v4521_v13 = vadd.f32 %v4489_v7, %v16518_v14  ;;  %v14168_v8 = vmul.f32 %v13357_v53, %v16519_v59  ;;  %5973 = vst [vmem:[#allocation12 + $0x158] sm:$0xff] %v5941_v3  ;;  %v14170_v41 = vadd.f32 %v5879_v0, %v2670_v22  ;;  %v5685_v43 = vadd.f32 %v5653_v30, %v5489_v16  ;;  %v16521_v28 = vld [vmem:[#allocation388_spill] sm:$0xff]  ;;  %v2672_v7 = vld [vmem:[%s16473_s22 + $0x78] sm:$0xff]  ;;  %v16523_v30 = vld [vmem:[#allocation298_spill] sm:$0xff]  ;;  %v5796_v9 = vpop.permute.xlu0 %5795 }
 0x743   : > { %v5491_v1 = vadd.f32 %v5459_v55, %v5295_v51  ;;  %v5297_v44 = vadd.f32 %v5265_v61, %v5101_v4  ;;  %v5461_v26 = vmul.f32 %v13530_v60, %v16520_v20  ;;  %v5267_v24 = vmul.f32 %v13484_v62, %v16521_v28  ;;  %v5576_v31 = vpop.permute.xlu1 %5575  ;;  %v16522_v61 = vld [vmem:[#allocation197_spill] sm:$0xff] }
 0x744   : > { %v5943_v53 = vmul.f32 %v14170_v41, %v16481_v2  ;;  %v5881_v3 = vadd.f32 %v5849_v33, %v5685_v43  ;;  %v5655_v22 = vmul.f32 %v13515_v25, %v5576_v31  ;;  %v5851_v16 = vmul.f32 %v13934_v49, %v14080_v37  ;;  %v16524_v59 = vld [vmem:[#allocation213_spill] sm:$0xff]  ;;  %v2674_v31 = vld [vmem:[%s16473_s22 + $0x88] sm:$0xff] }
 0x745   : > { %v5103_v51 = vadd.f32 %v5071_v6, %v4907_v35  ;;  %v4909_v55 = vadd.f32 %v4877_v19, %v14092_v34  ;;  %v5073_v0 = vmul.f32 %v13466_v27, %v16522_v61  ;;  %v4879_v4 = vmul.f32 %v13433_v5, %v16523_v30  ;;  %v16525_v6 = vld [vmem:[#allocation369_spill] sm:$0xff]  ;;  %v16526_v19 = vld [vmem:[#allocation127_spill] sm:$0xff] }
 0x746   : > { %v4717_v14 = vadd.f32 %v14069_v15, %v4521_v13  ;;  %v4491_v33 = vmul.f32 %v13237_v45, %v16524_v59  ;;  %5975 = vst [vmem:[#allocation12 + $0x168] sm:$0xff] %v5943_v53  ;;  %v14192_v43 = vadd.f32 %v5881_v3, %v2672_v7  ;;  %v5687_v20 = vadd.f32 %v5655_v22, %v5491_v1  ;;  %v16528_v22 = vld [vmem:[#allocation112_spill] sm:$0xff]  ;;  %v16529_v61 = vld [vmem:[#allocation169_spill] sm:$0xff]  ;;  %v16530_v59 = vld [vmem:[#allocation263_spill] sm:$0xff] }
 0x747   : > { %v5493_v37 = vadd.f32 %v5461_v26, %v5297_v44  ;;  %v5299_v35 = vadd.f32 %v5267_v24, %v5103_v51  ;;  %v5463_v34 = vmul.f32 %v13530_v60, %v16525_v6  ;;  %v5269_v28 = vmul.f32 %v13484_v62, %v16526_v19  ;;  %v5584_v15 = vpop.permute.xlu1 %5583  ;;  %v16527_v24 = vld [vmem:[#allocation198_spill] sm:$0xff] }
 0x748   : > { %v5945_v13 = vmul.f32 %v14192_v43, %v16481_v2  ;;  %v5883_v53 = vadd.f32 %v5851_v16, %v5687_v20  ;;  %v5657_v7 = vmul.f32 %v13515_v25, %v5584_v15  ;;  %v5853_v1 = vmul.f32 %v13934_v49, %v14115_v58  ;;  %v16531_v58 = vld [vmem:[#allocation372_spill] sm:$0xff] }
 0x749   : > { %v5105_v44 = vadd.f32 %v5073_v0, %v4909_v55  ;;  %v4911_v26 = vadd.f32 %v4879_v4, %v4715_v57  ;;  %v5075_v3 = vmul.f32 %v13466_v27, %v16527_v24  ;;  %v4881_v51 = vmul.f32 %v13433_v5, %v16528_v22  ;;  %v16532_v55 = vld [vmem:[#allocation145_spill] sm:$0xff]  ;;  %v5804_v24 = vpop.permute.xlu0 %5803 }
 0x74a   : > { %v4523_v30 = vadd.f32 %v4491_v33, %v16529_v61  ;;  %v4493_v6 = vmul.f32 %v13237_v45, %v16530_v59  ;;  %5977 = vst [vmem:[#allocation12 + $0x178] sm:$0xff] %v5945_v13  ;;  %v14213_v16 = vadd.f32 %v5883_v53, %v2674_v31  ;;  %v5689_v20 = vadd.f32 %v5657_v7, %v5493_v37  ;;  %v2676_v4 = vld [vmem:[%s16473_s22 + $0x98] sm:$0xff]  ;;  %v16533_v13 = vld [vmem:[#allocation314_spill] sm:$0xff]  ;;  %v16535_v61 = vld [vmem:[#allocation171_spill] sm:$0xff] }
 0x74b   : > { %v5495_v19 = vadd.f32 %v5463_v34, %v5299_v35  ;;  %v5301_v15 = vadd.f32 %v5269_v28, %v5105_v44  ;;  %v5465_v57 = vmul.f32 %v13530_v60, %v16531_v58  ;;  %v5271_v0 = vmul.f32 %v13484_v62, %v16532_v55  ;;  %v5592_v33 = vpop.permute.xlu1 %5591  ;;  %v16534_v7 = vld [vmem:[#allocation206_spill] sm:$0xff] }
 0x74c   : > { %v5947_v45 = vmul.f32 %v14213_v16, %v16481_v2  ;;  %v5885_v31 = vadd.f32 %v5853_v1, %v5689_v20  ;;  %v5659_v37 = vmul.f32 %v13515_v25, %v5592_v33  ;;  %v5855_v35 = vmul.f32 %v13934_v49, %v14153_v56  ;;  %v16536_v33 = vld [vmem:[#allocation119_spill] sm:$0xff] }
 0x74d   : > { %v5107_v34 = vadd.f32 %v5075_v3, %v4911_v26  ;;  %v4913_v28 = vadd.f32 %v4881_v51, %v4717_v14  ;;  %v5077_v53 = vmul.f32 %v13466_v27, %v16533_v13  ;;  %v4883_v44 = vmul.f32 %v13433_v5, %v16534_v7  ;;  %v16537_v14 = vld [vmem:[#allocation160_spill] sm:$0xff]  ;;  %v2678_v3 = vld [vmem:[%s16473_s22 + $0xa8] sm:$0xff] }
 0x74e   : > { %v4719_v22 = vadd.f32 %v14120_v32, %v4523_v30  ;;  %v4525_v59 = vadd.f32 %v4493_v6, %v16535_v61  ;;  %5979 = vst [vmem:[#allocation12 + $0x188] sm:$0xff] %v5947_v45  ;;  %v14233_v58 = vadd.f32 %v5885_v31, %v2676_v4  ;;  %v5691_v1 = vadd.f32 %v5659_v37, %v5495_v19  ;;  %v16539_v45 = vld [vmem:[#allocation82_spill] sm:$0xff]  ;;  %v5812_v37 = vpop.permute.xlu0 %5811 }
 0x74f   : > { %v5497_v20 = vadd.f32 %v5465_v57, %v5301_v15  ;;  %v5303_v55 = vadd.f32 %v5271_v0, %v5107_v34  ;;  %v5467_v56 = vmul.f32 %v13530_v60, %v16536_v33  ;;  %v5273_v26 = vmul.f32 %v13484_v62, %v16537_v14  ;;  %v5600_v51 = vpop.permute.xlu1 %5599  ;;  %v16538_v0 = vld [vmem:[#allocation200_spill] sm:$0xff] }
 0x750   : > { %v5949_v32 = vmul.f32 %v14233_v58, %v16481_v2  ;;  %v5887_v30 = vadd.f32 %v5855_v35, %v5691_v1  ;;  %v5661_v6 = vmul.f32 %v13515_v25, %v5600_v51  ;;  %v5857_v19 = vmul.f32 %v13934_v49, %v5796_v9  ;;  %v16540_v1 = vld [vmem:[#allocation99_spill] sm:$0xff] }
 0x751   : > { %v5109_v15 = vadd.f32 %v5077_v53, %v4913_v28  ;;  %v4915_v57 = vadd.f32 %v4883_v44, %v4719_v22  ;;  %v5079_v4 = vmul.f32 %v13466_v27, %v16538_v0  ;;  %v4885_v31 = vmul.f32 %v13433_v5, %v16539_v45  ;;  %v16541_v28 = vld [vmem:[#allocation392_spill] sm:$0xff]  ;;  %v2680_v44 = vld [vmem:[%s16473_s22 + $0xb8] sm:$0xff] }
 0x752   : > { %v4721_v34 = vadd.f32 %v14168_v8, %v4525_v59  ;;  %5981 = vst [vmem:[#allocation12 + $0x198] sm:$0xff] %v5949_v32  ;;  %v14251_v13 = vadd.f32 %v5887_v30, %v2678_v3  ;;  %v5693_v7 = vadd.f32 %v5661_v6, %v5497_v20  ;;  %v5499_v35 = vadd.f32 %v5467_v56, %v5303_v55  ;;  %v16542_v56 = vld [vmem:[#allocation111_spill] sm:$0xff]  ;;  %v16543_v30 = vld [vmem:[#allocation125_spill] sm:$0xff]  ;;  %v5820_v0 = vpop.permute.xlu0 %5819 }
 0x753   : > { %v5305_v61 = vadd.f32 %v5273_v26, %v5109_v15  ;;  %v5469_v9 = vmul.f32 %v13530_v60, %v16540_v1  ;;  %v5275_v53 = vmul.f32 %v13484_v62, %v16541_v28  ;;  %v5608_v5 = vpop.permute.xlu1 %5607  ;;  %v5859_v20 = vmul.f32 %v13934_v49, %v5804_v24  ;;  %v16544_v15 = vld [vmem:[#allocation394_spill] sm:$0xff]  ;;  %v2682_v24 = vld [vmem:[%s16473_s22 + $0xc8] sm:$0xff]  ;;  %v16545_v1 = vld [vmem:[#allocation105_spill] sm:$0xff] }
 0x754   : > { %v5951_v8 = vmul.f32 %v14251_v13, %v16481_v2  ;;  %v5889_v22 = vadd.f32 %v5857_v19, %v5693_v7  ;;  %v5663_v59 = vmul.f32 %v13515_v25, %v5608_v5  ;;  %v5111_v55 = vadd.f32 %v5079_v4, %v4915_v57  ;;  %v2684_v28 = vld [vmem:[%s16473_s22 + $0xd8] sm:$0xff] }
 0x755   : > { %v4917_v33 = vadd.f32 %v4885_v31, %v4721_v34  ;;  %v5081_v14 = vmul.f32 %v13466_v27, %v16542_v56  ;;  %v5501_v51 = vadd.f32 %v5469_v9, %v5305_v61  ;;  %v5471_v6 = vmul.f32 %v13530_v60, %v16543_v30 }
 0x756   : > { %5983 = vst [vmem:[#allocation12 + $0x1a8] sm:$0xff] %v5951_v8  ;;  %v14266_v26 = vadd.f32 %v5889_v22, %v2680_v44  ;;  %v5695_v3 = vadd.f32 %v5663_v59, %v5499_v35  ;;  %v5307_v32 = vadd.f32 %v5275_v53, %v5111_v55  ;;  %v5277_v19 = vmul.f32 %v13484_v62, %v16544_v15  ;;  %v5828_v22 = vpop.permute.xlu0 %5827 }
 0x757   : > { %v5616_v57 = vpop.permute.xlu1 %5615  ;;  %v5861_v31 = vmul.f32 %v13934_v49, %v5812_v37  ;;  %v5113_v34 = vadd.f32 %v5081_v14, %v4917_v33  ;;  %v5473_v9 = vmul.f32 %v13530_v60, %v16545_v1  ;;  %v5863_v8 = vmul.f32 %v13934_v49, %v5820_v0  ;;  %v2686_v60 = vld [vmem:[%s16473_s22 + $0xe8] sm:$0xff] }
 0x758   : > { %v5953_v27 = vmul.f32 %v14266_v26, %v16481_v2  ;;  %v5891_v4 = vadd.f32 %v5859_v20, %v5695_v3  ;;  %v5665_v45 = vmul.f32 %v13515_v25, %v5616_v57  ;;  %v5503_v62 = vadd.f32 %v5471_v6, %v5307_v32  ;;  %v2688_v6 = vld [vmem:[%s16473_s22 + $0xf8] sm:$0xff] }
 0x759   : > { %v5309_v61 = vadd.f32 %v5277_v19, %v5113_v34 }
 0x75a   : > { %5985 = vst [vmem:[#allocation12 + $0x1b8] sm:$0xff] %v5953_v27  ;;  %v14279_v7 = vadd.f32 %v5891_v4, %v2682_v24  ;;  %v5697_v35 = vadd.f32 %v5665_v45, %v5501_v51  ;;  %v5865_v51 = vmul.f32 %v13934_v49, %v5828_v22  ;;  %v2663_v22 = vld [vmem:[%s16473_s22 + $0x30] sm:$0xff] }
 0x75b   : > { %v5624_v53 = vpop.permute.xlu1 %5623  ;;  %v5505_v55 = vadd.f32 %v5473_v9, %v5309_v61 }
 0x75c   : > { %v5955_v44 = vmul.f32 %v14279_v7, %v16481_v2  ;;  %v5893_v5 = vadd.f32 %v5861_v31, %v5697_v35  ;;  %v5667_v37 = vmul.f32 %v13515_v25, %v5624_v53  ;;  %v2659_v35 = vld [vmem:[%s16473_s22 + $0x10] sm:$0xff]  ;;  %v2661_v53 = vld [vmem:[%s16473_s22 + $0x20] sm:$0xff] }
 0x75e   : > { %5987 = vst [vmem:[#allocation12 + $0x1c8] sm:$0xff] %v5955_v44  ;;  %v14290_v59 = vadd.f32 %v5893_v5, %v2684_v28  ;;  %v5699_v20 = vadd.f32 %v5667_v37, %v5503_v62 }
 0x75f   : > { %v5632_v33 = vpop.permute.xlu1 %5631 }
 0x760   : > { %v5957_v56 = vmul.f32 %v14290_v59, %v16481_v2  ;;  %v5895_v14 = vadd.f32 %v5863_v8, %v5699_v20  ;;  %v5669_v3 = vmul.f32 %v13515_v25, %v5632_v33  ;;  %v2658_v25 = vld [vmem:[%s16473_s22 + $0x8] sm:$0xff] }
 0x762   : > { %5989 = vst [vmem:[#allocation12 + $0x1d8] sm:$0xff] %v5957_v56  ;;  %v14299_v32 = vadd.f32 %v5895_v14, %v2686_v60  ;;  %v5701_v30 = vadd.f32 %v5669_v3, %v5505_v55  ;;  %v2665_v56 = vld [vmem:[%s16473_s22 + $0x40] sm:$0xff] }
 0x764   : > { %v5959_v15 = vmul.f32 %v14299_v32, %v16481_v2  ;;  %v5897_v19 = vadd.f32 %v5865_v51, %v5701_v30 }
 0x765   : > { %v5708_v24 = vpop.permute.xlu1 %5707 }
 0x766   : > { %v5835_v57 = vmul.f32 %v13934_v49, %v5708_v24  ;;  %5991 = vst [vmem:[#allocation12 + $0x1e8] sm:$0xff] %v5959_v15  ;;  %v14307_v0 = vadd.f32 %v5897_v19, %v2688_v6  ;;  %v2667_v6 = vld [vmem:[%s16473_s22 + $0x50] sm:$0xff] }
 0x768   : > { %v5867_v27 = vadd.f32 %v5835_v57, %v13567_v18  ;;  %v5961_v4 = vmul.f32 %v14307_v0, %v16481_v2 }
 0x769   : > { %v5712_v45 = vpop.permute.xlu1 %5711 }
 0x76a   : > { %v5899_v31 = vadd.f32 %v5867_v27, %v2658_v25  ;;  %v5836_v34 = vmul.f32 %v13934_v49, %v5712_v45  ;;  %5993 = vst [vmem:[#allocation12 + $0x1f8] sm:$0xff] %v5961_v4  ;;  %v2669_v25 = vld [vmem:[%s16473_s22 + $0x60] sm:$0xff] }
 0x76c   : > { %v5931_v62 = vmul.f32 %v5899_v31, %v16481_v2  ;;  %v5994_v61 = vpack.c.bf16 %v5899_v31, %v13994_v38  ;;  %v5868_v1 = vadd.f32 %v5836_v34, %v13996_v17  ;;  %v2671_v34 = vld [vmem:[%s16473_s22 + $0x70] sm:$0xff] }
 0x76d   : > { %v5720_v9 = vpop.permute.xlu1 %5719 }
 0x76e   : > { %5963 = vst [vmem:[#allocation12 + $0x108] sm:$0xff] %v5931_v62  ;;  %6010 = vst [vmem:[#allocation2 + $0x80] sm:$0xff] %v5994_v61  ;;  %v5900_v18 = vadd.f32 %v5868_v1, %v2659_v35  ;;  %v5838_v28 = vmul.f32 %v13934_v49, %v5720_v9  ;;  %v2673_v9 = vld [vmem:[%s16473_s22 + $0x80] sm:$0xff] }
 0x770   : > { %v5932_v44 = vmul.f32 %v5900_v18, %v16481_v2  ;;  %v5995_v5 = vpack.c.bf16 %v14047_v23, %v5900_v18  ;;  %v5870_v37 = vadd.f32 %v5838_v28, %v13611_v10 }
 0x771   : > { %v5728_v8 = vpop.permute.xlu1 %5727 }
 0x772   : > { %5964 = vst [vmem:[#allocation12 + $0x110] sm:$0xff] %v5932_v44  ;;  %6011 = vst [vmem:[#allocation2 + $0x88] sm:$0xff] %v5995_v5  ;;  %v5902_v38 = vadd.f32 %v5870_v37, %v2661_v53  ;;  %v5840_v17 = vmul.f32 %v13934_v49, %v5728_v8  ;;  %v2675_v5 = vld [vmem:[%s16473_s22 + $0x90] sm:$0xff] }
 0x774   : > { %v5934_v20 = vmul.f32 %v5902_v38, %v16481_v2  ;;  %v5996_v55 = vpack.c.bf16 %v14071_v63, %v5902_v38  ;;  %v5872_v60 = vadd.f32 %v5840_v17, %v13636_v42 }
 0x775   : > { %v5736_v33 = vpop.permute.xlu1 %5735 }
 0x776   : > { %5966 = vst [vmem:[#allocation12 + $0x120] sm:$0xff] %v5934_v20  ;;  %6012 = vst [vmem:[#allocation2 + $0x90] sm:$0xff] %v5996_v55  ;;  %v5904_v10 = vadd.f32 %v5872_v60, %v2663_v22  ;;  %v5842_v23 = vmul.f32 %v13934_v49, %v5736_v33  ;;  %v2677_v22 = vld [vmem:[%s16473_s22 + $0xa0] sm:$0xff] }
 0x778   : > { %v5936_v14 = vmul.f32 %v5904_v10, %v16481_v2  ;;  %v5997_v3 = vpack.c.bf16 %v14096_v29, %v5904_v10  ;;  %v5874_v51 = vadd.f32 %v5842_v23, %v13660_v11  ;;  %v2679_v10 = vld [vmem:[%s16473_s22 + $0xb0] sm:$0xff] }
 0x779   : > { %v5744_v30 = vpop.permute.xlu1 %5743 }
 0x77a   : > { %5968 = vst [vmem:[#allocation12 + $0x130] sm:$0xff] %v5936_v14  ;;  %6013 = vst [vmem:[#allocation2 + $0x98] sm:$0xff] %v5997_v3  ;;  %v5906_v42 = vadd.f32 %v5874_v51, %v2665_v56  ;;  %v5844_v63 = vmul.f32 %v13934_v49, %v5744_v30  ;;  %v2681_v51 = vld [vmem:[%s16473_s22 + $0xc0] sm:$0xff] }
 0x77c   : > { %v5938_v15 = vmul.f32 %v5906_v42, %v16481_v2  ;;  %v5998_v19 = vpack.c.bf16 %v14122_v21, %v5906_v42  ;;  %v5876_v24 = vadd.f32 %v5844_v63, %v13687_v50 }
 0x77d   : > { %v5752_v57 = vpop.permute.xlu1 %5751 }
 0x77e   : > { %5970 = vst [vmem:[#allocation12 + $0x140] sm:$0xff] %v5938_v15  ;;  %6014 = vst [vmem:[#allocation2 + $0xa0] sm:$0xff] %v5998_v19  ;;  %v5908_v11 = vadd.f32 %v5876_v24, %v2667_v6  ;;  %v5846_v29 = vmul.f32 %v13934_v49, %v5752_v57  ;;  %v2683_v15 = vld [vmem:[%s16473_s22 + $0xd0] sm:$0xff] }
 0x780   : > { %v5940_v27 = vmul.f32 %v5908_v11, %v16481_v2  ;;  %v5999_v4 = vpack.c.bf16 %v14144_v54, %v5908_v11  ;;  %v5878_v45 = vadd.f32 %v5846_v29, %v13713_v40  ;;  %v2685_v29 = vld [vmem:[%s16473_s22 + $0xe0] sm:$0xff] }
 0x781   : > { %v5760_v31 = vpop.permute.xlu1 %5759 }
 0x782   : > { %5972 = vst [vmem:[#allocation12 + $0x150] sm:$0xff] %v5940_v27  ;;  %6015 = vst [vmem:[#allocation2 + $0xa8] sm:$0xff] %v5999_v4  ;;  %v5910_v50 = vadd.f32 %v5878_v45, %v2669_v25  ;;  %v5848_v21 = vmul.f32 %v13934_v49, %v5760_v31  ;;  %v16546_v4 = vld [vmem:[#allocation173_spill] sm:$0xff] }
 0x784   : > { %v5942_v35 = vmul.f32 %v5910_v50, %v16481_v2  ;;  %v6000_v62 = vpack.c.bf16 %v14170_v41, %v5910_v50  ;;  %v5880_v61 = vadd.f32 %v5848_v21, %v13738_v52  ;;  %v2687_v50 = vld [vmem:[%s16473_s22 + $0xf0] sm:$0xff] }
 0x785   : > { %v5768_v1 = vpop.permute.xlu1 %5767 }
 0x786   : > { %5974 = vst [vmem:[#allocation12 + $0x160] sm:$0xff] %v5942_v35  ;;  %6016 = vst [vmem:[#allocation2 + $0xb0] sm:$0xff] %v6000_v62  ;;  %v5912_v40 = vadd.f32 %v5880_v61, %v2671_v34  ;;  %v5850_v54 = vmul.f32 %v13934_v49, %v5768_v1  ;;  %v16547_v35 = vld [vmem:[#allocation75_spill] sm:$0xff] }
 0x788   : > { %v5944_v18 = vmul.f32 %v5912_v40, %v16481_v2  ;;  %v6001_v28 = vpack.c.bf16 %v14192_v43, %v5912_v40  ;;  %v5882_v53 = vadd.f32 %v5850_v54, %v13765_v39 }
 0x789   : > { %v5776_v44 = vpop.permute.xlu1 %5775 }
 0x78a   : > { %5976 = vst [vmem:[#allocation12 + $0x170] sm:$0xff] %v5944_v18  ;;  %6017 = vst [vmem:[#allocation2 + $0xb8] sm:$0xff] %v6001_v28  ;;  %v5914_v52 = vadd.f32 %v5882_v53, %v2673_v9  ;;  %v5852_v41 = vmul.f32 %v13934_v49, %v5776_v44 }
 0x78c   : > { %v5946_v37 = vmul.f32 %v5914_v52, %v16481_v2  ;;  %v6002_v8 = vpack.c.bf16 %v14213_v16, %v5914_v52  ;;  %v5884_v38 = vadd.f32 %v5852_v41, %v13793_v48 }
 0x78d   : > { %v5784_v17 = vpop.permute.xlu1 %5783 }
 0x78e   : > { %5978 = vst [vmem:[#allocation12 + $0x180] sm:$0xff] %v5946_v37  ;;  %6018 = vst [vmem:[#allocation2 + $0xc0] sm:$0xff] %v6002_v8  ;;  %v5916_v39 = vadd.f32 %v5884_v38, %v2675_v5  ;;  %v5854_v43 = vmul.f32 %v13934_v49, %v5784_v17 }
 0x790   : > { %v5948_v20 = vmul.f32 %v5916_v39, %v16481_v2  ;;  %v6003_v55 = vpack.c.bf16 %v14233_v58, %v5916_v39  ;;  %v5886_v60 = vadd.f32 %v5854_v43, %v13818_v36 }
 0x791   : > { %v5792_v33 = vpop.permute.xlu1 %5791 }
 0x792   : > { %5980 = vst [vmem:[#allocation12 + $0x190] sm:$0xff] %v5948_v20  ;;  %6019 = vst [vmem:[#allocation2 + $0xc8] sm:$0xff] %v6003_v55  ;;  %v5918_v48 = vadd.f32 %v5886_v60, %v2677_v22  ;;  %v5856_v16 = vmul.f32 %v13934_v49, %v5792_v33 }
 0x794   : > { %v5950_v23 = vmul.f32 %v5918_v48, %v16481_v2  ;;  %v6004_v56 = vpack.c.bf16 %v14251_v13, %v5918_v48  ;;  %v5888_v14 = vadd.f32 %v5856_v16, %v13843_v12 }
 0x795   : > { %v5800_v3 = vpop.permute.xlu1 %5799 }
 0x796   : > { %5982 = vst [vmem:[#allocation12 + $0x1a0] sm:$0xff] %v5950_v23  ;;  %6020 = vst [vmem:[#allocation2 + $0xd0] sm:$0xff] %v6004_v56  ;;  %v5920_v36 = vadd.f32 %v5888_v14, %v2679_v10  ;;  %v5858_v58 = vmul.f32 %v13934_v49, %v5800_v3 }
 0x798   : > { %v5952_v30 = vmul.f32 %v5920_v36, %v16481_v2  ;;  %v6005_v42 = vpack.c.bf16 %v14266_v26, %v5920_v36  ;;  %v5890_v63 = vadd.f32 %v5858_v58, %v13868_v47 }
 0x799   : > { %v5808_v6 = vpop.permute.xlu1 %5807 }
 0x79a   : > { %5984 = vst [vmem:[#allocation12 + $0x1b0] sm:$0xff] %v5952_v30  ;;  %6021 = vst [vmem:[#allocation2 + $0xd8] sm:$0xff] %v6005_v42  ;;  %v5922_v12 = vadd.f32 %v5890_v63, %v2681_v51  ;;  %v5860_v13 = vmul.f32 %v13934_v49, %v5808_v6 }
 0x79c   : > { %v5954_v19 = vmul.f32 %v5922_v12, %v16481_v2  ;;  %v6006_v24 = vpack.c.bf16 %v14279_v7, %v5922_v12  ;;  %v5892_v57 = vadd.f32 %v5860_v13, %v13894_v46 }
 0x79d   : > { %v5816_v11 = vpop.permute.xlu1 %5815 }
 0x79e   : > { %5986 = vst [vmem:[#allocation12 + $0x1c0] sm:$0xff] %v5954_v19  ;;  %6022 = vst [vmem:[#allocation2 + $0xe0] sm:$0xff] %v6006_v24  ;;  %v5924_v47 = vadd.f32 %v5892_v57, %v2683_v15  ;;  %v5862_v26 = vmul.f32 %v13934_v49, %v5816_v11 }
 0x7a0   : > { %v5956_v25 = vmul.f32 %v5924_v47, %v16481_v2  ;;  %v6007_v27 = vpack.c.bf16 %v14290_v59, %v5924_v47  ;;  %v5894_v45 = vadd.f32 %v5862_v26, %v16546_v4 }
 0x7a1   : > { %v5824_v31 = vpop.permute.xlu1 %5823 }
 0x7a2   : > { %5988 = vst [vmem:[#allocation12 + $0x1d0] sm:$0xff] %v5956_v25  ;;  %6023 = vst [vmem:[#allocation2 + $0xe8] sm:$0xff] %v6007_v27  ;;  %v5926_v46 = vadd.f32 %v5894_v45, %v2685_v29  ;;  %v5864_v7 = vmul.f32 %v13934_v49, %v5824_v31 }
 0x7a4   : > { %v5958_v21 = vmul.f32 %v5926_v46, %v16481_v2  ;;  %v6008_v34 = vpack.c.bf16 %v14299_v32, %v5926_v46  ;;  %v5896_v62 = vadd.f32 %v5864_v7, %v16547_v35 }
 0x7a6   : > { %5990 = vst [vmem:[#allocation12 + $0x1e0] sm:$0xff] %v5958_v21  ;;  %6024 = vst [vmem:[#allocation2 + $0xf0] sm:$0xff] %v6008_v34  ;;  %v5928_v59 = vadd.f32 %v5896_v62, %v2687_v50 }
 0x7a8   : > { %v5960_v61 = vmul.f32 %v5928_v59, %v16481_v2  ;;  %v6009_v1 = vpack.c.bf16 %v14307_v0, %v5928_v59 }
 0x7aa   : > { %5992 = vst [vmem:[#allocation12 + $0x1f0] sm:$0xff] %v5960_v61  ;;  %6025 = vst [vmem:[#allocation2 + $0xf8] sm:$0xff] %v6009_v1 }
 0x7ab PF: > { %p6026_p5 = scmp.lt.s32.totalorder %s7630_s16, 0  ;;  %s6027_s4 = ssub.s32 0, %s7630_s16 }
 0x7ac   : > { %s6877_s26 = smin.u32 %s7630_s16, %s6027_s4  ;;  %p6880_p8 = scmp.ne.s32.totalorder %s7622_s29, 0 }
 0x7ad   : > { %s6029_s21 = sand.u32 1, %s6877_s26   ;;  %v7671_v49 = vmov (!%p6880_p8), 0.0  }
 0x7ae   : > { %s6030_s2 = ssub.s32 0, %s6029_s21  ;;  %6041 = sbr.rel (%p6880_p8) target bundleno = 1982 (0x7be), region = 88  ;;  %6042 = vst [vmem:[#allocation3] sm:$0xff] (!%p6880_p8), %v7671_v49  ;;  %6043 = vst [vmem:[#allocation3 + $0x8] sm:$0xff] (!%p6880_p8), %v7671_v49 }
 0x7af   : > { %s16579_s2 = smov (!%p6026_p5, %s6030_s2), %s6029_s21  ;;  %6044 = vst [vmem:[#allocation3 + $0x10] sm:$0xff] (!%p6880_p8), %v7671_v49  ;;  %6045 = vst [vmem:[#allocation3 + $0x18] sm:$0xff] (!%p6880_p8), %v7671_v49 }
 0x7b0   : > { %p6879_p1 = scmp.lt.s32.totalorder %s16579_s2, 0  ;;  %s6036_s3 = sadd.s32 2, %s16579_s2  ;;  %6046 = vst [vmem:[#allocation3 + $0x20] sm:$0xff] (!%p6880_p8), %v7671_v49  ;;  %6047 = vst [vmem:[#allocation3 + $0x28] sm:$0xff] (!%p6880_p8), %v7671_v49 }
 0x7b1   : > { %6048 = vst [vmem:[#allocation3 + $0x30] sm:$0xff] (!%p6880_p8), %v7671_v49  ;;  %6049 = vst [vmem:[#allocation3 + $0x38] sm:$0xff] (!%p6880_p8), %v7671_v49 }
 0x7b2   : > { %s16581_s3 = smov (!%p6879_p1, %s6036_s3), %s16579_s2  ;;  %6050 = vst [vmem:[#allocation3 + $0x40] sm:$0xff] (!%p6880_p8), %v7671_v49  ;;  %6051 = vst [vmem:[#allocation3 + $0x48] sm:$0xff] (!%p6880_p8), %v7671_v49 }
 0x7b3   : > { %s6038_s28 = ssub.s32 1, %s16581_s3  ;;  %6052 = vst [vmem:[#allocation3 + $0x50] sm:$0xff] (!%p6880_p8), %v7671_v49  ;;  %6053 = vst [vmem:[#allocation3 + $0x58] sm:$0xff] (!%p6880_p8), %v7671_v49 }
 0x7b4   : > { %6054 = vst [vmem:[#allocation3 + $0x60] sm:$0xff] (!%p6880_p8), %v7671_v49  ;;  %6055 = vst [vmem:[#allocation3 + $0x68] sm:$0xff] (!%p6880_p8), %v7671_v49 }
 0x7b5   : > { %6056 = vst [vmem:[#allocation3 + $0x70] sm:$0xff] %v7671_v49  ;;  %6057 = vst [vmem:[#allocation3 + $0x78] sm:$0xff] %v7671_v49 }
 0x7b6   : > { %6058 = vst [vmem:[#allocation3 + $0x80] sm:$0xff] %v7671_v49  ;;  %6059 = vst [vmem:[#allocation3 + $0x88] sm:$0xff] %v7671_v49 }
 0x7b7   : > { %6060 = vst [vmem:[#allocation3 + $0x90] sm:$0xff] %v7671_v49  ;;  %6061 = vst [vmem:[#allocation3 + $0x98] sm:$0xff] %v7671_v49 }
 0x7b8   : > { %6062 = vst [vmem:[#allocation3 + $0xa0] sm:$0xff] %v7671_v49  ;;  %6063 = vst [vmem:[#allocation3 + $0xa8] sm:$0xff] %v7671_v49 }
 0x7b9   : > { %6064 = vst [vmem:[#allocation3 + $0xb0] sm:$0xff] %v7671_v49  ;;  %6065 = vst [vmem:[#allocation3 + $0xb8] sm:$0xff] %v7671_v49 }
 0x7ba   : > { %6066 = vst [vmem:[#allocation3 + $0xc0] sm:$0xff] %v7671_v49  ;;  %6067 = vst [vmem:[#allocation3 + $0xc8] sm:$0xff] %v7671_v49 }
 0x7bb   : > { %6068 = vst [vmem:[#allocation3 + $0xd0] sm:$0xff] %v7671_v49  ;;  %6069 = vst [vmem:[#allocation3 + $0xd8] sm:$0xff] %v7671_v49 }
 0x7bc   : > { %6070 = vst [vmem:[#allocation3 + $0xe0] sm:$0xff] %v7671_v49  ;;  %6071 = vst [vmem:[#allocation3 + $0xe8] sm:$0xff] %v7671_v49 }
 0x7bd   : > { %6072 = vst [vmem:[#allocation3 + $0xf0] sm:$0xff] %v7671_v49  ;;  %6073 = vst [vmem:[#allocation3 + $0xf8] sm:$0xff] %v7671_v49 }
 0x7be PF: > { %s6881_s13 = sshll.u32 %s7626_s30, 1 }
 0x7bf   : > { %s6075_s24 = sadd.s32 %s7622_s29, %s6881_s13 }
 0x7c0   : > { %s6076_s19 = sld [smem:[#allocation6 + %s6075_s24]] }
 0x7c6   : > { %p6882_p10 = scmp.eq.s32.totalorder %s6076_s19, 0 }
 0x7c7   : > { %s6883_s25 = sshll.u32 (!%p6882_p10), %s16581_s3, 9  ;;  %s6884_s17 = sshll.u32 (!%p6882_p10), %s7622_s29, 8  ;;  %v7413_v2 = vld [vmem:[%s7940_s23 + $0x4] ss:$8 sps:$4 sm:$0xff] (!%p6882_p10)   ;;  %v7411_v43 = vld [vmem:[%s7940_s23] ss:$8 sps:$4 sm:$0xff] (!%p6882_p10)  }
 0x7c8   : > { %6080 = sbr.rel (%p6882_p10) target bundleno = 2305 (0x901), region = 92  ;;  %s6083_s1 = sadd.s32 (!%p6882_p10), %s6884_s17, %s6883_s25  ;;  %v7416_v32 = vld [vmem:[%s7940_s23 + $0x84] ss:$8 sps:$4 sm:$0xff] (!%p6882_p10)   ;;  %6360 = vmatprep.mubr.bf16.mxu0 (!%p6882_p10), %v7413_v2  ;;  %v7414_v22 = vld [vmem:[%s7940_s23 + $0x80] ss:$8 sps:$4 sm:$0xff] (!%p6882_p10)  }
 0x7c9   : > { %s6084_s12 = sshra.s32 (!%p6882_p10), %s6083_s1, 4  ;;  %6424 = vmatprep.mubr.bf16.mxu1 (!%p6882_p10), %v7416_v32  ;;  %v7417_v20 = vld [vmem:[%s7940_s23 + $0x14] ss:$8 sps:$4 sm:$0xff] (!%p6882_p10)   ;;  %v7421_v60 = vld [vmem:[%s7940_s23 + $0x10] ss:$8 sps:$4 sm:$0xff] (!%p6882_p10)   ;;  %v6104_v4 = vld [vmem:[#allocation3] sm:$0xff] (!%p6882_p10) }
 0x7ca   : > { %s6885_s4 = sshll.u32 (!%p6882_p10), %s6084_s12, 3  ;;  %v7419_v55 = vld [vmem:[%s7940_s23 + $0x94] ss:$8 sps:$4 sm:$0xff] (!%p6882_p10)   ;;  %v7422_v33 = vld [vmem:[%s7940_s23 + $0x90] ss:$8 sps:$4 sm:$0xff] (!%p6882_p10)   ;;  %v6120_v31 = vld [vmem:[#allocation3 + $0x80] sm:$0xff] (!%p6882_p10) }
 0x7cb   : > { %s14435_s26 = scalar_lea.vmem (!%p6882_p10), [#allocation2], %s6885_s4  ;;  %v7423_v48 = vld [vmem:[%s7940_s23 + $0x24] ss:$8 sps:$4 sm:$0xff] (!%p6882_p10)   ;;  %v7427_v10 = vld [vmem:[%s7940_s23 + $0x20] ss:$8 sps:$4 sm:$0xff] (!%p6882_p10)  }
 0x7cc   : > { %v6096_v0 = vld [vmem:[%s14435_s26 + $0x40] sm:$0xff] (!%p6882_p10)  ;;  %v6097_v54 = vld [vmem:[%s14435_s26 + $0x48] sm:$0xff] (!%p6882_p10)  ;;  %v6098_v18 = vld [vmem:[%s14435_s26 + $0x50] sm:$0xff] (!%p6882_p10) }
 0x7cd   : > { %v6088_v40 = vld [vmem:[%s14435_s26] sm:$0xff] (!%p6882_p10)  ;;  %6927 = vmatprep.subr.bf16.mxu0 (!%p6882_p10), %v6096_v0  ;;  %7039 = vmatprep.subr.bf16.mxu1 (!%p6882_p10), %v6096_v0  ;;  %v6089_v9 = vld [vmem:[%s14435_s26 + $0x8] sm:$0xff] (!%p6882_p10)  ;;  %v6090_v28 = vld [vmem:[%s14435_s26 + $0x10] sm:$0xff] (!%p6882_p10) }
 0x7ce   : > { %6928 = vmatpush3.bf16.msra.mxu0 (!%p6882_p10), %v6088_v40  ;;  %7047 = vmatpush3.bf16.msra.mxu1 (!%p6882_p10), %v6088_v40  ;;  %v6099_v53 = vld [vmem:[%s14435_s26 + $0x58] sm:$0xff] (!%p6882_p10)  ;;  %v6100_v52 = vld [vmem:[%s14435_s26 + $0x60] sm:$0xff] (!%p6882_p10)  ;;  %v6101_v5 = vld [vmem:[%s14435_s26 + $0x68] sm:$0xff] (!%p6882_p10) }
 0x7cf   : > { %6929 = vmatprep.subr.bf16.mxu0 %v6097_v54  ;;  %7040 = vmatprep.subr.bf16.mxu1 %v6097_v54  ;;  %v6091_v44 = vld [vmem:[%s14435_s26 + $0x18] sm:$0xff]  ;;  %v6092_v41 = vld [vmem:[%s14435_s26 + $0x20] sm:$0xff]  ;;  %v6093_v37 = vld [vmem:[%s14435_s26 + $0x28] sm:$0xff] }
 0x7d0   : > { %v6102_v8 = vld [vmem:[%s14435_s26 + $0x70] sm:$0xff]  ;;  %v6103_v17 = vld [vmem:[%s14435_s26 + $0x78] sm:$0xff]  ;;  %v7425_v16 = vld [vmem:[%s7940_s23 + $0xa4] ss:$8 sps:$4 sm:$0xff]  }
 0x7d1   : > { %v6094_v38 = vld [vmem:[%s14435_s26 + $0x30] sm:$0xff]  ;;  %v6095_v39 = vld [vmem:[%s14435_s26 + $0x38] sm:$0xff]  ;;  %v7428_v23 = vld [vmem:[%s7940_s23 + $0xa0] ss:$8 sps:$4 sm:$0xff]  }
 0x7d2   : > { %6930 = vmatpush3.bf16.msra.mxu0 %v6089_v9  ;;  %7048 = vmatpush3.bf16.msra.mxu1 %v6089_v9  ;;  %v7429_v56 = vld [vmem:[%s7940_s23 + $0x34] ss:$8 sps:$4 sm:$0xff]   ;;  %v7433_v3 = vld [vmem:[%s7940_s23 + $0x30] ss:$8 sps:$4 sm:$0xff]   ;;  %v7435_v58 = vld [vmem:[%s7940_s23 + $0x44] ss:$8 sps:$4 sm:$0xff]  }
 0x7d3   : > { %6931 = vmatprep.subr.bf16.mxu0 %v6098_v18  ;;  %7041 = vmatprep.subr.bf16.mxu1 %v6098_v18  ;;  %v7431_v14 = vld [vmem:[%s7940_s23 + $0xb4] ss:$8 sps:$4 sm:$0xff]   ;;  %v7434_v36 = vld [vmem:[%s7940_s23 + $0xb0] ss:$8 sps:$4 sm:$0xff]   ;;  %v7437_v51 = vld [vmem:[%s7940_s23 + $0xc4] ss:$8 sps:$4 sm:$0xff]  }
 0x7d4   : > { %v7439_v30 = vld [vmem:[%s7940_s23 + $0x40] ss:$8 sps:$4 sm:$0xff]   ;;  %v7441_v63 = vld [vmem:[%s7940_s23 + $0x54] ss:$8 sps:$4 sm:$0xff]   ;;  %v7445_v12 = vld [vmem:[%s7940_s23 + $0x50] ss:$8 sps:$4 sm:$0xff]  }
 0x7d5   : > { %v7440_v42 = vld [vmem:[%s7940_s23 + $0xc0] ss:$8 sps:$4 sm:$0xff]   ;;  %v7443_v6 = vld [vmem:[%s7940_s23 + $0xd4] ss:$8 sps:$4 sm:$0xff]   ;;  %v7446_v13 = vld [vmem:[%s7940_s23 + $0xd0] ss:$8 sps:$4 sm:$0xff]  }
 0x7d6   : > { %6932 = vmatpush3.bf16.msra.mxu0 %v6090_v28  ;;  %7049 = vmatpush3.bf16.msra.mxu1 %v6090_v28  ;;  %v7447_v15 = vld [vmem:[%s7940_s23 + $0x64] ss:$8 sps:$4 sm:$0xff]   ;;  %v7451_v24 = vld [vmem:[%s7940_s23 + $0x60] ss:$8 sps:$4 sm:$0xff]   ;;  %v7453_v11 = vld [vmem:[%s7940_s23 + $0x74] ss:$8 sps:$4 sm:$0xff]  }
 0x7d7   : > { %6933 = vmatprep.subr.bf16.mxu0 %v6099_v53  ;;  %7042 = vmatprep.subr.bf16.mxu1 %v6099_v53  ;;  %v7449_v19 = vld [vmem:[%s7940_s23 + $0xe4] ss:$8 sps:$4 sm:$0xff]   ;;  %v7452_v57 = vld [vmem:[%s7940_s23 + $0xe0] ss:$8 sps:$4 sm:$0xff]   ;;  %v7455_v47 = vld [vmem:[%s7940_s23 + $0xf4] ss:$8 sps:$4 sm:$0xff]  }
 0x7d8   : > { %v7457_v26 = vld [vmem:[%s7940_s23 + $0x70] ss:$8 sps:$4 sm:$0xff]   ;;  %v6105_v35 = vld [vmem:[#allocation3 + $0x8] sm:$0xff] }
 0x7d9   : > { %v7458_v29 = vld [vmem:[%s7940_s23 + $0xf0] ss:$8 sps:$4 sm:$0xff]   ;;  %v6121_v59 = vld [vmem:[#allocation3 + $0x88] sm:$0xff] }
 0x7da   : > { %6934 = vmatpush3.bf16.msra.mxu0 %v6091_v44  ;;  %7050 = vmatpush3.bf16.msra.mxu1 %v6091_v44  ;;  %v6106_v18 = vld [vmem:[#allocation3 + $0x10] sm:$0xff] }
 0x7db   : > { %6935 = vmatprep.subr.bf16.mxu0 %v6100_v52  ;;  %7043 = vmatprep.subr.bf16.mxu1 %v6100_v52  ;;  %v6122_v53 = vld [vmem:[#allocation3 + $0x90] sm:$0xff] }
 0x7de   : > { %6936 = vmatpush3.bf16.msra.mxu0 %v6092_v41  ;;  %7051 = vmatpush3.bf16.msra.mxu1 %v6092_v41 }
 0x7df   : > { %6937 = vmatprep.subr.bf16.mxu0 %v6101_v5  ;;  %7044 = vmatprep.subr.bf16.mxu1 %v6101_v5 }
 0x7e2   : > { %6938 = vmatpush3.bf16.msra.mxu0 %v6093_v37  ;;  %7052 = vmatpush3.bf16.msra.mxu1 %v6093_v37 }
 0x7e3   : > { %6939 = vmatprep.subr.bf16.mxu0 %v6102_v8  ;;  %7045 = vmatprep.subr.bf16.mxu1 %v6102_v8  ;;  %v6107_v8 = vld [vmem:[#allocation3 + $0x18] sm:$0xff] }
 0x7e6   : > { %6940 = vmatpush3.bf16.msra.mxu0 %v6094_v38  ;;  %7053 = vmatpush3.bf16.msra.mxu1 %v6094_v38 }
 0x7e7   : > { %6941 = vmatprep.subr.bf16.mxu0 %v6103_v17  ;;  %7046 = vmatprep.subr.bf16.mxu1 %v6103_v17  ;;  %v6123_v17 = vld [vmem:[#allocation3 + $0x98] sm:$0xff] }
 0x7ea   : > { %6942 = vmatpush3.bf16.msra.mxu0 %v6095_v39  ;;  %7054 = vmatpush3.bf16.msra.mxu1 %v6095_v39 }
 0x7ed   : > { %6361 = vmatmul.mubr.bf16.vlgmr.msra.gmra.mrb[0].mxu0 %v7411_v43  ;;  %6425 = vmatmul.mubr.bf16.vlgmr.msra.gmra.mrb[0].mxu1 %v7414_v22 }
 0x7ee   : > { %6368 = vmatprep.mubr.bf16.mxu0 %v7417_v20  ;;  %6432 = vmatprep.mubr.bf16.mxu1 %v7419_v55 }
 0x7f5   : > { %6369 = vmatmul.mubr.bf16.gmra.mrb[4].mxu0 %v7421_v60  ;;  %6433 = vmatmul.mubr.bf16.gmra.mrb[4].mxu1 %v7422_v33 }
 0x7f6   : > { %6376 = vmatprep.mubr.bf16.mxu0 %v7423_v48  ;;  %6440 = vmatprep.mubr.bf16.mxu1 %v7425_v16 }
 0x7fd   : > { %6377 = vmatmul.mubr.bf16.gmra.mrb[8].mxu0 %v7427_v10  ;;  %6441 = vmatmul.mubr.bf16.gmra.mrb[8].mxu1 %v7428_v23  ;;  %v6108_v10 = vld [vmem:[#allocation3 + $0x20] sm:$0xff] }
 0x7fe   : > { %6384 = vmatprep.mubr.bf16.mxu0 %v7429_v56  ;;  %6448 = vmatprep.mubr.bf16.mxu1 %v7431_v14  ;;  %v6124_v56 = vld [vmem:[#allocation3 + $0xa0] sm:$0xff] }
 0x805   : > { %6385 = vmatmul.mubr.bf16.gmra.mrb[12].mxu0 %v7433_v3  ;;  %6449 = vmatmul.mubr.bf16.gmra.mrb[12].mxu1 %v7434_v36 }
 0x806   : > { %6392 = vmatprep.mubr.bf16.mxu0 %v7435_v58  ;;  %6456 = vmatprep.mubr.bf16.mxu1 %v7437_v51 }
 0x80d   : > { %6393 = vmatmul.mubr.bf16.gmra.mrb[16].mxu0 %v7439_v30  ;;  %6457 = vmatmul.mubr.bf16.gmra.mrb[16].mxu1 %v7440_v42  ;;  %v6109_v30 = vld [vmem:[#allocation3 + $0x28] sm:$0xff] }
 0x80e   : > { %6400 = vmatprep.mubr.bf16.mxu0 %v7441_v63  ;;  %6464 = vmatprep.mubr.bf16.mxu1 %v7443_v6  ;;  %v6125_v63 = vld [vmem:[#allocation3 + $0xa8] sm:$0xff] }
 0x815   : > { %6401 = vmatmul.mubr.bf16.gmra.mrb[20].mxu0 %v7445_v12  ;;  %6465 = vmatmul.mubr.bf16.gmra.mrb[20].mxu1 %v7446_v13 }
 0x816   : > { %6408 = vmatprep.mubr.bf16.mxu0 %v7447_v15  ;;  %6472 = vmatprep.mubr.bf16.mxu1 %v7449_v19 }
 0x81d   : > { %6409 = vmatmul.mubr.bf16.gmra.mrb[24].mxu0 %v7451_v24  ;;  %6473 = vmatmul.mubr.bf16.gmra.mrb[24].mxu1 %v7452_v57 }
 0x81e   : > { %6416 = vmatprep.mubr.bf16.mxu0 %v7453_v11  ;;  %6480 = vmatprep.mubr.bf16.mxu1 %v7455_v47 }
 0x825   : > { %6417 = vmatmul.mubr.bf16.gmra.mrb[28].mxu0 %v7457_v26  ;;  %6481 = vmatmul.mubr.bf16.gmra.mrb[28].mxu1 %v7458_v29  ;;  %v6110_v26 = vld [vmem:[#allocation3 + $0x30] sm:$0xff] }
 0x8c0   : > { %v6943_v25 = vpop.f32.mrb[0].mxu0  ;;  %v6991_v27 = vpop.f32.mrb[0].mxu1 }
 0x8c1   : > { %v6944_v45 = vpop.f32.mrb[1].mxu0  ;;  %v6992_v46 = vpop.f32.mrb[1].mxu1 }
 0x8c2   : > { %v6945_v7 = vadd.f32 %v6944_v45, %v6943_v25  ;;  %v6993_v50 = vadd.f32 %v6992_v46, %v6991_v27  ;;  %v6946_v21 = vpop.f32.mrb[2].mxu0  ;;  %v6994_v34 = vpop.f32.mrb[2].mxu1  ;;  %v6126_v25 = vld [vmem:[#allocation3 + $0xb0] sm:$0xff] }
 0x8c3   : > { %v6947_v62 = vpop.f32.mrb[3].mxu0  ;;  %v6995_v61 = vpop.f32.mrb[3].mxu1 }
 0x8c4   : > { %v6489_v1 = vadd.f32 %v6945_v7, %v6104_v4  ;;  %v6505_v49 = vadd.f32 %v6993_v50, %v6120_v31  ;;  %v6948_v2 = vadd.f32 %v6947_v62, %v6946_v21  ;;  %v6996_v32 = vadd.f32 %v6995_v61, %v6994_v34  ;;  %v6111_v7 = vld [vmem:[#allocation3 + $0x38] sm:$0xff] }
 0x8c5   : > { %v6127_v21 = vld [vmem:[#allocation3 + $0xb8] sm:$0xff] }
 0x8c6   : > { %6521 = vst [vmem:[#allocation3] sm:$0xff] %v6489_v1  ;;  %6537 = vst [vmem:[#allocation3 + $0x80] sm:$0xff] %v6505_v49  ;;  %v6490_v0 = vadd.f32 %v6948_v2, %v6105_v35  ;;  %v6506_v40 = vadd.f32 %v6996_v32, %v6121_v59 }
 0x8c8   : > { %6522 = vst [vmem:[#allocation3 + $0x8] sm:$0xff] %v6490_v0  ;;  %6538 = vst [vmem:[#allocation3 + $0x88] sm:$0xff] %v6506_v40  ;;  %v6949_v54 = vpop.f32.mrb[4].mxu0  ;;  %v6997_v9 = vpop.f32.mrb[4].mxu1  ;;  %v6112_v0 = vld [vmem:[#allocation3 + $0x40] sm:$0xff] }
 0x8c9   : > { %v6950_v28 = vpop.f32.mrb[5].mxu0  ;;  %v6998_v44 = vpop.f32.mrb[5].mxu1 }
 0x8ca   : > { %v6951_v52 = vadd.f32 %v6950_v28, %v6949_v54  ;;  %v6999_v41 = vadd.f32 %v6998_v44, %v6997_v9  ;;  %v6952_v5 = vpop.f32.mrb[6].mxu0  ;;  %v7000_v37 = vpop.f32.mrb[6].mxu1  ;;  %v6128_v54 = vld [vmem:[#allocation3 + $0xc0] sm:$0xff] }
 0x8cb   : > { %v6953_v38 = vpop.f32.mrb[7].mxu0  ;;  %v7001_v39 = vpop.f32.mrb[7].mxu1 }
 0x8cc   : > { %v6491_v43 = vadd.f32 %v6951_v52, %v6106_v18  ;;  %v6507_v22 = vadd.f32 %v6999_v41, %v6122_v53  ;;  %v6954_v20 = vadd.f32 %v6953_v38, %v6952_v5  ;;  %v7002_v55 = vadd.f32 %v7001_v39, %v7000_v37  ;;  %v6113_v52 = vld [vmem:[#allocation3 + $0x48] sm:$0xff] }
 0x8cd   : > { %v6129_v5 = vld [vmem:[#allocation3 + $0xc8] sm:$0xff] }
 0x8ce   : > { %6523 = vst [vmem:[#allocation3 + $0x10] sm:$0xff] %v6491_v43  ;;  %6539 = vst [vmem:[#allocation3 + $0x90] sm:$0xff] %v6507_v22  ;;  %v6492_v60 = vadd.f32 %v6954_v20, %v6107_v8  ;;  %v6508_v33 = vadd.f32 %v7002_v55, %v6123_v17 }
 0x8d0   : > { %6524 = vst [vmem:[#allocation3 + $0x18] sm:$0xff] %v6492_v60  ;;  %6540 = vst [vmem:[#allocation3 + $0x98] sm:$0xff] %v6508_v33  ;;  %v6955_v48 = vpop.f32.mrb[8].mxu0  ;;  %v7003_v16 = vpop.f32.mrb[8].mxu1  ;;  %v6114_v60 = vld [vmem:[#allocation3 + $0x50] sm:$0xff] }
 0x8d1   : > { %v6956_v23 = vpop.f32.mrb[9].mxu0  ;;  %v7004_v14 = vpop.f32.mrb[9].mxu1 }
 0x8d2   : > { %v6957_v3 = vadd.f32 %v6956_v23, %v6955_v48  ;;  %v7005_v36 = vadd.f32 %v7004_v14, %v7003_v16  ;;  %v6958_v58 = vpop.f32.mrb[10].mxu0  ;;  %v7006_v51 = vpop.f32.mrb[10].mxu1  ;;  %v6130_v48 = vld [vmem:[#allocation3 + $0xd0] sm:$0xff] }
 0x8d3   : > { %v6959_v42 = vpop.f32.mrb[11].mxu0  ;;  %v7007_v6 = vpop.f32.mrb[11].mxu1 }
 0x8d4   : > { %v6493_v12 = vadd.f32 %v6957_v3, %v6108_v10  ;;  %v6509_v13 = vadd.f32 %v7005_v36, %v6124_v56  ;;  %v6960_v15 = vadd.f32 %v6959_v42, %v6958_v58  ;;  %v7008_v19 = vadd.f32 %v7007_v6, %v7006_v51  ;;  %v6115_v3 = vld [vmem:[#allocation3 + $0x58] sm:$0xff] }
 0x8d5   : > { %v6131_v58 = vld [vmem:[#allocation3 + $0xd8] sm:$0xff] }
 0x8d6   : > { %6525 = vst [vmem:[#allocation3 + $0x20] sm:$0xff] %v6493_v12  ;;  %6541 = vst [vmem:[#allocation3 + $0xa0] sm:$0xff] %v6509_v13  ;;  %v6494_v24 = vadd.f32 %v6960_v15, %v6109_v30  ;;  %v6510_v57 = vadd.f32 %v7008_v19, %v6125_v63 }
 0x8d8   : > { %6526 = vst [vmem:[#allocation3 + $0x28] sm:$0xff] %v6494_v24  ;;  %6542 = vst [vmem:[#allocation3 + $0xa8] sm:$0xff] %v6510_v57  ;;  %v6961_v11 = vpop.f32.mrb[12].mxu0  ;;  %v7009_v47 = vpop.f32.mrb[12].mxu1  ;;  %v6116_v24 = vld [vmem:[#allocation3 + $0x60] sm:$0xff] }
 0x8d9   : > { %v6962_v29 = vpop.f32.mrb[13].mxu0  ;;  %v7010_v27 = vpop.f32.mrb[13].mxu1 }
 0x8da   : > { %v6963_v4 = vadd.f32 %v6962_v29, %v6961_v11  ;;  %v7011_v45 = vadd.f32 %v7010_v27, %v7009_v47  ;;  %v6964_v31 = vpop.f32.mrb[14].mxu0  ;;  %v7012_v46 = vpop.f32.mrb[14].mxu1  ;;  %v6132_v11 = vld [vmem:[#allocation3 + $0xe0] sm:$0xff] }
 0x8db   : > { %v6965_v50 = vpop.f32.mrb[15].mxu0  ;;  %v7013_v34 = vpop.f32.mrb[15].mxu1 }
 0x8dc   : > { %v6495_v35 = vadd.f32 %v6963_v4, %v6110_v26  ;;  %v6511_v62 = vadd.f32 %v7011_v45, %v6126_v25  ;;  %v6966_v59 = vadd.f32 %v6965_v50, %v6964_v31  ;;  %v7014_v61 = vadd.f32 %v7013_v34, %v7012_v46  ;;  %v6117_v4 = vld [vmem:[#allocation3 + $0x68] sm:$0xff] }
 0x8dd   : > { %v6133_v31 = vld [vmem:[#allocation3 + $0xe8] sm:$0xff] }
 0x8de   : > { %6527 = vst [vmem:[#allocation3 + $0x30] sm:$0xff] %v6495_v35  ;;  %6543 = vst [vmem:[#allocation3 + $0xb0] sm:$0xff] %v6511_v62  ;;  %v6496_v1 = vadd.f32 %v6966_v59, %v6111_v7  ;;  %v6512_v49 = vadd.f32 %v7014_v61, %v6127_v21 }
 0x8e0   : > { %6528 = vst [vmem:[#allocation3 + $0x38] sm:$0xff] %v6496_v1  ;;  %6544 = vst [vmem:[#allocation3 + $0xb8] sm:$0xff] %v6512_v49  ;;  %v6967_v2 = vpop.f32.mrb[16].mxu0  ;;  %v7015_v32 = vpop.f32.mrb[16].mxu1  ;;  %v6118_v1 = vld [vmem:[#allocation3 + $0x70] sm:$0xff] }
 0x8e1   : > { %v6968_v40 = vpop.f32.mrb[17].mxu0  ;;  %v7016_v9 = vpop.f32.mrb[17].mxu1 }
 0x8e2   : > { %v6969_v18 = vadd.f32 %v6968_v40, %v6967_v2  ;;  %v7017_v28 = vadd.f32 %v7016_v9, %v7015_v32  ;;  %v6970_v53 = vpop.f32.mrb[18].mxu0  ;;  %v7018_v44 = vpop.f32.mrb[18].mxu1  ;;  %v6134_v2 = vld [vmem:[#allocation3 + $0xf0] sm:$0xff] }
 0x8e3   : > { %v6971_v41 = vpop.f32.mrb[19].mxu0  ;;  %v7019_v37 = vpop.f32.mrb[19].mxu1 }
 0x8e4   : > { %v6497_v8 = vadd.f32 %v6969_v18, %v6112_v0  ;;  %v6513_v38 = vadd.f32 %v7017_v28, %v6128_v54  ;;  %v6972_v17 = vadd.f32 %v6971_v41, %v6970_v53  ;;  %v7020_v39 = vadd.f32 %v7019_v37, %v7018_v44  ;;  %v6119_v18 = vld [vmem:[#allocation3 + $0x78] sm:$0xff] }
 0x8e5   : > { %v6135_v53 = vld [vmem:[#allocation3 + $0xf8] sm:$0xff] }
 0x8e6   : > { %6529 = vst [vmem:[#allocation3 + $0x40] sm:$0xff] %v6497_v8  ;;  %6545 = vst [vmem:[#allocation3 + $0xc0] sm:$0xff] %v6513_v38  ;;  %v6498_v43 = vadd.f32 %v6972_v17, %v6113_v52  ;;  %v6514_v22 = vadd.f32 %v7020_v39, %v6129_v5 }
 0x8e8   : > { %6530 = vst [vmem:[#allocation3 + $0x48] sm:$0xff] %v6498_v43  ;;  %6546 = vst [vmem:[#allocation3 + $0xc8] sm:$0xff] %v6514_v22  ;;  %v6973_v20 = vpop.f32.mrb[20].mxu0  ;;  %v7021_v55 = vpop.f32.mrb[20].mxu1 }
 0x8e9   : > { %v6974_v33 = vpop.f32.mrb[21].mxu0  ;;  %v7022_v16 = vpop.f32.mrb[21].mxu1 }
 0x8ea   : > { %v6975_v10 = vadd.f32 %v6974_v33, %v6973_v20  ;;  %v7023_v23 = vadd.f32 %v7022_v16, %v7021_v55  ;;  %v6976_v56 = vpop.f32.mrb[22].mxu0  ;;  %v7024_v14 = vpop.f32.mrb[22].mxu1 }
 0x8eb   : > { %v6977_v36 = vpop.f32.mrb[23].mxu0  ;;  %v7025_v51 = vpop.f32.mrb[23].mxu1 }
 0x8ec   : > { %v6499_v30 = vadd.f32 %v6975_v10, %v6114_v60  ;;  %v6515_v42 = vadd.f32 %v7023_v23, %v6130_v48  ;;  %v6978_v63 = vadd.f32 %v6977_v36, %v6976_v56  ;;  %v7026_v6 = vadd.f32 %v7025_v51, %v7024_v14 }
 0x8ee   : > { %6531 = vst [vmem:[#allocation3 + $0x50] sm:$0xff] %v6499_v30  ;;  %6547 = vst [vmem:[#allocation3 + $0xd0] sm:$0xff] %v6515_v42  ;;  %v6500_v12 = vadd.f32 %v6978_v63, %v6115_v3  ;;  %v6516_v13 = vadd.f32 %v7026_v6, %v6131_v58 }
 0x8f0   : > { %6532 = vst [vmem:[#allocation3 + $0x58] sm:$0xff] %v6500_v12  ;;  %6548 = vst [vmem:[#allocation3 + $0xd8] sm:$0xff] %v6516_v13  ;;  %v6979_v15 = vpop.f32.mrb[24].mxu0  ;;  %v7027_v19 = vpop.f32.mrb[24].mxu1 }
 0x8f1   : > { %v6980_v57 = vpop.f32.mrb[25].mxu0  ;;  %v7028_v47 = vpop.f32.mrb[25].mxu1 }
 0x8f2   : > { %v6981_v26 = vadd.f32 %v6980_v57, %v6979_v15  ;;  %v7029_v29 = vadd.f32 %v7028_v47, %v7027_v19  ;;  %v6982_v25 = vpop.f32.mrb[26].mxu0  ;;  %v7030_v27 = vpop.f32.mrb[26].mxu1 }
 0x8f3   : > { %v6983_v45 = vpop.f32.mrb[27].mxu0  ;;  %v7031_v46 = vpop.f32.mrb[27].mxu1 }
 0x8f4   : > { %v6501_v7 = vadd.f32 %v6981_v26, %v6116_v24  ;;  %v6517_v50 = vadd.f32 %v7029_v29, %v6132_v11  ;;  %v6984_v21 = vadd.f32 %v6983_v45, %v6982_v25  ;;  %v7032_v34 = vadd.f32 %v7031_v46, %v7030_v27 }
 0x8f6   : > { %6533 = vst [vmem:[#allocation3 + $0x60] sm:$0xff] %v6501_v7  ;;  %6549 = vst [vmem:[#allocation3 + $0xe0] sm:$0xff] %v6517_v50  ;;  %v6502_v35 = vadd.f32 %v6984_v21, %v6117_v4  ;;  %v6518_v62 = vadd.f32 %v7032_v34, %v6133_v31 }
 0x8f8   : > { %6534 = vst [vmem:[#allocation3 + $0x68] sm:$0xff] %v6502_v35  ;;  %6550 = vst [vmem:[#allocation3 + $0xe8] sm:$0xff] %v6518_v62  ;;  %v6985_v59 = vpop.f32.mrb[28].mxu0  ;;  %v7033_v61 = vpop.f32.mrb[28].mxu1 }
 0x8f9   : > { %v6986_v49 = vpop.f32.mrb[29].mxu0  ;;  %v7034_v32 = vpop.f32.mrb[29].mxu1 }
 0x8fa   : > { %v6987_v0 = vadd.f32 %v6986_v49, %v6985_v59  ;;  %v7035_v40 = vadd.f32 %v7034_v32, %v7033_v61  ;;  %v6988_v54 = vpop.f32.mrb[30].mxu0  ;;  %v7036_v9 = vpop.f32.mrb[30].mxu1 }
 0x8fb   : > { %v6989_v28 = vpop.f32.mrb[31].mxu0  ;;  %v7037_v44 = vpop.f32.mrb[31].mxu1 }
 0x8fc   : > { %v6503_v52 = vadd.f32 %v6987_v0, %v6118_v1  ;;  %v6519_v41 = vadd.f32 %v7035_v40, %v6134_v2  ;;  %v6990_v5 = vadd.f32 %v6989_v28, %v6988_v54  ;;  %v7038_v37 = vadd.f32 %v7037_v44, %v7036_v9 }
 0x8fe   : > { %6535 = vst [vmem:[#allocation3 + $0x70] sm:$0xff] %v6503_v52  ;;  %6551 = vst [vmem:[#allocation3 + $0xf0] sm:$0xff] %v6519_v41  ;;  %v6504_v8 = vadd.f32 %v6990_v5, %v6119_v18  ;;  %v6520_v38 = vadd.f32 %v7038_v37, %v6135_v53 }
 0x900   : > { %6536 = vst [vmem:[#allocation3 + $0x78] sm:$0xff] %v6504_v8  ;;  %6552 = vst [vmem:[#allocation3 + $0xf8] sm:$0xff] %v6520_v38 }
 0x901 PF: > { %p6918_p11 = scmp.ne.s32.totalorder %s7622_s29, 1 }
 0x902   : > { %v6557_v17 = vld [vmem:[#allocation3] sm:$0xff] (!%p6918_p11)  ;;  %v6558_v39 = vld [vmem:[#allocation3 + $0x8] sm:$0xff] (!%p6918_p11)  ;;  %s6919_s23 = sshll.u32 (!%p6918_p11), %s6038_s28, 9  ;;  %s6920_s21 = sshll.u32 (!%p6918_p11), %s7626_s30, 8  ;;  %v6559_v43 = vld [vmem:[#allocation3 + $0x10] sm:$0xff] (!%p6918_p11) }
 0x903   : > { %6556 = sbr.rel (%p6918_p11) target bundleno = 2343 (0x927), region = 96  ;;  %s6591_s2 = sadd.s32 (!%p6918_p11), %s6920_s21, %s6919_s23  ;;  %v6592_v22 = vpack.c.bf16 (!%p6918_p11), %v6558_v39, %v6557_v17  ;;  %v6560_v20 = vld [vmem:[#allocation3 + $0x18] sm:$0xff] (!%p6918_p11)  ;;  %v6561_v55 = vld [vmem:[#allocation3 + $0x20] sm:$0xff] (!%p6918_p11)  ;;  %v6562_v60 = vld [vmem:[#allocation3 + $0x28] sm:$0xff] (!%p6918_p11) }
 0x904   : > { %s6608_s13 = sshra.s32 (!%p6918_p11), %s6591_s2, 4  ;;  %s6661_s24 = sadd.s32 (!%p6918_p11), 1, %s7630_s16  ;;  %v6593_v33 = vpack.c.bf16 (!%p6918_p11), %v6560_v20, %v6559_v43  ;;  %v6594_v48 = vpack.c.bf16 (!%p6918_p11), %v6562_v60, %v6561_v55  ;;  %v6563_v16 = vld [vmem:[#allocation3 + $0x30] sm:$0xff] (!%p6918_p11)  ;;  %v6564_v10 = vld [vmem:[#allocation3 + $0x38] sm:$0xff] (!%p6918_p11)  ;;  %v6565_v23 = vld [vmem:[#allocation3 + $0x40] sm:$0xff] (!%p6918_p11) }
 0x905   : > { %s6921_s29 = sshll.u32 (!%p6918_p11), %s6608_s13, 3  ;;  %s14490_s19 = sld [smem:[#allocation7 + %s6661_s24]] (!%p6918_p11)  ;;  %v6595_v56 = vpack.c.bf16 (!%p6918_p11), %v6564_v10, %v6563_v16  ;;  %v6566_v14 = vld [vmem:[#allocation3 + $0x48] sm:$0xff] (!%p6918_p11)  ;;  %v6567_v3 = vld [vmem:[#allocation3 + $0x50] sm:$0xff] (!%p6918_p11)  ;;  %v6568_v36 = vld [vmem:[#allocation3 + $0x58] sm:$0xff] (!%p6918_p11) }
 0x906   : > { %v6596_v58 = vpack.c.bf16 (!%p6918_p11), %v6566_v14, %v6565_v23  ;;  %v6597_v51 = vpack.c.bf16 (!%p6918_p11), %v6568_v36, %v6567_v3  ;;  %v6569_v30 = vld [vmem:[#allocation3 + $0x60] sm:$0xff] (!%p6918_p11)  ;;  %v6570_v42 = vld [vmem:[#allocation3 + $0x68] sm:$0xff] (!%p6918_p11)  ;;  %v6571_v63 = vld [vmem:[#allocation3 + $0x70] sm:$0xff] (!%p6918_p11)  ;;  %s14492_s3 = scalar_lea.vmem (!%p6918_p11), [#allocation2], %s6921_s29  ;;  %s14538_s16 = scalar_lea.vmem (!%p6918_p11), [#allocation12], %s6920_s21 }
 0x907   : > { %6612 = vst [vmem:[%s14492_s3] sm:$0xff] (!%p6918_p11), %v6592_v22  ;;  %6613 = vst [vmem:[%s14492_s3 + $0x8] sm:$0xff] (!%p6918_p11), %v6593_v33  ;;  %v6598_v6 = vpack.c.bf16 (!%p6918_p11), %v6570_v42, %v6569_v30  ;;  %v6572_v12 = vld [vmem:[#allocation3 + $0x78] sm:$0xff] (!%p6918_p11)  ;;  %v6573_v13 = vld [vmem:[#allocation3 + $0x80] sm:$0xff] (!%p6918_p11) }
 0x908   : > { %6614 = vst [vmem:[%s14492_s3 + $0x10] sm:$0xff] (!%p6918_p11), %v6594_v48  ;;  %6615 = vst [vmem:[%s14492_s3 + $0x18] sm:$0xff] (!%p6918_p11), %v6595_v56  ;;  %v6574_v15 = vld [vmem:[#allocation3 + $0x88] sm:$0xff] (!%p6918_p11)  ;;  %v6599_v19 = vpack.c.bf16 (!%p6918_p11), %v6572_v12, %v6571_v63  ;;  %v6575_v57 = vld [vmem:[#allocation3 + $0x90] sm:$0xff] (!%p6918_p11) }
 0x909   : > { %6616 = vst [vmem:[%s14492_s3 + $0x20] sm:$0xff] (!%p6918_p11), %v6596_v58  ;;  %6617 = vst [vmem:[%s14492_s3 + $0x28] sm:$0xff] (!%p6918_p11), %v6597_v51  ;;  %v6600_v24 = vpack.c.bf16 (!%p6918_p11), %v6574_v15, %v6573_v13  ;;  %v6576_v11 = vld [vmem:[#allocation3 + $0x98] sm:$0xff] (!%p6918_p11)  ;;  %v6577_v47 = vld [vmem:[#allocation3 + $0xa0] sm:$0xff] (!%p6918_p11) }
 0x90a   : > { %6618 = vst [vmem:[%s14492_s3 + $0x30] sm:$0xff] %v6598_v6  ;;  %v6601_v26 = vpack.c.bf16 %v6576_v11, %v6575_v57  ;;  %v6578_v29 = vld [vmem:[#allocation3 + $0xa8] sm:$0xff]  ;;  %v6579_v25 = vld [vmem:[#allocation3 + $0xb0] sm:$0xff]  ;;  %v6580_v27 = vld [vmem:[#allocation3 + $0xb8] sm:$0xff] }
 0x90b   : > { %6619 = vst [vmem:[%s14492_s3 + $0x38] sm:$0xff] %v6599_v19  ;;  %6620 = vst [vmem:[%s14492_s3 + $0x40] sm:$0xff] %v6600_v24  ;;  %v6602_v4 = vpack.c.bf16 %v6578_v29, %v6577_v47  ;;  %v6603_v45 = vpack.c.bf16 %v6580_v27, %v6579_v25  ;;  %v6581_v31 = vld [vmem:[#allocation3 + $0xc0] sm:$0xff]  ;;  %v6582_v46 = vld [vmem:[#allocation3 + $0xc8] sm:$0xff]  ;;  %v6663_v7 = vstv %s14490_s19 }
 0x90c   : > { %6621 = vst [vmem:[%s14492_s3 + $0x48] sm:$0xff] %v6601_v26  ;;  %v6604_v50 = vpack.c.bf16 %v6582_v46, %v6581_v31  ;;  %v6664_v21 = vmul.f32 %v6663_v7, %v6557_v17  ;;  %v14505_v34 = vmul.f32 %v6663_v7, %v6558_v39  ;;  %v14507_v35 = vmul.f32 %v6663_v7, %v6559_v43  ;;  %v6583_v2 = vld [vmem:[#allocation3 + $0xd0] sm:$0xff]  ;;  %v6584_v9 = vld [vmem:[#allocation3 + $0xd8] sm:$0xff]  ;;  %v6585_v18 = vld [vmem:[#allocation3 + $0xe0] sm:$0xff] }
 0x90d   : > { %v14509_v62 = vmul.f32 %v6663_v7, %v6560_v20  ;;  %6622 = vst [vmem:[%s14492_s3 + $0x50] sm:$0xff] %v6602_v4  ;;  %6623 = vst [vmem:[%s14492_s3 + $0x58] sm:$0xff] %v6603_v45  ;;  %v6668_v59 = vmul.f32 %v6663_v7, %v6561_v55  ;;  %v14513_v61 = vmul.f32 %v6663_v7, %v6562_v60  ;;  %v6586_v28 = vld [vmem:[#allocation3 + $0xe8] sm:$0xff]  ;;  %v6587_v5 = vld [vmem:[#allocation3 + $0xf0] sm:$0xff] }
 0x90e   : > { %v14515_v1 = vmul.f32 %v6663_v7, %v6563_v16  ;;  %v14517_v49 = vmul.f32 %v6663_v7, %v6564_v10  ;;  %6624 = vst [vmem:[%s14492_s3 + $0x60] sm:$0xff] %v6604_v50  ;;  %v14520_v32 = vmul.f32 %v6663_v7, %v6565_v23  ;;  %v14522_v0 = vmul.f32 %v6663_v7, %v6566_v14  ;;  %v6588_v37 = vld [vmem:[#allocation3 + $0xf8] sm:$0xff]  ;;  %v6629_v8 = vld [vmem:[%s14538_s16] sm:$0xff]  ;;  %v6630_v22 = vld [vmem:[%s14538_s16 + $0x8] sm:$0xff] }
 0x90f   : > { %v14524_v40 = vmul.f32 %v6663_v7, %v6567_v3  ;;  %v14526_v54 = vmul.f32 %v6663_v7, %v6568_v36  ;;  %v14528_v53 = vmul.f32 %v6663_v7, %v6569_v30  ;;  %v14530_v44 = vmul.f32 %v6663_v7, %v6570_v42  ;;  %v6631_v20 = vld [vmem:[%s14538_s16 + $0x10] sm:$0xff]  ;;  %v6632_v55 = vld [vmem:[%s14538_s16 + $0x18] sm:$0xff]  ;;  %v6633_v60 = vld [vmem:[%s14538_s16 + $0x20] sm:$0xff] }
 0x910   : > { %v14532_v52 = vmul.f32 %v6663_v7, %v6571_v63  ;;  %v14534_v41 = vmul.f32 %v6663_v7, %v6572_v12  ;;  %v14541_v38 = vmul.f32 %v6663_v7, %v6573_v13  ;;  %v14543_v17 = vmul.f32 %v6663_v7, %v6574_v15  ;;  %v6634_v23 = vld [vmem:[%s14538_s16 + $0x28] sm:$0xff]  ;;  %v6635_v56 = vld [vmem:[%s14538_s16 + $0x30] sm:$0xff]  ;;  %v6636_v14 = vld [vmem:[%s14538_s16 + $0x38] sm:$0xff] }
 0x911   : > { %v14545_v39 = vmul.f32 %v6663_v7, %v6575_v57  ;;  %v14547_v43 = vmul.f32 %v6663_v7, %v6576_v11  ;;  %v14553_v33 = vmul.f32 %v6663_v7, %v6577_v47  ;;  %v14555_v48 = vmul.f32 %v6663_v7, %v6578_v29  ;;  %v6637_v30 = vld [vmem:[%s14538_s16 + $0x40] sm:$0xff]  ;;  %v6638_v42 = vld [vmem:[%s14538_s16 + $0x48] sm:$0xff]  ;;  %v6639_v63 = vld [vmem:[%s14538_s16 + $0x50] sm:$0xff] }
 0x912   : > { %v14557_v16 = vmul.f32 %v6663_v7, %v6579_v25  ;;  %v14559_v10 = vmul.f32 %v6663_v7, %v6580_v27  ;;  %v14564_v3 = vmul.f32 %v6663_v7, %v6581_v31  ;;  %v14566_v36 = vmul.f32 %v6663_v7, %v6582_v46  ;;  %v6640_v19 = vld [vmem:[%s14538_s16 + $0x58] sm:$0xff]  ;;  %v6641_v24 = vld [vmem:[%s14538_s16 + $0x60] sm:$0xff]  ;;  %v6642_v57 = vld [vmem:[%s14538_s16 + $0x68] sm:$0xff] }
 0x913   : > { %v6605_v58 = vpack.c.bf16 %v6584_v9, %v6583_v2  ;;  %v14568_v51 = vmul.f32 %v6663_v7, %v6583_v2  ;;  %v14573_v6 = vmul.f32 %v6663_v7, %v6584_v9  ;;  %v6606_v12 = vpack.c.bf16 %v6586_v28, %v6585_v18  ;;  %v6643_v25 = vld [vmem:[%s14538_s16 + $0x70] sm:$0xff]  ;;  %v6644_v27 = vld [vmem:[%s14538_s16 + $0x78] sm:$0xff]  ;;  %v6645_v4 = vld [vmem:[%s14538_s16 + $0x80] sm:$0xff] }
 0x914   : > { %v14575_v13 = vmul.f32 %v6663_v7, %v6585_v18  ;;  %v14577_v15 = vmul.f32 %v6663_v7, %v6586_v28  ;;  %v6607_v11 = vpack.c.bf16 %v6588_v37, %v6587_v5  ;;  %v14583_v47 = vmul.f32 %v6663_v7, %v6587_v5  ;;  %v6648_v2 = vld [vmem:[%s14538_s16 + $0x98] sm:$0xff]  ;;  %v6650_v18 = vld [vmem:[%s14538_s16 + $0xa8] sm:$0xff]  ;;  %v6651_v28 = vld [vmem:[%s14538_s16 + $0xb0] sm:$0xff] }
 0x915   : > { %6625 = vst [vmem:[%s14492_s3 + $0x68] sm:$0xff] %v6605_v58  ;;  %v14585_v26 = vmul.f32 %v6663_v7, %v6588_v37  ;;  %v6696_v29 = vadd.f32 %v6664_v21, %v6629_v8  ;;  %6626 = vst [vmem:[%s14492_s3 + $0x70] sm:$0xff] %v6606_v12  ;;  %v6697_v45 = vadd.f32 %v14505_v34, %v6630_v22  ;;  %v6646_v7 = vld [vmem:[%s14538_s16 + $0x88] sm:$0xff]  ;;  %v6647_v21 = vld [vmem:[%s14538_s16 + $0x90] sm:$0xff] }
 0x916   : > { %v6698_v31 = vadd.f32 %v14507_v35, %v6631_v20  ;;  %v6699_v46 = vadd.f32 %v14509_v62, %v6632_v55  ;;  %v6700_v50 = vadd.f32 %v6668_v59, %v6633_v60  ;;  %6627 = vst [vmem:[%s14492_s3 + $0x78] sm:$0xff] %v6607_v11  ;;  %v6701_v9 = vadd.f32 %v14513_v61, %v6634_v23  ;;  %v6649_v59 = vld [vmem:[%s14538_s16 + $0xa0] sm:$0xff]  ;;  %v6652_v5 = vld [vmem:[%s14538_s16 + $0xb8] sm:$0xff]  ;;  %v6654_v8 = vld [vmem:[%s14538_s16 + $0xc8] sm:$0xff] }
 0x917   : > { %6728 = vst [vmem:[%s14538_s16] sm:$0xff] %v6696_v29  ;;  %v6702_v34 = vadd.f32 %v14515_v1, %v6635_v56  ;;  %v6703_v35 = vadd.f32 %v14517_v49, %v6636_v14  ;;  %v6704_v62 = vadd.f32 %v14520_v32, %v6637_v30  ;;  %6729 = vst [vmem:[%s14538_s16 + $0x8] sm:$0xff] %v6697_v45  ;;  %v6653_v37 = vld [vmem:[%s14538_s16 + $0xc0] sm:$0xff]  ;;  %v6655_v22 = vld [vmem:[%s14538_s16 + $0xd0] sm:$0xff] }
 0x918   : > { %6730 = vst [vmem:[%s14538_s16 + $0x10] sm:$0xff] %v6698_v31  ;;  %6731 = vst [vmem:[%s14538_s16 + $0x18] sm:$0xff] %v6699_v46  ;;  %v6705_v61 = vadd.f32 %v14522_v0, %v6638_v42  ;;  %v6706_v1 = vadd.f32 %v14524_v40, %v6639_v63  ;;  %v6707_v49 = vadd.f32 %v14526_v54, %v6640_v19  ;;  %v6656_v20 = vld [vmem:[%s14538_s16 + $0xd8] sm:$0xff]  ;;  %v6657_v55 = vld [vmem:[%s14538_s16 + $0xe0] sm:$0xff] }
 0x919   : > { %6732 = vst [vmem:[%s14538_s16 + $0x20] sm:$0xff] %v6700_v50  ;;  %v6708_v32 = vadd.f32 %v14528_v53, %v6641_v24  ;;  %6733 = vst [vmem:[%s14538_s16 + $0x28] sm:$0xff] %v6701_v9  ;;  %v6709_v0 = vadd.f32 %v14530_v44, %v6642_v57  ;;  %v6710_v40 = vadd.f32 %v14532_v52, %v6643_v25  ;;  %v6658_v60 = vld [vmem:[%s14538_s16 + $0xe8] sm:$0xff]  ;;  %v6659_v23 = vld [vmem:[%s14538_s16 + $0xf0] sm:$0xff] }
 0x91a   : > { %6734 = vst [vmem:[%s14538_s16 + $0x30] sm:$0xff] %v6702_v34  ;;  %6735 = vst [vmem:[%s14538_s16 + $0x38] sm:$0xff] %v6703_v35  ;;  %v6711_v54 = vadd.f32 %v14534_v41, %v6644_v27  ;;  %v6712_v53 = vadd.f32 %v14541_v38, %v6645_v4  ;;  %v6713_v44 = vadd.f32 %v14543_v17, %v6646_v7  ;;  %v6660_v56 = vld [vmem:[%s14538_s16 + $0xf8] sm:$0xff] }
 0x91b   : > { %6736 = vst [vmem:[%s14538_s16 + $0x40] sm:$0xff] %v6704_v62  ;;  %6737 = vst [vmem:[%s14538_s16 + $0x48] sm:$0xff] %v6705_v61  ;;  %v6714_v52 = vadd.f32 %v14545_v39, %v6647_v21  ;;  %v6715_v41 = vadd.f32 %v14547_v43, %v6648_v2  ;;  %v6716_v38 = vadd.f32 %v14553_v33, %v6649_v59 }
 0x91c   : > { %6738 = vst [vmem:[%s14538_s16 + $0x50] sm:$0xff] %v6706_v1  ;;  %6739 = vst [vmem:[%s14538_s16 + $0x58] sm:$0xff] %v6707_v49  ;;  %v6717_v17 = vadd.f32 %v14555_v48, %v6650_v18  ;;  %v6718_v39 = vadd.f32 %v14557_v16, %v6651_v28  ;;  %v6719_v43 = vadd.f32 %v14559_v10, %v6652_v5 }
 0x91d   : > { %6740 = vst [vmem:[%s14538_s16 + $0x60] sm:$0xff] %v6708_v32  ;;  %6741 = vst [vmem:[%s14538_s16 + $0x68] sm:$0xff] %v6709_v0  ;;  %v6720_v14 = vadd.f32 %v14564_v3, %v6653_v37  ;;  %v6721_v33 = vadd.f32 %v14566_v36, %v6654_v8  ;;  %v6722_v48 = vadd.f32 %v14568_v51, %v6655_v22 }
 0x91e   : > { %6742 = vst [vmem:[%s14538_s16 + $0x70] sm:$0xff] %v6710_v40  ;;  %6743 = vst [vmem:[%s14538_s16 + $0x78] sm:$0xff] %v6711_v54  ;;  %v6723_v16 = vadd.f32 %v14573_v6, %v6656_v20  ;;  %v6724_v10 = vadd.f32 %v14575_v13, %v6657_v55  ;;  %v6725_v3 = vadd.f32 %v14577_v15, %v6658_v60 }
 0x91f   : > { %6744 = vst [vmem:[%s14538_s16 + $0x80] sm:$0xff] %v6712_v53  ;;  %6745 = vst [vmem:[%s14538_s16 + $0x88] sm:$0xff] %v6713_v44  ;;  %v6726_v58 = vadd.f32 %v14583_v47, %v6659_v23  ;;  %v6727_v30 = vadd.f32 %v14585_v26, %v6660_v56 }
 0x920   : > { %6746 = vst [vmem:[%s14538_s16 + $0x90] sm:$0xff] %v6714_v52  ;;  %6747 = vst [vmem:[%s14538_s16 + $0x98] sm:$0xff] %v6715_v41 }
 0x921   : > { %6748 = vst [vmem:[%s14538_s16 + $0xa0] sm:$0xff] %v6716_v38  ;;  %6749 = vst [vmem:[%s14538_s16 + $0xa8] sm:$0xff] %v6717_v17 }
 0x922   : > { %6750 = vst [vmem:[%s14538_s16 + $0xb0] sm:$0xff] %v6718_v39  ;;  %6751 = vst [vmem:[%s14538_s16 + $0xb8] sm:$0xff] %v6719_v43 }
 0x923   : > { %6752 = vst [vmem:[%s14538_s16 + $0xc0] sm:$0xff] %v6720_v14  ;;  %6753 = vst [vmem:[%s14538_s16 + $0xc8] sm:$0xff] %v6721_v33 }
 0x924   : > { %6754 = vst [vmem:[%s14538_s16 + $0xd0] sm:$0xff] %v6722_v48  ;;  %6755 = vst [vmem:[%s14538_s16 + $0xd8] sm:$0xff] %v6723_v16 }
 0x925   : > { %6756 = vst [vmem:[%s14538_s16 + $0xe0] sm:$0xff] %v6724_v10  ;;  %6757 = vst [vmem:[%s14538_s16 + $0xe8] sm:$0xff] %v6725_v3 }
 0x926   : > { %6758 = vst [vmem:[%s14538_s16 + $0xf0] sm:$0xff] %v6726_v58  ;;  %6759 = vst [vmem:[%s14538_s16 + $0xf8] sm:$0xff] %v6727_v30 }
 0x927 PF: > { %s16548_s30 = sadd.s32 4294967295, %s7646_s20   ;;  %s7672_s25 = smov [#allocation12]  }
 0x928   : > { %p14671_p12 = scmp.eq.s32.totalorder %s16548_s30, 11  ;;  %s6766_s17 = sshll.u32 %s7672_s25, 4  ;;  %s6767_s17 = int_to_ptr.vmem [resolvable:$true] %s6766_s17 }
 0x929   : > { %s7528_s1 = scalar_lea.vmem %s6767_s17, 8192  ;;  %p7535_p13 = scmp.lt.s32.totalorder %s6767_s17, %s6767_s17 }
 0x92a   : > { %p7529_p7 = scmp.ne.s32.totalorder %s6767_s17, %s7528_s1  ;;  %p7536_p0 = scmp.lt.s32.totalorder %s7528_s1, %s7528_s1 }
 0x92c   : > { %p7530_p9 = pnand %p7529_p7, %p14671_p12  ;;  %p7537_p3 = por %p7536_p0, %p7535_p13 }
 0x92e   : > { %p7531_p6 = pneg %p7530_p9 }
 0x930   : > { %p7538_p2 = pnand %p7537_p3, %p7531_p6 }
 0x932   : > { %7541 = shalt.err (!%p7538_p2)
}
 0x933   : > { %s16550_s26 = sld [smem:[#allocation421_spill]] }
 0x939   : > { %s7542_s23 = scalar_lea.hbm %s16550_s26, 8192 }
 0x93a   : > { %p7543_p4 = scmp.ne.s32.totalorder %s16550_s26, %s7542_s23  ;;  %p7548_p8 = scmp.lt.u32.totalorder %s7542_s23, %s16550_s26 }
 0x93c   : > { %p7544_p5 = pnand %p7543_p4, %p14671_p12 }
 0x93e   : > { %p7545_p1 = pneg %p7544_p5 }
 0x940   : > { %p7550_p10 = pnand %p7548_p8, %p7545_p1 }
 0x942   : > { %7553 = shalt.err (!%p7550_p10)
}
 0x943   : > { %s7673_s29 = smov 128   ;;  %s7674_s19 = smov 8  }
 0x944   : > { %7064 = dma.vmem_to_hbm [thread:$0]  (%p14671_p12), %s6767_s17, 8192, %s16550_s26, [#allocation9], %s7673_s29, %s7673_s29, %s7674_s19  }
 0x945   : > { %7605 = dma.done.wait (%p14671_p12), [#allocation9], 8192  }
 0x946   : > { %7607 = vsyncadd (%p14671_p12), [#allocation9], 4294959104 }
 0x947 PF: > { %s40_s20 = sadd.s32 1, %s7646_s20   ;;  %s16551_s30 = sld [smem:[#allocation19_spill]] }
 0x948   : > { %p37_p11 = scmp.ge.s32.totalorder %s40_s20, 14   ;;  %s16552_s28 = sld [smem:[#allocation25_spill]] }
 0x949   : > { %s16553_s29 = sld [smem:[#allocation20_spill]]  ;;  %s16554_s16 = sld [smem:[#allocation21_spill]] }
 0x94a   : > { %s16555_s17 = sld [smem:[#allocation22_spill]]  ;;  %s16556_s25 = sld [smem:[#allocation23_spill]] }
 0x94b   : > { %s16557_s19 = sld [smem:[#allocation24_spill]]  ;;  %s16558_s1 = smov %s7614_s27 }
 0x94c   :  { %39 = sbr.rel (!%p37_p11) target bundleno = 36 (0x24), region = 133 }
 0x94d   : > { %s16559_s27 = smov %s16551_s30  ;;  %s16560_s30 = smov %s7638_s18 }
 0x950   : > { %s16561_s18 = smov %s16556_s25 }
 0x953   :  { %6782 = vsyncpa [#allocation8], 1 }
 0x954   :  { %6784 = vsyncpa [#allocation8 + $0x1], 1 }
 0x955   :  { %6785 = vsyncpa [#allocation9], 1 }
 0x956   :  { %6787 = vsyncpa [#allocation9 + $0x1], 1 }
 0x957   :  { %6788 = vsyncpa [#allocation10], 1 }
 0x958   :  { %6790 = vsyncpa [#allocation10 + $0x1], 1 }

</bundles_post_ra>
